<compile_context>
chip_gen: v5e
topology: v5e:2x2
jax: 0.10.0
libtpu: 0.0.40
codegen_flags: <defaults>
</compile_context>

<pallas_src>
import functools

import jax
import jax.numpy as jnp
from jax import lax
from jax.experimental import pallas as pl
from jax.experimental.pallas import tpu as pltpu


def _round_up(v, m):
    return (v + m - 1) // m * m


def _spp_kernel(x_ref, w_ref, b_ref, o_ref, pad_ref, *,
                H, W, TH, Cp, Coutp, Ph, pk, k, pool_sizes, cascadable,
                n_row_tiles, compute_dtype):
    """Fused SPP body for one (image, row-tile) grid step.

    x_ref:   (1, H, W, Cp)        whole NHWC image (resident per image).
    w_ref:   (k*k, nb, Cp, Coutp) BN-folded conv weights, tap/branch major (resident).
    b_ref:   (1, Coutp)           BN-folded bias, float32 (resident).
    o_ref:   (1, TH, W, Coutp)    output row tile.
    pad_ref: (TH+2Ph, W+2Ph, Cp)  VMEM scratch: "-inf"-padded halo slab.
    """
    r = pl.program_id(1)
    row0 = r * TH if n_row_tiles > 1 else 0
    slab_rows = TH + 2 * Ph
    # Finite stand-in for -inf (dtype min); exact for any representable input.
    neg = float(jnp.finfo(compute_dtype).min)

    # ---- 1) build the -inf padded halo slab for this row tile in VMEM ----
    pad_ref[...] = jnp.full(pad_ref.shape, neg, compute_dtype)
    if n_row_tiles == 1:
        pad_ref[Ph:Ph + H, Ph:Ph + W, :] = x_ref[0]
    else:
        @pl.when(r == 0)
        def _():
            pad_ref[Ph:slab_rows, Ph:Ph + W, :] = x_ref[0, 0:TH + Ph, :, :]

        @pl.when(r == n_row_tiles - 1)
        def _():
            pad_ref[0:TH + Ph, Ph:Ph + W, :] = x_ref[0, H - TH - Ph:H, :, :]

        @pl.when((r > 0) & (r < n_row_tiles - 1))
        def _():
            pad_ref[:, Ph:Ph + W, :] = x_ref[0, pl.ds(row0 - Ph, slab_rows), :, :]

    slab = pad_ref[...]                                   # (slab_rows, W+2Ph, Cp)

    Rk, Wk = TH + 2 * pk, W + 2 * pk
    m = TH * W

    # Conv zero-padding mask: positions outside the image must contribute 0 to
    # the conv even though the pools see them as real values (only when k > 1).
    if pk > 0:
        li = lax.broadcasted_iota(jnp.int32, (Rk, Wk, 1), 0)
        lj = lax.broadcasted_iota(jnp.int32, (Rk, Wk, 1), 1)
        img_r = row0 - pk + li
        conv_valid = (img_r >= 0) & (img_r < H) & (lj >= pk) & (lj < pk + W)
    else:
        conv_valid = None

    def center(a, e_from, e_to):
        d = e_from - e_to
        if d == 0:
            return a
        return a[d:a.shape[0] - d, d:a.shape[1] - d, :]

    def pool_once(a, p):
        """Separable stride-1 max-pool of window 2p+1 (shrinks the halo by p).
        Vertical (row / free address-offset) max first, then the horizontal
        (sublane) max on the already row-reduced tensor."""
        s = 2 * p + 1
        nrow = a.shape[0] - 2 * p
        v = a[0:nrow, :, :]
        for dv in range(1, s):
            v = jnp.maximum(v, a[dv:dv + nrow, :, :])
        ncol = a.shape[1] - 2 * p
        h = v[:, 0:ncol, :]
        for du in range(1, s):
            h = jnp.maximum(h, v[:, du:du + ncol, :])
        return h

    def conv_accumulate(acc, branch, b_idx):
        """Accumulate one concat-branch's contribution as k*k MXU matmuls
        (a single matmul per branch for the canonical k=1 SPP)."""
        if conv_valid is not None:
            branch = jnp.where(conv_valid, branch, jnp.zeros_like(branch))
        for di in range(k):
            for dj in range(k):
                # TODO(synk): when W % 8 != 0 (e.g. 20x20 maps) a 3-D
                # contraction would avoid the (TH,W,Cp)->(TH*W,Cp) relayout.
                a2 = branch[di:di + TH, dj:dj + W, :].reshape(m, Cp)
                acc = acc + jnp.dot(a2, w_ref[di * k + dj, b_idx],
                                    preferred_element_type=jnp.float32)
        return acc

    acc = jnp.zeros((m, Coutp), jnp.float32)
    # Branch 0: identity.  Its matmul is issued first so MXU work overlaps the
    # VALU-bound pool computation of the following branches.
    acc = conv_accumulate(acc, center(slab, Ph, pk), 0)

    if cascadable:
        # SPPF cascade: applying pool_{s0} i times == pool of size i*(s0-1)+1.
        p0 = pool_sizes[0] // 2
        cur, e = slab, Ph
        for bi in range(len(pool_sizes)):
            cur = pool_once(cur, p0)
            e -= p0
            acc = conv_accumulate(acc, center(cur, e, pk), bi + 1)
    else:
        for bi, s in enumerate(pool_sizes):
            p = s // 2
            acc = conv_accumulate(acc, center(pool_once(slab, p), Ph - p, pk),
                                  bi + 1)

    # ---- 2) folded-BN bias + Swish epilogue (exp + reciprocal on the EUP) ----
    y = acc + b_ref[...]
    y = y * pl.reciprocal(1.0 + jnp.exp(-y), approx=True)
    o_ref[...] = y.reshape(1, TH, W, Coutp).astype(o_ref.dtype)


def _vmem_capacity_bytes():
    try:
        return int(getattr(pltpu.get_tpu_info(), "vmem_capacity_bytes", 64 << 20))
    except Exception:
        return 64 << 20


@functools.partial(jax.jit, static_argnames=("pool_size", "k", "compute_dtype",
                                             "row_splits", "out_dtype"))
def spp_pallas(x_nchw, w, gamma, beta, mean, var, eps=1e-5, *, pool_size, k,
               compute_dtype=jnp.bfloat16, row_splits=None,
               out_dtype=jnp.float32):
    """SPP forward (eval-mode BN): x (N, C, H, W) float32 -> (N, Cout, H, W)."""
    N, C, H, W = x_nchw.shape
    Cout, ch_in, kh, kw = w.shape
    ps = tuple(int(s) for s in pool_size)
    nb = 1 + len(ps)
    assert ch_in == nb * C and kh == k and kw == k, "conv weight shape mismatch"
    assert k % 2 == 1 and all(s % 2 == 1 for s in ps), (
        "only odd (shape-preserving) conv / pool sizes supported")
    # TODO(synk): even pool / conv kernel sizes (shape-changing padding) are
    # not implemented in the fused kernel.

    pk = k // 2
    Pmax = max(s // 2 for s in ps)
    Ph = Pmax + pk                          # pool + conv halo carried per tile
    s0 = ps[0]
    cascadable = all(ps[i] == s0 + i * (s0 - 1) for i in range(len(ps)))

    Cp = _round_up(C, 128)                  # lane-dense (no-op for 256/512)
    Coutp = _round_up(Cout, 128)

    # ---- fold eval-mode BatchNorm into the conv weight / bias ----
    scale = gamma / jnp.sqrt(var + eps)                           # (Cout,)
    bias = (beta - mean * scale).astype(jnp.float32)
    wf = w * scale[:, None, None, None]                           # (Cout, nb*C, k, k)
    wt = jnp.transpose(wf.reshape(Cout, nb, C, k, k), (3, 4, 1, 2, 0))
    wt = wt.reshape(k * k, nb, C, Cout)
    wt = jnp.pad(wt, ((0, 0), (0, 0), (0, Cp - C), (0, Coutp - Cout)))
    wt = wt.astype(compute_dtype)
    bias_p = jnp.pad(bias, (0, Coutp - Cout)).reshape(1, Coutp)

    # ---- layout: NCHW -> NHWC + cast + channel pad (one fused XLA copy; the
    #      -inf spatial halo is built inside the kernel, not in HBM) ----
    # TODO(synk): in a full network keep activations NHWC end-to-end so this
    # transpose pair is not paid once per SPP block.
    x_nhwc = jnp.pad(jnp.transpose(x_nchw, (0, 2, 3, 1)).astype(compute_dtype),
                     ((0, 0), (0, 0), (0, 0), (0, Cp - C)))

    # ---- generation-aware tile selection (v5e/v6e: 128 MiB VMEM, v7x: 64 MiB) ----
    vmem_cap = _vmem_capacity_bytes()
    in_b = jnp.finfo(compute_dtype).bits // 8
    out_b = jnp.finfo(out_dtype).bits // 8

    def est_vmem(th):
        slab = (th + 2 * Ph) * (W + 2 * Ph) * Cp * in_b
        return (2 * H * W * Cp * in_b                 # resident image, dbl-buffered
                + k * k * nb * Cp * Coutp * in_b      # folded weights
                + 4 * slab                            # slab + live pool temporaries
                + th * W * Coutp * 4                  # f32 accumulator
                + 2 * th * W * Coutp * out_b          # output tile, dbl-buffered
                + (2 << 20))                          # headroom

    if row_splits is None:
        budget = min(int(0.75 * vmem_cap), 90 << 20)
        cands = [d for d in range(H, 0, -1)
                 if H % d == 0 and (d == H or d >= max(Ph, 1))]
        TH = next((d for d in cands if est_vmem(d) <= budget), cands[-1])
        # TODO(synk): for batch-1 inference on dual-TensorCore parts (v7x) pass
        # row_splits=2 so the second core gets its own row tile.
    else:
        TH = H // row_splits
        assert H % row_splits == 0 and (row_splits == 1 or TH >= Ph), (
            "row_splits must divide H and leave tiles at least the halo tall")
    RS = H // TH

    kernel = functools.partial(
        _spp_kernel, H=H, W=W, TH=TH, Cp=Cp, Coutp=Coutp, Ph=Ph, pk=pk, k=k,
        pool_sizes=ps, cascadable=cascadable, n_row_tiles=RS,
        compute_dtype=compute_dtype)

    out = pl.pallas_call(
        kernel,
        out_shape=jax.ShapeDtypeStruct((N, H, W, Coutp), out_dtype),
        grid=(N, RS),
        in_specs=[
            # Whole image: resident per image, reused across its row tiles.
            pl.BlockSpec((1, H, W, Cp), lambda n, r: (n, 0, 0, 0)),
            # Folded weights / bias: resident across the whole grid.
            pl.BlockSpec((k * k, nb, Cp, Coutp), lambda n, r: (0, 0, 0, 0)),
            pl.BlockSpec((1, Coutp), lambda n, r: (0, 0)),
        ],
        out_specs=pl.BlockSpec((1, TH, W, Coutp), lambda n, r: (n, r, 0, 0)),
        scratch_shapes=[pltpu.VMEM((TH + 2 * Ph, W + 2 * Ph, Cp), compute_dtype)],
        compiler_params=pltpu.CompilerParams(
            dimension_semantics=("parallel", "parallel"),
            vmem_limit_bytes=int(min(int(0.9 * vmem_cap), 100 << 20)),
        ),
    )(x_nhwc, wt, bias_p)

    if Coutp != Cout:
        out = out[..., :Cout]
    return jnp.transpose(out, (0, 3, 1, 2))


def spp_reference(x_nchw, w, gamma, beta, mean, var, eps, pool_size, k):
    """Pure-JAX/XLA reference mirroring the PyTorch SPP forward (eval-mode BN)."""
    outs = [x_nchw]
    for s in pool_size:
        p = s // 2
        outs.append(lax.reduce_window(
            x_nchw, -jnp.inf, lax.max,
            window_dimensions=(1, 1, s, s), window_strides=(1, 1, 1, 1),
            padding=((0, 0), (0, 0), (p, p), (p, p))))
    y = jnp.concatenate(outs, axis=1)
    pk = k // 2
    y = lax.conv_general_dilated(
        y, w, window_strides=(1, 1), padding=((pk, pk), (pk, pk)),
        dimension_numbers=('NCHW', 'OIHW', 'NCHW'))
    sc = (gamma / jnp.sqrt(var + eps)).reshape(1, -1, 1, 1)
    sh = (beta - mean * gamma / jnp.sqrt(var + eps)).reshape(1, -1, 1, 1)
    y = y * sc + sh
    return y * jax.nn.sigmoid(y)          # Swish / SiLU


if __name__ == "__main__":
    eps = 1e-5

    def make_case(key, N, C, H, W, pool_size, k, ch_out):
        ks = jax.random.split(key, 6)
        ch_in = C * (1 + len(pool_size))
        x = jax.random.normal(ks[0], (N, C, H, W), jnp.float32)
        w = 0.1 * jax.random.normal(ks[1], (ch_out, ch_in, k, k), jnp.float32)
        gamma = 1.0 + 0.1 * jax.random.normal(ks[2], (ch_out,), jnp.float32)
        beta = 0.1 * jax.random.normal(ks[3], (ch_out,), jnp.float32)
        mean = 0.1 * jax.random.normal(ks[4], (ch_out,), jnp.float32)
        var = 0.5 + jnp.abs(jax.random.normal(ks[5], (ch_out,), jnp.float32))
        return x, w, gamma, beta, mean, var

    k0, k1 = jax.random.split(jax.random.PRNGKey(0))

    # Case A: canonical SPP config (pool 5/9/13 -> SPPF cascade, 1x1 ConvBN +
    # swish), whole-image tile.  f32 run checks semantics tightly; bf16 run
    # exercises the fast MXU path with a loosened tolerance.
    N, C, H, W = 2, 4, 16, 16
    pool_size, kconv, ch_out = (5, 9, 13), 1, 8
    x, w, gamma, beta, mean, var = make_case(k0, N, C, H, W, pool_size, kconv, ch_out)
    y_ref = jax.block_until_ready(
        spp_reference(x, w, gamma, beta, mean, var, eps, pool_size, kconv))

    y_f32 = jax.block_until_ready(spp_pallas(
        x, w, gamma, beta, mean, var, eps, pool_size=pool_size, k=kconv,
        compute_dtype=jnp.float32))
    assert y_f32.shape == (N, ch_out, H, W)
    err = float(jnp.max(jnp.abs(y_f32 - y_ref)))
    assert jnp.allclose(y_f32, y_ref, atol=5e-3, rtol=5e-3), (
        f"f32 path mismatch vs reference, max abs err = {err}")

    y_bf16 = jax.block_until_ready(spp_pallas(
        x, w, gamma, beta, mean, var, eps, pool_size=pool_size, k=kconv,
        compute_dtype=jnp.bfloat16))
    err = float(jnp.max(jnp.abs(y_bf16 - y_ref)))
    # bf16 pools/MXU with f32 accumulation + epilogue; exactness is covered by
    # the f32 run above.
    assert jnp.allclose(y_bf16, y_ref, atol=8e-2, rtol=8e-2), (
        f"bf16 path mismatch vs reference, max abs err = {err}")

    # Case B: 3x3 ConvBN (exercises the conv zero-pad masking), non-cascadable
    # pool sizes, explicit row_splits=4 (multi-tile halo path, both grid axes
    # parallel).
    N, C, H, W = 1, 4, 32, 32
    pool_size, kconv, ch_out = (3, 7), 3, 8
    x, w, gamma, beta, mean, var = make_case(k1, N, C, H, W, pool_size, kconv, ch_out)
    y_ref = jax.block_until_ready(
        spp_reference(x, w, gamma, beta, mean, var, eps, pool_size, kconv))
    y_t = jax.block_until_ready(spp_pallas(
        x, w, gamma, beta, mean, var, eps, pool_size=pool_size, k=kconv,
        compute_dtype=jnp.float32, row_splits=4))
    err = float(jnp.max(jnp.abs(y_t - y_ref)))
    assert jnp.allclose(y_t, y_ref, atol=5e-3, rtol=5e-3), (
        f"k=3 row-tiled path mismatch vs reference, max abs err = {err}")

    print("KERNEL_OK")
</pallas_src>

<mosaic_0001>
module attributes {stable_mosaic.version = 11 : i64} {
  func.func @_spp_kernel(%arg0: i32, %arg1: i32, %arg2: memref<1x16x16x128xf32, #tpu.memory_space<vmem>>, %arg3: memref<1x4x128x128xf32, #tpu.memory_space<vmem>>, %arg4: memref<1x128xf32, #tpu.memory_space<vmem>>, %arg5: memref<1x16x16x128xf32, #tpu.memory_space<vmem>>, %arg6: memref<28x28x128xf32, #tpu.memory_space<vmem>>) attributes {dimension_semantics = [#tpu.dimension_semantics<parallel>, #tpu.dimension_semantics<parallel>], iteration_bounds = array<i64: 2, 1>, scalar_prefetch = 0 : i64, scratch_operands = 1 : i64, tpu.core_type = #tpu.core_type<tc>, window_params = [{transform_indices = @transform_0, window_bounds = array<i64: 1, 16, 16, 128>}, {pipeline_mode = #tpu.pipeline_mode<synchronous>, transform_indices = @transform_1, window_bounds = array<i64: 1, 4, 128, 128>}, {pipeline_mode = #tpu.pipeline_mode<synchronous>, transform_indices = @transform_2, window_bounds = array<i64: 1, 128>}, {transform_indices = @transform_3, window_bounds = array<i64: 1, 16, 16, 128>}]} {
    %cst = arith.constant -3.40282347E+38 : f32
    %0 = vector.broadcast %cst : f32 to vector<28x28x128xf32>
    %c0 = arith.constant 0 : index
    %c0_0 = arith.constant 0 : index
    %c0_1 = arith.constant 0 : index
    %1 = vector.load %arg6[%c0, %c0_0, %c0_1] : memref<28x28x128xf32, #tpu.memory_space<vmem>>, vector<28x28x128xf32>
    tpu.vector_store %arg6[%c0, %c0_0, %c0_1], %0 {strides = array<i32>} : memref<28x28x128xf32, #tpu.memory_space<vmem>>, vector<28x28x128xf32>,
    %c0_2 = arith.constant 0 : index
    %c0_3 = arith.constant 0 : index
    %c0_4 = arith.constant 0 : index
    %c0_5 = arith.constant 0 : index
    %2 = vector.load %arg2[%c0_2, %c0_3, %c0_4, %c0_5] : memref<1x16x16x128xf32, #tpu.memory_space<vmem>>, vector<1x16x16x128xf32>
    %3 = vector.shape_cast %2 : vector<1x16x16x128xf32> to vector<16x16x128xf32>
    %c6 = arith.constant 6 : index
    %c6_6 = arith.constant 6 : index
    %c0_7 = arith.constant 0 : index
    %4 = vector.load %arg6[%c6, %c6_6, %c0_7] : memref<28x28x128xf32, #tpu.memory_space<vmem>>, vector<16x16x128xf32>
    tpu.vector_store %arg6[%c6, %c6_6, %c0_7], %3 {strides = array<i32>} : memref<28x28x128xf32, #tpu.memory_space<vmem>>, vector<16x16x128xf32>,
    %c0_8 = arith.constant 0 : index
    %c0_9 = arith.constant 0 : index
    %c0_10 = arith.constant 0 : index
    %5 = vector.load %arg6[%c0_8, %c0_9, %c0_10] : memref<28x28x128xf32, #tpu.memory_space<vmem>>, vector<28x28x128xf32>
    %cst_11 = arith.constant 0.000000e+00 : f32
    %6 = vector.broadcast %cst_11 : f32 to vector<256x128xf32>
    %7 = vector.extract_strided_slice %5 {offsets = [6, 6, 0], sizes = [16, 16, 128], strides = [1, 1, 1]} : vector<28x28x128xf32> to vector<16x16x128xf32>
    %8 = vector.shape_cast %7 : vector<16x16x128xf32> to vector<256x128xf32>
    %c0_12 = arith.constant 0 : index
    %c0_13 = arith.constant 0 : index
    %c0_14 = arith.constant 0 : index
    %c0_15 = arith.constant 0 : index
    %9 = vector.load %arg3[%c0_12, %c0_13, %c0_14, %c0_15] : memref<1x4x128x128xf32, #tpu.memory_space<vmem>>, vector<1x1x128x128xf32>
    %10 = vector.shape_cast %9 : vector<1x1x128x128xf32> to vector<128x128xf32>
    %cst_16 = arith.constant dense<0.000000e+00> : vector<256x128xf32>
    %11 = tpu.matmul %8, %10, %cst_16 {dimension_numbers = #tpu.dot_dimension_numbers<[1], [0], [0], [1], [0, 0, 1, 1], [], []>} : vector<256x128xf32>, vector<128x128xf32>, vector<256x128xf32> -> vector<256x128xf32>
    %12 = arith.addf %6, %11 : vector<256x128xf32>
    %13 = vector.extract_strided_slice %5 {offsets = [0, 0, 0], sizes = [24, 28, 128], strides = [1, 1, 1]} : vector<28x28x128xf32> to vector<24x28x128xf32>
    %14 = vector.extract_strided_slice %5 {offsets = [1, 0, 0], sizes = [24, 28, 128], strides = [1, 1, 1]} : vector<28x28x128xf32> to vector<24x28x128xf32>
    %15 = arith.maximumf %13, %14 : vector<24x28x128xf32>
    %16 = vector.extract_strided_slice %5 {offsets = [2, 0, 0], sizes = [24, 28, 128], strides = [1, 1, 1]} : vector<28x28x128xf32> to vector<24x28x128xf32>
    %17 = arith.maximumf %15, %16 : vector<24x28x128xf32>
    %18 = vector.extract_strided_slice %5 {offsets = [3, 0, 0], sizes = [24, 28, 128], strides = [1, 1, 1]} : vector<28x28x128xf32> to vector<24x28x128xf32>
    %19 = arith.maximumf %17, %18 : vector<24x28x128xf32>
    %20 = vector.extract_strided_slice %5 {offsets = [4, 0, 0], sizes = [24, 28, 128], strides = [1, 1, 1]} : vector<28x28x128xf32> to vector<24x28x128xf32>
    %21 = arith.maximumf %19, %20 : vector<24x28x128xf32>
    %22 = vector.extract_strided_slice %21 {offsets = [0, 0, 0], sizes = [24, 24, 128], strides = [1, 1, 1]} : vector<24x28x128xf32> to vector<24x24x128xf32>
    %23 = vector.extract_strided_slice %21 {offsets = [0, 1, 0], sizes = [24, 24, 128], strides = [1, 1, 1]} : vector<24x28x128xf32> to vector<24x24x128xf32>
    %24 = arith.maximumf %22, %23 : vector<24x24x128xf32>
    %25 = vector.extract_strided_slice %21 {offsets = [0, 2, 0], sizes = [24, 24, 128], strides = [1, 1, 1]} : vector<24x28x128xf32> to vector<24x24x128xf32>
    %26 = arith.maximumf %24, %25 : vector<24x24x128xf32>
    %27 = vector.extract_strided_slice %21 {offsets = [0, 3, 0], sizes = [24, 24, 128], strides = [1, 1, 1]} : vector<24x28x128xf32> to vector<24x24x128xf32>
    %28 = arith.maximumf %26, %27 : vector<24x24x128xf32>
    %29 = vector.extract_strided_slice %21 {offsets = [0, 4, 0], sizes = [24, 24, 128], strides = [1, 1, 1]} : vector<24x28x128xf32> to vector<24x24x128xf32>
    %30 = arith.maximumf %28, %29 : vector<24x24x128xf32>
    %31 = vector.extract_strided_slice %30 {offsets = [4, 4, 0], sizes = [16, 16, 128], strides = [1, 1, 1]} : vector<24x24x128xf32> to vector<16x16x128xf32>
    %32 = vector.shape_cast %31 : vector<16x16x128xf32> to vector<256x128xf32>
    %c0_17 = arith.constant 0 : index
    %c1 = arith.constant 1 : index
    %c0_18 = arith.constant 0 : index
    %c0_19 = arith.constant 0 : index
    %33 = vector.load %arg3[%c0_17, %c1, %c0_18, %c0_19] : memref<1x4x128x128xf32, #tpu.memory_space<vmem>>, vector<1x1x128x128xf32>
    %34 = vector.shape_cast %33 : vector<1x1x128x128xf32> to vector<128x128xf32>
    %cst_20 = arith.constant dense<0.000000e+00> : vector<256x128xf32>
    %35 = tpu.matmul %32, %34, %cst_20 {dimension_numbers = #tpu.dot_dimension_numbers<[1], [0], [0], [1], [0, 0, 1, 1], [], []>} : vector<256x128xf32>, vector<128x128xf32>, vector<256x128xf32> -> vector<256x128xf32>
    %36 = arith.addf %12, %35 : vector<256x128xf32>
    %37 = vector.extract_strided_slice %30 {offsets = [0, 0, 0], sizes = [20, 24, 128], strides = [1, 1, 1]} : vector<24x24x128xf32> to vector<20x24x128xf32>
    %38 = vector.extract_strided_slice %30 {offsets = [1, 0, 0], sizes = [20, 24, 128], strides = [1, 1, 1]} : vector<24x24x128xf32> to vector<20x24x128xf32>
    %39 = arith.maximumf %37, %38 : vector<20x24x128xf32>
    %40 = vector.extract_strided_slice %30 {offsets = [2, 0, 0], sizes = [20, 24, 128], strides = [1, 1, 1]} : vector<24x24x128xf32> to vector<20x24x128xf32>
    %41 = arith.maximumf %39, %40 : vector<20x24x128xf32>
    %42 = vector.extract_strided_slice %30 {offsets = [3, 0, 0], sizes = [20, 24, 128], strides = [1, 1, 1]} : vector<24x24x128xf32> to vector<20x24x128xf32>
    %43 = arith.maximumf %41, %42 : vector<20x24x128xf32>
    %44 = vector.extract_strided_slice %30 {offsets = [4, 0, 0], sizes = [20, 24, 128], strides = [1, 1, 1]} : vector<24x24x128xf32> to vector<20x24x128xf32>
    %45 = arith.maximumf %43, %44 : vector<20x24x128xf32>
    %46 = vector.extract_strided_slice %45 {offsets = [0, 0, 0], sizes = [20, 20, 128], strides = [1, 1, 1]} : vector<20x24x128xf32> to vector<20x20x128xf32>
    %47 = vector.extract_strided_slice %45 {offsets = [0, 1, 0], sizes = [20, 20, 128], strides = [1, 1, 1]} : vector<20x24x128xf32> to vector<20x20x128xf32>
    %48 = arith.maximumf %46, %47 : vector<20x20x128xf32>
    %49 = vector.extract_strided_slice %45 {offsets = [0, 2, 0], sizes = [20, 20, 128], strides = [1, 1, 1]} : vector<20x24x128xf32> to vector<20x20x128xf32>
    %50 = arith.maximumf %48, %49 : vector<20x20x128xf32>
    %51 = vector.extract_strided_slice %45 {offsets = [0, 3, 0], sizes = [20, 20, 128], strides = [1, 1, 1]} : vector<20x24x128xf32> to vector<20x20x128xf32>
    %52 = arith.maximumf %50, %51 : vector<20x20x128xf32>
    %53 = vector.extract_strided_slice %45 {offsets = [0, 4, 0], sizes = [20, 20, 128], strides = [1, 1, 1]} : vector<20x24x128xf32> to vector<20x20x128xf32>
    %54 = arith.maximumf %52, %53 : vector<20x20x128xf32>
    %55 = vector.extract_strided_slice %54 {offsets = [2, 2, 0], sizes = [16, 16, 128], strides = [1, 1, 1]} : vector<20x20x128xf32> to vector<16x16x128xf32>
    %56 = vector.shape_cast %55 : vector<16x16x128xf32> to vector<256x128xf32>
    %c0_21 = arith.constant 0 : index
    %c2 = arith.constant 2 : index
    %c0_22 = arith.constant 0 : index
    %c0_23 = arith.constant 0 : index
    %57 = vector.load %arg3[%c0_21, %c2, %c0_22, %c0_23] : memref<1x4x128x128xf32, #tpu.memory_space<vmem>>, vector<1x1x128x128xf32>
    %58 = vector.shape_cast %57 : vector<1x1x128x128xf32> to vector<128x128xf32>
    %cst_24 = arith.constant dense<0.000000e+00> : vector<256x128xf32>
    %59 = tpu.matmul %56, %58, %cst_24 {dimension_numbers = #tpu.dot_dimension_numbers<[1], [0], [0], [1], [0, 0, 1, 1], [], []>} : vector<256x128xf32>, vector<128x128xf32>, vector<256x128xf32> -> vector<256x128xf32>
    %60 = arith.addf %36, %59 : vector<256x128xf32>
    %61 = vector.extract_strided_slice %54 {offsets = [0, 0, 0], sizes = [16, 20, 128], strides = [1, 1, 1]} : vector<20x20x128xf32> to vector<16x20x128xf32>
    %62 = vector.extract_strided_slice %54 {offsets = [1, 0, 0], sizes = [16, 20, 128], strides = [1, 1, 1]} : vector<20x20x128xf32> to vector<16x20x128xf32>
    %63 = arith.maximumf %61, %62 : vector<16x20x128xf32>
    %64 = vector.extract_strided_slice %54 {offsets = [2, 0, 0], sizes = [16, 20, 128], strides = [1, 1, 1]} : vector<20x20x128xf32> to vector<16x20x128xf32>
    %65 = arith.maximumf %63, %64 : vector<16x20x128xf32>
    %66 = vector.extract_strided_slice %54 {offsets = [3, 0, 0], sizes = [16, 20, 128], strides = [1, 1, 1]} : vector<20x20x128xf32> to vector<16x20x128xf32>
    %67 = arith.maximumf %65, %66 : vector<16x20x128xf32>
    %68 = vector.extract_strided_slice %54 {offsets = [4, 0, 0], sizes = [16, 20, 128], strides = [1, 1, 1]} : vector<20x20x128xf32> to vector<16x20x128xf32>
    %69 = arith.maximumf %67, %68 : vector<16x20x128xf32>
    %70 = vector.extract_strided_slice %69 {offsets = [0, 0, 0], sizes = [16, 16, 128], strides = [1, 1, 1]} : vector<16x20x128xf32> to vector<16x16x128xf32>
    %71 = vector.extract_strided_slice %69 {offsets = [0, 1, 0], sizes = [16, 16, 128], strides = [1, 1, 1]} : vector<16x20x128xf32> to vector<16x16x128xf32>
    %72 = arith.maximumf %70, %71 : vector<16x16x128xf32>
    %73 = vector.extract_strided_slice %69 {offsets = [0, 2, 0], sizes = [16, 16, 128], strides = [1, 1, 1]} : vector<16x20x128xf32> to vector<16x16x128xf32>
    %74 = arith.maximumf %72, %73 : vector<16x16x128xf32>
    %75 = vector.extract_strided_slice %69 {offsets = [0, 3, 0], sizes = [16, 16, 128], strides = [1, 1, 1]} : vector<16x20x128xf32> to vector<16x16x128xf32>
    %76 = arith.maximumf %74, %75 : vector<16x16x128xf32>
    %77 = vector.extract_strided_slice %69 {offsets = [0, 4, 0], sizes = [16, 16, 128], strides = [1, 1, 1]} : vector<16x20x128xf32> to vector<16x16x128xf32>
    %78 = arith.maximumf %76, %77 : vector<16x16x128xf32>
    %79 = vector.shape_cast %78 : vector<16x16x128xf32> to vector<256x128xf32>
    %c0_25 = arith.constant 0 : index
    %c3 = arith.constant 3 : index
    %c0_26 = arith.constant 0 : index
    %c0_27 = arith.constant 0 : index
    %80 = vector.load %arg3[%c0_25, %c3, %c0_26, %c0_27] : memref<1x4x128x128xf32, #tpu.memory_space<vmem>>, vector<1x1x128x128xf32>
    %81 = vector.shape_cast %80 : vector<1x1x128x128xf32> to vector<128x128xf32>
    %cst_28 = arith.constant dense<0.000000e+00> : vector<256x128xf32>
    %82 = tpu.matmul %79, %81, %cst_28 {dimension_numbers = #tpu.dot_dimension_numbers<[1], [0], [0], [1], [0, 0, 1, 1], [], []>} : vector<256x128xf32>, vector<128x128xf32>, vector<256x128xf32> -> vector<256x128xf32>
    %83 = arith.addf %60, %82 : vector<256x128xf32>
    %c0_29 = arith.constant 0 : index
    %c0_30 = arith.constant 0 : index
    %84 = vector.load %arg4[%c0_29, %c0_30] : memref<1x128xf32, #tpu.memory_space<vmem>>, vector<1x128xf32>
    %85 = vector.broadcast %84 : vector<1x128xf32> to vector<256x128xf32>
    %86 = arith.addf %83, %85 : vector<256x128xf32>
    %cst_31 = arith.constant 0.000000e+00 : f32
    %87 = vector.broadcast %cst_31 : f32 to vector<256x128xf32>
    %88 = arith.subf %87, %86 : vector<256x128xf32>
    %89 = math.exp %88 : vector<256x128xf32>
    %cst_32 = arith.constant 1.000000e+00 : f32
    %90 = vector.broadcast %cst_32 : f32 to vector<256x128xf32>
    %91 = arith.addf %90, %89 : vector<256x128xf32>
    %92 = tpu.reciprocal %91 {approx = true} : vector<256x128xf32> -> vector<256x128xf32>
    %93 = arith.mulf %86, %92 : vector<256x128xf32>
    %94 = vector.shape_cast %93 : vector<256x128xf32> to vector<1x16x16x128xf32>
    %c0_33 = arith.constant 0 : index
    %c0_34 = arith.constant 0 : index
    %c0_35 = arith.constant 0 : index
    %c0_36 = arith.constant 0 : index
    %95 = vector.load %arg5[%c0_33, %c0_34, %c0_35, %c0_36] : memref<1x16x16x128xf32, #tpu.memory_space<vmem>>, vector<1x16x16x128xf32>
    tpu.vector_store %arg5[%c0_33, %c0_34, %c0_35, %c0_36], %94 {strides = array<i32>} : memref<1x16x16x128xf32, #tpu.memory_space<vmem>>, vector<1x16x16x128xf32>,
    return
  }
  func.func @transform_0(%arg0: i32, %arg1: i32) -> (i32, i32, i32, i32) {
    %c0_i32 = arith.constant 0 : i32
    %c0_i32_0 = arith.constant 0 : i32
    %c0_i32_1 = arith.constant 0 : i32
    %c0_i32_2 = arith.constant 0 : i32
    return %arg0, %c0_i32, %c0_i32_0, %c0_i32_1 : i32, i32, i32, i32
  }
  func.func @transform_1(%arg0: i32, %arg1: i32) -> (i32, i32, i32, i32) {
    %c0_i32 = arith.constant 0 : i32
    %c0_i32_0 = arith.constant 0 : i32
    %c0_i32_1 = arith.constant 0 : i32
    %c0_i32_2 = arith.constant 0 : i32
    %c0_i32_3 = arith.constant 0 : i32
    return %c0_i32, %c0_i32_0, %c0_i32_1, %c0_i32_2 : i32, i32, i32, i32
  }
  func.func @transform_2(%arg0: i32, %arg1: i32) -> (i32, i32) {
    %c0_i32 = arith.constant 0 : i32
    %c0_i32_0 = arith.constant 0 : i32
    %c0_i32_1 = arith.constant 0 : i32
    return %c0_i32, %c0_i32_0 : i32, i32
  }
  func.func @transform_3(%arg0: i32, %arg1: i32) -> (i32, i32, i32, i32) {
    %c0_i32 = arith.constant 0 : i32
    %c0_i32_0 = arith.constant 0 : i32
    %c0_i32_1 = arith.constant 0 : i32
    return %arg0, %arg1, %c0_i32, %c0_i32_0 : i32, i32, i32, i32
  }
}

</mosaic_0001>

<bundles_post_ra>
// kernel: spp_pallas.1
= control target key start
LH: loop header
LB: loop body
LE: loop exit
PB: predicated region body
PF: predicated region fallthrough
CT: control target
= control target key end

     0   :  { %s5978_s12 = smov 0   ;;  %s5980_s13 = smov 0   ;;  %s9679_s0 = inlined_call_operand.vmem [shape: f32[2,16,16,128], index: 0, kind: input, shape index: {}]   ;;  %s9680_s1 = inlined_call_operand.vmem [shape: f32[1,4,128,128], index: 1, kind: input, shape index: {}]   ;;  %s9681_s2 = inlined_call_operand.vmem [shape: f32[1,128], index: 2, kind: input, shape index: {}]   ;;  %s9682_s3 = inlined_call_operand.vmem [shape: f32[2,16,16,128], index: 3, kind: output, shape index: {}]  }
   0x1   :  { %s5982_s14 = smov 0  }
   0x2 LB: > { %s25_s15 = sadd.s32 1, %s5951_s13  ;;  %p5628_p0 = scmp.ge.s32.totalorder %s5955_s14, 1  ;;  %s5955_s14 = sphi %s5982_s14, %s13_s14   ;;  %s5951_s13 = sphi %s5980_s13, %s10239_s13   ;;  %s5947_s12 = sphi %s5978_s12, %s10238_s12  }
   0x3   : > { %p27_p1 = scmp.ge.s32.totalorder %s25_s15, 2  ;;  %p151_p2 = scmp.lt.s32.totalorder %s5955_s14, 3 }
   0x5   : > { %s10241_s15 = smov (%p27_p1, %s25_s15), 0  ;;  %p152_p3 = pnand %p5628_p0, %p151_p2 }
   0x7   : > { %155 = sbr.rel (%p152_p3) target bundleno = 1061 (0x425), region = 32 }
   0xc   : > { %v5664_v0 = vld [vmem:[%s9680_s1 + $0x178] sm:$0xff]  ;;  %v5663_v1 = vld [vmem:[%s9680_s1 + $0x170] sm:$0xff]  ;;  %v5662_v5 = vld [vmem:[%s9680_s1 + $0x168] sm:$0xff]  ;;  %v9696_v6 = vmov -3.4028235e+38   ;;  %p180_p4 = scmp.lt.s32.totalorder %s5947_s12, 1 }
   0xd   : > { %v5680_v2 = vld [vmem:[%s9680_s1 + $0x1f8] sm:$0xff]  ;;  %4154 = vmatpush.msra.mxu2 %v5664_v0  ;;  %196 = vst [vmem:[#allocation2] sm:$0xff] %v9696_v6  ;;  %v5679_v7 = vld [vmem:[%s9680_s1 + $0x1f0] sm:$0xff]  ;;  %v5678_v10 = vld [vmem:[%s9680_s1 + $0x1e8] sm:$0xff]  ;;  %vm1142_vm0 = vcmask 1046528   ;;  %vm1455_vm1 = vcmask 1045504  }
   0xe   : > { %5132 = vmatpush.msra.mxu3 %v5680_v2  ;;  %v5648_v3 = vld [vmem:[%s9680_s1 + $0xf8] sm:$0xff]  ;;  %v5647_v8 = vld [vmem:[%s9680_s1 + $0xf0] sm:$0xff]  ;;  %v5646_v11 = vld [vmem:[%s9680_s1 + $0xe8] sm:$0xff]  ;;  %199 = vst [vmem:[#allocation2 + $0x18] sm:$0xf] %v9696_v6  ;;  %s10243_s12 = smov (!%p180_p4, %s5947_s12), 1 }
   0xf   : > { %v661_v4 = vld [vmem:[%s9680_s1 + $0x78] sm:$0xff]  ;;  %2571 = vmatpush.msra.mxu0 %v5648_v3  ;;  %v660_v9 = vld [vmem:[%s9680_s1 + $0x70] sm:$0xff]  ;;  %4155 = vmatpush.msra.mxu2 %v5663_v1  ;;  %v5661_v12 = vld [vmem:[%s9680_s1 + $0x160] sm:$0xff]  ;;  %203 = vst [vmem:[#allocation2 + $0x38] sm:$0xf] %v9696_v6  ;;  %s5683_s19 = sshll.u32 %s10243_s12, 8 }
  0x10   : > { %2684 = vmatpush.msra.mxu1 %v661_v4  ;;  %5133 = vmatpush.msra.mxu3 %v5679_v7  ;;  %v659_v13 = vld [vmem:[%s9680_s1 + $0x68] sm:$0xff]  ;;  %v5677_v14 = vld [vmem:[%s9680_s1 + $0x1e0] sm:$0xff]  ;;  %v5660_v17 = vld [vmem:[%s9680_s1 + $0x158] sm:$0xff]  ;;  %207 = vst [vmem:[#allocation2 + $0x58] sm:$0xf] %v9696_v6  ;;  %s6242_s22 = scalar_lea.vmem %s9679_s0, %s5683_s19  ;;  %vm1768_vm2 = vcmask 1044480   ;;  %s8641_s10 = scalar_lea.vmem %s9682_s3, %s5683_s19 }
  0x11   : > { %2572 = vmatpush.msra.mxu0 %v5647_v8  ;;  %4156 = vmatpush.msra.mxu2 %v5662_v5  ;;  %v5645_v15 = vld [vmem:[%s9680_s1 + $0xe0] sm:$0xff]  ;;  %v5676_v18 = vld [vmem:[%s9680_s1 + $0x1d8] sm:$0xff]  ;;  %v5659_v21 = vld [vmem:[%s9680_s1 + $0x150] sm:$0xff]  ;;  %211 = vst [vmem:[#allocation2 + $0x78] sm:$0xf] %v9696_v6  ;;  %vm2081_vm3 = vcmask 1043456  }
  0x12   : > { %2685 = vmatpush.msra.mxu1 %v660_v9  ;;  %5134 = vmatpush.msra.mxu3 %v5678_v10  ;;  %v658_v16 = vld [vmem:[%s9680_s1 + $0x60] sm:$0xff]  ;;  %v5644_v19 = vld [vmem:[%s9680_s1 + $0xd8] sm:$0xff]  ;;  %v5675_v22 = vld [vmem:[%s9680_s1 + $0x1d0] sm:$0xff]  ;;  %215 = vst [vmem:[#allocation2 + $0x98] sm:$0xf] %v9696_v6  ;;  %vm533_vm4 = vcmask 1041408  }
  0x13   : > { %2573 = vmatpush.msra.mxu0 %v5646_v11  ;;  %4157 = vmatpush.msra.mxu2 %v5661_v12  ;;  %v657_v20 = vld [vmem:[%s9680_s1 + $0x58] sm:$0xff]  ;;  %v5643_v23 = vld [vmem:[%s9680_s1 + $0xd0] sm:$0xff]  ;;  %v5658_v25 = vld [vmem:[%s9680_s1 + $0x148] sm:$0xff]  ;;  %219 = vst [vmem:[#allocation2 + $0xb8] sm:$0xf] %v9696_v6 }
  0x14   : > { %2686 = vmatpush.msra.mxu1 %v659_v13  ;;  %5135 = vmatpush.msra.mxu3 %v5677_v14  ;;  %v656_v24 = vld [vmem:[%s9680_s1 + $0x50] sm:$0xff]  ;;  %v5674_v26 = vld [vmem:[%s9680_s1 + $0x1c8] sm:$0xff]  ;;  %v5657_v29 = vld [vmem:[%s9680_s1 + $0x140] sm:$0xff]  ;;  %220 = vst [vmem:[#allocation2 + $0xc0] sm:$0xff] %v9696_v6 }
  0x15   : > { %2574 = vmatpush.msra.mxu0 %v5645_v15  ;;  %4158 = vmatpush.msra.mxu2 %v5660_v17  ;;  %v5642_v27 = vld [vmem:[%s9680_s1 + $0xc8] sm:$0xff]  ;;  %v5673_v30 = vld [vmem:[%s9680_s1 + $0x1c0] sm:$0xff]  ;;  %v5656_v33 = vld [vmem:[%s9680_s1 + $0x138] sm:$0xff]  ;;  %221 = vst [vmem:[#allocation2 + $0xc8] sm:$0xff] %v9696_v6 }
  0x16   : > { %2687 = vmatpush.msra.mxu1 %v658_v16  ;;  %5136 = vmatpush.msra.mxu3 %v5676_v18  ;;  %v655_v28 = vld [vmem:[%s9680_s1 + $0x48] sm:$0xff]  ;;  %v5641_v31 = vld [vmem:[%s9680_s1 + $0xc0] sm:$0xff]  ;;  %v5672_v34 = vld [vmem:[%s9680_s1 + $0x1b8] sm:$0xff]  ;;  %222 = vst [vmem:[#allocation2 + $0xd0] sm:$0xff] %v9696_v6 }
  0x17   : > { %2575 = vmatpush.msra.mxu0 %v5644_v19  ;;  %4159 = vmatpush.msra.mxu2 %v5659_v21  ;;  %v654_v32 = vld [vmem:[%s9680_s1 + $0x40] sm:$0xff]  ;;  %v5640_v35 = vld [vmem:[%s9680_s1 + $0xb8] sm:$0xff]  ;;  %v5655_v37 = vld [vmem:[%s9680_s1 + $0x130] sm:$0xff]  ;;  %223 = vst [vmem:[#allocation2 + $0xd8] sm:$0xf] %v9696_v6 }
  0x18   : > { %2688 = vmatpush.msra.mxu1 %v657_v20  ;;  %5137 = vmatpush.msra.mxu3 %v5675_v22  ;;  %v653_v36 = vld [vmem:[%s9680_s1 + $0x38] sm:$0xff]  ;;  %v5671_v38 = vld [vmem:[%s9680_s1 + $0x1b0] sm:$0xff]  ;;  %v5654_v41 = vld [vmem:[%s9680_s1 + $0x128] sm:$0xff]  ;;  %224 = vst [vmem:[#allocation2 + $0xe0] sm:$0xff] %v9696_v6 }
  0x19   : > { %2576 = vmatpush.msra.mxu0 %v5643_v23  ;;  %4160 = vmatpush.msra.mxu2 %v5658_v25  ;;  %v5639_v39 = vld [vmem:[%s9680_s1 + $0xb0] sm:$0xff]  ;;  %v5670_v42 = vld [vmem:[%s9680_s1 + $0x1a8] sm:$0xff]  ;;  %v5653_v45 = vld [vmem:[%s9680_s1 + $0x120] sm:$0xff]  ;;  %225 = vst [vmem:[#allocation2 + $0xe8] sm:$0xff] %v9696_v6 }
  0x1a   : > { %2689 = vmatpush.msra.mxu1 %v656_v24  ;;  %5138 = vmatpush.msra.mxu3 %v5674_v26  ;;  %v652_v40 = vld [vmem:[%s9680_s1 + $0x30] sm:$0xff]  ;;  %v5638_v43 = vld [vmem:[%s9680_s1 + $0xa8] sm:$0xff]  ;;  %v5669_v46 = vld [vmem:[%s9680_s1 + $0x1a0] sm:$0xff]  ;;  %226 = vst [vmem:[#allocation2 + $0xf0] sm:$0xff] %v9696_v6 }
  0x1b   : > { %2577 = vmatpush.msra.mxu0 %v5642_v27  ;;  %4161 = vmatpush.msra.mxu2 %v5657_v29  ;;  %v651_v44 = vld [vmem:[%s9680_s1 + $0x28] sm:$0xff]  ;;  %v5637_v47 = vld [vmem:[%s9680_s1 + $0xa0] sm:$0xff]  ;;  %v5652_v49 = vld [vmem:[%s9680_s1 + $0x118] sm:$0xff]  ;;  %227 = vst [vmem:[#allocation2 + $0xf8] sm:$0xf] %v9696_v6 }
  0x1c   : > { %2690 = vmatpush.msra.mxu1 %v655_v28  ;;  %5139 = vmatpush.msra.mxu3 %v5673_v30  ;;  %v650_v48 = vld [vmem:[%s9680_s1 + $0x20] sm:$0xff]  ;;  %v5668_v50 = vld [vmem:[%s9680_s1 + $0x198] sm:$0xff]  ;;  %v5651_v53 = vld [vmem:[%s9680_s1 + $0x110] sm:$0xff]  ;;  %228 = vst [vmem:[#allocation2 + $0x100] sm:$0xff] %v9696_v6 }
  0x1d   : > { %2578 = vmatpush.msra.mxu0 %v5641_v31  ;;  %4162 = vmatpush.msra.mxu2 %v5656_v33  ;;  %v5636_v51 = vld [vmem:[%s9680_s1 + $0x98] sm:$0xff]  ;;  %v5667_v54 = vld [vmem:[%s9680_s1 + $0x190] sm:$0xff]  ;;  %v5650_v57 = vld [vmem:[%s9680_s1 + $0x108] sm:$0xff]  ;;  %229 = vst [vmem:[#allocation2 + $0x108] sm:$0xff] %v9696_v6 }
  0x1e   : > { %2691 = vmatpush.msra.mxu1 %v654_v32  ;;  %5140 = vmatpush.msra.mxu3 %v5672_v34  ;;  %v649_v52 = vld [vmem:[%s9680_s1 + $0x18] sm:$0xff]  ;;  %v5635_v55 = vld [vmem:[%s9680_s1 + $0x90] sm:$0xff]  ;;  %v5666_v58 = vld [vmem:[%s9680_s1 + $0x188] sm:$0xff]  ;;  %230 = vst [vmem:[#allocation2 + $0x110] sm:$0xff] %v9696_v6 }
  0x1f   : > { %2579 = vmatpush.msra.mxu0 %v5640_v35  ;;  %4163 = vmatpush.msra.mxu2 %v5655_v37  ;;  %v648_v56 = vld [vmem:[%s9680_s1 + $0x10] sm:$0xff]  ;;  %v5649_v59 = vld [vmem:[%s9680_s1 + $0x100] sm:$0xff]  ;;  %231 = vst [vmem:[#allocation2 + $0x118] sm:$0xf] %v9696_v6  ;;  %v376_v60 = vld [vmem:[#allocation2 + $0x18] sm:$0xf] }
  0x20   : > { %2692 = vmatpush.msra.mxu1 %v653_v36  ;;  %5141 = vmatpush.msra.mxu3 %v5671_v38  ;;  %232 = vst [vmem:[#allocation2 + $0x120] sm:$0xff] %v9696_v6  ;;  %v380_v61 = vld [vmem:[#allocation2 + $0x38] sm:$0xf]  ;;  %v308_v34 = vld [vmem:[%s6242_s22] sm:$0xff] }
  0x21   : > { %2580 = vmatpush.msra.mxu0 %v5639_v39  ;;  %4164 = vmatpush.msra.mxu2 %v5654_v41  ;;  %233 = vst [vmem:[#allocation2 + $0x128] sm:$0xff] %v9696_v6  ;;  %v384_v62 = vld [vmem:[#allocation2 + $0x58] sm:$0xf]  ;;  %v665_v63 = vmax.f32 %v376_v60, %v380_v61  ;;  %v309_v39 = vld [vmem:[%s6242_s22 + $0x8] sm:$0xff] }
  0x22   : > { %2693 = vmatpush.msra.mxu1 %v652_v40  ;;  %5142 = vmatpush.msra.mxu3 %v5670_v42  ;;  %234 = vst [vmem:[#allocation2 + $0x130] sm:$0xff] %v9696_v6  ;;  %v669_v0 = vmax.f32 %v380_v61, %v384_v62  ;;  %v388_v1 = vld [vmem:[#allocation2 + $0x78] sm:$0xf] }
  0x23   : > { %2581 = vmatpush.msra.mxu0 %v5638_v43  ;;  %4165 = vmatpush.msra.mxu2 %v5653_v45  ;;  %235 = vst [vmem:[#allocation2 + $0x138] sm:$0xf] %v9696_v6  ;;  %v392_v2 = vld [vmem:[#allocation2 + $0x98] sm:$0xf]  ;;  %v761_v7 = vmax.f32 %v665_v63, %v384_v62  ;;  %v673_v10 = vmax.f32 %v384_v62, %v388_v1  ;;  %v6263_v43 = vrot.slane %v9696_v6, 1  ;;  %v310_v45 = vld [vmem:[%s6242_s22 + $0x10] sm:$0xff] }
  0x24   : > { %2694 = vmatpush.msra.mxu1 %v651_v44  ;;  %5143 = vmatpush.msra.mxu3 %v5669_v46  ;;  %236 = vst [vmem:[#allocation2 + $0x140] sm:$0xff] %v9696_v6  ;;  %v6205_v3 = vld [vmem:[#allocation2 + $0xb8] sm:$0xf]  ;;  %v765_v9 = vmax.f32 %v669_v0, %v388_v1  ;;  %v677_v12 = vmax.f32 %v388_v1, %v392_v2  ;;  %v314_v62 = vld [vmem:[%s6242_s22 + $0x30] sm:$0xff] }
  0x25   : > { %2582 = vmatpush.msra.mxu0 %v5637_v47  ;;  %4166 = vmatpush.msra.mxu2 %v5652_v49  ;;  %237 = vst [vmem:[#allocation2 + $0x148] sm:$0xff] %v9696_v6  ;;  %v6208_v4 = vld [vmem:[#allocation2 + $0xd8] sm:$0xf]  ;;  %v681_v13 = vmax.f32 %v392_v2, %v6205_v3  ;;  %v857_v17 = vmax.f32 %v761_v7, %v388_v1 }
  0x26   : > { %2695 = vmatpush.msra.mxu1 %v650_v48  ;;  %5144 = vmatpush.msra.mxu3 %v5668_v50  ;;  %238 = vst [vmem:[#allocation2 + $0x150] sm:$0xff] %v9696_v6  ;;  %v6210_v5 = vld [vmem:[#allocation2 + $0xf8] sm:$0xf]  ;;  %v685_v14 = vmax.f32 %v6205_v3, %v6208_v4  ;;  %v861_v18 = vmax.f32 %v765_v9, %v392_v2 }
  0x27   : > { %2583 = vmatpush.msra.mxu0 %v5636_v51  ;;  %4167 = vmatpush.msra.mxu2 %v5651_v53  ;;  %239 = vst [vmem:[#allocation2 + $0x158] sm:$0xf] %v9696_v6  ;;  %v6216_v8 = vld [vmem:[#allocation2 + $0x118] sm:$0xf]  ;;  %v689_v15 = vmax.f32 %v6208_v4, %v6210_v5  ;;  %v769_v20 = vmax.f32 %v673_v10, %v392_v2 }
  0x28   : > { %2696 = vmatpush.msra.mxu1 %v649_v52  ;;  %5145 = vmatpush.msra.mxu3 %v5667_v54  ;;  %240 = vst [vmem:[#allocation2 + $0x160] sm:$0xff] %v9696_v6  ;;  %v693_v16 = vmax.f32 %v6210_v5, %v6216_v8  ;;  %v773_v22 = vmax.f32 %v677_v12, %v6205_v3  ;;  %v311_v49 = vld [vmem:[%s6242_s22 + $0x18] sm:$0xff]  ;;  %v312_v52 = vld [vmem:[%s6242_s22 + $0x20] sm:$0xff] }
  0x29   : > { %2584 = vmatpush.msra.mxu0 %v5635_v55  ;;  %4168 = vmatpush.msra.mxu2 %v5650_v57  ;;  %241 = vst [vmem:[#allocation2 + $0x168] sm:$0xff] %v9696_v6  ;;  %v777_v23 = vmax.f32 %v681_v13, %v6208_v4  ;;  %v781_v24 = vmax.f32 %v685_v14, %v6210_v5  ;;  %v313_v57 = vld [vmem:[%s6242_s22 + $0x28] sm:$0xff] }
  0x2a   : > { %2697 = vmatpush.msra.mxu1 %v648_v56  ;;  %5146 = vmatpush.msra.mxu3 %v5666_v58  ;;  %242 = vst [vmem:[#allocation2 + $0x170] sm:$0xff] %v9696_v6  ;;  %v412_v11 = vld [vmem:[#allocation2 + $0x138] sm:$0xf]  ;;  %v785_v25 = vmax.f32 %v689_v15, %v6216_v8  ;;  %v6245_v29 = vmax.f32 %v857_v17, %v392_v2  ;;  %v318_v17 = vld [vmem:[%s6242_s22 + $0x50] sm:$0xff] }
  0x2b   : > { %4169 = vmatpush.msra.mxu2 %v5649_v59  ;;  %243 = vst [vmem:[#allocation2 + $0x178] sm:$0xf] %v9696_v6  ;;  %v697_v19 = vmax.f32 %v6216_v8, %v412_v11  ;;  %v789_v28 = vmax.f32 %v693_v16, %v412_v11  ;;  %v6249_v31 = vmax.f32 %v861_v18, %v6205_v3 }
  0x2c   : > { %244 = vst [vmem:[#allocation2 + $0x180] sm:$0xff] %v9696_v6  ;;  %v865_v33 = vmax.f32 %v769_v20, %v6205_v3  ;;  %v869_v35 = vmax.f32 %v773_v22, %v6208_v4  ;;  %v873_v36 = vmax.f32 %v777_v23, %v6210_v5  ;;  %v877_v37 = vmax.f32 %v781_v24, %v6216_v8  ;;  %v315_v3 = vld [vmem:[%s6242_s22 + $0x38] sm:$0xff] }
  0x2d   : > { %245 = vst [vmem:[#allocation2 + $0x188] sm:$0xff] %v9696_v6  ;;  %v881_v38 = vmax.f32 %v785_v25, %v412_v11  ;;  %v1148_v44 = vrot.slane %v6245_v29, 1  ;;  %v1155_v48 = vrot.slane %v6249_v31, 1  ;;  %v319_v23 = vld [vmem:[%s6242_s22 + $0x58] sm:$0xff] }
  0x2e   : > { %246 = vst [vmem:[#allocation2 + $0x190] sm:$0xff] %v9696_v6  ;;  %v416_v21 = vld [vmem:[#allocation2 + $0x158] sm:$0xf]  ;;  %v6273_v51 = vmax.f32 %v865_v33, %v6208_v4  ;;  %v6277_v53 = vmax.f32 %v869_v35, %v6210_v5  ;;  %v6280_v54 = vmax.f32 %v873_v36, %v6216_v8  ;;  %v6282_v55 = vmax.f32 %v877_v37, %v412_v11  ;;  %v316_v5 = vld [vmem:[%s6242_s22 + $0x40] sm:$0xff]  ;;  %v321_v33 = vld [vmem:[%s6242_s22 + $0x68] sm:$0xff] }
  0x2f   : > { %247 = vst [vmem:[#allocation2 + $0x198] sm:$0xf] %v9696_v6  ;;  %v701_v27 = vmax.f32 %v412_v11, %v416_v21  ;;  %v793_v32 = vmax.f32 %v697_v19, %v416_v21  ;;  %v885_v42 = vmax.f32 %v789_v28, %v416_v21  ;;  %v6284_v56 = vmax.f32 %v881_v38, %v416_v21  ;;  %v317_v11 = vld [vmem:[%s6242_s22 + $0x48] sm:$0xff]  ;;  %v322_v38 = vld [vmem:[%s6242_s22 + $0x70] sm:$0xff] }
  0x30   : > { %248 = vst [vmem:[#allocation2 + $0x1a0] sm:$0xff] %v9696_v6  ;;  %v6294_v61 = vsel %vm1142_vm0, %v6263_v43, %v1148_v44  ;;  %v6305_v2 = vsel %vm1142_vm0, %v6263_v43, %v1155_v48 }
  0x31   : > { %249 = vst [vmem:[#allocation2 + $0x1a8] sm:$0xff] %v9696_v6 }
  0x32   : > { %250 = vst [vmem:[#allocation2 + $0x1b0] sm:$0xff] %v9696_v6  ;;  %v420_v26 = vld [vmem:[#allocation2 + $0x178] sm:$0xf] }
  0x33   : > { %9881 = vst [vmem:[#allocation3_spill] sm:$0xff] %v6245_v29  ;;  %v705_v30 = vmax.f32 %v416_v21, %v420_v26  ;;  %v797_v41 = vmax.f32 %v701_v27, %v420_v26  ;;  %v889_v50 = vmax.f32 %v793_v32, %v420_v26  ;;  %v6290_v60 = vmax.f32 %v885_v42, %v420_v26  ;;  %v320_v27 = vld [vmem:[%s6242_s22 + $0x60] sm:$0xff] }
  0x34   : > { %251 = vst [vmem:[#allocation2 + $0x1b8] sm:$0xf] %v9696_v6 }
  0x35   : > { %9882 = vst [vmem:[#allocation4_spill] sm:$0xff] %v6249_v31 }
  0x36   : > { %252 = vst [vmem:[#allocation2 + $0x1c0] sm:$0xff] %v9696_v6  ;;  %v6260_v40 = vld [vmem:[#allocation2 + $0x198] sm:$0xf] }
  0x37   : > { %253 = vst [vmem:[#allocation2 + $0x1c8] sm:$0xff] %v9696_v6  ;;  %v709_v46 = vmax.f32 %v420_v26, %v6260_v40  ;;  %v801_v47 = vmax.f32 %v705_v30, %v6260_v40  ;;  %v893_v59 = vmax.f32 %v797_v41, %v6260_v40  ;;  %v6309_v4 = vmax.f32 %v889_v50, %v6260_v40 }
  0x38   : > { %254 = vst [vmem:[#allocation2 + $0x1d0] sm:$0xff] %v9696_v6 }
  0x39   : > { %9883 = vst [vmem:[#allocation5_spill] sm:$0xff] %v6260_v40 }
  0x3a   : > { %255 = vst [vmem:[#allocation2 + $0x1d8] sm:$0xf] %v9696_v6 }
  0x3b   : > { %341 = vst [vmem:[#allocation2 + $0xc6] sm:$0xff] %v308_v34  ;;  %v6287_v58 = vld [vmem:[#allocation2 + $0x1b8] sm:$0xf] }
  0x3c   : > { %9884 = vst [vmem:[#allocation6_spill] sm:$0xff] %v6273_v51  ;;  %v6300_v0 = vmax.f32 %v709_v46, %v6287_v58  ;;  %v897_v1 = vmax.f32 %v801_v47, %v6287_v58  ;;  %v6320_v13 = vmax.f32 %v893_v59, %v6287_v58  ;;  %v323_v46 = vld [vmem:[%s6242_s22 + $0x78] sm:$0xff] }
  0x3d   : > { %342 = vst [vmem:[#allocation2 + $0xce] sm:$0xff] %v309_v39 }
  0x3e   : > { %9885 = vst [vmem:[#allocation7_spill] sm:$0xff] %v6277_v53 }
  0x3f   : > { %9886 = vst [vmem:[#allocation8_spill] sm:$0xff] %v6280_v54 }
  0x40   : > { %9887 = vst [vmem:[#allocation9_spill] sm:$0xff] %v6282_v55 }
  0x41   : > { %9888 = vst [vmem:[#allocation10_spill] sm:$0xff] %v6284_v56  ;;  %v6317_v12 = vld [vmem:[#allocation2 + $0x1d8] sm:$0xf] }
  0x42   : > { %343 = vst [vmem:[#allocation2 + $0xe6] sm:$0xff] %v310_v45  ;;  %v397_v18 = vld [vmem:[#allocation2 + $0xc0] sm:$0xff]  ;;  %v6329_v20 = vmax.f32 %v897_v1, %v6317_v12 }
  0x43   : > { %9889 = vst [vmem:[#allocation11_spill] sm:$0xff] %v6287_v58  ;;  %v6334_v26 = vmax.f32 %v397_v18, -3.4028235e+38 }
  0x44   : > { %9890 = vst [vmem:[#allocation12_spill] sm:$0xff] %v6290_v60  ;;  %v398_v24 = vld [vmem:[#allocation2 + $0xc8] sm:$0xff]  ;;  %v399_v25 = vld [vmem:[#allocation2 + $0xd0] sm:$0xff] }
  0x45   : > { %344 = vst [vmem:[#allocation2 + $0xee] sm:$0xff] %v311_v49  ;;  %v6337_v30 = vmax.f32 %v398_v24, -3.4028235e+38  ;;  %v6339_v32 = vmax.f32 %v399_v25, -3.4028235e+38 }
  0x46   : > { %9891 = vst [vmem:[#allocation13_spill] sm:$0xff] %v6300_v0 }
  0x47   : > { %345 = vst [vmem:[#allocation2 + $0x106] sm:$0xff] %v312_v52  ;;  %v324_v52 = vld [vmem:[%s6242_s22 + $0x80] sm:$0xff] }
  0x48   : > { %346 = vst [vmem:[#allocation2 + $0x10e] sm:$0xff] %v313_v57 }
  0x49   : > { %347 = vst [vmem:[#allocation2 + $0x126] sm:$0xff] %v314_v62  ;;  %v401_v28 = vld [vmem:[#allocation2 + $0xe0] sm:$0xff] }
  0x4a   : > { %9892 = vst [vmem:[#allocation14_spill] sm:$0xff] %v6317_v12  ;;  %v686_v36 = vmax.f32 %v397_v18, %v401_v28  ;;  %v6343_v37 = vmax.f32 %v6334_v26, %v401_v28 }
  0x4b   : > { %9893 = vst [vmem:[#allocation15_spill] sm:$0xff] %v6320_v13 }
  0x4c   : > { %348 = vst [vmem:[#allocation2 + $0x12e] sm:$0xff] %v315_v3  ;;  %v402_v34 = vld [vmem:[#allocation2 + $0xe8] sm:$0xff]  ;;  %v403_v35 = vld [vmem:[#allocation2 + $0xf0] sm:$0xff]  ;;  %v1477_v13 = vrot.slane %v6343_v37, 2 }
  0x4d   : > { %9894 = vst [vmem:[#allocation16_spill] sm:$0xff] %v6329_v20  ;;  %v687_v41 = vmax.f32 %v398_v24, %v402_v34  ;;  %v688_v42 = vmax.f32 %v399_v25, %v403_v35  ;;  %v6347_v44 = vmax.f32 %v6337_v30, %v402_v34  ;;  %v6350_v45 = vmax.f32 %v6339_v32, %v403_v35 }
  0x4e   : > { %349 = vst [vmem:[#allocation2 + $0x146] sm:$0xff] %v316_v5  ;;  %v405_v39 = vld [vmem:[#allocation2 + $0x100] sm:$0xff]  ;;  %v325_v5 = vld [vmem:[%s6242_s22 + $0x88] sm:$0xff] }
  0x4f   : > { %9895 = vst [vmem:[#allocation17_spill] sm:$0xff] %v6334_v26  ;;  %v406_v47 = vld [vmem:[#allocation2 + $0x108] sm:$0xff]  ;;  %v407_v48 = vld [vmem:[#allocation2 + $0x110] sm:$0xff]  ;;  %v690_v49 = vmax.f32 %v401_v28, %v405_v39  ;;  %v6353_v50 = vmax.f32 %v686_v36, %v405_v39  ;;  %v6372_v24 = vmax.f32 %v6343_v37, %v405_v39 }
  0x50   : > { %350 = vst [vmem:[#allocation2 + $0x14e] sm:$0xff] %v317_v11  ;;  %v6356_v57 = vld [vmem:[#allocation2 + $0x120] sm:$0xff]  ;;  %v691_v59 = vmax.f32 %v402_v34, %v406_v47  ;;  %v692_v62 = vmax.f32 %v403_v35, %v407_v48  ;;  %v6358_v1 = vmax.f32 %v687_v41, %v406_v47  ;;  %v6360_v3 = vmax.f32 %v688_v42, %v407_v48 }
  0x51   : > { %9896 = vst [vmem:[#allocation18_spill] sm:$0xff] %v6337_v30  ;;  %v694_v18 = vmax.f32 %v405_v39, %v6356_v57  ;;  %v6394_v41 = vmax.f32 %v6347_v44, %v406_v47  ;;  %v6397_v42 = vmax.f32 %v6350_v45, %v407_v48 }
  0x52   : > { %9897 = vst [vmem:[#allocation19_spill] sm:$0xff] %v6339_v32 }
  0x53   : > { %351 = vst [vmem:[#allocation2 + $0x166] sm:$0xff] %v318_v17  ;;  %v6363_v11 = vld [vmem:[#allocation2 + $0x128] sm:$0xff]  ;;  %v6365_v17 = vld [vmem:[#allocation2 + $0x130] sm:$0xff] }
  0x54   : > { %9898 = vst [vmem:[#allocation20_spill] sm:$0xff] %v6343_v37  ;;  %v696_v28 = vmax.f32 %v407_v48, %v6365_v17  ;;  %v6382_v34 = vmax.f32 %v692_v62, %v6365_v17  ;;  %v878_v48 = vmax.f32 %v6353_v50, %v6356_v57  ;;  %v880_v50 = vmax.f32 %v6360_v3, %v6365_v17 }
  0x55   : > { %352 = vst [vmem:[#allocation2 + $0x16e] sm:$0xff] %v319_v23  ;;  %v6369_v23 = vmax.f32 %v690_v49, %v6356_v57  ;;  %v6374_v25 = vld [vmem:[#allocation2 + $0x140] sm:$0xff] }
  0x56   : > { %9899 = vst [vmem:[#allocation21_spill] sm:$0xff] %v6347_v44  ;;  %v6391_v39 = vmax.f32 %v694_v18, %v6374_v25 }
  0x57   : > { %9900 = vst [vmem:[#allocation22_spill] sm:$0xff] %v6350_v45  ;;  %v6384_v35 = vld [vmem:[#allocation2 + $0x148] sm:$0xff]  ;;  %v6386_v36 = vld [vmem:[#allocation2 + $0x150] sm:$0xff] }
  0x58   : > { %353 = vst [vmem:[#allocation2 + $0x186] sm:$0xff] %v320_v27  ;;  %v695_v27 = vmax.f32 %v406_v47, %v6363_v11  ;;  %v699_v49 = vmax.f32 %v6363_v11, %v6384_v35  ;;  %v792_v62 = vmax.f32 %v696_v28, %v6386_v36 }
  0x59   : > { %354 = vst [vmem:[#allocation2 + $0x18e] sm:$0xff] %v321_v33  ;;  %v6379_v33 = vmax.f32 %v691_v59, %v6363_v11 }
  0x5a   : > { %355 = vst [vmem:[#allocation2 + $0x1a6] sm:$0xff] %v322_v38  ;;  %v698_v38 = vmax.f32 %v6356_v57, %v6374_v25  ;;  %v791_v59 = vmax.f32 %v695_v27, %v6384_v35 }
  0x5b   : > { %9901 = vst [vmem:[#allocation23_spill] sm:$0xff] %v6372_v24  ;;  %v883_v14 = vmax.f32 %v6379_v33, %v6384_v35 }
  0x5c   : > { %356 = vst [vmem:[#allocation2 + $0x1ae] sm:$0xff] %v323_v46  ;;  %v417_v46 = vld [vmem:[#allocation2 + $0x160] sm:$0xff]  ;;  %v418_v18 = vld [vmem:[#allocation2 + $0x168] sm:$0xff]  ;;  %v419_v19 = vld [vmem:[#allocation2 + $0x170] sm:$0xff] }
  0x5d   : > { %357 = vst [vmem:[#allocation2 + $0x1c6] sm:$0xff] %v324_v52  ;;  %v700_v52 = vmax.f32 %v6365_v17, %v6386_v36  ;;  %v702_v47 = vmax.f32 %v6374_v25, %v417_v46  ;;  %v794_v63 = vmax.f32 %v698_v38, %v417_v46  ;;  %v703_v15 = vmax.f32 %v6384_v35, %v418_v18 }
  0x5e   : > { %9902 = vst [vmem:[#allocation24_spill] sm:$0xff] %v6394_v41  ;;  %v704_v27 = vmax.f32 %v6386_v36, %v419_v19  ;;  %v795_v10 = vmax.f32 %v699_v49, %v418_v18  ;;  %v884_v49 = vmax.f32 %v6382_v34, %v6386_v36  ;;  %v887_v12 = vmax.f32 %v791_v59, %v418_v18 }
  0x5f   : > { %9903 = vst [vmem:[#allocation25_spill] sm:$0xff] %v6397_v42  ;;  %v421_v16 = vld [vmem:[#allocation2 + $0x180] sm:$0xff]  ;;  %v796_v28 = vmax.f32 %v700_v52, %v419_v19  ;;  %v886_v52 = vmax.f32 %v6391_v39, %v417_v46  ;;  %v888_v58 = vmax.f32 %v792_v62, %v419_v19  ;;  %v6431_v39 = vmax.f32 %v6372_v24, %v6356_v57 }
  0x60   : > { %358 = vst [vmem:[#allocation2 + $0x1ce] sm:$0xff] %v325_v5  ;;  %v879_v5 = vmax.f32 %v6358_v1, %v6363_v11  ;;  %v422_v22 = vld [vmem:[#allocation2 + $0x188] sm:$0xff]  ;;  %v423_v21 = vld [vmem:[#allocation2 + $0x190] sm:$0xff]  ;;  %v798_v38 = vmax.f32 %v702_v47, %v421_v16  ;;  %v882_v1 = vmax.f32 %v6369_v23, %v6374_v25  ;;  %v890_v23 = vmax.f32 %v794_v63, %v421_v16 }
  0x61   : > { %256 = vst [vmem:[#allocation2 + $0x1e0] sm:$0xff] %v9696_v6  ;;  %v799_v9 = vmax.f32 %v703_v15, %v422_v22  ;;  %v800_v8 = vmax.f32 %v704_v27, %v423_v21  ;;  %v425_v47 = vld [vmem:[#allocation2 + $0x1a0] sm:$0xff]  ;;  %v891_v40 = vmax.f32 %v795_v10, %v422_v22  ;;  %v892_v33 = vmax.f32 %v796_v28, %v423_v21 }
  0x62   : > { %257 = vst [vmem:[#allocation2 + $0x1e8] sm:$0xff] %v9696_v6  ;;  %v894_v0 = vmax.f32 %v798_v38, %v425_v47  ;;  %v6435_v63 = vmax.f32 %v6394_v41, %v6363_v11  ;;  %v6439_v10 = vmax.f32 %v6397_v42, %v6365_v17  ;;  %v6446_v62 = vmax.f32 %v879_v5, %v6384_v35 }
  0x63   : > { %258 = vst [vmem:[#allocation2 + $0x1f0] sm:$0xff] %v9696_v6  ;;  %v426_v7 = vld [vmem:[#allocation2 + $0x1a8] sm:$0xff]  ;;  %v427_v3 = vld [vmem:[#allocation2 + $0x1b0] sm:$0xff]  ;;  %v6449_v57 = vmax.f32 %v880_v50, %v6386_v36  ;;  %v6451_v28 = vmax.f32 %v882_v1, %v417_v46  ;;  %v6453_v11 = vmax.f32 %v883_v14, %v418_v18  ;;  %v6456_v17 = vmax.f32 %v884_v49, %v419_v19 }
  0x64   : > { %259 = vst [vmem:[#allocation2 + $0x1f8] sm:$0xf] %v9696_v6  ;;  %v895_v15 = vmax.f32 %v799_v9, %v426_v7  ;;  %v896_v27 = vmax.f32 %v800_v8, %v427_v3  ;;  %v429_v34 = vld [vmem:[#allocation2 + $0x1c0] sm:$0xff]  ;;  %v6442_v8 = vmax.f32 %v878_v48, %v6374_v25  ;;  %v6458_v25 = vmax.f32 %v886_v52, %v421_v16 }
  0x65   : > { %260 = vst [vmem:[#allocation2 + $0x200] sm:$0xff] %v9696_v6  ;;  %v6460_v48 = vmax.f32 %v887_v12, %v422_v22  ;;  %v6462_v38 = vmax.f32 %v888_v58, %v423_v21  ;;  %v6465_v35 = vmax.f32 %v890_v23, %v425_v47  ;;  %v6467_v36 = vmax.f32 %v891_v40, %v426_v7 }
  0x66   : > { %261 = vst [vmem:[#allocation2 + $0x208] sm:$0xff] %v9696_v6  ;;  %v6469_v46 = vmax.f32 %v892_v33, %v427_v3  ;;  %v6471_v14 = vmax.f32 %v894_v0, %v429_v34  ;;  %v1157_v12 = vrot.slane %v6334_v26, 1  ;;  %v1158_v58 = vrot.slane %v6337_v30, 1 }
  0x67   : > { %262 = vst [vmem:[#allocation2 + $0x210] sm:$0xff] %v9696_v6  ;;  %v430_v9 = vld [vmem:[#allocation2 + $0x1c8] sm:$0xff]  ;;  %v431_v59 = vld [vmem:[#allocation2 + $0x1d0] sm:$0xff]  ;;  %v1160_v21 = vrot.slane %v6339_v32, 1  ;;  %v1164_v40 = vrot.slane %v6343_v37, 1  ;;  %v1165_v7 = vrot.slane %v6347_v44, 1 }
  0x68   : > { %263 = vst [vmem:[#allocation2 + $0x218] sm:$0xf] %v9696_v6  ;;  %v6474_v19 = vmax.f32 %v895_v15, %v430_v9  ;;  %v6476_v16 = vmax.f32 %v896_v27, %v431_v59  ;;  %v1167_v0 = vrot.slane %v6350_v45, 1  ;;  %v6487_v22 = vsel %vm1142_vm0, %v1157_v12, %v1158_v58 }
  0x69   : > { %9904 = vst [vmem:[#allocation26_spill] sm:$0xff] %v6431_v39  ;;  %v1171_v18 = vrot.slane %v6372_v24, 1  ;;  %v1172_v5 = vrot.slane %v6394_v41, 1  ;;  %v1174_v50 = vrot.slane %v6397_v42, 1  ;;  %v6494_v1 = vsel %vm1142_vm0, %v1158_v58, %v1160_v21 }
  0x6a   : > { %9905 = vst [vmem:[#allocation27_spill] sm:$0xff] %v6435_v63  ;;  %v9922_v49 = vrot.slane %v6273_v51, 1  ;;  %v6502_v47 = vsel %vm1142_vm0, %v1164_v40, %v1165_v7  ;;  %v6505_v3 = vsel %vm1142_vm0, %v1165_v7, %v1167_v0  ;;  %v9923_v23 = vrot.slane %v6277_v53, 1 }
  0x6b   : > { %9906 = vst [vmem:[#allocation28_spill] sm:$0xff] %v6439_v10  ;;  %v6514_v15 = vsel %vm1142_vm0, %v1171_v18, %v1172_v5  ;;  %v6517_v27 = vsel %vm1142_vm0, %v1172_v5, %v1174_v50  ;;  %v9924_v34 = vrot.slane %v6280_v54, 1  ;;  %v1178_v59 = vrot.slane %v6431_v39, 1 }
  0x6c   : > { %9907 = vst [vmem:[#allocation29_spill] sm:$0xff] %v6442_v8  ;;  %v6499_v52 = vsel %vm1142_vm0, %v1160_v21, %v9922_v49  ;;  %v6511_v33 = vsel %vm1142_vm0, %v1167_v0, %v9923_v23  ;;  %v1179_v12 = vrot.slane %v6435_v63, 1  ;;  %v1181_v58 = vrot.slane %v6439_v10, 1 }
  0x6d   : > { %264 = vst [vmem:[#allocation2 + $0x220] sm:$0xff] %v9696_v6  ;;  %v6522_v9 = vsel %vm1142_vm0, %v1174_v50, %v9924_v34  ;;  %v1185_v21 = vrot.slane %v6442_v8, 1  ;;  %v1186_v40 = vrot.slane %v6446_v62, 1  ;;  %v1188_v7 = vrot.slane %v6449_v57, 1 }
  0x6e   : > { %9908 = vst [vmem:[#allocation30_spill] sm:$0xff] %v6446_v62  ;;  %v1192_v0 = vrot.slane %v6451_v28, 1  ;;  %v1193_v18 = vrot.slane %v6453_v11, 1  ;;  %v6536_v5 = vsel %vm1142_vm0, %v1178_v59, %v1179_v12  ;;  %v6539_v50 = vsel %vm1142_vm0, %v1179_v12, %v1181_v58 }
  0x6f   : > { %9909 = vst [vmem:[#allocation31_spill] sm:$0xff] %v6449_v57  ;;  %v9926_v49 = vrot.slane %v6282_v55, 1  ;;  %v1195_v34 = vrot.slane %v6456_v17, 1  ;;  %v6549_v20 = vsel %vm1142_vm0, %v1185_v21, %v1186_v40  ;;  %v9930_v59 = vrot.slane %v6284_v56, 1 }
  0x70   : > { %9910 = vst [vmem:[#allocation32_spill] sm:$0xff] %v6451_v28 }
  0x71   : > { %9911 = vst [vmem:[#allocation33_spill] sm:$0xff] %v6453_v11  ;;  %v6544_v23 = vsel %vm1142_vm0, %v1181_v58, %v9926_v49  ;;  %v6557_v12 = vsel %vm1142_vm0, %v1188_v7, %v9930_v59  ;;  %v6564_v58 = vsel %vm1142_vm0, %v1193_v18, %v1195_v34  ;;  %v9934_v49 = vrot.slane %v6290_v60, 1 }
  0x72   : > { %265 = vst [vmem:[#allocation2 + $0x228] sm:$0xff] %v9696_v6 }
  0x73   : > { %9912 = vst [vmem:[#allocation34_spill] sm:$0xff] %v6456_v17  ;;  %v6569_v21 = vsel %vm1142_vm0, %v1195_v34, %v9934_v49  ;;  %v1473_v49 = vrot.slane %v6339_v32, 2 }
  0x74   : > { %9913 = vst [vmem:[#allocation35_spill] sm:$0xff] %v6458_v25 }
  0x75   : > { %9914 = vst [vmem:[#allocation36_spill] sm:$0xff] %v6460_v48 }
  0x76   : > { %9915 = vst [vmem:[#allocation37_spill] sm:$0xff] %v6462_v38 }
  0x77   : > { %266 = vst [vmem:[#allocation2 + $0x230] sm:$0xff] %v9696_v6 }
  0x78   : > { %9916 = vst [vmem:[#allocation38_spill] sm:$0xff] %v6465_v35  ;;  %v1475_v35 = vrot.slane %v6273_v51, 2  ;;  %v1480_v51 = vrot.slane %v6350_v45, 2 }
  0x79   : > { %9917 = vst [vmem:[#allocation39_spill] sm:$0xff] %v6467_v36  ;;  %v1471_v36 = vrot.slane %v6337_v30, 2 }
  0x7a   : > { %9918 = vst [vmem:[#allocation40_spill] sm:$0xff] %v6469_v46 }
  0x7b   : > { %9919 = vst [vmem:[#allocation41_spill] sm:$0xff] %v6471_v14  ;;  %v1200_v14 = vrot.slane %v6460_v48, 1 }
  0x7c   : > { %267 = vst [vmem:[#allocation2 + $0x238] sm:$0xf] %v9696_v6 }
  0x7d   : > { %9920 = vst [vmem:[#allocation42_spill] sm:$0xff] %v6474_v19  ;;  %v6560_v19 = vsel %vm1142_vm0, %v1192_v0, %v1193_v18  ;;  %v1204_v0 = vrot.slane %v6309_v4, 1 }
  0x7e   : > { %9921 = vst [vmem:[#allocation43_spill] sm:$0xff] %v6476_v16  ;;  %v6552_v16 = vsel %vm1142_vm0, %v1186_v40, %v1188_v7  ;;  %v1199_v40 = vrot.slane %v6458_v25, 1  ;;  %v1202_v7 = vrot.slane %v6462_v38, 1 }
  0x7f   : > { %268 = vst [vmem:[#allocation2 + $0x240] sm:$0xff] %v9696_v6 }
  0x80   : > { %269 = vst [vmem:[#allocation2 + $0x248] sm:$0xff] %v9696_v6  ;;  %v6582_v34 = vsel %vm1142_vm0, %v1199_v40, %v1200_v14  ;;  %v6592_v59 = vsel %vm1142_vm0, %v1200_v14, %v1202_v7  ;;  %v6595_v18 = vsel %vm1142_vm0, %v1202_v7, %v1204_v0  ;;  %v1456_v14 = vrot.slane %v9696_v6, 2 }
  0x81   : > { %270 = vst [vmem:[#allocation2 + $0x250] sm:$0xff] %v9696_v6  ;;  %v1461_v40 = vrot.slane %v6245_v29, 2  ;;  %v1468_v7 = vrot.slane %v6249_v31, 2  ;;  %v1470_v0 = vrot.slane %v6334_v26, 2  ;;  %v1478_v31 = vrot.slane %v6347_v44, 2 }
  0x82   : > { %271 = vst [vmem:[#allocation2 + $0x258] sm:$0xf] %v9696_v6 }
  0x83   : > { %272 = vst [vmem:[#allocation2 + $0x260] sm:$0xff] %v9696_v6  ;;  %v1462_v46 = vsel %vm1455_vm1, %v1456_v14, %v1461_v40  ;;  %v1472_v29 = vsel %vm1455_vm1, %v1470_v0, %v1471_v36  ;;  %v1484_v40 = vrot.slane %v6372_v24, 2  ;;  %v1487_v0 = vrot.slane %v6397_v42, 2 }
  0x84   : > { %273 = vst [vmem:[#allocation2 + $0x268] sm:$0xff] %v9696_v6 }
  0x85   : > { %274 = vst [vmem:[#allocation2 + $0x270] sm:$0xff] %v9696_v6 }
  0x86   : > { %9925 = vst [vmem:[#allocation44_spill] sm:$0xff] %v6539_v50 }
  0x87   : > { %9927 = vst [vmem:[#allocation45_spill] sm:$0xff] %v6544_v23  ;;  %v1503_v23 = vrot.slane %v6284_v56, 2 }
  0x88   : > { %275 = vst [vmem:[#allocation2 + $0x278] sm:$0xf] %v9696_v6 }
  0x89   : > { %9928 = vst [vmem:[#allocation46_spill] sm:$0xff] %v6549_v20 }
  0x8a   : > { %9929 = vst [vmem:[#allocation47_spill] sm:$0xff] %v6552_v16  ;;  %v1494_v16 = vrot.slane %v6439_v10, 2 }
  0x8b   : > { %9931 = vst [vmem:[#allocation48_spill] sm:$0xff] %v6557_v12 }
  0x8c   : > { %9932 = vst [vmem:[#allocation49_spill] sm:$0xff] %v6560_v19  ;;  %v1481_v19 = vsel %vm1455_vm1, %v1478_v31, %v1480_v51 }
  0x8d   : > { %276 = vst [vmem:[#allocation2 + $0x280] sm:$0xff] %v9696_v6 }
  0x8e   : > { %9933 = vst [vmem:[#allocation50_spill] sm:$0xff] %v6564_v58  ;;  %v1479_v58 = vsel %vm1455_vm1, %v1477_v13, %v1478_v31  ;;  %v1492_v13 = vrot.slane %v6435_v63, 2  ;;  %v1496_v31 = vrot.slane %v6282_v55, 2 }
  0x8f   : > { %9935 = vst [vmem:[#allocation51_spill] sm:$0xff] %v6569_v21  ;;  %v1482_v21 = vrot.slane %v6277_v53, 2 }
  0x90   : > { %277 = vst [vmem:[#allocation2 + $0x288] sm:$0xff] %v9696_v6  ;;  %v1497_v10 = vsel %vm1455_vm1, %v1494_v16, %v1496_v31  ;;  %v1513_v31 = vrot.slane %v6460_v48, 2 }
  0x91   : > { %278 = vst [vmem:[#allocation2 + $0x290] sm:$0xff] %v9696_v6  ;;  %v1483_v12 = vsel %vm1455_vm1, %v1480_v51, %v1482_v21  ;;  %v1498_v51 = vrot.slane %v6442_v8, 2  ;;  %v1499_v21 = vrot.slane %v6446_v62, 2 }
  0x92   : > { %9936 = vst [vmem:[#allocation52_spill] sm:$0xff] %v6582_v34  ;;  %v1476_v34 = vsel %vm1455_vm1, %v1473_v49, %v1475_v35  ;;  %v1491_v35 = vrot.slane %v6431_v39, 2 }
  0x93   : > { %279 = vst [vmem:[#allocation2 + $0x298] sm:$0xf] %v9696_v6  ;;  %v1500_v50 = vsel %vm1455_vm1, %v1498_v51, %v1499_v21  ;;  %v1515_v51 = vrot.slane %v6462_v38, 2  ;;  %v9941_v38 = vmax.f32 %v6305_v2, -3.4028235e+38 }
  0x94   : > { %9937 = vst [vmem:[#allocation53_spill] sm:$0xff] %v6592_v59  ;;  %v6641_v59 = vld [vmem:[#allocation2] sm:$0xff] }
  0x95   : > { %9938 = vst [vmem:[#allocation54_spill] sm:$0xff] %v6595_v18  ;;  %v1474_v18 = vsel %vm1455_vm1, %v1471_v36, %v1473_v49  ;;  %v1489_v36 = vrot.slane %v6280_v54, 2  ;;  %v1493_v54 = vsel %vm1455_vm1, %v1491_v35, %v1492_v13  ;;  %v1508_v35 = vrot.slane %v6456_v17, 2 }
  0x96   : > { %280 = vst [vmem:[#allocation2 + $0x2a0] sm:$0xff] %v9696_v6 }
  0x97   : > { %281 = vst [vmem:[#allocation2 + $0x2a8] sm:$0xff] %v9696_v6  ;;  %v1490_v20 = vsel %vm1455_vm1, %v1487_v0, %v1489_v36  ;;  %v1506_v36 = vrot.slane %v6453_v11, 2 }
  0x98   : > { %282 = vst [vmem:[#allocation2 + $0x2b0] sm:$0xff] %v9696_v6 }
  0x99   : > { %283 = vst [vmem:[#allocation2 + $0x2b8] sm:$0xf] %v9696_v6  ;;  %v1469_v6 = vsel %vm1455_vm1, %v1456_v14, %v1468_v7  ;;  %v1485_v7 = vrot.slane %v6394_v41, 2  ;;  %v1509_v11 = vsel %vm1455_vm1, %v1506_v36, %v1508_v35 }
  0x9a   : > { %287 = vst [vmem:[#allocation2 + $0x2d8] sm:$0xf] %v6641_v59  ;;  %v6701_v48 = vmax.f32 %v9941_v38, %v1469_v6  ;;  %v9945_v6 = vmax.f32 %v6343_v37, %v6502_v47  ;;  %v9949_v47 = vmax.f32 %v6394_v41, %v6517_v27 }
  0x9b   : > { %v1486_v49 = vsel %vm1455_vm1, %v1484_v40, %v1485_v7  ;;  %v1488_v53 = vsel %vm1455_vm1, %v1485_v7, %v1487_v0  ;;  %291 = vst [vmem:[#allocation2 + $0x2f8] sm:$0xf] %v6641_v59  ;;  %v1495_v40 = vsel %vm1455_vm1, %v1492_v13, %v1494_v16  ;;  %v1501_v7 = vrot.slane %v6449_v57, 2 }
  0x9c   : > { %v1505_v0 = vrot.slane %v6451_v28, 2  ;;  %v1510_v13 = vrot.slane %v6290_v60, 2  ;;  %295 = vst [vmem:[#allocation2 + $0x318] sm:$0xf] %v6641_v59  ;;  %v1512_v16 = vrot.slane %v6458_v25, 2  ;;  %v6723_v2 = vmax.f32 %v9945_v6, %v1479_v58 }
  0x9d   : > { %v1502_v55 = vsel %vm1455_vm1, %v1499_v21, %v1501_v7  ;;  %v1504_v62 = vsel %vm1455_vm1, %v1501_v7, %v1503_v23  ;;  %v1517_v23 = vrot.slane %v6309_v4, 2  ;;  %v9939_v7 = vmax.f32 %v6263_v43, -3.4028235e+38  ;;  %299 = vst [vmem:[#allocation2 + $0x338] sm:$0xf] %v6641_v59 }
  0x9e   : > { %v1507_v56 = vsel %vm1455_vm1, %v1505_v0, %v1506_v36  ;;  %v1511_v21 = vsel %vm1455_vm1, %v1508_v35, %v1510_v13  ;;  %v1514_v60 = vsel %vm1455_vm1, %v1512_v16, %v1513_v31  ;;  %v1516_v0 = vsel %vm1455_vm1, %v1513_v31, %v1515_v51  ;;  %v9955_v16 = vld [vmem:[#allocation45_spill] sm:$0xff]  ;;  %v9958_v31 = vld [vmem:[#allocation46_spill] sm:$0xff]  ;;  %303 = vst [vmem:[#allocation2 + $0x358] sm:$0xf] %v6641_v59 }
  0x9f   : > { %v6691_v17 = vmax.f32 %v9939_v7, %v1456_v14  ;;  %v9940_v25 = vmax.f32 %v6294_v61, -3.4028235e+38  ;;  %v1518_v36 = vsel %vm1455_vm1, %v1515_v51, %v1517_v23  ;;  %v9942_v35 = vmax.f32 %v6334_v26, %v6487_v22  ;;  %v9961_v51 = vld [vmem:[#allocation30_spill] sm:$0xff]  ;;  %v9962_v23 = vld [vmem:[#allocation47_spill] sm:$0xff]  ;;  %v9965_v7 = vld [vmem:[#allocation48_spill] sm:$0xff] }
  0xa0   : > { %v9943_v14 = vmax.f32 %v6337_v30, %v6494_v1  ;;  %v9944_v61 = vmax.f32 %v6339_v32, %v6499_v52  ;;  %v9948_v1 = vmax.f32 %v6372_v24, %v6514_v15  ;;  %v6743_v58 = vmax.f32 %v9949_v47, %v1488_v53  ;;  %v9976_v47 = vld [vmem:[#allocation34_spill] sm:$0xff]  ;;  %307 = vst [vmem:[#allocation2 + $0x378] sm:$0xf] %v6641_v59 }
  0xa1   : > { %v6697_v28 = vmax.f32 %v9940_v25, %v1462_v46  ;;  %v6707_v43 = vmax.f32 %v9942_v35, %v1472_v29  ;;  %v9946_v29 = vmax.f32 %v6347_v44, %v6505_v3  ;;  %v9947_v46 = vmax.f32 %v6350_v45, %v6511_v33 }
  0xa2   : > { %v6712_v13 = vmax.f32 %v9943_v14, %v1474_v18  ;;  %v6717_v25 = vmax.f32 %v9944_v61, %v1476_v34  ;;  %v6738_v52 = vmax.f32 %v9948_v1, %v1486_v49  ;;  %v9950_v3 = vmax.f32 %v6397_v42, %v6522_v9  ;;  %v9952_v18 = vld [vmem:[#allocation44_spill] sm:$0xff]  ;;  %v9969_v61 = vld [vmem:[#allocation49_spill] sm:$0xff] }
  0xa3   : > { %v6728_v38 = vmax.f32 %v9946_v29, %v1481_v19  ;;  %v6733_v22 = vmax.f32 %v9947_v46, %v1483_v12  ;;  %v9951_v33 = vmax.f32 %v6431_v39, %v6536_v5  ;;  %v9953_v15 = vmax.f32 %v6435_v63, %v9952_v18  ;;  %v9954_v49 = vld [vmem:[#allocation28_spill] sm:$0xff]  ;;  %v9972_v29 = vld [vmem:[#allocation33_spill] sm:$0xff]  ;;  %v9973_v46 = vld [vmem:[#allocation50_spill] sm:$0xff] }
  0xa4   : > { %v6748_v19 = vmax.f32 %v9950_v3, %v1490_v20  ;;  %v9956_v27 = vmax.f32 %v9954_v49, %v9955_v16  ;;  %v9959_v9 = vmax.f32 %v6442_v8, %v9958_v31  ;;  %v9963_v5 = vmax.f32 %v9961_v51, %v9962_v23  ;;  %v9968_v14 = vld [vmem:[#allocation32_spill] sm:$0xff]  ;;  %v9977_v3 = vld [vmem:[#allocation51_spill] sm:$0xff]  ;;  %v9988_v23 = vld [vmem:[#allocation37_spill] sm:$0xff] }
  0xa5   : > { %v6753_v12 = vmax.f32 %v9951_v33, %v1493_v54  ;;  %v6758_v34 = vmax.f32 %v9953_v15, %v1495_v40  ;;  %v9966_v35 = vmax.f32 %v6449_v57, %v9965_v7  ;;  %v9970_v6 = vmax.f32 %v9968_v14, %v9969_v61  ;;  %v9980_v18 = vld [vmem:[#allocation35_spill] sm:$0xff]  ;;  %v9981_v15 = vld [vmem:[#allocation52_spill] sm:$0xff] }
  0xa6   : > { %v6763_v53 = vmax.f32 %v9956_v27, %v1497_v10  ;;  %v6768_v20 = vmax.f32 %v9959_v9, %v1500_v50  ;;  %v6773_v54 = vmax.f32 %v9963_v5, %v1502_v55  ;;  %v9974_v1 = vmax.f32 %v9972_v29, %v9973_v46  ;;  %v9984_v27 = vld [vmem:[#allocation36_spill] sm:$0xff]  ;;  %v9993_v61 = vld [vmem:[#allocation3_spill] sm:$0xff] }
  0xa7   : > { %v6778_v40 = vmax.f32 %v9966_v35, %v1504_v62  ;;  %v6783_v10 = vmax.f32 %v9970_v6, %v1507_v56  ;;  %v9978_v33 = vmax.f32 %v9976_v47, %v9977_v3  ;;  %v9982_v16 = vmax.f32 %v9980_v18, %v9981_v15  ;;  %v9985_v56 = vld [vmem:[#allocation53_spill] sm:$0xff] }
  0xa8   : > { %9957 = vst [vmem:[#allocation44_spill] sm:$0xff] %v6763_v53  ;;  %v6788_v50 = vmax.f32 %v9974_v1, %v1509_v11  ;;  %v9986_v31 = vmax.f32 %v9984_v27, %v9985_v56  ;;  %v9989_v11 = vld [vmem:[#allocation54_spill] sm:$0xff]  ;;  %v1774_v6 = vrot.slane %v9993_v61, 3  ;;  %v1783_v1 = vrot.slane %v6334_v26, 3  ;;  %v10031_v53 = vld [vmem:[#allocation32_spill] sm:$0xff] }
  0xa9   : > { %9960 = vst [vmem:[#allocation45_spill] sm:$0xff] %v6768_v20  ;;  %v6793_v55 = vmax.f32 %v9978_v33, %v1511_v21  ;;  %v6798_v62 = vmax.f32 %v9982_v16, %v1514_v60  ;;  %v9990_v5 = vmax.f32 %v9988_v23, %v9989_v11  ;;  %v9992_v21 = vmov -3.4028235e+38   ;;  %v9994_v60 = vld [vmem:[#allocation4_spill] sm:$0xff]  ;;  %v9995_v33 = vld [vmem:[#allocation6_spill] sm:$0xff] }
  0xaa   : > { %9964 = vst [vmem:[#allocation46_spill] sm:$0xff] %v6773_v54  ;;  %v6804_v9 = vmax.f32 %v9986_v31, %v1516_v0  ;;  %v6812_v35 = vrot.slane %v9992_v21, 3  ;;  %v1781_v46 = vrot.slane %v9994_v60, 3  ;;  %v1784_v3 = vrot.slane %v6337_v30, 3  ;;  %v10026_v54 = vld [vmem:[#allocation28_spill] sm:$0xff]  ;;  %v10028_v20 = vld [vmem:[#allocation30_spill] sm:$0xff] }
  0xab   : > { %9967 = vst [vmem:[#allocation47_spill] sm:$0xff] %v6778_v40  ;;  %v6809_v7 = vmax.f32 %v9990_v5, %v1518_v36  ;;  %v1786_v0 = vrot.slane %v6339_v32, 3  ;;  %v1788_v15 = vrot.slane %v9995_v33, 3  ;;  %v1790_v16 = vrot.slane %v6343_v37, 3  ;;  %v9996_v33 = vld [vmem:[#allocation7_spill] sm:$0xff]  ;;  %v10023_v40 = vld [vmem:[#allocation8_spill] sm:$0xff] }
  0xac   : > { %9971 = vst [vmem:[#allocation48_spill] sm:$0xff] %v6783_v10  ;;  %v6823_v36 = vsel %vm1768_vm2, %v6812_v35, %v1774_v6  ;;  %v6827_v56 = vsel %vm1768_vm2, %v6812_v35, %v1781_v46  ;;  %v6830_v31 = vsel %vm1768_vm2, %v1783_v1, %v1784_v3  ;;  %v1791_v11 = vrot.slane %v6347_v44, 3  ;;  %v10021_v10 = vld [vmem:[#allocation24_spill] sm:$0xff] }
  0xad   : > { %9975 = vst [vmem:[#allocation49_spill] sm:$0xff] %v6788_v50  ;;  %v6835_v5 = vsel %vm1768_vm2, %v1784_v3, %v1786_v0  ;;  %v6838_v37 = vsel %vm1768_vm2, %v1786_v0, %v1788_v15  ;;  %v1793_v6 = vrot.slane %v6350_v45, 3  ;;  %v1795_v32 = vrot.slane %v9996_v33, 3  ;;  %v9997_v0 = vld [vmem:[#allocation8_spill] sm:$0xff]  ;;  %v10013_v50 = vld [vmem:[#allocation18_spill] sm:$0xff] }
  0xae   : > { %9979 = vst [vmem:[#allocation50_spill] sm:$0xff] %v6793_v55  ;;  %v6843_v46 = vsel %vm1768_vm2, %v1790_v16, %v1791_v11  ;;  %v1797_v1 = vrot.slane %v6372_v24, 3  ;;  %v1798_v30 = vrot.slane %v6394_v41, 3  ;;  %v1800_v44 = vrot.slane %v6397_v42, 3  ;;  %v9998_v24 = vld [vmem:[#allocation9_spill] sm:$0xff] }
  0xaf   : > { %9983 = vst [vmem:[#allocation34_spill] sm:$0xff] %v6798_v62  ;;  %v6849_v59 = vsel %vm1768_vm2, %v1791_v11, %v1793_v6  ;;  %v6852_v3 = vsel %vm1768_vm2, %v1793_v6, %v1795_v32  ;;  %v1802_v15 = vrot.slane %v9997_v0, 3  ;;  %v1804_v45 = vrot.slane %v6431_v39, 3  ;;  %v10016_v62 = vld [vmem:[#allocation20_spill] sm:$0xff] }
  0xb0   : > { %9987 = vst [vmem:[#allocation51_spill] sm:$0xff] %v6804_v9  ;;  %v6857_v33 = vsel %vm1768_vm2, %v1797_v1, %v1798_v30  ;;  %v6860_v16 = vsel %vm1768_vm2, %v1798_v30, %v1800_v44  ;;  %v1805_v41 = vrot.slane %v6435_v63, 3  ;;  %v1807_v42 = vrot.slane %v9954_v49, 3  ;;  %v10000_v63 = vld [vmem:[#allocation10_spill] sm:$0xff]  ;;  %v10019_v9 = vld [vmem:[#allocation7_spill] sm:$0xff] }
  0xb1   : > { %9991 = vst [vmem:[#allocation52_spill] sm:$0xff] %v6809_v7  ;;  %v6865_v11 = vsel %vm1768_vm2, %v1800_v44, %v1802_v15  ;;  %v1809_v32 = vrot.slane %v9998_v24, 3  ;;  %v1811_v6 = vrot.slane %v6442_v8, 3  ;;  %v1812_v0 = vrot.slane %v9961_v51, 3  ;;  %v10005_v8 = vld [vmem:[#allocation12_spill] sm:$0xff]  ;;  %v10018_v7 = vld [vmem:[#allocation22_spill] sm:$0xff] }
  0xb2   : > { %v6871_v39 = vsel %vm1768_vm2, %v1804_v45, %v1805_v41  ;;  %v6874_v1 = vsel %vm1768_vm2, %v1805_v41, %v1807_v42  ;;  %v1814_v30 = vrot.slane %v6449_v57, 3  ;;  %v1816_v26 = vrot.slane %v10000_v63, 3 }
  0xb3   : > { %9999 = vst [vmem:[#allocation36_spill] sm:$0xff] %v6874_v1  ;;  %v6879_v49 = vsel %vm1768_vm2, %v1807_v42, %v1809_v32  ;;  %v6882_v44 = vsel %vm1768_vm2, %v1811_v6, %v1812_v0  ;;  %v1818_v15 = vrot.slane %v9968_v14, 3  ;;  %v1819_v51 = vrot.slane %v9972_v29, 3  ;;  %v10033_v1 = vld [vmem:[#allocation35_spill] sm:$0xff] }
  0xb4   : > { %10001 = vst [vmem:[#allocation53_spill] sm:$0xff] %v6879_v49  ;;  %v6887_v45 = vsel %vm1768_vm2, %v1812_v0, %v1814_v30  ;;  %v6890_v41 = vsel %vm1768_vm2, %v1814_v30, %v1816_v26  ;;  %v1821_v57 = vrot.slane %v9976_v47, 3  ;;  %v1823_v63 = vrot.slane %v10005_v8, 3  ;;  %v10030_v49 = vld [vmem:[#allocation10_spill] sm:$0xff] }
  0xb5   : > { %10002 = vst [vmem:[#allocation54_spill] sm:$0xff] %v6882_v44  ;;  %v6895_v42 = vsel %vm1768_vm2, %v1818_v15, %v1819_v51  ;;  %v1825_v32 = vrot.slane %v9980_v18, 3  ;;  %v1826_v6 = vrot.slane %v9984_v27, 3  ;;  %v1828_v14 = vrot.slane %v9988_v23, 3  ;;  %v10015_v23 = vld [vmem:[#allocation6_spill] sm:$0xff]  ;;  %v10027_v44 = vld [vmem:[#allocation29_spill] sm:$0xff] }
  0xb6   : > { %10003 = vst [vmem:[#allocation3_spill] sm:$0xff] %v6887_v45  ;;  %v6901_v29 = vsel %vm1768_vm2, %v1819_v51, %v1821_v57  ;;  %v6904_v0 = vsel %vm1768_vm2, %v1821_v57, %v1823_v63  ;;  %v1830_v26 = vrot.slane %v6309_v4, 3  ;;  %v2087_v30 = vrot.slane %v9993_v61, 4  ;;  %v10024_v45 = vld [vmem:[#allocation26_spill] sm:$0xff] }
  0xb7   : > { %10004 = vst [vmem:[#allocation4_spill] sm:$0xff] %v6890_v41  ;;  %v6910_v15 = vsel %vm1768_vm2, %v1825_v32, %v1826_v6  ;;  %v6913_v18 = vsel %vm1768_vm2, %v1826_v6, %v1828_v14  ;;  %v2094_v57 = vrot.slane %v9994_v60, 4  ;;  %v10012_v32 = vld [vmem:[#allocation17_spill] sm:$0xff]  ;;  %v2097_v6 = vrot.slane %v10013_v50, 4 }
  0xb8   : > { %10006 = vst [vmem:[#allocation9_spill] sm:$0xff] %v6895_v42  ;;  %v6920_v63 = vsel %vm1768_vm2, %v1828_v14, %v1830_v26  ;;  %v2082_v26 = vrot.slane %v9992_v21, 4  ;;  %v2103_v51 = vrot.slane %v10016_v62, 4  ;;  %v2106_v50 = vrot.slane %v10018_v7, 4  ;;  %v10020_v42 = vld [vmem:[#allocation23_spill] sm:$0xff]  ;;  %v10022_v41 = vld [vmem:[#allocation25_spill] sm:$0xff] }
  0xb9   : > { %10007 = vst [vmem:[#allocation12_spill] sm:$0xff] %v6901_v29  ;;  %v2096_v29 = vrot.slane %v10012_v32, 4  ;;  %v2110_v62 = vrot.slane %v10020_v42, 4  ;;  %v2120_v42 = vrot.slane %v10026_v54, 4 }
  0xba   : > { %10008 = vst [vmem:[#allocation55_spill] sm:$0xff] %v6904_v0  ;;  %v10014_v0 = vld [vmem:[#allocation19_spill] sm:$0xff]  ;;  %v2095_v14 = vsel %vm2081_vm3, %v2082_v26, %v2094_v57  ;;  %v2113_v57 = vrot.slane %v10022_v41, 4  ;;  %v2122_v41 = vrot.slane %v9998_v24, 4 }
  0xbb   : > { %10009 = vst [vmem:[#allocation56_spill] sm:$0xff] %v6910_v15  ;;  %v2099_v55 = vrot.slane %v10014_v0, 4  ;;  %v2101_v15 = vrot.slane %v10015_v23, 4  ;;  %v2098_v21 = vsel %vm2081_vm3, %v2096_v29, %v2097_v6  ;;  %v2108_v0 = vrot.slane %v10019_v9, 4 }
  0xbc   : > { %10010 = vst [vmem:[#allocation57_spill] sm:$0xff] %v6913_v18  ;;  %v2088_v18 = vsel %vm2081_vm3, %v2082_v26, %v2087_v30  ;;  %v2111_v30 = vrot.slane %v10021_v10, 4 }
  0xbd   : > { %10011 = vst [vmem:[#allocation58_spill] sm:$0xff] %v6920_v63  ;;  %v10017_v63 = vld [vmem:[#allocation21_spill] sm:$0xff]  ;;  %v2100_v60 = vsel %vm2081_vm3, %v2097_v6, %v2099_v55  ;;  %v2102_v32 = vsel %vm2081_vm3, %v2099_v55, %v2101_v15  ;;  %v2115_v6 = vrot.slane %v10023_v40, 4  ;;  %v2117_v55 = vrot.slane %v10024_v45, 4  ;;  %v10025_v15 = vld [vmem:[#allocation27_spill] sm:$0xff] }
  0xbe   : > { %v2104_v61 = vrot.slane %v10017_v63, 4  ;;  %v2109_v63 = vsel %vm2081_vm3, %v2106_v50, %v2108_v0  ;;  %v2112_v7 = vsel %vm2081_vm3, %v2110_v62, %v2111_v30  ;;  %v2114_v9 = vsel %vm2081_vm3, %v2111_v30, %v2113_v57  ;;  %v10029_v0 = vld [vmem:[#allocation31_spill] sm:$0xff] }
  0xbf   : > { %v2116_v10 = vsel %vm2081_vm3, %v2113_v57, %v2115_v6  ;;  %v2127_v62 = vrot.slane %v10029_v0, 4  ;;  %v2129_v30 = vrot.slane %v10030_v49, 4  ;;  %v2131_v57 = vrot.slane %v10031_v53, 4  ;;  %v10032_v6 = vld [vmem:[#allocation33_spill] sm:$0xff] }
  0xc0   : > { %v2105_v23 = vsel %vm2081_vm3, %v2103_v51, %v2104_v61  ;;  %v2107_v29 = vsel %vm2081_vm3, %v2104_v61, %v2106_v50  ;;  %v2118_v51 = vrot.slane %v10025_v15, 4  ;;  %v2124_v61 = vrot.slane %v10027_v44, 4 }
  0xc1   : > { %v2125_v50 = vrot.slane %v10028_v20, 4  ;;  %v2123_v15 = vsel %vm2081_vm3, %v2120_v42, %v2122_v41  ;;  %v2132_v24 = vrot.slane %v10032_v6, 4  ;;  %v2130_v20 = vsel %vm2081_vm3, %v2127_v62, %v2129_v30  ;;  %v10034_v41 = vld [vmem:[#allocation37_spill] sm:$0xff] }
  0xc2   : > { %v2119_v40 = vsel %vm2081_vm3, %v2117_v55, %v2118_v51  ;;  %v2121_v45 = vsel %vm2081_vm3, %v2118_v51, %v2120_v42  ;;  %v2134_v55 = vrot.slane %v9976_v47, 4  ;;  %v2136_v51 = vrot.slane %v10005_v8, 4 }
  0xc3   : > { %v2126_v54 = vsel %vm2081_vm3, %v2124_v61, %v2125_v50  ;;  %v2128_v44 = vsel %vm2081_vm3, %v2125_v50, %v2127_v62  ;;  %v2133_v0 = vsel %vm2081_vm3, %v2131_v57, %v2132_v24  ;;  %v2138_v49 = vrot.slane %v10033_v1, 4 }
  0xc4   : > { %v2139_v42 = vrot.slane %v9984_v27, 4  ;;  %v2141_v61 = vrot.slane %v10034_v41, 4  ;;  %v2135_v53 = vsel %vm2081_vm3, %v2132_v24, %v2134_v55  ;;  %v2137_v6 = vsel %vm2081_vm3, %v2134_v55, %v2136_v51  ;;  %v10068_v41 = vld [vmem:[#allocation50_spill] sm:$0xff] }
  0xc5   : > { %v2143_v50 = vrot.slane %v6309_v4, 4  ;;  %v10035_v62 = vmax.f32 %v6691_v17, %v6812_v35  ;;  %v10036_v1 = vmax.f32 %v6697_v28, %v6823_v36  ;;  %v10037_v57 = vmax.f32 %v6701_v48, %v6827_v56 }
  0xc6   : > { %v2140_v8 = vsel %vm2081_vm3, %v2138_v49, %v2139_v42  ;;  %v2142_v30 = vsel %vm2081_vm3, %v2139_v42, %v2141_v61  ;;  %v10038_v4 = vmax.f32 %v6707_v43, %v6830_v31  ;;  %v10039_v17 = vmax.f32 %v6712_v13, %v6835_v5 }
  0xc7   : > { %v2322_v47 = vmax.f32 %v10035_v62, %v2082_v26  ;;  %v2324_v27 = vmax.f32 %v10036_v1, %v2088_v18  ;;  %v2327_v24 = vmax.f32 %v10037_v57, %v2095_v14  ;;  %v2144_v55 = vsel %vm2081_vm3, %v2141_v61, %v2143_v50  ;;  %v10053_v14 = vld [vmem:[#allocation45_spill] sm:$0xff]  ;;  %v10069_v61 = vld [vmem:[#allocation55_spill] sm:$0xff]  ;;  %v10071_v62 = vld [vmem:[#allocation34_spill] sm:$0xff] }
  0xc8   : > { %v2328_v51 = vmax.f32 %v10038_v4, %v2098_v21  ;;  %v2329_v35 = vmax.f32 %v10039_v17, %v2100_v60  ;;  %v10040_v26 = vmax.f32 %v6717_v25, %v6838_v37  ;;  %v10041_v28 = vmax.f32 %v6723_v2, %v6843_v46  ;;  %v10048_v46 = vld [vmem:[#allocation36_spill] sm:$0xff]  ;;  %v10054_v21 = vld [vmem:[#allocation54_spill] sm:$0xff]  ;;  %v10074_v4 = vld [vmem:[#allocation51_spill] sm:$0xff] }
  0xc9   : > { %v10042_v48 = vmax.f32 %v6728_v38, %v6849_v59  ;;  %v10043_v43 = vmax.f32 %v6733_v22, %v6852_v3  ;;  %v10044_v13 = vmax.f32 %v6738_v52, %v6857_v33  ;;  %v10045_v37 = vmax.f32 %v6743_v58, %v6860_v16  ;;  %v10050_v59 = vld [vmem:[#allocation44_spill] sm:$0xff]  ;;  %v10051_v3 = vld [vmem:[#allocation53_spill] sm:$0xff]  ;;  %v10056_v60 = vld [vmem:[#allocation46_spill] sm:$0xff] }
  0xca   : > { %v2330_v49 = vmax.f32 %v10040_v26, %v2102_v32  ;;  %v2331_v18 = vmax.f32 %v10041_v28, %v2105_v23  ;;  %v10046_v2 = vmax.f32 %v6748_v19, %v6865_v11  ;;  %v10047_v38 = vmax.f32 %v6753_v12, %v6871_v39  ;;  %v10057_v32 = vld [vmem:[#allocation3_spill] sm:$0xff]  ;;  %v10072_v1 = vld [vmem:[#allocation56_spill] sm:$0xff]  ;;  %v10075_v17 = vld [vmem:[#allocation57_spill] sm:$0xff] }
  0xcb   : > { %v2332_v36 = vmax.f32 %v10042_v48, %v2107_v29  ;;  %v2333_v56 = vmax.f32 %v10043_v43, %v2109_v63  ;;  %v7048_v31 = vmax.f32 %v10044_v13, %v2112_v7  ;;  %v7053_v25 = vmax.f32 %v10045_v37, %v2114_v9  ;;  %v10059_v23 = vld [vmem:[#allocation47_spill] sm:$0xff]  ;;  %v10060_v29 = vld [vmem:[#allocation4_spill] sm:$0xff]  ;;  %v10063_v9 = vld [vmem:[#allocation9_spill] sm:$0xff] }
  0xcc   : > { %v7058_v5 = vmax.f32 %v10046_v2, %v2116_v10  ;;  %v7063_v22 = vmax.f32 %v10047_v38, %v2119_v40  ;;  %v10049_v52 = vmax.f32 %v6758_v34, %v10048_v46  ;;  %v10052_v58 = vmax.f32 %v10050_v59, %v10051_v3  ;;  %v10062_v7 = vld [vmem:[#allocation48_spill] sm:$0xff]  ;;  %v10078_v48 = vld [vmem:[#allocation58_spill] sm:$0xff] }
  0xcd   : > { %v10055_v19 = vmax.f32 %v10053_v14, %v10054_v21  ;;  %v10058_v39 = vmax.f32 %v10056_v60, %v10057_v32  ;;  %v10061_v34 = vmax.f32 %v10059_v23, %v10060_v29  ;;  %v10064_v10 = vmax.f32 %v10062_v7, %v10063_v9  ;;  %v10077_v28 = vld [vmem:[#allocation52_spill] sm:$0xff] }
  0xce   : > { %v7068_v33 = vmax.f32 %v10049_v52, %v2121_v45  ;;  %v7073_v16 = vmax.f32 %v10052_v58, %v2123_v15  ;;  %v10065_v45 = vld [vmem:[#allocation49_spill] sm:$0xff]  ;;  %v10066_v15 = vld [vmem:[#allocation12_spill] sm:$0xff]  ;;  %v10070_v50 = vmax.f32 %v10068_v41, %v10069_v61  ;;  %v10073_v57 = vmax.f32 %v10071_v62, %v10072_v1 }
  0xcf   : > { %v7078_v11 = vmax.f32 %v10055_v19, %v2126_v54  ;;  %v7083_v12 = vmax.f32 %v10058_v39, %v2128_v44  ;;  %v7088_v63 = vmax.f32 %v10061_v34, %v2130_v20  ;;  %v7093_v40 = vmax.f32 %v10064_v10, %v2133_v0 }
  0xd0   : > { %v10067_v42 = vmax.f32 %v10065_v45, %v10066_v15  ;;  %v7103_v44 = vmax.f32 %v10070_v50, %v2137_v6  ;;  %v7108_v20 = vmax.f32 %v10073_v57, %v2140_v8  ;;  %v10076_v26 = vmax.f32 %v10074_v4, %v10075_v17 }
  0xd1   : > { %v10079_v43 = vmax.f32 %v10077_v28, %v10078_v48  ;;  %v2799_v13 = vmax.f32 %v2324_v27, %v2327_v24  ;;  %v2800_v37 = vmax.f32 %v2322_v47, %v2328_v51  ;;  %v2801_v2 = vmax.f32 %v2322_v47, %v2329_v35 }
  0xd2   : > { %v7098_v54 = vmax.f32 %v10067_v42, %v2135_v53  ;;  %v7113_v0 = vmax.f32 %v10076_v26, %v2142_v30  ;;  %v2802_v6 = vmax.f32 %v2327_v24, %v2330_v49  ;;  %v2803_v38 = vmax.f32 %v2328_v51, %v2331_v18 }
  0xd3   : > { %v7118_v53 = vmax.f32 %v10079_v43, %v2144_v55  ;;  %v2804_v46 = vmax.f32 %v2329_v35, %v2332_v36  ;;  %v2805_v52 = vmax.f32 %v2330_v49, %v2333_v56  ;;  %v2806_v8 = vmax.f32 %v2331_v18, %v7048_v31 }
  0xd4   : > { %v2807_v59 = vmax.f32 %v2332_v36, %v7053_v25  ;;  %v2808_v3 = vmax.f32 %v2333_v56, %v7058_v5  ;;  %v2809_v30 = vmax.f32 %v7048_v31, %v7063_v22  ;;  %v2810_v55 = vmax.f32 %v7053_v25, %v7068_v33 }
  0xd5   : > { %v2811_v27 = vmax.f32 %v7058_v5, %v7073_v16  ;;  %v2859_v47 = vmax.f32 %v2799_v13, %v2330_v49  ;;  %v2860_v24 = vmax.f32 %v2800_v37, %v2331_v18  ;;  %v2861_v51 = vmax.f32 %v2801_v2, %v2332_v36 }
  0xd6   : > { %v2862_v35 = vmax.f32 %v2802_v6, %v2333_v56  ;;  %v2863_v58 = vmax.f32 %v2803_v38, %v7048_v31  ;;  %v2864_v14 = vmax.f32 %v2804_v46, %v7053_v25  ;;  %v2865_v21 = vmax.f32 %v2805_v52, %v7058_v5 }
  0xd7   : > { %v2866_v19 = vmax.f32 %v2806_v8, %v7063_v22  ;;  %v2867_v60 = vmax.f32 %v2807_v59, %v7068_v33  ;;  %v2868_v32 = vmax.f32 %v2808_v3, %v7073_v16  ;;  %v2869_v39 = vmax.f32 %v2809_v30, %v7078_v11 }
  0xd8   : > { %v2870_v23 = vmax.f32 %v2810_v55, %v7083_v12  ;;  %v2871_v49 = vmax.f32 %v2811_v27, %v7088_v63  ;;  %v2919_v18 = vmax.f32 %v2859_v47, %v2333_v56  ;;  %v7139_v36 = vmax.f32 %v2860_v24, %v7048_v31 }
  0xd9   : > { %v7142_v29 = vmax.f32 %v2861_v51, %v7053_v25  ;;  %v2922_v34 = vmax.f32 %v2862_v35, %v7058_v5  ;;  %v2923_v7 = vmax.f32 %v2863_v58, %v7063_v22  ;;  %v2924_v9 = vmax.f32 %v2864_v14, %v7068_v33 }
  0xda   : > { %v2925_v10 = vmax.f32 %v2865_v21, %v7073_v16  ;;  %v2926_v45 = vmax.f32 %v2866_v19, %v7078_v11  ;;  %v2927_v15 = vmax.f32 %v2867_v60, %v7083_v12  ;;  %v2928_v56 = vmax.f32 %v2868_v32, %v7088_v63 }
  0xdb   : > { %v2929_v42 = vmax.f32 %v2869_v39, %v7093_v40  ;;  %v2930_v41 = vmax.f32 %v2870_v23, %v7098_v54  ;;  %v2931_v61 = vmax.f32 %v2871_v49, %v7103_v44  ;;  %v7155_v50 = vmax.f32 %v2919_v18, %v7058_v5 }
  0xdc   : > { %v7159_v62 = vmax.f32 %v7139_v36, %v7063_v22  ;;  %v7163_v1 = vmax.f32 %v7142_v29, %v7068_v33  ;;  %v7166_v57 = vmax.f32 %v2922_v34, %v7073_v16  ;;  %v7169_v4 = vmax.f32 %v2923_v7, %v7078_v11 }
  0xdd   : > { %v7172_v17 = vmax.f32 %v2924_v9, %v7083_v12  ;;  %v7175_v26 = vmax.f32 %v2925_v10, %v7088_v63  ;;  %v7178_v28 = vmax.f32 %v2926_v45, %v7093_v40  ;;  %v7181_v48 = vmax.f32 %v2927_v15, %v7098_v54 }
  0xde   : > { %v7184_v43 = vmax.f32 %v2928_v56, %v7103_v44  ;;  %v7187_v13 = vmax.f32 %v2929_v42, %v7108_v20  ;;  %v7190_v37 = vmax.f32 %v2930_v41, %v7113_v0  ;;  %v7193_v2 = vmax.f32 %v2931_v61, %v7118_v53  ;;  %v5634_v42 = vld [vmem:[%s9680_s1 + $0x88] sm:$0xff]  ;;  %v5665_v61 = vld [vmem:[%s9680_s1 + $0x180] sm:$0xff] }
  0xdf   : > { %v3097_v6 = vrot.slane %v7139_v36, 1  ;;  %v3098_v38 = vrot.slane %v7142_v29, 1  ;;  %v3100_v46 = vrot.slane %v7155_v50, 1  ;;  %v3102_v52 = vrot.slane %v7159_v62, 1  ;;  %v647_v41 = vld [vmem:[%s9680_s1 + $0x8] sm:$0xff]  ;;  %2585 = vmatpush.msra.mxu0 %v5634_v42  ;;  %5147 = vmatpush.msra.mxu3 %v5665_v61 }
  0xe0   : > { %v3103_v8 = vrot.slane %v7163_v1, 1  ;;  %v9789_v59 = vrot.slane %v7166_v57, 1  ;;  %v3107_v3 = vrot.slane %v7169_v4, 1  ;;  %v3108_v27 = vrot.slane %v7172_v17, 1  ;;  %2698 = vmatpush.msra.mxu1 %v647_v41 }
  0xe1   : > { %v3099_v30 = vsel %vm1142_vm0, %v3097_v6, %v3098_v38  ;;  %v3101_v55 = vsel %vm1142_vm0, %v3098_v38, %v3100_v46  ;;  %v3110_v47 = vrot.slane %v7175_v26, 1  ;;  %v3112_v35 = vrot.slane %v7178_v28, 1 }
  0xe2   : > { %v3104_v24 = vsel %vm1142_vm0, %v3102_v52, %v3103_v8  ;;  %v3106_v51 = vsel %vm1142_vm0, %v3103_v8, %v9789_v59  ;;  %v3113_v58 = vrot.slane %v7181_v48, 1  ;;  %v3109_v14 = vsel %vm1142_vm0, %v3107_v3, %v3108_v27 }
  0xe3   : > { %v3111_v21 = vsel %vm1142_vm0, %v3108_v27, %v3110_v47  ;;  %v9783_v19 = vrot.slane %v7184_v43, 1  ;;  %v3117_v60 = vrot.slane %v7187_v13, 1  ;;  %v3118_v39 = vrot.slane %v7190_v37, 1 }
  0xe4   : > { %v3114_v32 = vsel %vm1142_vm0, %v3112_v35, %v3113_v58  ;;  %v9782_v23 = vrot.slane %v7193_v2, 1  ;;  %v3257_v49 = vmax.f32 %v7139_v36, %v3099_v30  ;;  %v3258_v34 = vmax.f32 %v7142_v29, %v3101_v55 }
  0xe5   : > { %v3116_v18 = vsel %vm1142_vm0, %v3113_v58, %v9783_v19  ;;  %v3260_v7 = vmax.f32 %v7159_v62, %v3104_v24  ;;  %v3261_v9 = vmax.f32 %v7163_v1, %v3106_v51  ;;  %v3119_v10 = vsel %vm1142_vm0, %v3117_v60, %v3118_v39 }
  0xe6   : > { %v3121_v45 = vsel %vm1142_vm0, %v3118_v39, %v9782_v23  ;;  %v3263_v15 = vmax.f32 %v7169_v4, %v3109_v14  ;;  %v3264_v56 = vmax.f32 %v7172_v17, %v3111_v21  ;;  %v3266_v6 = vmax.f32 %v7178_v28, %v3114_v32 }
  0xe7   : > { %v3267_v38 = vmax.f32 %v7181_v48, %v3116_v18  ;;  %v3269_v52 = vmax.f32 %v7187_v13, %v3119_v10  ;;  %v3270_v8 = vmax.f32 %v7190_v37, %v3121_v45  ;;  %v3317_v3 = vrot.slane %v7139_v36, 2 }
  0xe8   : > { %v3318_v30 = vrot.slane %v7142_v29, 2  ;;  %v9780_v55 = vrot.slane %v7155_v50, 2  ;;  %v3322_v27 = vrot.slane %v7159_v62, 2  ;;  %v3323_v24 = vrot.slane %v7163_v1, 2 }
  0xe9   : > { %v9781_v51 = vrot.slane %v7166_v57, 2  ;;  %v3327_v35 = vrot.slane %v7169_v4, 2  ;;  %v3328_v58 = vrot.slane %v7172_v17, 2  ;;  %v9790_v60 = vrot.slane %v7175_v26, 2 }
  0xea   : > { %v3319_v14 = vsel %vm1455_vm1, %v3317_v3, %v3318_v30  ;;  %v3321_v21 = vsel %vm1455_vm1, %v3318_v30, %v9780_v55  ;;  %v3332_v32 = vrot.slane %v7178_v28, 2  ;;  %v3324_v39 = vsel %vm1455_vm1, %v3322_v27, %v3323_v24 }
  0xeb   : > { %v3326_v18 = vsel %vm1455_vm1, %v3323_v24, %v9781_v51  ;;  %v3329_v10 = vsel %vm1455_vm1, %v3327_v35, %v3328_v58  ;;  %v3333_v45 = vrot.slane %v7181_v48, 2  ;;  %v3331_v42 = vsel %vm1455_vm1, %v3328_v58, %v9790_v60 }
  0xec   : > { %v9787_v41 = vrot.slane %v7184_v43, 2  ;;  %v3337_v61 = vrot.slane %v7187_v13, 2  ;;  %v3338_v3 = vrot.slane %v7190_v37, 2  ;;  %v9786_v27 = vrot.slane %v7193_v2, 2 }
  0xed   : > { %v3334_v30 = vsel %vm1455_vm1, %v3332_v32, %v3333_v45  ;;  %v7277_v55 = vmax.f32 %v3257_v49, %v3319_v14  ;;  %v7279_v24 = vmax.f32 %v3258_v34, %v3321_v21  ;;  %v7285_v51 = vmax.f32 %v3260_v7, %v3324_v39 }
  0xee   : > { %v3336_v35 = vsel %vm1455_vm1, %v3333_v45, %v9787_v41  ;;  %v3339_v58 = vsel %vm1455_vm1, %v3337_v61, %v3338_v3  ;;  %v7287_v23 = vmax.f32 %v3261_v9, %v3326_v18  ;;  %v3341_v32 = vsel %vm1455_vm1, %v3338_v3, %v9786_v27 }
  0xef   : > { %v7292_v19 = vmax.f32 %v3263_v15, %v3329_v10  ;;  %v7294_v49 = vmax.f32 %v3264_v56, %v3331_v42  ;;  %v7296_v34 = vmax.f32 %v3266_v6, %v3334_v30  ;;  %v7298_v14 = vmax.f32 %v3267_v38, %v3336_v35 }
  0xf0   : > { %v7300_v21 = vmax.f32 %v3269_v52, %v3339_v58  ;;  %v7302_v45 = vmax.f32 %v3270_v8, %v3341_v32  ;;  %v3537_v7 = vrot.slane %v7139_v36, 3  ;;  %v3538_v9 = vrot.slane %v7142_v29, 3 }
  0xf1   : > { %v9785_v39 = vrot.slane %v7155_v50, 3  ;;  %v3542_v18 = vrot.slane %v7159_v62, 3  ;;  %v3543_v15 = vrot.slane %v7163_v1, 3  ;;  %v9784_v56 = vrot.slane %v7166_v57, 3 }
  0xf2   : > { %v3547_v6 = vrot.slane %v7169_v4, 3  ;;  %v3548_v38 = vrot.slane %v7172_v17, 3  ;;  %v9788_v52 = vrot.slane %v7175_v26, 3  ;;  %v3539_v8 = vsel %vm1768_vm2, %v3537_v7, %v3538_v9 }
  0xf3   : > { %v3541_v10 = vsel %vm1768_vm2, %v3538_v9, %v9785_v39  ;;  %v3544_v42 = vsel %vm1768_vm2, %v3542_v18, %v3543_v15  ;;  %v3552_v61 = vrot.slane %v7178_v28, 3  ;;  %v3546_v3 = vsel %vm1768_vm2, %v3543_v15, %v9784_v56  ;;  %v5633_v15 = vld [vmem:[%s9680_s1 + $0x80] sm:$0xff] }
  0xf4   : > { %v3549_v30 = vsel %vm1768_vm2, %v3547_v6, %v3548_v38  ;;  %v3551_v35 = vsel %vm1768_vm2, %v3548_v38, %v9788_v52  ;;  %v3553_v58 = vrot.slane %v7181_v48, 3  ;;  %v3555_v32 = vrot.slane %v7184_v43, 3  ;;  %v646_v6 = vld [vmem:[%s9680_s1] sm:$0xff]  ;;  %2586 = vmatpush.msra.mxu0 %v5633_v15 }
  0xf5   : > { %v3557_v7 = vrot.slane %v7187_v13, 3  ;;  %v3558_v9 = vrot.slane %v7190_v37, 3  ;;  %v3560_v18 = vrot.slane %v7193_v2, 3  ;;  %v3697_v56 = vmax.f32 %v7277_v55, %v3539_v8  ;;  %2699 = vmatpush.msra.mxu1 %v646_v6 }
  0xf6   : > { %v3554_v38 = vsel %vm1768_vm2, %v3552_v61, %v3553_v58  ;;  %v3698_v39 = vmax.f32 %v7279_v24, %v3541_v10  ;;  %v3700_v27 = vmax.f32 %v7285_v51, %v3544_v42  ;;  %v3556_v41 = vsel %vm1768_vm2, %v3553_v58, %v3555_v32 }
  0xf7   : > { %v3559_v52 = vsel %vm1768_vm2, %v3557_v7, %v3558_v9  ;;  %v3561_v59 = vsel %vm1768_vm2, %v3558_v9, %v3560_v18  ;;  %v3701_v60 = vmax.f32 %v7287_v23, %v3546_v3  ;;  %v3703_v55 = vmax.f32 %v7292_v19, %v3549_v30 }
  0xf8   : > { %v3704_v24 = vmax.f32 %v7294_v49, %v3551_v35  ;;  %v3706_v51 = vmax.f32 %v7296_v34, %v3554_v38  ;;  %v3707_v8 = vmax.f32 %v7298_v14, %v3556_v41  ;;  %v3709_v10 = vmax.f32 %v7300_v21, %v3559_v52 }
  0xf9   : > { %v3710_v42 = vmax.f32 %v7302_v45, %v3561_v59  ;;  %v3757_v61 = vrot.slane %v7139_v36, 4  ;;  %v3758_v58 = vrot.slane %v7142_v29, 4  ;;  %v3760_v7 = vrot.slane %v7155_v50, 4 }
  0xfa   : > { %v3762_v23 = vrot.slane %v7159_v62, 4  ;;  %v3763_v19 = vrot.slane %v7163_v1, 4  ;;  %v3765_v49 = vrot.slane %v7166_v57, 4  ;;  %v3767_v41 = vrot.slane %v7169_v4, 4 }
  0xfb   : > { %v3759_v34 = vsel %vm2081_vm3, %v3757_v61, %v3758_v58  ;;  %v3768_v14 = vrot.slane %v7172_v17, 4  ;;  %v3770_v59 = vrot.slane %v7175_v26, 4  ;;  %v3761_v36 = vsel %vm2081_vm3, %v3758_v58, %v3760_v7 }
  0xfc   : > { %v3764_v29 = vsel %vm2081_vm3, %v3762_v23, %v3763_v19  ;;  %v3766_v62 = vsel %vm2081_vm3, %v3763_v19, %v3765_v49  ;;  %v3772_v1 = vrot.slane %v7178_v28, 4  ;;  %v3773_v17 = vrot.slane %v7181_v48, 4 }
  0xfd   : > { %v3769_v21 = vsel %vm2081_vm3, %v3767_v41, %v3768_v14  ;;  %v3771_v4 = vsel %vm2081_vm3, %v3768_v14, %v3770_v59  ;;  %v3775_v45 = vrot.slane %v7184_v43, 4  ;;  %v3777_v52 = vrot.slane %v7187_v13, 4 }
  0xfe   : > { %v3778_v3 = vrot.slane %v7190_v37, 4  ;;  %v3780_v30 = vrot.slane %v7193_v2, 4  ;;  %v3917_v35 = vmax.f32 %v3697_v56, %v3759_v34  ;;  %v3774_v9 = vsel %vm2081_vm3, %v3772_v1, %v3773_v17 }
  0xff   : > { %v3776_v28 = vsel %vm2081_vm3, %v3773_v17, %v3775_v45  ;;  %v3918_v15 = vmax.f32 %v3698_v39, %v3761_v36  ;;  %v3920_v6 = vmax.f32 %v3700_v27, %v3764_v29  ;;  %v3921_v13 = vmax.f32 %v3701_v60, %v3766_v62  ;;  %v5840_v17 = vld [vmem:[#allocation2 + $0xc0] sm:$0xff] }
 0x100   : > { %v3779_v38 = vsel %vm2081_vm3, %v3777_v52, %v3778_v3  ;;  %v3781_v48 = vsel %vm2081_vm3, %v3778_v3, %v3780_v30  ;;  %v3923_v61 = vmax.f32 %v3703_v55, %v3769_v21  ;;  %v7390_v37 = vmax.f32 %v3704_v24, %v3771_v4  ;;  %v5841_v3 = vld [vmem:[#allocation2 + $0xc8] sm:$0xff] }
 0x101   : > { %v7392_v58 = vmax.f32 %v3706_v51, %v3774_v9  ;;  %v7394_v56 = vmax.f32 %v3707_v8, %v3776_v28  ;;  %v7396_v23 = vmax.f32 %v3709_v10, %v3779_v38  ;;  %v7398_v19 = vmax.f32 %v3710_v42, %v3781_v48 }
 0x102   : > { %v4025_v39 = vrot.slane %v3923_v61, 2  ;;  %v4299_v27 = vmax.f32 %v3917_v35, %v3920_v6  ;;  %v4300_v34 = vmax.f32 %v3918_v15, %v3921_v13  ;;  %v4026_v41 = vrot.slane %v7390_v37, 2 }
 0x103   : > { %v4302_v14 = vmax.f32 %v3920_v6, %v3923_v61  ;;  %v4303_v36 = vmax.f32 %v3921_v13, %v7390_v37  ;;  %v4305_v60 = vmax.f32 %v3923_v61, %v7392_v58  ;;  %v4306_v55 = vmax.f32 %v7390_v37, %v7394_v56 }
 0x104   : > { %v4347_v24 = vmax.f32 %v4299_v27, %v3923_v61  ;;  %v4348_v51 = vmax.f32 %v4300_v34, %v7390_v37  ;;  %v2442_v8 = vrot.slane %v7048_v31, 4  ;;  %v4027_v10 = vsel %vm1455_vm1, %v4025_v39, %v4026_v41 }
 0x105   : > { %v7411_v42 = vmax.f32 %v4302_v14, %v7392_v58  ;;  %v7414_v29 = vmax.f32 %v4303_v36, %v7394_v56  ;;  %v7417_v62 = vmax.f32 %v4305_v60, %v7396_v23  ;;  %4170 = vmatmul.f32.vlgmr.msra.gmra.mxu2 %v4027_v10  ;;  %v7420_v1 = vmax.f32 %v4306_v55, %v7398_v19 }
 0x106   : > { %v4395_v21 = vmax.f32 %v4347_v24, %v7392_v58  ;;  %v4396_v31 = vmax.f32 %v4348_v51, %v7394_v56  ;;  %v2443_v4 = vrot.slane %v7053_v25, 4  ;;  %v534_v52 = vrot.slane %v5840_v17, 6 }
 0x107   : > { %v535_v35 = vrot.slane %v5841_v3, 6  ;;  %v3265_v9 = vmax.f32 %v7175_v26, %v3110_v47  ;;  %v3259_v25 = vmax.f32 %v7155_v50, %v3100_v46  ;;  %v10080_v48 = vrot.slane %v7175_v26, 2 }
 0x108   : > { %v4443_v28 = vmax.f32 %v4395_v21, %v7396_v23  ;;  %v7430_v15 = vmax.f32 %v4396_v31, %v7398_v19  ;;  %v2444_v6 = vsel %vm2081_vm3, %v2442_v8, %v2443_v4  ;;  %v10081_v61 = vrot.slane %v7166_v57, 1 }
 0x109   : > { %2587 = vmatmul.f32.vlgmr.msra.gmra.mxu0 %v2444_v6  ;;  %v536_v38 = vsel %vm533_vm4, %v534_v52, %v535_v35  ;;  %v3485_v13 = vmax.f32 %v3265_v9, %v10080_v48  ;;  %v10082_v39 = vrot.slane %v7184_v43, 1  ;;  %v10083_v21 = vrot.slane %v7175_v26, 3 }
 0x10a   : > { %v3262_v47 = vmax.f32 %v7166_v57, %v10081_v61  ;;  %v4539_v34 = vrot.slane %v4443_v28, 1  ;;  %v4540_v14 = vrot.slane %v7430_v15, 1  ;;  %v4683_v36 = vrot.slane %v4443_v28, 2  ;;  %2700 = vmatmul.f32.vlgmr.msra.gmra.mxu1 %v536_v38 }
 0x10b   : > { %v3268_v27 = vmax.f32 %v7184_v43, %v10082_v39  ;;  %v4684_v46 = vrot.slane %v7430_v15, 2  ;;  %v4827_v60 = vrot.slane %v4443_v28, 3  ;;  %v4828_v55 = vrot.slane %v7430_v15, 3 }
 0x10c   : > { %v4971_v24 = vrot.slane %v4443_v28, 4  ;;  %v4972_v51 = vrot.slane %v7430_v15, 4  ;;  %v4541_v8 = vsel %vm1142_vm0, %v4539_v34, %v4540_v14  ;;  %v3705_v31 = vmax.f32 %v3485_v13, %v10083_v21 }
 0x10d   : > { %v4685_v10 = vsel %vm1455_vm1, %v4683_v36, %v4684_v46  ;;  %v10084_v17 = vrot.slane %v7193_v2, 1  ;;  %v4651_v3 = vmax.f32 %v4443_v28, %v4541_v8  ;;  %v4829_v9 = vsel %vm1768_vm2, %v4827_v60, %v4828_v55 }
 0x10e   : > { %v4973_v6 = vsel %vm2081_vm3, %v4971_v24, %v4972_v51  ;;  %v10085_v38 = vrot.slane %v7155_v50, 2  ;;  %v7470_v61 = vmax.f32 %v3705_v31, %v3770_v59  ;;  %v10086_v13 = vrot.slane %v7166_v57, 2 }
 0x10f   : > { %v3271_v52 = vmax.f32 %v7193_v2, %v10084_v17  ;;  %v10087_v28 = vrot.slane %v7184_v43, 2  ;;  %v10088_v36 = vrot.slane %v7193_v2, 2  ;;  %v4795_v8 = vmax.f32 %v4651_v3, %v4685_v10 }
 0x110   : > { %v3479_v48 = vmax.f32 %v3259_v25, %v10085_v38  ;;  %v3482_v39 = vmax.f32 %v3262_v47, %v10086_v13  ;;  %v10089_v21 = vrot.slane %v7155_v50, 3  ;;  %v2445_v17 = vrot.slane %v7058_v5, 4  ;;  %v5842_v25 = vld [vmem:[#allocation2 + $0xd0] sm:$0xff] }
 0x111   : > { %v3488_v34 = vmax.f32 %v3268_v27, %v10087_v28  ;;  %v3491_v60 = vmax.f32 %v3271_v52, %v10088_v36  ;;  %v537_v38 = vrot.slane %v5842_v25, 6  ;;  %v4028_v26 = vrot.slane %v7470_v61, 2 }
 0x112   : > { %v3699_v24 = vmax.f32 %v3479_v48, %v10089_v21  ;;  %v10090_v59 = vrot.slane %v7166_v57, 3  ;;  %v4939_v52 = vmax.f32 %v4795_v8, %v4829_v9  ;;  %v2446_v3 = vsel %vm2081_vm3, %v2443_v4, %v2445_v17  ;;  %v10092_v4 = vld [vmem:[#allocation39_spill] sm:$0xff] }
 0x113   : > { %v3708_v47 = vmax.f32 %v3488_v34, %v3555_v32  ;;  %v3711_v27 = vmax.f32 %v3491_v60, %v3560_v18  ;;  %v538_v5 = vsel %vm533_vm4, %v535_v35, %v537_v38  ;;  %v4029_v48 = vsel %vm1455_vm1, %v4026_v41, %v4028_v26  ;;  %2590 = vmatmul.f32.gmra.mxu0 %v2446_v3  ;;  %v10091_v41 = vld [vmem:[#allocation38_spill] sm:$0xff]  ;;  %v10094_v9 = vld [vmem:[#allocation15_spill] sm:$0xff] }
 0x114   : > { %v3702_v31 = vmax.f32 %v3482_v39, %v10090_v59  ;;  %v3919_v10 = vmax.f32 %v3699_v24, %v3760_v7  ;;  %v5083_v18 = vmax.f32 %v4939_v52, %v4973_v6  ;;  %4173 = vmatmul.f32.gmra.mxu2 %v4029_v48  ;;  %2703 = vmatmul.f32.gmra.mxu1 %v538_v5  ;;  %v4030_v7 = vrot.slane %v7392_v58, 2 }
 0x115   : > { %v7501_v32 = vmax.f32 %v3708_v47, %v3775_v45  ;;  %v7505_v50 = vmax.f32 %v3711_v27, %v3780_v30  ;;  %v4031_v37 = vrot.slane %v7394_v56, 2  ;;  %v1206_v57 = vrot.slane %v10091_v41, 1  ;;  %v10093_v45 = vld [vmem:[#allocation40_spill] sm:$0xff] }
 0x116   : > { %v7497_v13 = vmax.f32 %v3702_v31, %v3765_v49  ;;  %v1207_v43 = vrot.slane %v10092_v4, 1  ;;  %v1209_v35 = vrot.slane %v10093_v45, 1  ;;  %v1211_v2 = vrot.slane %v10094_v9, 1  ;;  %5148 = vmatmul.f32.vlgmr.msra.gmra.mxu3 %v5083_v18 }
 0x117   : > { %v4032_v30 = vsel %vm1455_vm1, %v4030_v7, %v4031_v37  ;;  %v1519_v6 = vrot.slane %v10091_v41, 2  ;;  %v1520_v39 = vrot.slane %v10092_v4, 2  ;;  %v1522_v28 = vrot.slane %v10093_v45, 2 }
 0x118   : > { %v4301_v49 = vmax.f32 %v3919_v10, %v7497_v13  ;;  %v1208_v36 = vsel %vm1142_vm0, %v1206_v57, %v1207_v43  ;;  %v1210_v60 = vsel %vm1142_vm0, %v1207_v43, %v1209_v35  ;;  %v1212_v8 = vsel %vm1142_vm0, %v1209_v35, %v1211_v2 }
 0x119   : > { %v1410_v21 = vmax.f32 %v10091_v41, %v1208_v36  ;;  %v1411_v24 = vmax.f32 %v10092_v4, %v1210_v60  ;;  %v1412_v17 = vmax.f32 %v10093_v45, %v1212_v8  ;;  %v1521_v25 = vsel %vm1455_vm1, %v1519_v6, %v1520_v39 }
 0x11a   : > { %v4349_v34 = vmax.f32 %v4301_v49, %v7470_v61  ;;  %v1523_v26 = vsel %vm1455_vm1, %v1520_v39, %v1522_v28  ;;  %v1524_v59 = vrot.slane %v10094_v9, 2  ;;  %v1832_v31 = vrot.slane %v10091_v41, 3 }
 0x11b   : > { %v1723_v47 = vmax.f32 %v1410_v21, %v1521_v25  ;;  %v1724_v27 = vmax.f32 %v1411_v24, %v1523_v26  ;;  %v1833_v52 = vrot.slane %v10092_v4, 3  ;;  %v1835_v10 = vrot.slane %v10093_v45, 3 }
 0x11c   : > { %v4397_v38 = vmax.f32 %v4349_v34, %v7501_v32  ;;  %v1525_v5 = vsel %vm1455_vm1, %v1522_v28, %v1524_v59  ;;  %v1837_v48 = vrot.slane %v10094_v9, 3  ;;  %v2145_v18 = vrot.slane %v10091_v41, 4  ;;  %4176 = vmatmul.f32.gmra.mxu2 %v4032_v30 }
 0x11d   : > { %v1725_v7 = vmax.f32 %v1412_v17, %v1525_v5  ;;  %v1834_v57 = vsel %vm1768_vm2, %v1832_v31, %v1833_v52  ;;  %v1836_v49 = vsel %vm1768_vm2, %v1833_v52, %v1835_v10  ;;  %v2146_v43 = vrot.slane %v10092_v4, 4  ;;  %v326_v5 = vld [vmem:[%s6242_s22 + $0x90] sm:$0xff] }
 0x11e   : > { %v4445_v3 = vmax.f32 %v4397_v38, %v7505_v50  ;;  %v1838_v34 = vsel %vm1768_vm2, %v1835_v10, %v1837_v48  ;;  %v2036_v36 = vmax.f32 %v1723_v47, %v1834_v57  ;;  %v2037_v28 = vmax.f32 %v1724_v27, %v1836_v49  ;;  %v327_v48 = vld [vmem:[%s6242_s22 + $0x98] sm:$0xff]  ;;  %v5843_v49 = vld [vmem:[#allocation2 + $0xe0] sm:$0xff]  ;;  %359 = vst [vmem:[#allocation2 + $0x1e6] sm:$0xff] %v326_v5 }
 0x11f   : > { %v2147_v60 = vsel %vm2081_vm3, %v2145_v18, %v2146_v43  ;;  %v2038_v24 = vmax.f32 %v1725_v7, %v1838_v34  ;;  %v2148_v17 = vrot.slane %v10093_v45, 4  ;;  %v2150_v25 = vrot.slane %v10094_v9, 4  ;;  %360 = vst [vmem:[#allocation2 + $0x1ee] sm:$0xff] %v327_v48 }
 0x120   : > { %v4542_v35 = vrot.slane %v4445_v3, 1  ;;  %v4686_v2 = vrot.slane %v4445_v3, 2  ;;  %v4830_v6 = vrot.slane %v4445_v3, 3  ;;  %v4974_v39 = vrot.slane %v4445_v3, 4 }
 0x121   : > { %v2151_v45 = vsel %vm2081_vm3, %v2148_v17, %v2150_v25  ;;  %v4398_v9 = vmax.f32 %v7411_v42, %v7396_v23  ;;  %v4399_v10 = vmax.f32 %v7414_v29, %v7398_v19  ;;  %v2447_v3 = vrot.slane %v7063_v22, 4 }
 0x122   : > { %v4543_v41 = vsel %vm1142_vm0, %v4540_v14, %v4542_v35  ;;  %v4687_v30 = vsel %vm1455_vm1, %v4684_v46, %v4686_v2  ;;  %v4831_v4 = vsel %vm1768_vm2, %v4828_v55, %v4830_v6  ;;  %v4975_v8 = vsel %vm2081_vm3, %v4972_v51, %v4974_v39  ;;  %v5844_v6 = vld [vmem:[#allocation2 + $0xe8] sm:$0xff] }
 0x123   : > { %v4652_v21 = vmax.f32 %v7430_v15, %v4543_v41  ;;  %v7558_v14 = vmax.f32 %v2036_v36, %v2147_v60  ;;  %v2812_v46 = vmax.f32 %v7063_v22, %v7078_v11  ;;  %v2813_v55 = vmax.f32 %v7068_v33, %v7083_v12 }
 0x124   : > { %v2814_v51 = vmax.f32 %v7073_v16, %v7088_v63  ;;  %v2149_v15 = vsel %vm2081_vm3, %v2146_v43, %v2148_v17  ;;  %v7572_v59 = vmax.f32 %v2038_v24, %v2151_v45  ;;  %v2448_v57 = vrot.slane %v7068_v33, 4 }
 0x125   : > { %10095 = vst [vmem:[#allocation17_spill] sm:$0xff] %v7558_v14  ;;  %v4796_v38 = vmax.f32 %v4652_v21, %v4687_v30  ;;  %v7570_v26 = vmax.f32 %v2037_v28, %v2149_v15  ;;  %v2872_v31 = vmax.f32 %v2812_v46, %v7093_v40  ;;  %v2873_v47 = vmax.f32 %v2813_v55, %v7098_v54 }
 0x126   : > { %v2874_v52 = vmax.f32 %v2814_v51, %v7103_v44  ;;  %v539_v43 = vrot.slane %v5843_v49, 6  ;;  %v540_v39 = vrot.slane %v5844_v6, 6  ;;  %v4033_v34 = vrot.slane %v7501_v32, 2 }
 0x127   : > { %v4940_v27 = vmax.f32 %v4796_v38, %v4831_v4  ;;  %v2932_v18 = vmax.f32 %v2872_v31, %v7108_v20  ;;  %v2933_v7 = vmax.f32 %v2873_v47, %v7113_v0  ;;  %v2449_v28 = vsel %vm2081_vm3, %v2447_v3, %v2448_v57  ;;  %v10096_v4 = vld [vmem:[#allocation41_spill] sm:$0xff] }
 0x128   : > { %v2934_v2 = vmax.f32 %v2874_v52, %v7118_v53  ;;  %v4304_v33 = vmax.f32 %v7497_v13, %v7470_v61  ;;  %2593 = vmatmul.f32.gmra.mxu0 %v2449_v28  ;;  %v541_v41 = vsel %vm533_vm4, %v539_v43, %v540_v39  ;;  %v4034_v30 = vsel %vm1455_vm1, %v4031_v37, %v4033_v34 }
 0x129   : > { %v5084_v35 = vmax.f32 %v4940_v27, %v4975_v8  ;;  %v2992_v22 = vmax.f32 %v2932_v18, %v7558_v14  ;;  %v2993_v36 = vmax.f32 %v2933_v7, %v7570_v26  ;;  %v1213_v8 = vrot.slane %v10096_v4, 1  ;;  %2706 = vmatmul.f32.gmra.mxu1 %v541_v41  ;;  %4179 = vmatmul.f32.gmra.mxu2 %v4034_v30 }
 0x12a   : > { %v2994_v60 = vmax.f32 %v2934_v2, %v7572_v59  ;;  %v4352_v43 = vmax.f32 %v4304_v33, %v7501_v32  ;;  %v4035_v33 = vrot.slane %v7396_v23, 2 }
 0x12b   : > { %5151 = vmatmul.f32.gmra.mxu3 %v5084_v35  ;;  %v3122_v21 = vrot.slane %v2992_v22, 1  ;;  %v3123_v24 = vrot.slane %v2993_v36, 1  ;;  %v3342_v17 = vrot.slane %v2992_v22, 2  ;;  %v3343_v25 = vrot.slane %v2993_v36, 2 }
 0x12c   : > { %v3125_v46 = vrot.slane %v2994_v60, 1  ;;  %v3345_v13 = vrot.slane %v2994_v60, 2  ;;  %v3562_v55 = vrot.slane %v2992_v22, 3  ;;  %v3563_v51 = vrot.slane %v2993_v36, 3 }
 0x12d   : > { %v3124_v38 = vsel %vm1142_vm0, %v3122_v21, %v3123_v24  ;;  %v3344_v15 = vsel %vm1455_vm1, %v3342_v17, %v3343_v25  ;;  %v3565_v45 = vrot.slane %v2994_v60, 3  ;;  %v3782_v31 = vrot.slane %v2992_v22, 4 }
 0x12e   : > { %v3126_v37 = vsel %vm1142_vm0, %v3123_v24, %v3125_v46  ;;  %v3272_v47 = vmax.f32 %v2992_v22, %v3124_v38  ;;  %v3346_v27 = vsel %vm1455_vm1, %v3343_v25, %v3345_v13  ;;  %v3564_v52 = vsel %vm1768_vm2, %v3562_v55, %v3563_v51  ;;  %v5845_v22 = vld [vmem:[#allocation2 + $0xf0] sm:$0xff] }
 0x12f   : > { %v3273_v3 = vmax.f32 %v2993_v36, %v3126_v37  ;;  %v3566_v5 = vsel %vm1768_vm2, %v3563_v51, %v3565_v45  ;;  %v3783_v48 = vrot.slane %v2993_v36, 4  ;;  %v3785_v18 = vrot.slane %v2994_v60, 4  ;;  %v10098_v51 = vld [vmem:[#allocation43_spill] sm:$0xff] }
 0x130   : > { %v3492_v7 = vmax.f32 %v3272_v47, %v3344_v15  ;;  %v3274_v49 = vmax.f32 %v2994_v60, %v3125_v46  ;;  %v2450_v35 = vrot.slane %v7073_v16, 4  ;;  %v542_v28 = vrot.slane %v5845_v22, 6  ;;  %v10097_v46 = vld [vmem:[#allocation42_spill] sm:$0xff]  ;;  %v10099_v15 = vld [vmem:[#allocation16_spill] sm:$0xff] }
 0x131   : > { %v3493_v2 = vmax.f32 %v3273_v3, %v3346_v27  ;;  %v3784_v6 = vsel %vm2081_vm3, %v3782_v31, %v3783_v48  ;;  %v3786_v34 = vsel %vm2081_vm3, %v3783_v48, %v3785_v18  ;;  %v4400_v21 = vmax.f32 %v4352_v43, %v7505_v50 }
 0x132   : > { %v3712_v41 = vmax.f32 %v3492_v7, %v3564_v52  ;;  %v3494_v30 = vmax.f32 %v3274_v49, %v3345_v13  ;;  %v2451_v36 = vsel %vm2081_vm3, %v2448_v57, %v2450_v35  ;;  %v543_v60 = vsel %vm533_vm4, %v540_v39, %v542_v28 }
 0x133   : > { %v3713_v24 = vmax.f32 %v3493_v2, %v3566_v5  ;;  %2596 = vmatmul.f32.gmra.mxu0 %v2451_v36  ;;  %v4036_v16 = vrot.slane %v7398_v19, 2  ;;  %2709 = vmatmul.f32.gmra.mxu1 %v543_v60  ;;  %v1214_v55 = vrot.slane %v10097_v46, 1  ;;  %v1216_v13 = vrot.slane %v10098_v51, 1 }
 0x134   : > { %v7613_v17 = vmax.f32 %v3712_v41, %v3784_v6  ;;  %v3714_v25 = vmax.f32 %v3494_v30, %v3565_v45  ;;  %v1218_v39 = vrot.slane %v10099_v15, 1  ;;  %v1526_v31 = vrot.slane %v10096_v4, 2 }
 0x135   : > { %v7617_v38 = vmax.f32 %v3713_v24, %v3786_v34  ;;  %v4037_v57 = vsel %vm1455_vm1, %v4035_v33, %v4036_v16  ;;  %v1215_v47 = vsel %vm1142_vm0, %v1213_v8, %v1214_v55  ;;  %v1217_v27 = vsel %vm1142_vm0, %v1214_v55, %v1216_v13 }
 0x136   : > { %v4446_v45 = vmax.f32 %v4398_v9, %v7613_v17  ;;  %v7628_v37 = vmax.f32 %v3714_v25, %v3785_v18  ;;  %4182 = vmatmul.f32.gmra.mxu2 %v4037_v57  ;;  %v1219_v3 = vsel %vm1142_vm0, %v1216_v13, %v1218_v39  ;;  %v1413_v5 = vmax.f32 %v10096_v4, %v1215_v47 }
 0x137   : > { %v4447_v52 = vmax.f32 %v4399_v10, %v7617_v38  ;;  %v1414_v48 = vmax.f32 %v10097_v46, %v1217_v27  ;;  %v1415_v6 = vmax.f32 %v10098_v51, %v1219_v3  ;;  %v1527_v29 = vrot.slane %v10097_v46, 2 }
 0x138   : > { %v4544_v42 = vrot.slane %v4446_v45, 1  ;;  %v4688_v9 = vrot.slane %v4446_v45, 2  ;;  %v4832_v18 = vrot.slane %v4446_v45, 3  ;;  %v4976_v7 = vrot.slane %v4446_v45, 4 }
 0x139   : > { %v4545_v49 = vrot.slane %v4447_v52, 1  ;;  %v4689_v43 = vrot.slane %v4447_v52, 2  ;;  %v4833_v8 = vrot.slane %v4447_v52, 3  ;;  %v4977_v35 = vrot.slane %v4447_v52, 4 }
 0x13a   : > { %v4448_v2 = vmax.f32 %v4400_v21, %v7628_v37  ;;  %v1529_v10 = vrot.slane %v10098_v51, 2  ;;  %v1528_v21 = vsel %vm1455_vm1, %v1526_v31, %v1527_v29  ;;  %v1531_v55 = vrot.slane %v10099_v15, 2 }
 0x13b   : > { %v4546_v34 = vsel %vm1142_vm0, %v4544_v42, %v4545_v49  ;;  %v4690_v22 = vsel %vm1455_vm1, %v4688_v9, %v4689_v43  ;;  %v4834_v28 = vsel %vm1768_vm2, %v4832_v18, %v4833_v8  ;;  %v4978_v41 = vsel %vm2081_vm3, %v4976_v7, %v4977_v35 }
 0x13c   : > { %v4653_v30 = vmax.f32 %v4446_v45, %v4546_v34  ;;  %v4547_v36 = vrot.slane %v4448_v2, 1  ;;  %v4691_v24 = vrot.slane %v4448_v2, 2  ;;  %v4835_v60 = vrot.slane %v4448_v2, 3 }
 0x13d   : > { %v4979_v33 = vrot.slane %v4448_v2, 4  ;;  %v1530_v25 = vsel %vm1455_vm1, %v1527_v29, %v1529_v10  ;;  %v1532_v3 = vsel %vm1455_vm1, %v1529_v10, %v1531_v55  ;;  %v1726_v42 = vmax.f32 %v1413_v5, %v1528_v21 }
 0x13e   : > { %v4797_v13 = vmax.f32 %v4653_v30, %v4690_v22  ;;  %v4548_v57 = vsel %vm1142_vm0, %v4545_v49, %v4547_v36  ;;  %v4692_v39 = vsel %vm1455_vm1, %v4689_v43, %v4691_v24  ;;  %v4836_v47 = vsel %vm1768_vm2, %v4833_v8, %v4835_v60 }
 0x13f   : > { %v4654_v27 = vmax.f32 %v4447_v52, %v4548_v57  ;;  %v4980_v45 = vsel %vm2081_vm3, %v4977_v35, %v4979_v33  ;;  %v1727_v18 = vmax.f32 %v1414_v48, %v1530_v25  ;;  %v1728_v31 = vmax.f32 %v1415_v6, %v1532_v3 }
 0x140   : > { %v4941_v9 = vmax.f32 %v4797_v13, %v4834_v28  ;;  %v1839_v7 = vrot.slane %v10096_v4, 3  ;;  %v1840_v29 = vrot.slane %v10097_v46, 3  ;;  %v1842_v49 = vrot.slane %v10098_v51, 3 }
 0x141   : > { %v4798_v2 = vmax.f32 %v4654_v27, %v4692_v39  ;;  %v1844_v43 = vrot.slane %v10099_v15, 3  ;;  %v2152_v52 = vrot.slane %v10096_v4, 4  ;;  %v2153_v8 = vrot.slane %v10097_v46, 4 }
 0x142   : > { %v5085_v34 = vmax.f32 %v4941_v9, %v4978_v41  ;;  %v2155_v35 = vrot.slane %v10098_v51, 4  ;;  %v1841_v48 = vsel %vm1768_vm2, %v1839_v7, %v1840_v29  ;;  %v1843_v6 = vsel %vm1768_vm2, %v1840_v29, %v1842_v49 }
 0x143   : > { %v4942_v5 = vmax.f32 %v4798_v2, %v4836_v47  ;;  %v1845_v10 = vsel %vm1768_vm2, %v1842_v49, %v1844_v43  ;;  %v2039_v22 = vmax.f32 %v1726_v42, %v1841_v48  ;;  %v2040_v28 = vmax.f32 %v1727_v18, %v1843_v6  ;;  %v5846_v42 = vld [vmem:[#allocation2 + $0x100] sm:$0xff]  ;;  %v5847_v18 = vld [vmem:[#allocation2 + $0x108] sm:$0xff] }
 0x144   : > { %5154 = vmatmul.f32.gmra.mxu3 %v5085_v34  ;;  %v2041_v30 = vmax.f32 %v1728_v31, %v1845_v10  ;;  %v2154_v36 = vsel %vm2081_vm3, %v2152_v52, %v2153_v8  ;;  %v2156_v4 = vsel %vm2081_vm3, %v2153_v8, %v2155_v35  ;;  %v2157_v46 = vrot.slane %v10099_v15, 4  ;;  %v7699_v34 = vld [vmem:[#allocation2 + $0x160] sm:$0xff] }
 0x145   : > { %v5086_v41 = vmax.f32 %v4942_v5, %v4980_v45  ;;  %v2815_v51 = vmax.f32 %v7078_v11, %v7093_v40  ;;  %v7670_v24 = vmax.f32 %v2039_v22, %v2154_v36  ;;  %v7672_v60 = vmax.f32 %v2040_v28, %v2156_v4  ;;  %10100 = vst [vmem:[#allocation18_spill] sm:$0xff] %v7699_v34  ;;  %v7701_v52 = vld [vmem:[#allocation2 + $0x180] sm:$0xff]  ;;  %v329_v5 = vld [vmem:[%s6242_s22 + $0xa8] sm:$0xff] }
 0x146   : > { %v2816_v33 = vmax.f32 %v7083_v12, %v7098_v54  ;;  %v2817_v21 = vmax.f32 %v7088_v63, %v7103_v44  ;;  %v2158_v25 = vsel %vm2081_vm3, %v2155_v35, %v2157_v46  ;;  %v4401_v15 = vmax.f32 %v7417_v62, %v7613_v17  ;;  %v328_v35 = vld [vmem:[%s6242_s22 + $0xa0] sm:$0xff]  ;;  %362 = vst [vmem:[#allocation2 + $0x20e] sm:$0xff] %v329_v5  ;;  %v5850_v5 = vld [vmem:[#allocation2 + $0x110] sm:$0xff] }
 0x147   : > { %v2875_v55 = vmax.f32 %v2815_v51, %v7108_v20  ;;  %v4402_v13 = vmax.f32 %v7420_v1, %v7617_v38  ;;  %v7684_v57 = vmax.f32 %v2041_v30, %v2158_v25  ;;  %v2452_v27 = vrot.slane %v7078_v11, 4  ;;  %361 = vst [vmem:[#allocation2 + $0x206] sm:$0xff] %v328_v35  ;;  %v7796_v1 = vld [vmem:[#allocation2 + $0x1f0] sm:$0xff] }
 0x148   : > { %v2876_v39 = vmax.f32 %v2816_v33, %v7113_v0  ;;  %v2877_v47 = vmax.f32 %v2817_v21, %v7118_v53  ;;  %v2453_v3 = vrot.slane %v7083_v12, 4  ;;  %v544_v9 = vrot.slane %v5846_v42, 6  ;;  %10109 = vst [vmem:[#allocation24_spill] sm:$0xff] %v7796_v1 }
 0x149   : > { %v2935_v45 = vmax.f32 %v2875_v55, %v7558_v14  ;;  %v545_v31 = vrot.slane %v5847_v18, 6  ;;  %v4038_v29 = vrot.slane %v7505_v50, 2  ;;  %v4307_v49 = vmax.f32 %v7470_v61, %v7501_v32 }
 0x14a   : > { %v2936_v7 = vmax.f32 %v2876_v39, %v7570_v26  ;;  %v2937_v2 = vmax.f32 %v2877_v47, %v7572_v59  ;;  %v2454_v43 = vsel %vm2081_vm3, %v2452_v27, %v2453_v3  ;;  %v706_v8 = vmax.f32 %v7699_v34, %v7701_v52 }
 0x14b   : > { %v2995_v11 = vmax.f32 %v2935_v45, %v7670_v24  ;;  %v546_v12 = vsel %vm533_vm4, %v544_v9, %v545_v31  ;;  %2599 = vmatmul.f32.gmra.mxu0 %v2454_v43  ;;  %v4039_v6 = vsel %vm1455_vm1, %v4036_v16, %v4038_v29  ;;  %v4355_v29 = vmax.f32 %v4307_v49, %v7505_v50 }
 0x14c   : > { %5157 = vmatmul.f32.gmra.mxu3 %v5086_v41  ;;  %v2996_v48 = vmax.f32 %v2936_v7, %v7672_v60  ;;  %v2997_v61 = vmax.f32 %v2937_v2, %v7684_v57  ;;  %2712 = vmatmul.f32.gmra.mxu1 %v546_v12  ;;  %v2455_v35 = vrot.slane %v7088_v63, 4 }
 0x14d   : > { %v3127_v10 = vrot.slane %v2995_v11, 1  ;;  %v3347_v22 = vrot.slane %v2995_v11, 2  ;;  %v3567_v28 = vrot.slane %v2995_v11, 3  ;;  %v3787_v30 = vrot.slane %v2995_v11, 4  ;;  %4185 = vmatmul.f32.gmra.mxu2 %v4039_v6 }
 0x14e   : > { %v3128_v36 = vrot.slane %v2996_v48, 1  ;;  %v3130_v4 = vrot.slane %v2997_v61, 1  ;;  %v3348_v41 = vrot.slane %v2996_v48, 2  ;;  %v3350_v46 = vrot.slane %v2997_v61, 2 }
 0x14f   : > { %v3568_v51 = vrot.slane %v2996_v48, 3  ;;  %v3570_v33 = vrot.slane %v2997_v61, 3  ;;  %v3788_v21 = vrot.slane %v2996_v48, 4  ;;  %v3790_v25 = vrot.slane %v2997_v61, 4 }
 0x150   : > { %v3129_v55 = vsel %vm1142_vm0, %v3127_v10, %v3128_v36  ;;  %v3131_v16 = vsel %vm1142_vm0, %v3128_v36, %v3130_v4  ;;  %v3349_v39 = vsel %vm1455_vm1, %v3347_v22, %v3348_v41  ;;  %v3351_v47 = vsel %vm1455_vm1, %v3348_v41, %v3350_v46  ;;  %v7732_v41 = vld [vmem:[#allocation2 + $0x188] sm:$0xff] }
 0x151   : > { %v3275_v27 = vmax.f32 %v2995_v11, %v3129_v55  ;;  %v3276_v45 = vmax.f32 %v2996_v48, %v3131_v16  ;;  %v3569_v42 = vsel %vm1768_vm2, %v3567_v28, %v3568_v51  ;;  %v3571_v9 = vsel %vm1768_vm2, %v3568_v51, %v3570_v33  ;;  %v7748_v16 = vld [vmem:[#allocation2 + $0x1a0] sm:$0xff] }
 0x152   : > { %v3789_v18 = vsel %vm2081_vm3, %v3787_v30, %v3788_v21  ;;  %v3791_v7 = vsel %vm2081_vm3, %v3788_v21, %v3790_v25  ;;  %v3277_v2 = vmax.f32 %v2997_v61, %v3130_v4  ;;  %v547_v6 = vrot.slane %v5850_v5, 6  ;;  %v7730_v4 = vld [vmem:[#allocation2 + $0x168] sm:$0xff] }
 0x153   : > { %v3495_v43 = vmax.f32 %v3275_v27, %v3349_v39  ;;  %v3496_v12 = vmax.f32 %v3276_v45, %v3351_v47  ;;  %v4403_v11 = vmax.f32 %v4355_v29, %v7628_v37  ;;  %v4040_v48 = vrot.slane %v7613_v17, 2  ;;  %10101 = vst [vmem:[#allocation19_spill] sm:$0xff] %v7730_v4  ;;  %v7756_v27 = vld [vmem:[#allocation2 + $0x1a8] sm:$0xff] }
 0x154   : > { %v3497_v10 = vmax.f32 %v3277_v2, %v3350_v46  ;;  %v9791_v22 = vrot.slane %v7617_v38, 2  ;;  %v2456_v36 = vsel %vm2081_vm3, %v2453_v3, %v2455_v35  ;;  %v548_v61 = vsel %vm533_vm4, %v545_v31, %v547_v6  ;;  %v7740_v3 = vld [vmem:[#allocation2 + $0x1f8] sm:$0xf]  ;;  %v7742_v31 = vld [vmem:[#allocation2 + $0x170] sm:$0xff]  ;;  %v7780_v5 = vld [vmem:[#allocation2 + $0x1c8] sm:$0xff] }
 0x155   : > { %v3715_v28 = vmax.f32 %v3495_v43, %v3569_v42  ;;  %v3716_v30 = vmax.f32 %v3496_v12, %v3571_v9  ;;  %2602 = vmatmul.f32.gmra.mxu0 %v2456_v36  ;;  %2715 = vmatmul.f32.gmra.mxu1 %v548_v61  ;;  %v707_v46 = vmax.f32 %v7730_v4, %v7732_v41  ;;  %v7759_v42 = vld [vmem:[#allocation2 + $0x1d8] sm:$0xf]  ;;  %v10105_v9 = vld [vmem:[#allocation13_spill] sm:$0xff]  ;;  %v7776_v43 = vld [vmem:[#allocation2 + $0x1c0] sm:$0xff] }
 0x156   : > { %v3717_v49 = vmax.f32 %v3497_v10, %v3570_v33  ;;  %v4042_v63 = vsel %vm1455_vm1, %v4040_v48, %v9791_v22  ;;  %10102 = vst [vmem:[#allocation6_spill] sm:$0xff] %v7740_v3  ;;  %v7744_v33 = vld [vmem:[#allocation2 + $0x190] sm:$0xff]  ;;  %v802_v39 = vmax.f32 %v706_v8, %v7748_v16  ;;  %v7794_v22 = vld [vmem:[#allocation2 + $0x1e8] sm:$0xff] }
 0x157   : > { %v7736_v51 = vmax.f32 %v3715_v28, %v3789_v18  ;;  %v7738_v21 = vmax.f32 %v3716_v30, %v3791_v7  ;;  %4188 = vmatmul.f32.gmra.mxu2 %v4042_v63  ;;  %10103 = vst [vmem:[#allocation20_spill] sm:$0xff] %v7742_v31  ;;  %v708_v55 = vmax.f32 %v7742_v31, %v7744_v33 }
 0x158   : > { %v7754_v47 = vmax.f32 %v3717_v49, %v3790_v25  ;;  %v803_v45 = vmax.f32 %v707_v46, %v7756_v27  ;;  %10104 = vst [vmem:[#allocation21_spill] sm:$0xff] %v7759_v42  ;;  %v901_v18 = vmax.f32 %v10105_v9, %v7759_v42  ;;  %v7773_v25 = vld [vmem:[#allocation2 + $0x1b0] sm:$0xff]  ;;  %v898_v12 = vmax.f32 %v802_v39, %v7776_v43 }
 0x159   : > { %v4449_v2 = vmax.f32 %v4401_v15, %v7736_v51  ;;  %v4450_v8 = vmax.f32 %v4402_v13, %v7738_v21  ;;  %10106 = vst [vmem:[#allocation22_spill] sm:$0xff] %v7773_v25  ;;  %v804_v29 = vmax.f32 %v708_v55, %v7773_v25  ;;  %v7790_v55 = vld [vmem:[#allocation2 + $0x1e0] sm:$0xff] }
 0x15a   : > { %v4451_v35 = vmax.f32 %v4403_v11, %v7754_v47  ;;  %10107 = vst [vmem:[#allocation7_spill] sm:$0xff] %v7780_v5  ;;  %v899_v62 = vmax.f32 %v803_v45, %v7780_v5  ;;  %v7784_v15 = vmax.f32 %v901_v18, %v7740_v3 }
 0x15b   : > { %v4549_v13 = vrot.slane %v4449_v2, 1  ;;  %v4550_v6 = vrot.slane %v4450_v8, 1  ;;  %v4693_v10 = vrot.slane %v4449_v2, 2  ;;  %v4694_v48 = vrot.slane %v4450_v8, 2  ;;  %10108 = vst [vmem:[#allocation23_spill] sm:$0xff] %v7790_v55 }
 0x15c   : > { %v4837_v28 = vrot.slane %v4449_v2, 3  ;;  %v4838_v30 = vrot.slane %v4450_v8, 3  ;;  %v4981_v36 = vrot.slane %v4449_v2, 4  ;;  %v4982_v61 = vrot.slane %v4450_v8, 4 }
 0x15d   : > { %v4551_v11 = vsel %vm1142_vm0, %v4549_v13, %v4550_v6  ;;  %v4695_v49 = vsel %vm1455_vm1, %v4693_v10, %v4694_v48  ;;  %v4552_v63 = vrot.slane %v4451_v35, 1  ;;  %v4696_v46 = vrot.slane %v4451_v35, 2  ;;  %v7800_v10 = vld [vmem:[#allocation2 + $0x1d0] sm:$0xff] }
 0x15e   : > { %v4655_v39 = vmax.f32 %v4449_v2, %v4551_v11  ;;  %v4839_v45 = vsel %vm1768_vm2, %v4837_v28, %v4838_v30  ;;  %v4983_v9 = vsel %vm2081_vm3, %v4981_v36, %v4982_v61  ;;  %v4840_v18 = vrot.slane %v4451_v35, 3 }
 0x15f   : > { %v4553_v7 = vsel %vm1142_vm0, %v4550_v6, %v4552_v63  ;;  %v4697_v13 = vsel %vm1455_vm1, %v4694_v48, %v4696_v46  ;;  %v4984_v31 = vrot.slane %v4451_v35, 4  ;;  %v900_v4 = vmax.f32 %v804_v29, %v7800_v10 }
 0x160   : > { %v4799_v34 = vmax.f32 %v4655_v39, %v4695_v49  ;;  %v4656_v2 = vmax.f32 %v4450_v8, %v4553_v7  ;;  %v4841_v28 = vsel %vm1768_vm2, %v4838_v30, %v4840_v18  ;;  %v994_v36 = vmax.f32 %v898_v12, %v7790_v55 }
 0x161   : > { %v4985_v11 = vsel %vm2081_vm3, %v4982_v61, %v4984_v31  ;;  %v995_v3 = vmax.f32 %v899_v62, %v7794_v22  ;;  %v996_v42 = vmax.f32 %v900_v4, %v7796_v1  ;;  %v1225_v6 = vrot.slane %v7784_v15, 1 }
 0x162   : > { %v4943_v48 = vmax.f32 %v4799_v34, %v4839_v45  ;;  %v4800_v35 = vmax.f32 %v4656_v2, %v4697_v13  ;;  %v1220_v63 = vrot.slane %v994_v36, 1  ;;  %v1533_v46 = vrot.slane %v994_v36, 2 }
 0x163   : > { %v1221_v5 = vrot.slane %v995_v3, 1  ;;  %v1223_v29 = vrot.slane %v996_v42, 1  ;;  %v1534_v49 = vrot.slane %v995_v3, 2  ;;  %v1536_v7 = vrot.slane %v996_v42, 2 }
 0x164   : > { %v5087_v8 = vmax.f32 %v4943_v48, %v4983_v9  ;;  %v4944_v30 = vmax.f32 %v4800_v35, %v4841_v28  ;;  %v1538_v12 = vrot.slane %v7784_v15, 2  ;;  %v1846_v39 = vrot.slane %v994_v36, 3 }
 0x165   : > { %v1222_v31 = vsel %vm1142_vm0, %v1220_v63, %v1221_v5  ;;  %v1224_v62 = vsel %vm1142_vm0, %v1221_v5, %v1223_v29  ;;  %v1226_v4 = vsel %vm1142_vm0, %v1223_v29, %v1225_v6  ;;  %v1535_v34 = vsel %vm1455_vm1, %v1533_v46, %v1534_v49 }
 0x166   : > { %5160 = vmatmul.f32.gmra.mxu3 %v5087_v8  ;;  %v5088_v61 = vmax.f32 %v4944_v30, %v4985_v11  ;;  %v1416_v45 = vmax.f32 %v994_v36, %v1222_v31  ;;  %v1417_v18 = vmax.f32 %v995_v3, %v1224_v62  ;;  %v1418_v13 = vmax.f32 %v996_v42, %v1226_v4 }
 0x167   : > { %v1537_v2 = vsel %vm1455_vm1, %v1534_v49, %v1536_v7  ;;  %v1539_v9 = vsel %vm1455_vm1, %v1536_v7, %v1538_v12  ;;  %v1847_v28 = vrot.slane %v995_v3, 3  ;;  %v1849_v48 = vrot.slane %v996_v42, 3 }
 0x168   : > { %v1729_v35 = vmax.f32 %v1416_v45, %v1535_v34  ;;  %v1730_v1 = vmax.f32 %v1417_v18, %v1537_v2  ;;  %v1731_v63 = vmax.f32 %v1418_v13, %v1539_v9  ;;  %v1851_v5 = vrot.slane %v7784_v15, 3 }
 0x169   : > { %v1848_v6 = vsel %vm1768_vm2, %v1846_v39, %v1847_v28  ;;  %v1850_v46 = vsel %vm1768_vm2, %v1847_v28, %v1849_v48  ;;  %v2159_v29 = vrot.slane %v994_v36, 4  ;;  %v2160_v11 = vrot.slane %v995_v3, 4 }
 0x16a   : > { %v1852_v8 = vsel %vm1768_vm2, %v1849_v48, %v1851_v5  ;;  %v2042_v30 = vmax.f32 %v1729_v35, %v1848_v6  ;;  %v2043_v31 = vmax.f32 %v1730_v1, %v1850_v46  ;;  %v2162_v49 = vrot.slane %v996_v42, 4 }
 0x16b   : > { %v2044_v62 = vmax.f32 %v1731_v63, %v1852_v8  ;;  %v2161_v7 = vsel %vm2081_vm3, %v2159_v29, %v2160_v11  ;;  %v2164_v12 = vrot.slane %v7784_v15, 4  ;;  %v2820_v4 = vmax.f32 %v7103_v44, %v7118_v53  ;;  %v5862_v29 = vld [vmem:[#allocation2 + $0x120] sm:$0xff] }
 0x16c   : > { %v2163_v34 = vsel %vm2081_vm3, %v2160_v11, %v2162_v49  ;;  %v7825_v39 = vmax.f32 %v2042_v30, %v2161_v7  ;;  %v10110_v3 = vmax.f32 %v7093_v40, %v7108_v20  ;;  %v10111_v42 = vmax.f32 %v7098_v54, %v7113_v0 }
 0x16d   : > { %v2165_v45 = vsel %vm2081_vm3, %v2162_v49, %v2164_v12  ;;  %v7836_v15 = vmax.f32 %v2043_v31, %v2163_v34  ;;  %v2880_v18 = vmax.f32 %v2820_v4, %v7572_v59  ;;  %v4308_v13 = vmax.f32 %v7392_v58, %v7396_v23  ;;  %v330_v12 = vld [vmem:[%s6242_s22 + $0xb0] sm:$0xff]  ;;  %v331_v4 = vld [vmem:[%s6242_s22 + $0xb8] sm:$0xff] }
 0x16e   : > { %v2878_v36 = vmax.f32 %v10110_v3, %v7558_v14  ;;  %v2879_v1 = vmax.f32 %v10111_v42, %v7570_v26  ;;  %5163 = vmatmul.f32.gmra.mxu3 %v5088_v61  ;;  %v7841_v2 = vmax.f32 %v2044_v62, %v2165_v45  ;;  %v4309_v48 = vmax.f32 %v7394_v56, %v7398_v19 }
 0x16f   : > { %v2940_v35 = vmax.f32 %v2880_v18, %v7684_v57  ;;  %v7849_v63 = vmax.f32 %v4308_v13, %v7613_v17  ;;  %v2457_v5 = vrot.slane %v7093_v40, 4  ;;  %v2458_v6 = vrot.slane %v7098_v54, 4  ;;  %v5863_v54 = vld [vmem:[#allocation2 + $0x128] sm:$0xff]  ;;  %363 = vst [vmem:[#allocation2 + $0x226] sm:$0xff] %v330_v12 }
 0x170   : > { %v2938_v9 = vmax.f32 %v2878_v36, %v7670_v24  ;;  %v2939_v28 = vmax.f32 %v2879_v1, %v7672_v60  ;;  %v7856_v46 = vmax.f32 %v4309_v48, %v7617_v38  ;;  %v549_v56 = vrot.slane %v5862_v29, 6  ;;  %364 = vst [vmem:[#allocation2 + $0x22e] sm:$0xff] %v331_v4 }
 0x171   : > { %v7859_v11 = vmax.f32 %v2940_v35, %v7841_v2  ;;  %v4404_v8 = vmax.f32 %v7849_v63, %v7736_v51  ;;  %v2459_v40 = vsel %vm2081_vm3, %v2457_v5, %v2458_v6  ;;  %v550_v30 = vrot.slane %v5863_v54, 6 }
 0x172   : > { %v2998_v58 = vmax.f32 %v2938_v9, %v7825_v39  ;;  %v2999_v61 = vmax.f32 %v2939_v28, %v7836_v15  ;;  %2605 = vmatmul.f32.gmra.mxu0 %v2459_v40  ;;  %v4043_v12 = vrot.slane %v7628_v37, 2 }
 0x173   : > { %v3135_v34 = vrot.slane %v7859_v11, 1  ;;  %v3355_v3 = vrot.slane %v7859_v11, 2  ;;  %v3575_v18 = vrot.slane %v7859_v11, 3  ;;  %v3795_v40 = vrot.slane %v7859_v11, 4 }
 0x174   : > { %v3132_v31 = vrot.slane %v2998_v58, 1  ;;  %v3133_v49 = vrot.slane %v2999_v61, 1  ;;  %v3352_v62 = vrot.slane %v2998_v58, 2  ;;  %v3353_v7 = vrot.slane %v2999_v61, 2 }
 0x175   : > { %v3572_v36 = vrot.slane %v2998_v58, 3  ;;  %v3573_v42 = vrot.slane %v2999_v61, 3  ;;  %v3792_v13 = vrot.slane %v2998_v58, 4  ;;  %v3793_v29 = vrot.slane %v2999_v61, 4 }
 0x176   : > { %v3134_v1 = vsel %vm1142_vm0, %v3132_v31, %v3133_v49  ;;  %v3354_v45 = vsel %vm1455_vm1, %v3352_v62, %v3353_v7  ;;  %v3136_v9 = vsel %vm1142_vm0, %v3133_v49, %v3135_v34  ;;  %v3356_v48 = vsel %vm1455_vm1, %v3353_v7, %v3355_v3 }
 0x177   : > { %v3278_v28 = vmax.f32 %v2998_v58, %v3134_v1  ;;  %v3574_v35 = vsel %vm1768_vm2, %v3572_v36, %v3573_v42  ;;  %v3279_v63 = vmax.f32 %v2999_v61, %v3136_v9  ;;  %v3576_v5 = vsel %vm1768_vm2, %v3573_v42, %v3575_v18  ;;  %v5864_v9 = vld [vmem:[#allocation2 + $0x130] sm:$0xff] }
 0x178   : > { %v4405_v31 = vmax.f32 %v7856_v46, %v7738_v21  ;;  %v551_v62 = vsel %vm533_vm4, %v549_v56, %v550_v30  ;;  %v3794_v58 = vsel %vm2081_vm3, %v3792_v13, %v3793_v29  ;;  %v3796_v7 = vsel %vm2081_vm3, %v3793_v29, %v3795_v40 }
 0x179   : > { %v3498_v54 = vmax.f32 %v3278_v28, %v3354_v45  ;;  %v3499_v49 = vmax.f32 %v3279_v63, %v3356_v48  ;;  %2718 = vmatmul.f32.gmra.mxu1 %v551_v62  ;;  %v3280_v4 = vmax.f32 %v7859_v11, %v3135_v34  ;;  %v10112_v61 = vrot.slane %v7617_v38, 2 }
 0x17a   : > { %v4310_v46 = vmax.f32 %v7501_v32, %v7505_v50  ;;  %v2460_v56 = vrot.slane %v7103_v44, 4  ;;  %v552_v13 = vrot.slane %v5864_v9, 6  ;;  %v4045_v28 = vrot.slane %v7736_v51, 2 }
 0x17b   : > { %v3718_v36 = vmax.f32 %v3498_v54, %v3574_v35  ;;  %v4044_v42 = vsel %vm1455_vm1, %v10112_v61, %v4043_v12  ;;  %v3719_v1 = vmax.f32 %v3499_v49, %v3576_v5  ;;  %v3500_v45 = vmax.f32 %v3280_v4, %v3355_v3 }
 0x17c   : > { %4191 = vmatmul.f32.gmra.mxu2 %v4044_v42  ;;  %v4358_v11 = vmax.f32 %v4310_v46, %v7628_v37  ;;  %v2461_v34 = vsel %vm2081_vm3, %v2458_v6, %v2460_v56  ;;  %v9803_v35 = vrot.slane %v7738_v21, 2  ;;  %v553_v44 = vsel %vm533_vm4, %v550_v30, %v552_v13  ;;  %v10113_v42 = vld [vmem:[#allocation7_spill] sm:$0xff]  ;;  %v10114_v46 = vld [vmem:[#allocation21_spill] sm:$0xff] }
 0x17d   : > { %v7890_v48 = vmax.f32 %v3718_v36, %v3794_v58  ;;  %v7895_v63 = vmax.f32 %v3719_v1, %v3796_v7  ;;  %v3720_v32 = vmax.f32 %v3500_v45, %v3575_v18  ;;  %2608 = vmatmul.f32.gmra.mxu0 %v2461_v34  ;;  %v710_v3 = vmax.f32 %v7701_v52, %v7748_v16  ;;  %v10115_v56 = vld [vmem:[#allocation5_spill] sm:$0xff] }
 0x17e   : > { %v4406_v29 = vmax.f32 %v4358_v11, %v7754_v47  ;;  %v4047_v54 = vsel %vm1455_vm1, %v4045_v28, %v9803_v35  ;;  %v711_v6 = vmax.f32 %v7732_v41, %v7756_v27  ;;  %v712_v30 = vmax.f32 %v7744_v33, %v7773_v25  ;;  %v10116_v33 = vld [vmem:[#allocation11_spill] sm:$0xff] }
 0x17f   : > { %v4452_v5 = vmax.f32 %v4404_v8, %v7890_v48  ;;  %v4453_v62 = vmax.f32 %v4405_v31, %v7895_v63  ;;  %v7908_v18 = vmax.f32 %v3720_v32, %v3795_v40  ;;  %v806_v52 = vmax.f32 %v710_v3, %v7776_v43 }
 0x180   : > { %v807_v31 = vmax.f32 %v711_v6, %v10113_v42  ;;  %v808_v40 = vmax.f32 %v712_v30, %v7800_v10  ;;  %v10117_v1 = vmax.f32 %v10115_v56, %v10116_v33  ;;  %v7926_v30 = vld [vmem:[#allocation2 + $0x208] sm:$0xff]  ;;  %v7928_v56 = vld [vmem:[#allocation2 + $0x210] sm:$0xff]  ;;  %v10123_v33 = vld [vmem:[#allocation6_spill] sm:$0xff] }
 0x181   : > { %v4554_v12 = vrot.slane %v4452_v5, 1  ;;  %v4698_v8 = vrot.slane %v4452_v5, 2  ;;  %v4842_v49 = vrot.slane %v4452_v5, 3  ;;  %v4986_v58 = vrot.slane %v4452_v5, 4  ;;  %2721 = vmatmul.f32.gmra.mxu1 %v553_v44  ;;  %10119 = vst [vmem:[#allocation8_spill] sm:$0xff] %v7926_v30 }
 0x182   : > { %v4555_v7 = vrot.slane %v4453_v62, 1  ;;  %v4699_v4 = vrot.slane %v4453_v62, 2  ;;  %v4843_v36 = vrot.slane %v4453_v62, 3  ;;  %v4987_v61 = vrot.slane %v4453_v62, 4  ;;  %10120 = vst [vmem:[#allocation26_spill] sm:$0xff] %v7928_v56 }
 0x183   : > { %v4454_v41 = vmax.f32 %v4406_v29, %v7908_v18  ;;  %v809_v45 = vmax.f32 %v10117_v1, %v10114_v46  ;;  %v7924_v29 = vld [vmem:[#allocation2 + $0x200] sm:$0xff]  ;;  %v10121_v1 = vld [vmem:[#allocation24_spill] sm:$0xff] }
 0x184   : > { %v4556_v9 = vsel %vm1142_vm0, %v4554_v12, %v4555_v7  ;;  %v4700_v13 = vsel %vm1455_vm1, %v4698_v8, %v4699_v4  ;;  %v4844_v28 = vsel %vm1768_vm2, %v4842_v49, %v4843_v36  ;;  %v4988_v11 = vsel %vm2081_vm3, %v4986_v58, %v4987_v61  ;;  %4194 = vmatmul.f32.gmra.mxu2 %v4047_v54 }
 0x185   : > { %v4657_v34 = vmax.f32 %v4452_v5, %v4556_v9  ;;  %v4557_v32 = vrot.slane %v4454_v41, 1  ;;  %v4701_v44 = vrot.slane %v4454_v41, 2  ;;  %v4845_v3 = vrot.slane %v4454_v41, 3  ;;  %10118 = vst [vmem:[#allocation25_spill] sm:$0xff] %v7924_v29  ;;  %v7936_v9 = vld [vmem:[#allocation2 + $0x218] sm:$0xf] }
 0x186   : > { %v4989_v6 = vrot.slane %v4454_v41, 4  ;;  %v902_v12 = vmax.f32 %v806_v52, %v7790_v55  ;;  %v903_v8 = vmax.f32 %v807_v31, %v7794_v22  ;;  %v904_v49 = vmax.f32 %v808_v40, %v10121_v1  ;;  %10122 = vst [vmem:[#allocation27_spill] sm:$0xff] %v7936_v9 }
 0x187   : > { %v4801_v35 = vmax.f32 %v4657_v34, %v4700_v13  ;;  %v4558_v54 = vsel %vm1142_vm0, %v4555_v7, %v4557_v32  ;;  %v4702_v5 = vsel %vm1455_vm1, %v4699_v4, %v4701_v44  ;;  %v4846_v58 = vsel %vm1768_vm2, %v4843_v36, %v4845_v3 }
 0x188   : > { %v4658_v41 = vmax.f32 %v4453_v62, %v4558_v54  ;;  %v4990_v46 = vsel %vm2081_vm3, %v4987_v61, %v4989_v6  ;;  %v905_v25 = vmax.f32 %v809_v45, %v10123_v33  ;;  %v998_v52 = vmax.f32 %v902_v12, %v7924_v29 }
 0x189   : > { %v4945_v55 = vmax.f32 %v4801_v35, %v4844_v28  ;;  %v999_v31 = vmax.f32 %v903_v8, %v7926_v30  ;;  %v1000_v40 = vmax.f32 %v904_v49, %v7928_v56  ;;  %v2821_v7 = vmax.f32 %v7108_v20, %v7558_v14 }
 0x18a   : > { %v4802_v4 = vmax.f32 %v4658_v41, %v4702_v5  ;;  %v1001_v36 = vmax.f32 %v905_v25, %v7936_v9  ;;  %v1227_v13 = vrot.slane %v998_v52, 1  ;;  %v1540_v34 = vrot.slane %v998_v52, 2 }
 0x18b   : > { %v5089_v62 = vmax.f32 %v4945_v55, %v4988_v11  ;;  %v1228_v32 = vrot.slane %v999_v31, 1  ;;  %v1230_v61 = vrot.slane %v1000_v40, 1  ;;  %v1541_v44 = vrot.slane %v999_v31, 2 }
 0x18c   : > { %v4946_v45 = vmax.f32 %v4802_v4, %v4846_v58  ;;  %v1232_v3 = vrot.slane %v1001_v36, 1  ;;  %v1543_v6 = vrot.slane %v1000_v40, 2  ;;  %v1545_v35 = vrot.slane %v1001_v36, 2 }
 0x18d   : > { %5166 = vmatmul.f32.gmra.mxu3 %v5089_v62  ;;  %v1229_v28 = vsel %vm1142_vm0, %v1227_v13, %v1228_v32  ;;  %v1231_v12 = vsel %vm1142_vm0, %v1228_v32, %v1230_v61  ;;  %v1542_v8 = vsel %vm1455_vm1, %v1540_v34, %v1541_v44  ;;  %v1853_v49 = vrot.slane %v998_v52, 3 }
 0x18e   : > { %v5090_v54 = vmax.f32 %v4946_v45, %v4990_v46  ;;  %v1233_v25 = vsel %vm1142_vm0, %v1230_v61, %v1232_v3  ;;  %v1419_v5 = vmax.f32 %v998_v52, %v1229_v28  ;;  %v1420_v55 = vmax.f32 %v999_v31, %v1231_v12 }
 0x18f   : > { %v1421_v11 = vmax.f32 %v1000_v40, %v1233_v25  ;;  %v1544_v41 = vsel %vm1455_vm1, %v1541_v44, %v1543_v6  ;;  %v1546_v58 = vsel %vm1455_vm1, %v1543_v6, %v1545_v35  ;;  %v1854_v4 = vrot.slane %v999_v31, 3 }
 0x190   : > { %v1732_v56 = vmax.f32 %v1419_v5, %v1542_v8  ;;  %v1733_v62 = vmax.f32 %v1420_v55, %v1544_v41  ;;  %v1856_v30 = vrot.slane %v1000_v40, 3  ;;  %v1858_v13 = vrot.slane %v1001_v36, 3 }
 0x191   : > { %v1734_v14 = vmax.f32 %v1421_v11, %v1546_v58  ;;  %v1855_v32 = vsel %vm1768_vm2, %v1853_v49, %v1854_v4  ;;  %v2166_v34 = vrot.slane %v998_v52, 4  ;;  %v2167_v9 = vrot.slane %v999_v31, 4  ;;  %v5865_v58 = vld [vmem:[#allocation2 + $0x140] sm:$0xff] }
 0x192   : > { %v1857_v46 = vsel %vm1768_vm2, %v1854_v4, %v1856_v30  ;;  %v1859_v61 = vsel %vm1768_vm2, %v1856_v30, %v1858_v13  ;;  %v2045_v45 = vmax.f32 %v1732_v56, %v1855_v32  ;;  %v2169_v3 = vrot.slane %v1000_v40, 4  ;;  %v5866_v13 = vld [vmem:[#allocation2 + $0x148] sm:$0xff] }
 0x193   : > { %v2046_v28 = vmax.f32 %v1733_v62, %v1857_v46  ;;  %v2047_v44 = vmax.f32 %v1734_v14, %v1859_v61  ;;  %v2168_v6 = vsel %vm2081_vm3, %v2166_v34, %v2167_v9  ;;  %v2171_v35 = vrot.slane %v1001_v36, 4 }
 0x194   : > { %v2170_v12 = vsel %vm2081_vm3, %v2167_v9, %v2169_v3  ;;  %v7957_v8 = vmax.f32 %v2045_v45, %v2168_v6  ;;  %v2822_v49 = vmax.f32 %v7113_v0, %v7570_v26  ;;  %v2823_v52 = vmax.f32 %v7118_v53, %v7572_v59  ;;  %v332_v6 = vld [vmem:[%s6242_s22 + $0xc0] sm:$0xff] }
 0x195   : > { %5169 = vmatmul.f32.gmra.mxu3 %v5090_v54  ;;  %v2172_v30 = vsel %vm2081_vm3, %v2169_v3, %v2171_v35  ;;  %v7964_v56 = vmax.f32 %v2046_v28, %v2170_v12  ;;  %v2881_v14 = vmax.f32 %v2821_v7, %v7670_v24  ;;  %v4311_v31 = vmax.f32 %v7396_v23, %v7613_v17  ;;  %v333_v35 = vld [vmem:[%s6242_s22 + $0xc8] sm:$0xff] }
 0x196   : > { %v7969_v40 = vmax.f32 %v2047_v44, %v2172_v30  ;;  %v2882_v9 = vmax.f32 %v2822_v49, %v7672_v60  ;;  %v2883_v36 = vmax.f32 %v2823_v52, %v7684_v57  ;;  %v4312_v25 = vmax.f32 %v7398_v19, %v7617_v38  ;;  %365 = vst [vmem:[#allocation2 + $0x246] sm:$0xff] %v332_v6 }
 0x197   : > { %v2941_v54 = vmax.f32 %v2881_v14, %v7825_v39  ;;  %v7977_v5 = vmax.f32 %v4311_v31, %v7736_v51  ;;  %v2462_v55 = vrot.slane %v7108_v20, 4  ;;  %v2463_v7 = vrot.slane %v7113_v0, 4  ;;  %366 = vst [vmem:[#allocation2 + $0x24e] sm:$0xff] %v333_v35 }
 0x198   : > { %v2942_v23 = vmax.f32 %v2882_v9, %v7836_v15  ;;  %v2943_v11 = vmax.f32 %v2883_v36, %v7841_v2  ;;  %v7984_v41 = vmax.f32 %v4312_v25, %v7738_v21  ;;  %v554_v4 = vrot.slane %v5865_v58, 6 }
 0x199   : > { %v3001_v19 = vmax.f32 %v2941_v54, %v7957_v8  ;;  %v2464_v20 = vsel %vm2081_vm3, %v2462_v55, %v2463_v7  ;;  %v555_v0 = vrot.slane %v5866_v13, 6  ;;  %v4048_v61 = vrot.slane %v7754_v47, 2 }
 0x19a   : > { %v3002_v32 = vmax.f32 %v2942_v23, %v7964_v56  ;;  %v7992_v34 = vmax.f32 %v2943_v11, %v7969_v40  ;;  %v4408_v46 = vmax.f32 %v7984_v41, %v7895_v63  ;;  %2611 = vmatmul.f32.gmra.mxu0 %v2464_v20 }
 0x19b   : > { %v3137_v45 = vrot.slane %v3001_v19, 1  ;;  %v3357_v3 = vrot.slane %v3001_v19, 2  ;;  %v3577_v28 = vrot.slane %v3001_v19, 3  ;;  %v3797_v44 = vrot.slane %v3001_v19, 4 }
 0x19c   : > { %v3138_v12 = vrot.slane %v3002_v32, 1  ;;  %v3140_v49 = vrot.slane %v7992_v34, 1  ;;  %v3358_v52 = vrot.slane %v3002_v32, 2  ;;  %v3360_v30 = vrot.slane %v7992_v34, 2 }
 0x19d   : > { %v3578_v14 = vrot.slane %v3002_v32, 3  ;;  %v3580_v31 = vrot.slane %v7992_v34, 3  ;;  %v3798_v9 = vrot.slane %v3002_v32, 4  ;;  %v3800_v36 = vrot.slane %v7992_v34, 4 }
 0x19e   : > { %v3139_v25 = vsel %vm1142_vm0, %v3137_v45, %v3138_v12  ;;  %v3141_v54 = vsel %vm1142_vm0, %v3138_v12, %v3140_v49  ;;  %v3359_v55 = vsel %vm1455_vm1, %v3357_v3, %v3358_v52  ;;  %v3361_v23 = vsel %vm1455_vm1, %v3358_v52, %v3360_v30 }
 0x19f   : > { %v3281_v11 = vmax.f32 %v3001_v19, %v3139_v25  ;;  %v3282_v41 = vmax.f32 %v3002_v32, %v3141_v54  ;;  %v3579_v58 = vsel %vm1768_vm2, %v3577_v28, %v3578_v14  ;;  %v3581_v20 = vsel %vm1768_vm2, %v3578_v14, %v3580_v31 }
 0x1a0   : > { %v3799_v13 = vsel %vm2081_vm3, %v3797_v44, %v3798_v9  ;;  %v3801_v6 = vsel %vm2081_vm3, %v3798_v9, %v3800_v36  ;;  %v556_v35 = vsel %vm533_vm4, %v554_v4, %v555_v0  ;;  %v10124_v45 = vrot.slane %v7738_v21, 2  ;;  %v5867_v44 = vld [vmem:[#allocation2 + $0x150] sm:$0xff] }
 0x1a1   : > { %v3501_v62 = vmax.f32 %v3281_v11, %v3359_v55  ;;  %v3502_v3 = vmax.f32 %v3282_v41, %v3361_v23  ;;  %2724 = vmatmul.f32.gmra.mxu1 %v556_v35  ;;  %v3283_v19 = vmax.f32 %v7992_v34, %v3140_v49  ;;  %v2465_v32 = vrot.slane %v7118_v53, 4  ;;  %v10125_v11 = vld [vmem:[#allocation22_spill] sm:$0xff]  ;;  %v10126_v41 = vld [vmem:[#allocation23_spill] sm:$0xff] }
 0x1a2   : > { %v4049_v12 = vsel %vm1455_vm1, %v10124_v45, %v4048_v61  ;;  %v4313_v28 = vmax.f32 %v7505_v50, %v7628_v37  ;;  %v557_v52 = vrot.slane %v5867_v44, 6  ;;  %v4050_v14 = vrot.slane %v7890_v48, 2  ;;  %v10128_v35 = vld [vmem:[#allocation14_spill] sm:$0xff]  ;;  %v10132_v44 = vld [vmem:[#allocation17_spill] sm:$0xff] }
 0x1a3   : > { %4197 = vmatmul.f32.gmra.mxu2 %v4049_v12  ;;  %v9815_v4 = vrot.slane %v7895_v63, 2  ;;  %v3721_v9 = vmax.f32 %v3501_v62, %v3579_v58  ;;  %v3722_v25 = vmax.f32 %v3502_v3, %v3581_v20  ;;  %v3503_v61 = vmax.f32 %v3283_v19, %v3360_v30  ;;  %v10127_v20 = vld [vmem:[#allocation11_spill] sm:$0xff] }
 0x1a4   : > { %v2466_v54 = vsel %vm2081_vm3, %v2463_v7, %v2465_v32  ;;  %v4361_v55 = vmax.f32 %v4313_v28, %v7754_v47  ;;  %v558_v34 = vsel %vm533_vm4, %v555_v0, %v557_v52  ;;  %v714_v50 = vmax.f32 %v7748_v16, %v7776_v43  ;;  %v10131_v32 = vld [vmem:[#allocation27_spill] sm:$0xff] }
 0x1a5   : > { %2614 = vmatmul.f32.gmra.mxu0 %v2466_v54  ;;  %v4052_v53 = vsel %vm1455_vm1, %v4050_v14, %v9815_v4  ;;  %v8029_v49 = vmax.f32 %v3721_v9, %v3799_v13  ;;  %v8031_v23 = vmax.f32 %v3722_v25, %v3801_v6  ;;  %v3723_v62 = vmax.f32 %v3503_v61, %v3580_v31 }
 0x1a6   : > { %v715_v7 = vmax.f32 %v7756_v27, %v10113_v42  ;;  %v4409_v30 = vmax.f32 %v4361_v55, %v7908_v18  ;;  %v716_v0 = vmax.f32 %v10125_v11, %v7800_v10  ;;  %v810_v58 = vmax.f32 %v714_v50, %v10126_v41  ;;  %v8061_v11 = vld [vmem:[#allocation2 + $0x228] sm:$0xff] }
 0x1a7   : > { %v10129_v45 = vmax.f32 %v10127_v20, %v10128_v35  ;;  %v10130_v13 = vmax.f32 %v7977_v5, %v7890_v48  ;;  %v4456_v6 = vmax.f32 %v4408_v46, %v8031_v23  ;;  %v8048_v27 = vmax.f32 %v3723_v62, %v3800_v36  ;;  %10134 = vst [vmem:[#allocation29_spill] sm:$0xff] %v8061_v11 }
 0x1a8   : > { %v811_v12 = vmax.f32 %v715_v7, %v7794_v22  ;;  %v812_v3 = vmax.f32 %v716_v0, %v10121_v1  ;;  %v906_v19 = vmax.f32 %v810_v58, %v7924_v29  ;;  %v8059_v7 = vld [vmem:[#allocation2 + $0x220] sm:$0xff]  ;;  %v8063_v0 = vld [vmem:[#allocation2 + $0x230] sm:$0xff]  ;;  %v10136_v58 = vld [vmem:[#allocation8_spill] sm:$0xff] }
 0x1a9   : > { %v813_v16 = vmax.f32 %v10129_v45, %v10123_v33  ;;  %v4455_v31 = vmax.f32 %v10130_v13, %v8029_v49  ;;  %v4560_v9 = vrot.slane %v4456_v6, 1  ;;  %v4704_v5 = vrot.slane %v4456_v6, 2  ;;  %2727 = vmatmul.f32.gmra.mxu1 %v558_v34  ;;  %10133 = vst [vmem:[#allocation28_spill] sm:$0xff] %v8059_v7  ;;  %v10137_v45 = vld [vmem:[#allocation26_spill] sm:$0xff] }
 0x1aa   : > { %v4848_v36 = vrot.slane %v4456_v6, 3  ;;  %v4992_v54 = vrot.slane %v4456_v6, 4  ;;  %v4457_v62 = vmax.f32 %v4409_v30, %v8048_v27  ;;  %10135 = vst [vmem:[#allocation30_spill] sm:$0xff] %v8063_v0  ;;  %v907_v20 = vmax.f32 %v811_v12, %v10136_v58  ;;  %v8069_v30 = vld [vmem:[#allocation2 + $0x238] sm:$0xf] }
 0x1ab   : > { %v909_v28 = vmax.f32 %v813_v16, %v10131_v32  ;;  %v4559_v14 = vrot.slane %v4455_v31, 1  ;;  %v4703_v25 = vrot.slane %v4455_v31, 2  ;;  %4200 = vmatmul.f32.gmra.mxu2 %v4052_v53  ;;  %v4847_v46 = vrot.slane %v4455_v31, 3  ;;  %10138 = vst [vmem:[#allocation31_spill] sm:$0xff] %v8069_v30 }
 0x1ac   : > { %v4991_v61 = vrot.slane %v4455_v31, 4  ;;  %v908_v16 = vmax.f32 %v812_v3, %v10137_v45  ;;  %v4562_v13 = vrot.slane %v4457_v62, 1  ;;  %v4994_v4 = vrot.slane %v4457_v62, 4 }
 0x1ad   : > { %v4561_v55 = vsel %vm1142_vm0, %v4559_v14, %v4560_v9  ;;  %v4705_v50 = vsel %vm1455_vm1, %v4703_v25, %v4704_v5  ;;  %v4849_v53 = vsel %vm1768_vm2, %v4847_v46, %v4848_v36  ;;  %v4706_v14 = vrot.slane %v4457_v62, 2 }
 0x1ae   : > { %v4659_v34 = vmax.f32 %v4455_v31, %v4561_v55  ;;  %v4993_v35 = vsel %vm2081_vm3, %v4991_v61, %v4992_v54  ;;  %v4850_v25 = vrot.slane %v4457_v62, 3  ;;  %v1002_v32 = vmax.f32 %v906_v19, %v8059_v7 }
 0x1af   : > { %v1003_v29 = vmax.f32 %v907_v20, %v8061_v11  ;;  %v1004_v12 = vmax.f32 %v908_v16, %v8063_v0  ;;  %v4563_v31 = vsel %vm1142_vm0, %v4560_v9, %v4562_v13  ;;  %v4707_v46 = vsel %vm1455_vm1, %v4704_v5, %v4706_v14 }
 0x1b0   : > { %v4803_v52 = vmax.f32 %v4659_v34, %v4705_v50  ;;  %v4851_v61 = vsel %vm1768_vm2, %v4848_v36, %v4850_v25  ;;  %v4995_v3 = vsel %vm2081_vm3, %v4992_v54, %v4994_v4  ;;  %v4660_v45 = vmax.f32 %v4456_v6, %v4563_v31 }
 0x1b1   : > { %v1005_v62 = vmax.f32 %v909_v28, %v8069_v30  ;;  %v1234_v58 = vrot.slane %v1002_v32, 1  ;;  %v1235_v50 = vrot.slane %v1003_v29, 1  ;;  %v1237_v34 = vrot.slane %v1004_v12, 1 }
 0x1b2   : > { %v4947_v55 = vmax.f32 %v4803_v52, %v4849_v53  ;;  %v1547_v19 = vrot.slane %v1002_v32, 2  ;;  %v1548_v7 = vrot.slane %v1003_v29, 2  ;;  %v4804_v11 = vmax.f32 %v4660_v45, %v4707_v46 }
 0x1b3   : > { %v1239_v16 = vrot.slane %v1005_v62, 1  ;;  %v1550_v0 = vrot.slane %v1004_v12, 2  ;;  %v1236_v9 = vsel %vm1142_vm0, %v1234_v58, %v1235_v50  ;;  %v1238_v5 = vsel %vm1142_vm0, %v1235_v50, %v1237_v34 }
 0x1b4   : > { %v5091_v20 = vmax.f32 %v4947_v55, %v4993_v35  ;;  %v1549_v36 = vsel %vm1455_vm1, %v1547_v19, %v1548_v7  ;;  %v1552_v4 = vrot.slane %v1005_v62, 2  ;;  %v4948_v6 = vmax.f32 %v4804_v11, %v4851_v61 }
 0x1b5   : > { %v1240_v28 = vsel %vm1142_vm0, %v1237_v34, %v1239_v16  ;;  %v1422_v52 = vmax.f32 %v1002_v32, %v1236_v9  ;;  %v1423_v54 = vmax.f32 %v1003_v29, %v1238_v5  ;;  %v1551_v13 = vsel %vm1455_vm1, %v1548_v7, %v1550_v0 }
 0x1b6   : > { %5172 = vmatmul.f32.gmra.mxu3 %v5091_v20  ;;  %v1424_v53 = vmax.f32 %v1004_v12, %v1240_v28  ;;  %v1553_v35 = vsel %vm1455_vm1, %v1550_v0, %v1552_v4  ;;  %v1860_v45 = vrot.slane %v1002_v32, 3  ;;  %v5092_v14 = vmax.f32 %v4948_v6, %v4995_v3 }
 0x1b7   : > { %v1735_v25 = vmax.f32 %v1422_v52, %v1549_v36  ;;  %v1736_v58 = vmax.f32 %v1423_v54, %v1551_v13  ;;  %v1861_v31 = vrot.slane %v1003_v29, 3  ;;  %v1863_v55 = vrot.slane %v1004_v12, 3 }
 0x1b8   : > { %v1737_v46 = vmax.f32 %v1424_v53, %v1553_v35  ;;  %v1865_v50 = vrot.slane %v1005_v62, 3  ;;  %v2173_v19 = vrot.slane %v1002_v32, 4  ;;  %v2174_v61 = vrot.slane %v1003_v29, 4 }
 0x1b9   : > { %v1862_v11 = vsel %vm1768_vm2, %v1860_v45, %v1861_v31  ;;  %v2176_v34 = vrot.slane %v1004_v12, 4  ;;  %v2178_v20 = vrot.slane %v1005_v62, 4  ;;  %v1864_v16 = vsel %vm1768_vm2, %v1861_v31, %v1863_v55 }
 0x1ba   : > { %v1866_v7 = vsel %vm1768_vm2, %v1863_v55, %v1865_v50  ;;  %v2048_v9 = vmax.f32 %v1735_v25, %v1862_v11  ;;  %v2825_v0 = vmax.f32 %v7570_v26, %v7672_v60  ;;  %v2049_v3 = vmax.f32 %v1736_v58, %v1864_v16 }
 0x1bb   : > { %v2050_v5 = vmax.f32 %v1737_v46, %v1866_v7  ;;  %v2175_v36 = vsel %vm2081_vm3, %v2173_v19, %v2174_v61  ;;  %v2177_v4 = vsel %vm2081_vm3, %v2174_v61, %v2176_v34  ;;  %v2179_v32 = vsel %vm2081_vm3, %v2176_v34, %v2178_v20  ;;  %v10140_v46 = vld [vmem:[#allocation18_spill] sm:$0xff] }
 0x1bc   : > { %v8093_v6 = vmax.f32 %v2048_v9, %v2175_v36  ;;  %v2826_v29 = vmax.f32 %v7572_v59, %v7684_v57  ;;  %v10139_v12 = vmax.f32 %v10132_v44, %v7670_v24  ;;  %v8101_v28 = vmax.f32 %v2049_v3, %v2177_v4  ;;  %v334_v4 = vld [vmem:[%s6242_s22 + $0xd0] sm:$0xff] }
 0x1bd   : > { %v8103_v52 = vmax.f32 %v2050_v5, %v2179_v32  ;;  %v2885_v54 = vmax.f32 %v2825_v0, %v7836_v15  ;;  %v4314_v53 = vmax.f32 %v7613_v17, %v7736_v51  ;;  %v4315_v45 = vmax.f32 %v7617_v38, %v7738_v21  ;;  %v10141_v38 = vld [vmem:[#allocation19_spill] sm:$0xff]  ;;  %v335_v32 = vld [vmem:[%s6242_s22 + $0xd8] sm:$0xff]  ;;  %367 = vst [vmem:[#allocation2 + $0x266] sm:$0xff] %v334_v4 }
 0x1be   : > { %v2884_v62 = vmax.f32 %v10139_v12, %v7825_v39  ;;  %5175 = vmatmul.f32.gmra.mxu3 %v5092_v14  ;;  %v2886_v13 = vmax.f32 %v2826_v29, %v7841_v2  ;;  %v2467_v25 = vrot.slane %v10132_v44, 4  ;;  %v2468_v31 = vrot.slane %v7570_v26, 4  ;;  %368 = vst [vmem:[#allocation2 + $0x26e] sm:$0xff] %v335_v32 }
 0x1bf   : > { %v2945_v14 = vmax.f32 %v2885_v54, %v7964_v56  ;;  %v8115_v58 = vmax.f32 %v4314_v53, %v7890_v48  ;;  %v559_v55 = vrot.slane %v10140_v46, 6  ;;  %v8122_v19 = vmax.f32 %v4315_v45, %v7895_v63 }
 0x1c0   : > { %v2944_v35 = vmax.f32 %v2884_v62, %v7957_v8  ;;  %v2946_v17 = vmax.f32 %v2886_v13, %v7969_v40  ;;  %v560_v44 = vrot.slane %v10141_v38, 6  ;;  %v2469_v26 = vsel %vm2081_vm3, %v2467_v25, %v2468_v31 }
 0x1c1   : > { %v3005_v11 = vmax.f32 %v2945_v14, %v8101_v28  ;;  %v4410_v61 = vmax.f32 %v8115_v58, %v8029_v49  ;;  %v4053_v34 = vrot.slane %v7908_v18, 2  ;;  %2617 = vmatmul.f32.gmra.mxu0 %v2469_v26  ;;  %v10142_v4 = vrot.slane %v7895_v63, 2 }
 0x1c2   : > { %v3004_v50 = vmax.f32 %v2944_v35, %v8093_v6  ;;  %v3006_v20 = vmax.f32 %v2946_v17, %v8103_v52 }
 0x1c3   : > { %v3143_v0 = vrot.slane %v3005_v11, 1  ;;  %v3363_v3 = vrot.slane %v3005_v11, 2  ;;  %v3583_v5 = vrot.slane %v3005_v11, 3  ;;  %v3803_v54 = vrot.slane %v3005_v11, 4 }
 0x1c4   : > { %v3142_v16 = vrot.slane %v3004_v50, 1  ;;  %v3362_v7 = vrot.slane %v3004_v50, 2  ;;  %v3582_v9 = vrot.slane %v3004_v50, 3  ;;  %v3802_v36 = vrot.slane %v3004_v50, 4 }
 0x1c5   : > { %v3145_v29 = vrot.slane %v3006_v20, 1  ;;  %v3365_v12 = vrot.slane %v3006_v20, 2  ;;  %v3585_v62 = vrot.slane %v3006_v20, 3  ;;  %v3805_v45 = vrot.slane %v3006_v20, 4 }
 0x1c6   : > { %v3144_v53 = vsel %vm1142_vm0, %v3142_v16, %v3143_v0  ;;  %v3364_v13 = vsel %vm1455_vm1, %v3362_v7, %v3363_v3  ;;  %v3584_v35 = vsel %vm1768_vm2, %v3582_v9, %v3583_v5  ;;  %v3804_v38 = vsel %vm2081_vm3, %v3802_v36, %v3803_v54 }
 0x1c7   : > { %v3146_v25 = vsel %vm1142_vm0, %v3143_v0, %v3145_v29  ;;  %v3284_v14 = vmax.f32 %v3004_v50, %v3144_v53  ;;  %v3366_v58 = vsel %vm1455_vm1, %v3363_v3, %v3365_v12  ;;  %v3586_v46 = vsel %vm1768_vm2, %v3583_v5, %v3585_v62  ;;  %v10143_v5 = vld [vmem:[#allocation20_spill] sm:$0xff] }
 0x1c8   : > { %v3285_v17 = vmax.f32 %v3005_v11, %v3146_v25  ;;  %v3806_v26 = vsel %vm2081_vm3, %v3803_v54, %v3805_v45  ;;  %v4411_v16 = vmax.f32 %v8122_v19, %v8031_v23  ;;  %v561_v9 = vsel %vm533_vm4, %v559_v55, %v560_v44 }
 0x1c9   : > { %v3504_v7 = vmax.f32 %v3284_v14, %v3364_v13  ;;  %v4054_v0 = vsel %vm1455_vm1, %v10142_v4, %v4053_v34  ;;  %v3286_v50 = vmax.f32 %v3006_v20, %v3145_v29  ;;  %2730 = vmatmul.f32.gmra.mxu1 %v561_v9  ;;  %v4316_v11 = vmax.f32 %v7628_v37, %v7754_v47  ;;  %v10149_v9 = vld [vmem:[#allocation26_spill] sm:$0xff] }
 0x1ca   : > { %v3505_v32 = vmax.f32 %v3285_v17, %v3366_v58  ;;  %4203 = vmatmul.f32.gmra.mxu2 %v4054_v0  ;;  %v2470_v3 = vrot.slane %v7572_v59, 4  ;;  %v562_v36 = vrot.slane %v10143_v5, 6  ;;  %v4055_v53 = vrot.slane %v8029_v49, 2  ;;  %v10151_v5 = vld [vmem:[#allocation28_spill] sm:$0xff] }
 0x1cb   : > { %v3724_v54 = vmax.f32 %v3504_v7, %v3584_v35  ;;  %v3506_v19 = vmax.f32 %v3286_v50, %v3365_v12  ;;  %v9824_v55 = vrot.slane %v8031_v23, 2  ;;  %v4364_v34 = vmax.f32 %v4316_v11, %v7908_v18  ;;  %v10150_v11 = vld [vmem:[#allocation27_spill] sm:$0xff] }
 0x1cc   : > { %v3725_v13 = vmax.f32 %v3505_v32, %v3586_v46  ;;  %v2471_v20 = vsel %vm2081_vm3, %v2468_v31, %v2470_v3  ;;  %v563_v29 = vsel %vm533_vm4, %v560_v44, %v562_v36  ;;  %v718_v12 = vmax.f32 %v7776_v43, %v10126_v41  ;;  %v10146_v46 = vld [vmem:[#allocation21_spill] sm:$0xff]  ;;  %v10148_v41 = vld [vmem:[#allocation8_spill] sm:$0xff] }
 0x1cd   : > { %v8156_v25 = vmax.f32 %v3724_v54, %v3804_v38  ;;  %v3726_v37 = vmax.f32 %v3506_v19, %v3585_v62  ;;  %2620 = vmatmul.f32.gmra.mxu0 %v2471_v20  ;;  %v4057_v59 = vsel %vm1455_vm1, %v4055_v53, %v9824_v55  ;;  %v4412_v14 = vmax.f32 %v4364_v34, %v8048_v27  ;;  %v10147_v38 = vld [vmem:[#allocation25_spill] sm:$0xff] }
 0x1ce   : > { %v8163_v35 = vmax.f32 %v3725_v13, %v3806_v26  ;;  %v719_v31 = vmax.f32 %v10113_v42, %v7794_v22  ;;  %v720_v44 = vmax.f32 %v7800_v10, %v10121_v1  ;;  %v721_v17 = vmax.f32 %v10146_v46, %v10123_v33  ;;  %v10152_v54 = vld [vmem:[#allocation29_spill] sm:$0xff]  ;;  %v8195_v46 = vld [vmem:[#allocation2 + $0x258] sm:$0xf] }
 0x1cf   : > { %10144 = vst [vmem:[#allocation10_spill] sm:$0xff] %v8156_v25  ;;  %v4458_v62 = vmax.f32 %v4410_v61, %v8156_v25  ;;  %v8171_v58 = vmax.f32 %v3726_v37, %v3805_v45  ;;  %v814_v7 = vmax.f32 %v718_v12, %v10147_v38 }
 0x1d0   : > { %10145 = vst [vmem:[#allocation32_spill] sm:$0xff] %v8163_v35  ;;  %v4459_v43 = vmax.f32 %v4411_v16, %v8163_v35  ;;  %v815_v26 = vmax.f32 %v719_v31, %v10148_v41  ;;  %v816_v4 = vmax.f32 %v720_v44, %v10149_v9  ;;  %v8182_v16 = vld [vmem:[#allocation2 + $0x240] sm:$0xff]  ;;  %v817_v3 = vmax.f32 %v721_v17, %v10150_v11  ;;  %v8193_v31 = vld [vmem:[#allocation2 + $0x250] sm:$0xff]  ;;  %v10154_v17 = vld [vmem:[#allocation30_spill] sm:$0xff] }
 0x1d1   : > { %v4564_v42 = vrot.slane %v4458_v62, 1  ;;  %v4708_v10 = vrot.slane %v4458_v62, 2  ;;  %v4852_v1 = vrot.slane %v4458_v62, 3  ;;  %v4996_v61 = vrot.slane %v4458_v62, 4  ;;  %2733 = vmatmul.f32.gmra.mxu1 %v563_v29  ;;  %10153 = vst [vmem:[#allocation33_spill] sm:$0xff] %v8195_v46 }
 0x1d2   : > { %v4565_v45 = vrot.slane %v4459_v43, 1  ;;  %v4709_v0 = vrot.slane %v4459_v43, 2  ;;  %v4853_v50 = vrot.slane %v4459_v43, 3  ;;  %v4997_v32 = vrot.slane %v4459_v43, 4  ;;  %4206 = vmatmul.f32.gmra.mxu2 %v4057_v59 }
 0x1d3   : > { %v4460_v33 = vmax.f32 %v4412_v14, %v8171_v58  ;;  %v910_v36 = vmax.f32 %v814_v7, %v10151_v5  ;;  %v911_v19 = vmax.f32 %v815_v26, %v10152_v54  ;;  %v8191_v14 = vld [vmem:[#allocation2 + $0x248] sm:$0xff]  ;;  %v912_v7 = vmax.f32 %v816_v4, %v10154_v17 }
 0x1d4   : > { %v4566_v53 = vsel %vm1142_vm0, %v4564_v42, %v4565_v45  ;;  %v4710_v13 = vsel %vm1455_vm1, %v4708_v10, %v4709_v0  ;;  %v4854_v34 = vsel %vm1768_vm2, %v4852_v1, %v4853_v50  ;;  %v4998_v20 = vsel %vm2081_vm3, %v4996_v61, %v4997_v32 }
 0x1d5   : > { %v4661_v29 = vmax.f32 %v4458_v62, %v4566_v53  ;;  %v4567_v37 = vrot.slane %v4460_v33, 1  ;;  %v4711_v59 = vrot.slane %v4460_v33, 2  ;;  %v4855_v12 = vrot.slane %v4460_v33, 3 }
 0x1d6   : > { %v4999_v44 = vrot.slane %v4460_v33, 4  ;;  %v913_v26 = vmax.f32 %v817_v3, %v8069_v30  ;;  %v1006_v42 = vmax.f32 %v910_v36, %v8182_v16  ;;  %v1007_v33 = vmax.f32 %v911_v19, %v8191_v14 }
 0x1d7   : > { %v4805_v10 = vmax.f32 %v4661_v29, %v4710_v13  ;;  %v4568_v1 = vsel %vm1142_vm0, %v4565_v45, %v4567_v37  ;;  %v4712_v62 = vsel %vm1455_vm1, %v4709_v0, %v4711_v59  ;;  %v4856_v61 = vsel %vm1768_vm2, %v4853_v50, %v4855_v12 }
 0x1d8   : > { %v4662_v53 = vmax.f32 %v4459_v43, %v4568_v1  ;;  %v5000_v55 = vsel %vm2081_vm3, %v4997_v32, %v4999_v44  ;;  %v1008_v22 = vmax.f32 %v912_v7, %v8193_v31  ;;  %v1009_v4 = vmax.f32 %v913_v26, %v8195_v46 }
 0x1d9   : > { %v4949_v54 = vmax.f32 %v4805_v10, %v4854_v34  ;;  %v1241_v3 = vrot.slane %v1006_v42, 1  ;;  %v1554_v30 = vrot.slane %v1006_v42, 2  ;;  %v1242_v13 = vrot.slane %v1007_v33, 1 }
 0x1da   : > { %v4806_v36 = vmax.f32 %v4662_v53, %v4712_v62  ;;  %v1244_v29 = vrot.slane %v1008_v22, 1  ;;  %v1555_v45 = vrot.slane %v1007_v33, 2  ;;  %v1246_v0 = vrot.slane %v1009_v4, 1 }
 0x1db   : > { %v5093_v37 = vmax.f32 %v4949_v54, %v4998_v20  ;;  %v1557_v59 = vrot.slane %v1008_v22, 2  ;;  %v1559_v50 = vrot.slane %v1009_v4, 2  ;;  %v1243_v32 = vsel %vm1142_vm0, %v1241_v3, %v1242_v13 }
 0x1dc   : > { %v4950_v43 = vmax.f32 %v4806_v36, %v4856_v61  ;;  %v1245_v19 = vsel %vm1142_vm0, %v1242_v13, %v1244_v29  ;;  %v1556_v12 = vsel %vm1455_vm1, %v1554_v30, %v1555_v45  ;;  %v1247_v34 = vsel %vm1142_vm0, %v1244_v29, %v1246_v0 }
 0x1dd   : > { %5178 = vmatmul.f32.gmra.mxu3 %v5093_v37  ;;  %v1425_v44 = vmax.f32 %v1006_v42, %v1243_v32  ;;  %v1426_v7 = vmax.f32 %v1007_v33, %v1245_v19  ;;  %v1558_v26 = vsel %vm1455_vm1, %v1555_v45, %v1557_v59  ;;  %v1427_v1 = vmax.f32 %v1008_v22, %v1247_v34 }
 0x1de   : > { %v5094_v10 = vmax.f32 %v4950_v43, %v5000_v55  ;;  %v1560_v54 = vsel %vm1455_vm1, %v1557_v59, %v1559_v50  ;;  %v1867_v20 = vrot.slane %v1006_v42, 3  ;;  %v1868_v53 = vrot.slane %v1007_v33, 3 }
 0x1df   : > { %v1738_v62 = vmax.f32 %v1425_v44, %v1556_v12  ;;  %v1739_v61 = vmax.f32 %v1426_v7, %v1558_v26  ;;  %v1870_v3 = vrot.slane %v1008_v22, 3  ;;  %v1740_v36 = vmax.f32 %v1427_v1, %v1560_v54 }
 0x1e0   : > { %v1872_v13 = vrot.slane %v1009_v4, 3  ;;  %v2180_v46 = vrot.slane %v1006_v42, 4  ;;  %v2181_v30 = vrot.slane %v1007_v33, 4  ;;  %v1869_v37 = vsel %vm1768_vm2, %v1867_v20, %v1868_v53 }
 0x1e1   : > { %v1871_v29 = vsel %vm1768_vm2, %v1868_v53, %v1870_v3  ;;  %v2183_v0 = vrot.slane %v1008_v22, 4  ;;  %v2185_v32 = vrot.slane %v1009_v4, 4  ;;  %v2051_v45 = vmax.f32 %v1738_v62, %v1869_v37 }
 0x1e2   : > { %v1873_v55 = vsel %vm1768_vm2, %v1870_v3, %v1872_v13  ;;  %v2052_v43 = vmax.f32 %v1739_v61, %v1871_v29  ;;  %v2182_v59 = vsel %vm2081_vm3, %v2180_v46, %v2181_v30  ;;  %v2828_v42 = vmax.f32 %v7672_v60, %v7836_v15 }
 0x1e3   : > { %v2053_v50 = vmax.f32 %v1740_v36, %v1873_v55  ;;  %v2184_v19 = vsel %vm2081_vm3, %v2181_v30, %v2183_v0  ;;  %v2186_v12 = vsel %vm2081_vm3, %v2183_v0, %v2185_v32  ;;  %v8221_v33 = vmax.f32 %v2051_v45, %v2182_v59  ;;  %v5869_v30 = vld [vmem:[#allocation2 + $0x188] sm:$0xff] }
 0x1e4   : > { %v8223_v34 = vmax.f32 %v2052_v43, %v2184_v19  ;;  %v2829_v22 = vmax.f32 %v7684_v57, %v7841_v2  ;;  %v10155_v4 = vmax.f32 %v7670_v24, %v7825_v39  ;;  %v2888_v7 = vmax.f32 %v2828_v42, %v7964_v56  ;;  %v337_v19 = vld [vmem:[%s6242_s22 + $0xe8] sm:$0xff] }
 0x1e5   : > { %5181 = vmatmul.f32.gmra.mxu3 %v5094_v10  ;;  %v8231_v44 = vmax.f32 %v2053_v50, %v2186_v12  ;;  %v4317_v26 = vmax.f32 %v7736_v51, %v7890_v48  ;;  %v4318_v1 = vmax.f32 %v7738_v21, %v7895_v63  ;;  %v2472_v62 = vrot.slane %v7670_v24, 4  ;;  %v5868_v51 = vld [vmem:[#allocation2 + $0x180] sm:$0xff]  ;;  %370 = vst [vmem:[#allocation2 + $0x28e] sm:$0xff] %v337_v19 }
 0x1e6   : > { %v2887_v46 = vmax.f32 %v10155_v4, %v7957_v8  ;;  %v2889_v54 = vmax.f32 %v2829_v22, %v7969_v40  ;;  %v2473_v61 = vrot.slane %v7672_v60, 4  ;;  %v2948_v10 = vmax.f32 %v2888_v7, %v8101_v28  ;;  %v336_v50 = vld [vmem:[%s6242_s22 + $0xe0] sm:$0xff] }
 0x1e7   : > { %10156 = vst [vmem:[#allocation35_spill] sm:$0xff] %v8231_v44  ;;  %v8244_v53 = vmax.f32 %v4317_v26, %v8029_v49  ;;  %v8247_v3 = vmax.f32 %v4318_v1, %v8031_v23  ;;  %v564_v36 = vrot.slane %v5868_v51, 6  ;;  %v565_v60 = vrot.slane %v5869_v30, 6 }
 0x1e8   : > { %v2947_v20 = vmax.f32 %v2887_v46, %v8093_v6  ;;  %v2949_v21 = vmax.f32 %v2889_v54, %v8103_v52  ;;  %v2474_v24 = vsel %vm2081_vm3, %v2472_v62, %v2473_v61  ;;  %v3008_v37 = vmax.f32 %v2948_v10, %v8223_v34  ;;  %369 = vst [vmem:[#allocation2 + $0x286] sm:$0xff] %v336_v50 }
 0x1e9   : > { %2623 = vmatmul.f32.gmra.mxu0 %v2474_v24  ;;  %v4058_v32 = vrot.slane %v8048_v27, 2  ;;  %v566_v19 = vsel %vm533_vm4, %v564_v36, %v565_v60 }
 0x1ea   : > { %v3007_v13 = vmax.f32 %v2947_v20, %v8221_v33  ;;  %v3009_v55 = vmax.f32 %v2949_v21, %v8231_v44  ;;  %v3148_v12 = vrot.slane %v3008_v37, 1  ;;  %v3368_v42 = vrot.slane %v3008_v37, 2  ;;  %2736 = vmatmul.f32.gmra.mxu1 %v566_v19 }
 0x1eb   : > { %v3588_v22 = vrot.slane %v3008_v37, 3  ;;  %v3808_v1 = vrot.slane %v3008_v37, 4 }
 0x1ec   : > { %v3147_v45 = vrot.slane %v3007_v13, 1  ;;  %v3367_v43 = vrot.slane %v3007_v13, 2  ;;  %v3587_v59 = vrot.slane %v3007_v13, 3  ;;  %v3807_v4 = vrot.slane %v3007_v13, 4 }
 0x1ed   : > { %v3150_v46 = vrot.slane %v3009_v55, 1  ;;  %v3370_v7 = vrot.slane %v3009_v55, 2  ;;  %v3590_v26 = vrot.slane %v3009_v55, 3  ;;  %v3810_v10 = vrot.slane %v3009_v55, 4 }
 0x1ee   : > { %v3149_v54 = vsel %vm1142_vm0, %v3147_v45, %v3148_v12  ;;  %v3369_v20 = vsel %vm1455_vm1, %v3367_v43, %v3368_v42  ;;  %v3589_v62 = vsel %vm1768_vm2, %v3587_v59, %v3588_v22  ;;  %v3809_v0 = vsel %vm2081_vm3, %v3807_v4, %v3808_v1 }
 0x1ef   : > { %v3151_v51 = vsel %vm1142_vm0, %v3148_v12, %v3150_v46  ;;  %v3287_v21 = vmax.f32 %v3007_v13, %v3149_v54  ;;  %v3371_v24 = vsel %vm1455_vm1, %v3368_v42, %v3370_v7  ;;  %v3591_v30 = vsel %vm1768_vm2, %v3588_v22, %v3590_v26  ;;  %v5870_v42 = vld [vmem:[#allocation2 + $0x190] sm:$0xff] }
 0x1f0   : > { %v3288_v50 = vmax.f32 %v3008_v37, %v3151_v51  ;;  %v3811_v29 = vsel %vm2081_vm3, %v3808_v1, %v3810_v10  ;;  %v10157_v43 = vrot.slane %v8031_v23, 2  ;;  %v3289_v44 = vmax.f32 %v3009_v55, %v3150_v46 }
 0x1f1   : > { %v3507_v45 = vmax.f32 %v3287_v21, %v3369_v20  ;;  %v4319_v13 = vmax.f32 %v7754_v47, %v7908_v18  ;;  %v2475_v37 = vrot.slane %v7684_v57, 4  ;;  %v567_v22 = vrot.slane %v5870_v42, 6  ;;  %v5871_v47 = vld [vmem:[#allocation2 + $0x1e0] sm:$0xff] }
 0x1f2   : > { %v4059_v59 = vsel %vm1455_vm1, %v10157_v43, %v4058_v32  ;;  %v3508_v12 = vmax.f32 %v3288_v50, %v3371_v24  ;;  %v4060_v4 = vrot.slane %v8156_v25, 2  ;;  %v3509_v36 = vmax.f32 %v3289_v44, %v3370_v7  ;;  %v5874_v50 = vld [vmem:[#allocation2 + $0x1f8] sm:$0xf]  ;;  %v10162_v43 = vld [vmem:[#allocation29_spill] sm:$0xff] }
 0x1f3   : > { %4209 = vmatmul.f32.gmra.mxu2 %v4059_v59  ;;  %v3727_v1 = vmax.f32 %v3507_v45, %v3589_v62  ;;  %v4367_v54 = vmax.f32 %v4319_v13, %v8048_v27  ;;  %v9831_v20 = vrot.slane %v8163_v35, 2  ;;  %v2476_v32 = vsel %vm2081_vm3, %v2473_v61, %v2475_v37  ;;  %v5872_v62 = vld [vmem:[#allocation2 + $0x1e8] sm:$0xff]  ;;  %v10163_v13 = vld [vmem:[#allocation31_spill] sm:$0xff] }
 0x1f4   : > { %v3728_v51 = vmax.f32 %v3508_v12, %v3591_v30  ;;  %v568_v55 = vsel %vm533_vm4, %v565_v60, %v567_v22  ;;  %v722_v46 = vmax.f32 %v5871_v47, %v10147_v38  ;;  %v3729_v57 = vmax.f32 %v3509_v36, %v3590_v26  ;;  %2626 = vmatmul.f32.gmra.mxu0 %v2476_v32  ;;  %v5873_v30 = vld [vmem:[#allocation2 + $0x1f0] sm:$0xff] }
 0x1f5   : > { %v8282_v21 = vmax.f32 %v3727_v1, %v3809_v0  ;;  %v4415_v24 = vmax.f32 %v4367_v54, %v8171_v58  ;;  %v4062_v44 = vsel %vm1455_vm1, %v4060_v4, %v9831_v20  ;;  %v723_v61 = vmax.f32 %v5872_v62, %v10148_v41  ;;  %2739 = vmatmul.f32.gmra.mxu1 %v568_v55 }
 0x1f6   : > { %v8288_v7 = vmax.f32 %v3728_v51, %v3811_v29  ;;  %v724_v60 = vmax.f32 %v5873_v30, %v10149_v9  ;;  %v725_v38 = vmax.f32 %v5874_v50, %v10150_v11  ;;  %v10160_v0 = vmax.f32 %v8244_v53, %v8156_v25  ;;  %v8312_v51 = vld [vmem:[#allocation2 + $0x268] sm:$0xff]  ;;  %v8321_v50 = vld [vmem:[#allocation2 + $0x270] sm:$0xff] }
 0x1f7   : > { %10158 = vst [vmem:[#allocation37_spill] sm:$0xff] %v8282_v21  ;;  %v8297_v19 = vmax.f32 %v3729_v57, %v3810_v10  ;;  %v818_v45 = vmax.f32 %v722_v46, %v10151_v5  ;;  %v10161_v41 = vmax.f32 %v8247_v3, %v8163_v35  ;;  %v819_v59 = vmax.f32 %v723_v61, %v10162_v43  ;;  %v8310_v3 = vld [vmem:[#allocation2 + $0x260] sm:$0xff] }
 0x1f8   : > { %10159 = vst [vmem:[#allocation36_spill] sm:$0xff] %v8288_v7  ;;  %v4461_v26 = vmax.f32 %v10160_v0, %v8282_v21  ;;  %v820_v11 = vmax.f32 %v724_v60, %v10154_v17  ;;  %v821_v12 = vmax.f32 %v725_v38, %v10163_v13  ;;  %v8323_v38 = vld [vmem:[#allocation2 + $0x278] sm:$0xf] }
 0x1f9   : > { %v4462_v9 = vmax.f32 %v10161_v41, %v8288_v7  ;;  %v4463_v54 = vmax.f32 %v4415_v24, %v8297_v19  ;;  %10164 = vst [vmem:[#allocation44_spill] sm:$0xff] %v8310_v3  ;;  %v914_v32 = vmax.f32 %v818_v45, %v8182_v16  ;;  %v915_v47 = vmax.f32 %v819_v59, %v8191_v14  ;;  %v10165_v45 = vld [vmem:[#allocation33_spill] sm:$0xff] }
 0x1fa   : > { %v4569_v53 = vrot.slane %v4461_v26, 1  ;;  %v4713_v37 = vrot.slane %v4461_v26, 2  ;;  %v4857_v10 = vrot.slane %v4461_v26, 3  ;;  %v5001_v42 = vrot.slane %v4461_v26, 4 }
 0x1fb   : > { %v4570_v22 = vrot.slane %v4462_v9, 1  ;;  %v4714_v4 = vrot.slane %v4462_v9, 2  ;;  %v4858_v1 = vrot.slane %v4462_v9, 3  ;;  %v5002_v36 = vrot.slane %v4462_v9, 4  ;;  %4212 = vmatmul.f32.gmra.mxu2 %v4062_v44 }
 0x1fc   : > { %v916_v46 = vmax.f32 %v820_v11, %v8193_v31  ;;  %v4572_v24 = vrot.slane %v4463_v54, 1  ;;  %v4716_v30 = vrot.slane %v4463_v54, 2  ;;  %v4860_v60 = vrot.slane %v4463_v54, 3 }
 0x1fd   : > { %v4571_v57 = vsel %vm1142_vm0, %v4569_v53, %v4570_v22  ;;  %v4715_v55 = vsel %vm1455_vm1, %v4713_v37, %v4714_v4  ;;  %v4859_v62 = vsel %vm1768_vm2, %v4857_v10, %v4858_v1  ;;  %v5003_v44 = vsel %vm2081_vm3, %v5001_v42, %v5002_v36 }
 0x1fe   : > { %v4663_v61 = vmax.f32 %v4461_v26, %v4571_v57  ;;  %v5004_v0 = vrot.slane %v4463_v54, 4  ;;  %v917_v41 = vmax.f32 %v821_v12, %v10165_v45  ;;  %v1010_v59 = vmax.f32 %v914_v32, %v8310_v3 }
 0x1ff   : > { %v1011_v11 = vmax.f32 %v915_v47, %v8312_v51  ;;  %v4573_v37 = vsel %vm1142_vm0, %v4570_v22, %v4572_v24  ;;  %v4717_v10 = vsel %vm1455_vm1, %v4714_v4, %v4716_v30  ;;  %v4861_v26 = vsel %vm1768_vm2, %v4858_v1, %v4860_v60 }
 0x200   : > { %v4807_v53 = vmax.f32 %v4663_v61, %v4715_v55  ;;  %v4664_v42 = vmax.f32 %v4462_v9, %v4573_v37  ;;  %v5005_v57 = vsel %vm2081_vm3, %v5002_v36, %v5004_v0  ;;  %v1012_v20 = vmax.f32 %v916_v46, %v8321_v50 }
 0x201   : > { %v1013_v54 = vmax.f32 %v917_v41, %v8323_v38  ;;  %v1248_v12 = vrot.slane %v1010_v59, 1  ;;  %v1249_v45 = vrot.slane %v1011_v11, 1  ;;  %v1561_v32 = vrot.slane %v1010_v59, 2 }
 0x202   : > { %v4951_v29 = vmax.f32 %v4807_v53, %v4859_v62  ;;  %v4808_v3 = vmax.f32 %v4664_v42, %v4717_v10  ;;  %v1251_v47 = vrot.slane %v1012_v20, 1  ;;  %v1562_v61 = vrot.slane %v1011_v11, 2 }
 0x203   : > { %v1253_v55 = vrot.slane %v1013_v54, 1  ;;  %v1250_v4 = vsel %vm1142_vm0, %v1248_v12, %v1249_v45  ;;  %v1564_v24 = vrot.slane %v1012_v20, 2  ;;  %v1566_v1 = vrot.slane %v1013_v54, 2 }
 0x204   : > { %v5095_v22 = vmax.f32 %v4951_v29, %v5003_v44  ;;  %v4952_v9 = vmax.f32 %v4808_v3, %v4861_v26  ;;  %v1252_v36 = vsel %vm1142_vm0, %v1249_v45, %v1251_v47  ;;  %v1428_v30 = vmax.f32 %v1010_v59, %v1250_v4 }
 0x205   : > { %v1254_v46 = vsel %vm1142_vm0, %v1251_v47, %v1253_v55  ;;  %v1429_v62 = vmax.f32 %v1011_v11, %v1252_v36  ;;  %v1563_v0 = vsel %vm1455_vm1, %v1561_v32, %v1562_v61  ;;  %v1565_v41 = vsel %vm1455_vm1, %v1562_v61, %v1564_v24 }
 0x206   : > { %5184 = vmatmul.f32.gmra.mxu3 %v5095_v22  ;;  %v1430_v60 = vmax.f32 %v1012_v20, %v1254_v46  ;;  %v5096_v53 = vmax.f32 %v4952_v9, %v5005_v57  ;;  %v1567_v29 = vsel %vm1455_vm1, %v1564_v24, %v1566_v1  ;;  %v1741_v44 = vmax.f32 %v1428_v30, %v1563_v0 }
 0x207   : > { %v1874_v37 = vrot.slane %v1010_v59, 3  ;;  %v1742_v10 = vmax.f32 %v1429_v62, %v1565_v41  ;;  %v1875_v3 = vrot.slane %v1011_v11, 3  ;;  %v1877_v26 = vrot.slane %v1012_v20, 3 }
 0x208   : > { %v1743_v42 = vmax.f32 %v1430_v60, %v1567_v29  ;;  %v1879_v45 = vrot.slane %v1013_v54, 3  ;;  %v2187_v12 = vrot.slane %v1010_v59, 4  ;;  %v2188_v47 = vrot.slane %v1011_v11, 4 }
 0x209   : > { %v2190_v55 = vrot.slane %v1012_v20, 4  ;;  %v1876_v22 = vsel %vm1768_vm2, %v1874_v37, %v1875_v3  ;;  %v1878_v4 = vsel %vm1768_vm2, %v1875_v3, %v1877_v26  ;;  %v2192_v32 = vrot.slane %v1013_v54, 4 }
 0x20a   : > { %v2831_v57 = vmax.f32 %v7836_v15, %v7964_v56  ;;  %v1880_v61 = vsel %vm1768_vm2, %v1877_v26, %v1879_v45  ;;  %v2054_v24 = vmax.f32 %v1741_v44, %v1876_v22  ;;  %v2055_v1 = vmax.f32 %v1742_v10, %v1878_v4  ;;  %v10169_v26 = vld [vmem:[#allocation35_spill] sm:$0xff]  ;;  %v5876_v22 = vld [vmem:[#allocation2 + $0x1a8] sm:$0xff] }
 0x20b   : > { %v2189_v9 = vsel %vm2081_vm3, %v2187_v12, %v2188_v47  ;;  %v2056_v36 = vmax.f32 %v1743_v42, %v1880_v61  ;;  %v2191_v46 = vsel %vm2081_vm3, %v2188_v47, %v2190_v55  ;;  %v2193_v59 = vsel %vm2081_vm3, %v2190_v55, %v2192_v32 }
 0x20c   : > { %v2832_v20 = vmax.f32 %v7841_v2, %v7969_v40  ;;  %v8350_v11 = vmax.f32 %v2054_v24, %v2189_v9  ;;  %v8352_v54 = vmax.f32 %v2055_v1, %v2191_v46  ;;  %v10167_v30 = vmax.f32 %v7825_v39, %v7957_v8  ;;  %v338_v46 = vld [vmem:[%s6242_s22 + $0xf0] sm:$0xff] }
 0x20d   : > { %v2891_v60 = vmax.f32 %v2831_v57, %v8101_v28  ;;  %v8359_v0 = vmax.f32 %v2056_v36, %v2193_v59  ;;  %v4320_v29 = vmax.f32 %v7890_v48, %v8029_v49  ;;  %v4321_v44 = vmax.f32 %v7895_v63, %v8031_v23  ;;  %v5875_v48 = vld [vmem:[#allocation2 + $0x1a0] sm:$0xff]  ;;  %v339_v59 = vld [vmem:[%s6242_s22 + $0xf8] sm:$0xff]  ;;  %371 = vst [vmem:[#allocation2 + $0x2a6] sm:$0xff] %v338_v46 }
 0x20e   : > { %10166 = vst [vmem:[#allocation53_spill] sm:$0xff] %v8352_v54  ;;  %v2890_v62 = vmax.f32 %v10167_v30, %v8093_v6  ;;  %5187 = vmatmul.f32.gmra.mxu3 %v5096_v53  ;;  %v2892_v41 = vmax.f32 %v2832_v20, %v8103_v52  ;;  %v2477_v42 = vrot.slane %v7825_v39, 4  ;;  %v2478_v3 = vrot.slane %v7836_v15, 4 }
 0x20f   : > { %10168 = vst [vmem:[#allocation45_spill] sm:$0xff] %v8359_v0  ;;  %v2951_v10 = vmax.f32 %v2891_v60, %v8223_v34  ;;  %v8372_v45 = vmax.f32 %v4320_v29, %v8156_v25  ;;  %v8375_v12 = vmax.f32 %v4321_v44, %v8163_v35  ;;  %v569_v47 = vrot.slane %v5875_v48, 6 }
 0x210   : > { %v2950_v37 = vmax.f32 %v2890_v62, %v8221_v33  ;;  %v2952_v53 = vmax.f32 %v2892_v41, %v10169_v26  ;;  %v2479_v39 = vsel %vm2081_vm3, %v2477_v42, %v2478_v3  ;;  %v570_v15 = vrot.slane %v5876_v22, 6  ;;  %372 = vst [vmem:[#allocation2 + $0x2ae] sm:$0xff] %v339_v59 }
 0x211   : > { %v3011_v55 = vmax.f32 %v2951_v10, %v8352_v54  ;;  %v4416_v32 = vmax.f32 %v8372_v45, %v8282_v21  ;;  %2629 = vmatmul.f32.gmra.mxu0 %v2479_v39  ;;  %v4063_v61 = vrot.slane %v8171_v58, 2 }
 0x212   : > { %v3010_v63 = vmax.f32 %v2950_v37, %v8350_v11  ;;  %v3012_v4 = vmax.f32 %v2952_v53, %v8359_v0 }
 0x213   : > { %v3153_v1 = vrot.slane %v3011_v55, 1  ;;  %v3373_v36 = vrot.slane %v3011_v55, 2  ;;  %v3593_v60 = vrot.slane %v3011_v55, 3  ;;  %v3813_v22 = vrot.slane %v3011_v55, 4 }
 0x214   : > { %v3152_v24 = vrot.slane %v3010_v63, 1  ;;  %v3372_v9 = vrot.slane %v3010_v63, 2  ;;  %v3155_v20 = vrot.slane %v3012_v4, 1  ;;  %v3375_v30 = vrot.slane %v3012_v4, 2 }
 0x215   : > { %v3592_v62 = vrot.slane %v3010_v63, 3  ;;  %v3595_v44 = vrot.slane %v3012_v4, 3  ;;  %v3812_v37 = vrot.slane %v3010_v63, 4  ;;  %v3815_v57 = vrot.slane %v3012_v4, 4 }
 0x216   : > { %v3154_v41 = vsel %vm1142_vm0, %v3152_v24, %v3153_v1  ;;  %v3374_v29 = vsel %vm1455_vm1, %v3372_v9, %v3373_v36  ;;  %v3156_v10 = vsel %vm1142_vm0, %v3153_v1, %v3155_v20  ;;  %v3376_v53 = vsel %vm1455_vm1, %v3373_v36, %v3375_v30 }
 0x217   : > { %v3290_v42 = vmax.f32 %v3010_v63, %v3154_v41  ;;  %v3594_v45 = vsel %vm1768_vm2, %v3592_v62, %v3593_v60  ;;  %v3291_v48 = vmax.f32 %v3011_v55, %v3156_v10  ;;  %v3596_v39 = vsel %vm1768_vm2, %v3593_v60, %v3595_v44  ;;  %v2701_v10 = vpop.f32.mrf.mxu1 }
 0x218   : > { %v571_v24 = vsel %vm533_vm4, %v569_v47, %v570_v15  ;;  %v10170_v9 = vrot.slane %v8163_v35, 2  ;;  %v3292_v59 = vmax.f32 %v3012_v4, %v3155_v20  ;;  %v3814_v63 = vsel %vm2081_vm3, %v3812_v37, %v3813_v22  ;;  %v5877_v47 = vld [vmem:[#allocation2 + $0x1b0] sm:$0xff] }
 0x219   : > { %v3510_v46 = vmax.f32 %v3290_v42, %v3374_v29  ;;  %v3511_v54 = vmax.f32 %v3291_v48, %v3376_v53  ;;  %v3816_v1 = vsel %vm2081_vm3, %v3813_v22, %v3815_v57  ;;  %2742 = vmatmul.f32.gmra.mxu1 %v571_v24  ;;  %v2480_v36 = vrot.slane %v7841_v2, 4  ;;  %v2588_v29 = vpop.f32.mrf.mxu0  ;;  %v5879_v22 = vld [vmem:[#allocation2 + $0x208] sm:$0xff] }
 0x21a   : > { %v4064_v0 = vsel %vm1455_vm1, %v10170_v9, %v4063_v61  ;;  %v3512_v55 = vmax.f32 %v3292_v59, %v3375_v30  ;;  %v4322_v60 = vmax.f32 %v7908_v18, %v8048_v27  ;;  %v572_v41 = vrot.slane %v5877_v47, 6  ;;  %v5880_v9 = vld [vmem:[#allocation2 + $0x210] sm:$0xff] }
 0x21b   : > { %4215 = vmatmul.f32.gmra.mxu2 %v4064_v0  ;;  %v3730_v62 = vmax.f32 %v3510_v46, %v3594_v45  ;;  %v3731_v61 = vmax.f32 %v3511_v54, %v3596_v39  ;;  %v2481_v4 = vsel %vm2081_vm3, %v2478_v3, %v2480_v36  ;;  %v4065_v20 = vrot.slane %v8282_v21, 2  ;;  %v5878_v3 = vld [vmem:[#allocation2 + $0x200] sm:$0xff] }
 0x21c   : > { %v9838_v37 = vrot.slane %v8288_v7, 2  ;;  %v3732_v0 = vmax.f32 %v3512_v55, %v3595_v44  ;;  %v4370_v2 = vmax.f32 %v4322_v60, %v8171_v58  ;;  %2632 = vmatmul.f32.gmra.mxu0 %v2481_v4  ;;  %v573_v30 = vsel %vm533_vm4, %v570_v15, %v572_v41 }
 0x21d   : > { %v8406_v42 = vmax.f32 %v3730_v62, %v3814_v63  ;;  %v8410_v18 = vmax.f32 %v3731_v61, %v3816_v1  ;;  %v8415_v53 = vadd.f32 %v2701_v10, %v2588_v29  ;;  %v726_v45 = vmax.f32 %v5878_v3, %v10151_v5  ;;  %v5881_v63 = vld [vmem:[#allocation2 + $0x218] sm:$0xf]  ;;  %v10174_v29 = vld [vmem:[#allocation33_spill] sm:$0xff] }
 0x21e   : > { %v4067_v54 = vsel %vm1455_vm1, %v4065_v20, %v9838_v37  ;;  %v8419_v39 = vmax.f32 %v3732_v0, %v3815_v57  ;;  %v4418_v44 = vmax.f32 %v4370_v2, %v8297_v19  ;;  %v727_v15 = vmax.f32 %v5879_v22, %v10162_v43 }
 0x21f   : > { %10171 = vst [vmem:[#allocation54_spill] sm:$0xff] %v8406_v42  ;;  %v4464_v48 = vmax.f32 %v4416_v32, %v8406_v42  ;;  %v10173_v46 = vmax.f32 %v8375_v12, %v8288_v7  ;;  %v728_v59 = vmax.f32 %v5880_v9, %v10154_v17  ;;  %v729_v5 = vmax.f32 %v5881_v63, %v10163_v13  ;;  %v8450_v63 = vld [vmem:[#allocation2 + $0x298] sm:$0xf] }
 0x220   : > { %10172 = vst [vmem:[#allocation46_spill] sm:$0xff] %v8410_v18  ;;  %v822_v32 = vmax.f32 %v726_v45, %v8182_v16  ;;  %v4466_v12 = vmax.f32 %v4418_v44, %v8419_v39  ;;  %v823_v41 = vmax.f32 %v727_v15, %v8191_v14  ;;  %v8440_v14 = vld [vmem:[#allocation2 + $0x288] sm:$0xff] }
 0x221   : > { %v4465_v24 = vmax.f32 %v10173_v46, %v8410_v18  ;;  %v4574_v57 = vrot.slane %v4464_v48, 1  ;;  %v4718_v1 = vrot.slane %v4464_v48, 2  ;;  %v4862_v36 = vrot.slane %v4464_v48, 3  ;;  %2745 = vmatmul.f32.gmra.mxu1 %v573_v30  ;;  %v10175_v45 = vld [vmem:[#allocation44_spill] sm:$0xff] }
 0x222   : > { %v5006_v62 = vrot.slane %v4464_v48, 4  ;;  %v824_v17 = vmax.f32 %v728_v59, %v8193_v31  ;;  %v825_v13 = vmax.f32 %v729_v5, %v10174_v29  ;;  %v4577_v0 = vrot.slane %v4466_v12, 1  ;;  %v8442_v31 = vld [vmem:[#allocation2 + $0x290] sm:$0xff] }
 0x223   : > { %v4575_v55 = vrot.slane %v4465_v24, 1  ;;  %v4719_v60 = vrot.slane %v4465_v24, 2  ;;  %v4863_v43 = vrot.slane %v4465_v24, 3  ;;  %v5007_v47 = vrot.slane %v4465_v24, 4  ;;  %4218 = vmatmul.f32.gmra.mxu2 %v4067_v54  ;;  %v8438_v54 = vld [vmem:[#allocation2 + $0x280] sm:$0xff] }
 0x224   : > { %v4721_v2 = vrot.slane %v4466_v12, 2  ;;  %v4865_v30 = vrot.slane %v4466_v12, 3  ;;  %v5009_v3 = vrot.slane %v4466_v12, 4  ;;  %v918_v44 = vmax.f32 %v822_v32, %v10175_v45 }
 0x225   : > { %v4576_v16 = vsel %vm1142_vm0, %v4574_v57, %v4575_v55  ;;  %v4720_v10 = vsel %vm1455_vm1, %v4718_v1, %v4719_v60  ;;  %v4864_v61 = vsel %vm1768_vm2, %v4862_v36, %v4863_v43  ;;  %v5008_v4 = vsel %vm2081_vm3, %v5006_v62, %v5007_v47 }
 0x226   : > { %v4665_v20 = vmax.f32 %v4464_v48, %v4576_v16  ;;  %v919_v22 = vmax.f32 %v823_v41, %v8312_v51  ;;  %v920_v15 = vmax.f32 %v824_v17, %v8321_v50  ;;  %v4578_v9 = vsel %vm1142_vm0, %v4575_v55, %v4577_v0 }
 0x227   : > { %v4722_v48 = vsel %vm1455_vm1, %v4719_v60, %v4721_v2  ;;  %v4866_v59 = vsel %vm1768_vm2, %v4863_v43, %v4865_v30  ;;  %v4666_v5 = vmax.f32 %v4465_v24, %v4578_v9  ;;  %v5010_v57 = vsel %vm2081_vm3, %v5007_v47, %v5009_v3 }
 0x228   : > { %v4809_v46 = vmax.f32 %v4665_v20, %v4720_v10  ;;  %v921_v1 = vmax.f32 %v825_v13, %v8323_v38  ;;  %v1014_v32 = vmax.f32 %v918_v44, %v8438_v54  ;;  %v1015_v62 = vmax.f32 %v919_v22, %v8440_v14 }
 0x229   : > { %v1016_v12 = vmax.f32 %v920_v15, %v8442_v31  ;;  %v2833_v55 = vmax.f32 %v7957_v8, %v8093_v6  ;;  %v4810_v60 = vmax.f32 %v4666_v5, %v4722_v48 }
 0x22a   : > { %v4953_v36 = vmax.f32 %v4809_v46, %v4864_v61  ;;  %v1017_v43 = vmax.f32 %v921_v1, %v8450_v63  ;;  %v1255_v41 = vrot.slane %v1014_v32, 1  ;;  %v1568_v17 = vrot.slane %v1014_v32, 2 }
 0x22b   : > { %v1256_v29 = vrot.slane %v1015_v62, 1  ;;  %v1258_v47 = vrot.slane %v1016_v12, 1  ;;  %v1569_v16 = vrot.slane %v1015_v62, 2  ;;  %v4954_v13 = vmax.f32 %v4810_v60, %v4866_v59 }
 0x22c   : > { %v5097_v24 = vmax.f32 %v4953_v36, %v5008_v4  ;;  %v1260_v10 = vrot.slane %v1017_v43, 1  ;;  %v1571_v20 = vrot.slane %v1016_v12, 2  ;;  %v1573_v61 = vrot.slane %v1017_v43, 2 }
 0x22d   : > { %v1257_v0 = vsel %vm1142_vm0, %v1255_v41, %v1256_v29  ;;  %v1259_v2 = vsel %vm1142_vm0, %v1256_v29, %v1258_v47  ;;  %v1570_v30 = vsel %vm1455_vm1, %v1568_v17, %v1569_v16  ;;  %v1881_v3 = vrot.slane %v1014_v32, 3 }
 0x22e   : > { %5190 = vmatmul.f32.gmra.mxu3 %v5097_v24  ;;  %v5098_v44 = vmax.f32 %v4954_v13, %v5010_v57  ;;  %v1261_v22 = vsel %vm1142_vm0, %v1258_v47, %v1260_v10  ;;  %v1431_v15 = vmax.f32 %v1014_v32, %v1257_v0  ;;  %v1432_v4 = vmax.f32 %v1015_v62, %v1259_v2 }
 0x22f   : > { %v1433_v46 = vmax.f32 %v1016_v12, %v1261_v22  ;;  %v1572_v9 = vsel %vm1455_vm1, %v1569_v16, %v1571_v20  ;;  %v1574_v48 = vsel %vm1455_vm1, %v1571_v20, %v1573_v61  ;;  %v1882_v59 = vrot.slane %v1015_v62, 3 }
 0x230   : > { %v1744_v5 = vmax.f32 %v1431_v15, %v1570_v30  ;;  %v1745_v1 = vmax.f32 %v1432_v4, %v1572_v9  ;;  %v1884_v36 = vrot.slane %v1016_v12, 3  ;;  %v1886_v60 = vrot.slane %v1017_v43, 3 }
 0x231   : > { %v1746_v41 = vmax.f32 %v1433_v46, %v1574_v48  ;;  %v1883_v24 = vsel %vm1768_vm2, %v1881_v3, %v1882_v59  ;;  %v2194_v17 = vrot.slane %v1014_v32, 4  ;;  %v2195_v29 = vrot.slane %v1015_v62, 4  ;;  %v4171_v62 = vpop.f32.mrf.mxu2 }
 0x232   : > { %v1885_v57 = vsel %vm1768_vm2, %v1882_v59, %v1884_v36  ;;  %v1887_v47 = vsel %vm1768_vm2, %v1884_v36, %v1886_v60  ;;  %v2057_v13 = vmax.f32 %v1744_v5, %v1883_v24  ;;  %v2197_v10 = vrot.slane %v1016_v12, 4  ;;  %v10179_v36 = vld [vmem:[#allocation45_spill] sm:$0xff] }
 0x233   : > { %v2058_v0 = vmax.f32 %v1745_v1, %v1885_v57  ;;  %v2059_v16 = vmax.f32 %v1746_v41, %v1887_v47  ;;  %v2196_v20 = vsel %vm2081_vm3, %v2194_v17, %v2195_v29  ;;  %v2199_v61 = vrot.slane %v1017_v43, 4  ;;  %v10178_v1 = vld [vmem:[#allocation53_spill] sm:$0xff]  ;;  %v5149_v17 = vpop.f32.mrf.mxu3  ;;  %v5882_v57 = vld [vmem:[#allocation2 + $0x1c0] sm:$0xff] }
 0x234   : > { %v2198_v2 = vsel %vm2081_vm3, %v2195_v29, %v2197_v10  ;;  %v8471_v30 = vmax.f32 %v2057_v13, %v2196_v20  ;;  %v2834_v3 = vmax.f32 %v7964_v56, %v8101_v28  ;;  %v2835_v32 = vmax.f32 %v7969_v40, %v8103_v52 }
 0x235   : > { %v2200_v22 = vsel %vm2081_vm3, %v2197_v10, %v2199_v61  ;;  %v8478_v12 = vmax.f32 %v2058_v0, %v2198_v2  ;;  %v2893_v15 = vmax.f32 %v2833_v55, %v8221_v33  ;;  %v4323_v43 = vmax.f32 %v8029_v49, %v8156_v25 }
 0x236   : > { %10176 = vst [vmem:[#allocation3_spill] sm:$0xff] %v8471_v30  ;;  %5193 = vmatmul.f32.gmra.mxu3 %v5098_v44  ;;  %v8483_v4 = vmax.f32 %v2059_v16, %v2200_v22  ;;  %v2894_v46 = vmax.f32 %v2834_v3, %v8223_v34  ;;  %v2895_v9 = vmax.f32 %v2835_v32, %v10169_v26  ;;  %v2482_v55 = vrot.slane %v7957_v8, 4  ;;  %v2591_v3 = vpop.f32.mrf.mxu0  ;;  %v2704_v32 = vpop.f32.mrf.mxu1 }
 0x237   : > { %v4324_v48 = vmax.f32 %v8031_v23, %v8163_v35  ;;  %v2953_v44 = vmax.f32 %v2893_v15, %v8350_v11  ;;  %v8491_v59 = vmax.f32 %v4323_v43, %v8282_v21  ;;  %v4267_v5 = vadd.f32 %v4171_v62, %v8415_v53  ;;  %v8504_v53 = vld [vmem:[#allocation2 + $0x1c8] sm:$0xff] }
 0x238   : > { %10177 = vst [vmem:[#allocation47_spill] sm:$0xff] %v8483_v4  ;;  %v2954_v49 = vmax.f32 %v2894_v46, %v10178_v1  ;;  %v2955_v60 = vmax.f32 %v2895_v9, %v10179_v36  ;;  %v2483_v24 = vrot.slane %v7964_v56, 4  ;;  %v574_v47 = vrot.slane %v5882_v57, 6 }
 0x239   : > { %v8498_v41 = vmax.f32 %v4324_v48, %v8288_v7  ;;  %v3013_v23 = vmax.f32 %v2953_v44, %v8471_v30  ;;  %v4174_v25 = vpop.f32.mrf.mxu2 }
 0x23a   : > { %v3014_v13 = vmax.f32 %v2954_v49, %v8478_v12  ;;  %v8509_v10 = vmax.f32 %v2955_v60, %v8483_v4  ;;  %v2484_v0 = vsel %vm2081_vm3, %v2482_v55, %v2483_v24 }
 0x23b   : > { %v3157_v16 = vrot.slane %v3013_v23, 1  ;;  %v3377_v20 = vrot.slane %v3013_v23, 2  ;;  %v3597_v61 = vrot.slane %v3013_v23, 3  ;;  %v3817_v2 = vrot.slane %v3013_v23, 4  ;;  %2635 = vmatmul.f32.gmra.mxu0 %v2484_v0  ;;  %v8525_v0 = vld [vmem:[%s9681_s2] ss:$0 sm:$0xff] }
 0x23c   : > { %v3158_v62 = vrot.slane %v3014_v13, 1  ;;  %v3160_v22 = vrot.slane %v8509_v10, 1  ;;  %v3378_v15 = vrot.slane %v3014_v13, 2  ;;  %v3380_v43 = vrot.slane %v8509_v10, 2 }
 0x23d   : > { %v3598_v46 = vrot.slane %v3014_v13, 3  ;;  %v3600_v9 = vrot.slane %v8509_v10, 3  ;;  %v3818_v48 = vrot.slane %v3014_v13, 4  ;;  %v3820_v44 = vrot.slane %v8509_v10, 4 }
 0x23e   : > { %v3159_v55 = vsel %vm1142_vm0, %v3157_v16, %v3158_v62  ;;  %v3161_v49 = vsel %vm1142_vm0, %v3158_v62, %v3160_v22  ;;  %v3379_v60 = vsel %vm1455_vm1, %v3377_v20, %v3378_v15  ;;  %v3381_v57 = vsel %vm1455_vm1, %v3378_v15, %v3380_v43 }
 0x23f   : > { %v3293_v56 = vmax.f32 %v3013_v23, %v3159_v55  ;;  %v3294_v29 = vmax.f32 %v3014_v13, %v3161_v49  ;;  %v3599_v37 = vsel %vm1768_vm2, %v3597_v61, %v3598_v46  ;;  %v3601_v8 = vsel %vm1768_vm2, %v3598_v46, %v3600_v9  ;;  %v5152_v55 = vpop.f32.mrf.mxu3 }
 0x240   : > { %v3819_v35 = vsel %vm2081_vm3, %v3817_v2, %v3818_v48  ;;  %v3821_v16 = vsel %vm2081_vm3, %v3818_v48, %v3820_v44  ;;  %v10180_v62 = vrot.slane %v8504_v53, 6  ;;  %v5245_v15 = vadd.f32 %v5149_v17, %v4267_v5 }
 0x241   : > { %v3513_v21 = vmax.f32 %v3293_v56, %v3379_v60  ;;  %v3514_v4 = vmax.f32 %v3294_v29, %v3381_v57  ;;  %v4068_v23 = vrot.slane %v8297_v19, 2  ;;  %v2705_v13 = vadd.f32 %v2704_v32, %v2591_v3 }
 0x242   : > { %v576_v20 = vsel %vm533_vm4, %v574_v47, %v10180_v62  ;;  %v8536_v61 = vadd.f32 %v8525_v0, %v5245_v15  ;;  %v3295_v46 = vmax.f32 %v8509_v10, %v3160_v22  ;;  %v4325_v2 = vmax.f32 %v8048_v27, %v8171_v58 }
 0x243   : > { %2748 = vmatmul.f32.gmra.mxu1 %v576_v20  ;;  %v2485_v48 = vrot.slane %v7969_v40, 4  ;;  %v3733_v47 = vmax.f32 %v3513_v21, %v3599_v37  ;;  %v3734_v5 = vmax.f32 %v3514_v4, %v3601_v8  ;;  %v10181_v17 = vrot.slane %v8288_v7, 2  ;;  %v5884_v40 = vld [vmem:[#allocation2 + $0x1d0] sm:$0xff]  ;;  %v2594_v4 = vpop.f32.mrf.mxu0  ;;  %v2707_v8 = vpop.f32.mrf.mxu1 }
 0x244   : > { %v4268_v56 = vadd.f32 %v4174_v25, %v2705_v13  ;;  %v5313_v3 = vsub.f32 0.0, %v8536_v61  ;;  %v3515_v32 = vmax.f32 %v3295_v46, %v3380_v43  ;;  %v4373_v49 = vmax.f32 %v4325_v2, %v8297_v19 }
 0x245   : > { %v4069_v29 = vsel %vm1455_vm1, %v10181_v17, %v4068_v23  ;;  %v2486_v10 = vsel %vm2081_vm3, %v2483_v24, %v2485_v48  ;;  %v8548_v22 = vmax.f32 %v3733_v47, %v3819_v35  ;;  %v8550_v27 = vmax.f32 %v3734_v5, %v3821_v16 }
 0x246   : > { %4221 = vmatmul.f32.gmra.mxu2 %v4069_v29  ;;  %2638 = vmatmul.f32.gmra.mxu0 %v2486_v10  ;;  %v577_v21 = vrot.slane %v5884_v40, 6  ;;  %v5246_v37 = vadd.f32 %v5152_v55, %v4268_v56  ;;  %v5345_v60 = vmul.f32 1.442695, %v5313_v3  ;;  %v3735_v25 = vmax.f32 %v3515_v32, %v3600_v9 }
 0x247   : > { %10182 = vst [vmem:[#allocation4_spill] sm:$0xff] %v8548_v22  ;;  %v4421_v57 = vmax.f32 %v4373_v49, %v8419_v39  ;;  %v4070_v43 = vrot.slane %v8406_v42, 2  ;;  %v10184_v24 = vmax.f32 %v8491_v59, %v8406_v42  ;;  %v10185_v16 = vmax.f32 %v8498_v41, %v8410_v18 }
 0x248   : > { %10183 = vst [vmem:[#allocation48_spill] sm:$0xff] %v8550_v27  ;;  %v10186_v20 = vrot.slane %v8504_v53, 6  ;;  %v8566_v9 = vadd.f32 %v8525_v0, %v5246_v37  ;;  %5711 = vpow2.f32 %v5345_v60  ;;  %v8568_v23 = vmax.f32 %v3735_v25, %v3820_v44 }
 0x249   : > { %v4467_v35 = vmax.f32 %v10184_v24, %v8548_v22  ;;  %v4468_v62 = vmax.f32 %v10185_v16, %v8550_v27  ;;  %v9845_v13 = vrot.slane %v8410_v18, 2  ;;  %v8571_v46 = vadd.f32 %v2707_v8, %v2594_v4  ;;  %v8584_v24 = vld [vmem:[#allocation2 + $0x240] sm:$0xff]  ;;  %v5887_v16 = vld [vmem:[#allocation2 + $0x228] sm:$0xff] }
 0x24a   : > { %v578_v15 = vsel %vm533_vm4, %v10186_v20, %v577_v21  ;;  %v4469_v44 = vmax.f32 %v4421_v57, %v8568_v23  ;;  %v5314_v56 = vsub.f32 0.0, %v8566_v9  ;;  %v8582_v57 = vld [vmem:[#allocation2 + $0x220] sm:$0xff]  ;;  %v8588_v20 = vld [vmem:[#allocation2 + $0x248] sm:$0xff] }
 0x24b   : > { %v4579_v59 = vrot.slane %v4467_v35, 1  ;;  %v4580_v2 = vrot.slane %v4468_v62, 1  ;;  %v4723_v48 = vrot.slane %v4467_v35, 2  ;;  %v4724_v55 = vrot.slane %v4468_v62, 2  ;;  %2751 = vmatmul.f32.gmra.mxu1 %v578_v15  ;;  %10187 = vst [vmem:[#allocation9_spill] sm:$0xff] %v8582_v57 }
 0x24c   : > { %v4867_v41 = vrot.slane %v4467_v35, 3  ;;  %v4868_v47 = vrot.slane %v4468_v62, 3  ;;  %v5011_v53 = vrot.slane %v4467_v35, 4  ;;  %v5012_v5 = vrot.slane %v4468_v62, 4 }
 0x24d   : > { %v4581_v17 = vsel %vm1142_vm0, %v4579_v59, %v4580_v2  ;;  %v4725_v29 = vsel %vm1455_vm1, %v4723_v48, %v4724_v55  ;;  %v4072_v10 = vsel %vm1455_vm1, %v4070_v43, %v9845_v13  ;;  %v4582_v40 = vrot.slane %v4469_v44, 1 }
 0x24e   : > { %v4667_v3 = vmax.f32 %v4467_v35, %v4581_v17  ;;  %v4869_v32 = vsel %vm1768_vm2, %v4867_v41, %v4868_v47  ;;  %v5013_v49 = vsel %vm2081_vm3, %v5011_v53, %v5012_v5  ;;  %v4726_v21 = vrot.slane %v4469_v44, 2  ;;  %4224 = vmatmul.f32.gmra.mxu2 %v4072_v10  ;;  %v5712_v8 = vpop.eup %5711  ;;  %v5891_v10 = vld [vmem:[#allocation2 + $0x238] sm:$0xf] }
 0x24f   : > { %v4870_v37 = vrot.slane %v4469_v44, 3  ;;  %v5014_v4 = vrot.slane %v4469_v44, 4  ;;  %v5347_v25 = vmul.f32 1.442695, %v5314_v56  ;;  %v730_v35 = vmax.f32 %v8582_v57, %v8584_v24  ;;  %v5889_v44 = vld [vmem:[#allocation2 + $0x230] sm:$0xff] }
 0x250   : > { %v4811_v60 = vmax.f32 %v4667_v3, %v4725_v29  ;;  %v731_v43 = vmax.f32 %v5887_v16, %v8588_v20  ;;  %v5409_v15 = vadd.f32 1.0, %v5712_v8  ;;  %v4583_v59 = vsel %vm1142_vm0, %v4580_v2, %v4582_v40  ;;  %v8595_v56 = vld [vmem:[#allocation2 + $0x250] sm:$0xff]  ;;  %v8598_v16 = vld [vmem:[#allocation2 + $0x258] sm:$0xf] }
 0x251   : > { %v4727_v48 = vsel %vm1455_vm1, %v4724_v55, %v4726_v21  ;;  %v4871_v41 = vsel %vm1768_vm2, %v4868_v47, %v4870_v37  ;;  %v4668_v17 = vmax.f32 %v4468_v62, %v4583_v59  ;;  %v5015_v29 = vsel %vm2081_vm3, %v5012_v5, %v5014_v4  ;;  %v8607_v21 = vld [vmem:[#allocation2 + $0x2a8] sm:$0xff] }
 0x252   : > { %v4955_v53 = vmax.f32 %v4811_v60, %v4869_v32  ;;  %5713 = vpow2.f32 %v5347_v25  ;;  %v732_v3 = vmax.f32 %v5889_v44, %v8595_v56  ;;  %v733_v2 = vmax.f32 %v5891_v10, %v8598_v16  ;;  %v8602_v32 = vld [vmem:[#allocation2 + $0x2a0] sm:$0xff]  ;;  %v8614_v60 = vld [vmem:[#allocation2 + $0x2b0] sm:$0xff] }
 0x253   : > { %5715 = vrcp.f32 %v5409_v15  ;;  %v826_v55 = vmax.f32 %v730_v35, %v10175_v45  ;;  %v4812_v47 = vmax.f32 %v4668_v17, %v4727_v48  ;;  %v827_v62 = vmax.f32 %v731_v43, %v8312_v51  ;;  %10188 = vst [vmem:[#allocation49_spill] sm:$0xff] %v8614_v60  ;;  %v8616_v51 = vld [vmem:[#allocation2 + $0x2b8] sm:$0xf] }
 0x254   : > { %v5099_v40 = vmax.f32 %v4955_v53, %v5013_v49  ;;  %v2836_v5 = vmax.f32 %v8093_v6, %v8221_v33  ;;  %v828_v37 = vmax.f32 %v732_v3, %v8321_v50  ;;  %v829_v4 = vmax.f32 %v733_v2, %v8323_v38  ;;  %10189 = vst [vmem:[#allocation12_spill] sm:$0xff] %v8616_v51 }
 0x255   : > { %v922_v8 = vmax.f32 %v826_v55, %v8438_v54  ;;  %v2837_v45 = vmax.f32 %v8101_v28, %v8223_v34  ;;  %v4956_v49 = vmax.f32 %v4812_v47, %v4871_v41  ;;  %v923_v25 = vmax.f32 %v827_v62, %v8440_v14 }
 0x256   : > { %5196 = vmatmul.f32.gmra.mxu3 %v5099_v40  ;;  %v2838_v35 = vmax.f32 %v8103_v52, %v10169_v26  ;;  %v8622_v50 = vmax.f32 %v2836_v5, %v8350_v11  ;;  %v924_v38 = vmax.f32 %v828_v37, %v8442_v31  ;;  %v925_v43 = vmax.f32 %v829_v4, %v8450_v63 }
 0x257   : > { %v1018_v15 = vmax.f32 %v922_v8, %v8602_v32  ;;  %v8628_v59 = vmax.f32 %v2837_v45, %v10178_v1  ;;  %v5100_v41 = vmax.f32 %v4956_v49, %v5015_v29  ;;  %v1019_v53 = vmax.f32 %v923_v25, %v8607_v21 }
 0x258   : > { %v5714_v48 = vpop.eup %5713  ;;  %v8632_v17 = vmax.f32 %v2838_v35, %v10179_v36  ;;  %v2956_v44 = vmax.f32 %v8622_v50, %v8471_v30  ;;  %v1020_v2 = vmax.f32 %v924_v38, %v8614_v60  ;;  %v1021_v29 = vmax.f32 %v925_v43, %v8616_v51 }
 0x259   : > { %v5716_v3 = vpop.eup %5715  ;;  %v5410_v10 = vadd.f32 1.0, %v5714_v48  ;;  %v1262_v55 = vrot.slane %v1018_v15, 1  ;;  %v1263_v47 = vrot.slane %v1019_v53, 1  ;;  %v1575_v62 = vrot.slane %v1018_v15, 2 }
 0x25a   : > { %v5473_v40 = vmul.f32 %v5716_v3, %v8536_v61  ;;  %v1576_v5 = vrot.slane %v1019_v53, 2  ;;  %v1265_v37 = vrot.slane %v1020_v2, 1  ;;  %v1267_v4 = vrot.slane %v1021_v29, 1 }
 0x25b   : > { %5717 = vrcp.f32 %v5410_v10  ;;  %v1578_v8 = vrot.slane %v1020_v2, 2  ;;  %v1264_v45 = vsel %vm1142_vm0, %v1262_v55, %v1263_v47  ;;  %v1580_v25 = vrot.slane %v1021_v29, 2 }
 0x25c   : > { %5505 = vst [vmem:[%s8641_s10] sm:$0xff] %v5473_v40  ;;  %v1577_v49 = vsel %vm1455_vm1, %v1575_v62, %v1576_v5  ;;  %v1888_v35 = vrot.slane %v1018_v15, 3  ;;  %v1266_v50 = vsel %vm1142_vm0, %v1263_v47, %v1265_v37  ;;  %v1268_v38 = vsel %vm1142_vm0, %v1265_v37, %v1267_v4 }
 0x25d   : > { %v1434_v43 = vmax.f32 %v1018_v15, %v1264_v45  ;;  %v1579_v61 = vsel %vm1455_vm1, %v1576_v5, %v1578_v8  ;;  %v1435_v48 = vmax.f32 %v1019_v53, %v1266_v50  ;;  %v1436_v3 = vmax.f32 %v1020_v2, %v1268_v38 }
 0x25e   : > { %5199 = vmatmul.f32.gmra.mxu3 %v5100_v41  ;;  %v1581_v10 = vsel %vm1455_vm1, %v1578_v8, %v1580_v25  ;;  %v1889_v13 = vrot.slane %v1019_v53, 3  ;;  %v1891_v57 = vrot.slane %v1020_v2, 3  ;;  %v1893_v55 = vrot.slane %v1021_v29, 3 }
 0x25f   : > { %v1747_v40 = vmax.f32 %v1434_v43, %v1577_v49  ;;  %v2201_v51 = vrot.slane %v1018_v15, 4  ;;  %v1748_v62 = vmax.f32 %v1435_v48, %v1579_v61  ;;  %v1749_v30 = vmax.f32 %v1436_v3, %v1581_v10  ;;  %v4177_v15 = vpop.f32.mrf.mxu2 }
 0x260   : > { %v1890_v60 = vsel %vm1768_vm2, %v1888_v35, %v1889_v13  ;;  %v2202_v47 = vrot.slane %v1019_v53, 4  ;;  %v1892_v4 = vsel %vm1768_vm2, %v1889_v13, %v1891_v57  ;;  %v1894_v41 = vsel %vm1768_vm2, %v1891_v57, %v1893_v55  ;;  %v10192_v57 = vld [vmem:[#allocation47_spill] sm:$0xff] }
 0x261   : > { %v5718_v37 = vpop.eup %5717  ;;  %v2060_v5 = vmax.f32 %v1747_v40, %v1890_v60  ;;  %v2204_v45 = vrot.slane %v1020_v2, 4  ;;  %v2061_v25 = vmax.f32 %v1748_v62, %v1892_v4  ;;  %v2062_v49 = vmax.f32 %v1749_v30, %v1894_v41  ;;  %v10194_v2 = vld [vmem:[#allocation10_spill] sm:$0xff]  ;;  %v5155_v41 = vpop.f32.mrf.mxu3 }
 0x262   : > { %v5474_v8 = vmul.f32 %v5718_v37, %v8566_v9  ;;  %v2203_v50 = vsel %vm2081_vm3, %v2201_v51, %v2202_v47  ;;  %v2206_v43 = vrot.slane %v1021_v29, 4  ;;  %v2957_v53 = vmax.f32 %v8628_v59, %v8478_v12  ;;  %v10193_v9 = vld [vmem:[#allocation37_spill] sm:$0xff]  ;;  %v10195_v51 = vld [vmem:[#allocation32_spill] sm:$0xff] }
 0x263   : > { %v2205_v38 = vsel %vm2081_vm3, %v2202_v47, %v2204_v45  ;;  %v8659_v35 = vmax.f32 %v2060_v5, %v2203_v50  ;;  %v2958_v60 = vmax.f32 %v8632_v17, %v10192_v57  ;;  %v4326_v30 = vmax.f32 %v10194_v2, %v10193_v9 }
 0x264   : > { %5506 = vst [vmem:[%s8641_s10 + $0x8] sm:$0xff] %v5474_v8  ;;  %v8664_v13 = vmax.f32 %v2061_v25, %v2205_v38  ;;  %v4327_v61 = vmax.f32 %v10195_v51, %v8288_v7  ;;  %v2207_v48 = vsel %vm2081_vm3, %v2204_v45, %v2206_v43  ;;  %v4269_v3 = vadd.f32 %v4177_v15, %v8571_v46 }
 0x265   : > { %10190 = vst [vmem:[#allocation50_spill] sm:$0xff] %v8659_v35  ;;  %v3016_v29 = vmax.f32 %v2956_v44, %v8659_v35  ;;  %v2487_v59 = vrot.slane %v8093_v6, 4  ;;  %v8676_v10 = vmax.f32 %v2062_v49, %v2207_v48  ;;  %v8680_v17 = vmax.f32 %v4326_v30, %v8406_v42 }
 0x266   : > { %10191 = vst [vmem:[#allocation55_spill] sm:$0xff] %v8664_v13  ;;  %v3017_v40 = vmax.f32 %v2957_v53, %v8664_v13  ;;  %v8683_v55 = vmax.f32 %v4327_v61, %v8410_v18  ;;  %v2488_v49 = vrot.slane %v8101_v28, 4 }
 0x267   : > { %10196 = vst [vmem:[#allocation34_spill] sm:$0xff] %v8676_v10  ;;  %v3162_v62 = vrot.slane %v3016_v29, 1  ;;  %v3382_v47 = vrot.slane %v3016_v29, 2  ;;  %v3602_v37 = vrot.slane %v3016_v29, 3  ;;  %v3822_v4 = vrot.slane %v3016_v29, 4  ;;  %v4180_v35 = vpop.f32.mrf.mxu2 }
 0x268   : > { %v8686_v44 = vmax.f32 %v2958_v60, %v8676_v10  ;;  %v3163_v46 = vrot.slane %v3017_v40, 1  ;;  %v3383_v6 = vrot.slane %v3017_v40, 2  ;;  %v3603_v5 = vrot.slane %v3017_v40, 3 }
 0x269   : > { %v3823_v45 = vrot.slane %v3017_v40, 4  ;;  %v4422_v8 = vmax.f32 %v8680_v17, %v8548_v22  ;;  %v4423_v25 = vmax.f32 %v8683_v55, %v8550_v27  ;;  %v2489_v48 = vsel %vm2081_vm3, %v2487_v59, %v2488_v49  ;;  %v2597_v17 = vpop.f32.mrf.mxu0  ;;  %v2710_v55 = vpop.f32.mrf.mxu1 }
 0x26a   : > { %v3164_v50 = vsel %vm1142_vm0, %v3162_v62, %v3163_v46  ;;  %v3165_v15 = vrot.slane %v8686_v44, 1  ;;  %v3384_v38 = vsel %vm1455_vm1, %v3382_v47, %v3383_v6  ;;  %v3385_v43 = vrot.slane %v8686_v44, 2  ;;  %2641 = vmatmul.f32.gmra.mxu0 %v2489_v48 }
 0x26b   : > { %v3296_v53 = vmax.f32 %v3016_v29, %v3164_v50  ;;  %v3604_v60 = vsel %vm1768_vm2, %v3602_v37, %v3603_v5  ;;  %v3605_v2 = vrot.slane %v8686_v44, 3  ;;  %v3824_v30 = vsel %vm2081_vm3, %v3822_v4, %v3823_v45  ;;  %v5893_v37 = vld [vmem:[#allocation2 + $0x1e0] sm:$0xff]  ;;  %v5894_v4 = vld [vmem:[#allocation2 + $0x1e8] sm:$0xff] }
 0x26c   : > { %v3166_v51 = vsel %vm1142_vm0, %v3163_v46, %v3165_v15  ;;  %v3386_v61 = vsel %vm1455_vm1, %v3383_v6, %v3385_v43  ;;  %v3825_v28 = vrot.slane %v8686_v44, 4  ;;  %v579_v50 = vrot.slane %v5893_v37, 6 }
 0x26d   : > { %v3297_v62 = vmax.f32 %v3017_v40, %v3166_v51  ;;  %v3516_v47 = vmax.f32 %v3296_v53, %v3384_v38  ;;  %v3606_v29 = vsel %vm1768_vm2, %v3603_v5, %v3605_v2  ;;  %v580_v9 = vrot.slane %v5894_v4, 6 }
 0x26e   : > { %v3826_v7 = vsel %vm2081_vm3, %v3823_v45, %v3825_v28  ;;  %v5247_v46 = vadd.f32 %v5155_v41, %v4269_v3  ;;  %v4073_v6 = vrot.slane %v8419_v39, 2  ;;  %v2711_v13 = vadd.f32 %v2710_v55, %v2597_v17  ;;  %v5895_v17 = vld [vmem:[#allocation2 + $0x1f0] sm:$0xff] }
 0x26f   : > { %v3517_v42 = vmax.f32 %v3297_v62, %v3386_v61  ;;  %v3736_v10 = vmax.f32 %v3516_v47, %v3604_v60  ;;  %v3298_v59 = vmax.f32 %v8686_v44, %v3165_v15  ;;  %v581_v40 = vsel %vm533_vm4, %v579_v50, %v580_v9  ;;  %v5158_v15 = vpop.f32.mrf.mxu3 }
 0x270   : > { %v8710_v5 = vadd.f32 %v8525_v0, %v5247_v46  ;;  %v10197_v38 = vrot.slane %v8410_v18, 2  ;;  %v4328_v3 = vmax.f32 %v8171_v58, %v8297_v19  ;;  %2754 = vmatmul.f32.gmra.mxu1 %v581_v40  ;;  %v2490_v44 = vrot.slane %v8103_v52, 4 }
 0x271   : > { %v3737_v41 = vmax.f32 %v3517_v42, %v3606_v29  ;;  %v8717_v53 = vmax.f32 %v3736_v10, %v3824_v30  ;;  %v3518_v60 = vmax.f32 %v3298_v59, %v3385_v43  ;;  %v4270_v48 = vadd.f32 %v4180_v35, %v2711_v13  ;;  %v2600_v40 = vpop.f32.mrf.mxu0 }
 0x272   : > { %v4074_v45 = vsel %vm1455_vm1, %v10197_v38, %v4073_v6  ;;  %v5315_v51 = vsub.f32 0.0, %v8710_v5  ;;  %v4376_v61 = vmax.f32 %v4328_v3, %v8419_v39  ;;  %v582_v55 = vrot.slane %v5895_v17, 6  ;;  %v2713_v38 = vpop.f32.mrf.mxu1 }
 0x273   : > { %4227 = vmatmul.f32.gmra.mxu2 %v4074_v45  ;;  %v8722_v62 = vmax.f32 %v3737_v41, %v3826_v7  ;;  %v4470_v58 = vmax.f32 %v4422_v8, %v8717_v53  ;;  %v3738_v42 = vmax.f32 %v3518_v60, %v3605_v2  ;;  %v2491_v10 = vsel %vm2081_vm3, %v2488_v49, %v2490_v44 }
 0x274   : > { %v5349_v30 = vmul.f32 1.442695, %v5315_v51  ;;  %v4424_v43 = vmax.f32 %v4376_v61, %v8568_v23  ;;  %v583_v52 = vsel %vm533_vm4, %v580_v9, %v582_v55  ;;  %v5248_v47 = vadd.f32 %v5158_v15, %v4270_v48  ;;  %2644 = vmatmul.f32.gmra.mxu0 %v2491_v10 }
 0x275   : > { %10198 = vst [vmem:[#allocation56_spill] sm:$0xff] %v8722_v62  ;;  %v4471_v29 = vmax.f32 %v4423_v25, %v8722_v62  ;;  %v4584_v37 = vrot.slane %v4470_v58, 1  ;;  %v4728_v50 = vrot.slane %v4470_v58, 2  ;;  %v4872_v35 = vrot.slane %v4470_v58, 3 }
 0x276   : > { %v5016_v13 = vrot.slane %v4470_v58, 4  ;;  %5719 = vpow2.f32 %v5349_v30  ;;  %v8729_v7 = vmax.f32 %v3738_v42, %v3825_v28  ;;  %v8732_v8 = vadd.f32 %v8525_v0, %v5248_v47 }
 0x277   : > { %v4585_v49 = vrot.slane %v4471_v29, 1  ;;  %v4729_v2 = vrot.slane %v4471_v29, 2  ;;  %v4873_v4 = vrot.slane %v4471_v29, 3  ;;  %v5017_v46 = vrot.slane %v4471_v29, 4 }
 0x278   : > { %v4472_v9 = vmax.f32 %v4424_v43, %v8729_v7  ;;  %v5316_v6 = vsub.f32 0.0, %v8732_v8  ;;  %v4075_v25 = vrot.slane %v8548_v22, 2  ;;  %v9862_v59 = vrot.slane %v8550_v27, 2  ;;  %2757 = vmatmul.f32.gmra.mxu1 %v583_v52 }
 0x279   : > { %v4586_v28 = vsel %vm1142_vm0, %v4584_v37, %v4585_v49  ;;  %v4730_v45 = vsel %vm1455_vm1, %v4728_v50, %v4729_v2  ;;  %v4874_v3 = vsel %vm1768_vm2, %v4872_v35, %v4873_v4  ;;  %v5018_v41 = vsel %vm2081_vm3, %v5016_v13, %v5017_v46  ;;  %v8751_v35 = vld [vmem:[#allocation2 + $0x260] sm:$0xff] }
 0x27a   : > { %v4669_v60 = vmax.f32 %v4470_v58, %v4586_v28  ;;  %v4587_v44 = vrot.slane %v4472_v9, 1  ;;  %v4731_v15 = vrot.slane %v4472_v9, 2  ;;  %v4875_v51 = vrot.slane %v4472_v9, 3 }
 0x27b   : > { %v5019_v61 = vrot.slane %v4472_v9, 4  ;;  %v5351_v48 = vmul.f32 1.442695, %v5316_v6  ;;  %v4077_v17 = vsel %vm1455_vm1, %v4075_v25, %v9862_v59  ;;  %v8745_v55 = vadd.f32 %v2713_v38, %v2600_v40  ;;  %v8755_v9 = vld [vmem:[#allocation2 + $0x268] sm:$0xff] }
 0x27c   : > { %v5720_v42 = vpop.eup %5719  ;;  %v4813_v10 = vmax.f32 %v4669_v60, %v4730_v45  ;;  %v4588_v30 = vsel %vm1142_vm0, %v4585_v49, %v4587_v44  ;;  %v4732_v43 = vsel %vm1455_vm1, %v4729_v2, %v4731_v15  ;;  %v4876_v52 = vsel %vm1768_vm2, %v4873_v4, %v4875_v51  ;;  %4230 = vmatmul.f32.gmra.mxu2 %v4077_v17  ;;  %v8759_v2 = vld [vmem:[#allocation2 + $0x270] sm:$0xff]  ;;  %v10201_v44 = vld [vmem:[#allocation3_spill] sm:$0xff]  ;;  %v10202_v51 = vld [vmem:[#allocation12_spill] sm:$0xff] }
 0x27d   : > { %v5411_v58 = vadd.f32 1.0, %v5720_v42  ;;  %v4670_v47 = vmax.f32 %v4471_v29, %v4588_v30  ;;  %v5020_v37 = vsel %vm2081_vm3, %v5017_v46, %v5019_v61  ;;  %5721 = vpow2.f32 %v5351_v48  ;;  %v8763_v46 = vld [vmem:[#allocation2 + $0x278] sm:$0xf]  ;;  %v10200_v60 = vld [vmem:[#allocation49_spill] sm:$0xff] }
 0x27e   : > { %v4957_v50 = vmax.f32 %v4813_v10, %v4874_v3  ;;  %v734_v13 = vmax.f32 %v8584_v24, %v8751_v35  ;;  %v735_v49 = vmax.f32 %v8588_v20, %v8755_v9  ;;  %v736_v4 = vmax.f32 %v8595_v56, %v8759_v2  ;;  %v8792_v10 = vld [vmem:[#allocation2] sm:$0xff] }
 0x27f   : > { %5723 = vrcp.f32 %v5411_v58  ;;  %v4814_v29 = vmax.f32 %v4670_v47, %v4732_v43  ;;  %v737_v6 = vmax.f32 %v8598_v16, %v8763_v46  ;;  %v2839_v24 = vmax.f32 %v8221_v33, %v8350_v11  ;;  %v8777_v16 = vld [vmem:[#allocation2 + $0x2d8] sm:$0xf] }
 0x280   : > { %v5101_v25 = vmax.f32 %v4957_v50, %v5018_v41  ;;  %v830_v40 = vmax.f32 %v734_v13, %v8438_v54  ;;  %v831_v20 = vmax.f32 %v735_v49, %v8440_v14  ;;  %v832_v38 = vmax.f32 %v736_v4, %v8442_v31  ;;  %10199 = vst [vmem:[#allocation51_spill] sm:$0xff] %v8777_v16  ;;  %v10204_v13 = vld [vmem:[#allocation55_spill] sm:$0xff]  ;;  %v10205_v4 = vld [vmem:[#allocation34_spill] sm:$0xff] }
 0x281   : > { %v4958_v28 = vmax.f32 %v4814_v29, %v4876_v52  ;;  %v833_v56 = vmax.f32 %v737_v6, %v8450_v63  ;;  %v2840_v45 = vmax.f32 %v8223_v34, %v10178_v1  ;;  %v2841_v3 = vmax.f32 %v10169_v26, %v10179_v36 }
 0x282   : > { %5202 = vmatmul.f32.gmra.mxu3 %v5101_v25  ;;  %v926_v41 = vmax.f32 %v830_v40, %v8602_v32  ;;  %v927_v54 = vmax.f32 %v831_v20, %v8607_v21  ;;  %v928_v14 = vmax.f32 %v832_v38, %v10200_v60  ;;  %v8783_v31 = vmax.f32 %v2839_v24, %v10201_v44 }
 0x283   : > { %v5722_v15 = vpop.eup %5721  ;;  %v5102_v63 = vmax.f32 %v4958_v28, %v5020_v37  ;;  %v929_v61 = vmax.f32 %v833_v56, %v10202_v51  ;;  %v8787_v48 = vmax.f32 %v2840_v45, %v8478_v12  ;;  %v8790_v17 = vmax.f32 %v2841_v3, %v10192_v57  ;;  %v10203_v37 = vld [vmem:[#allocation50_spill] sm:$0xff] }
 0x284   : > { %v5412_v42 = vadd.f32 1.0, %v5722_v15  ;;  %v1022_v30 = vmax.f32 %v926_v41, %v8792_v10  ;;  %v1023_v43 = vmax.f32 %v927_v54, %v8792_v10  ;;  %v1024_v52 = vmax.f32 %v928_v14, %v8792_v10 }
 0x285   : > { %v5724_v58 = vpop.eup %5723  ;;  %v1025_v47 = vmax.f32 %v929_v61, %v8777_v16  ;;  %v2959_v50 = vmax.f32 %v8783_v31, %v10203_v37 }
 0x286   : > { %v5475_v6 = vmul.f32 %v5724_v58, %v8710_v5  ;;  %5725 = vrcp.f32 %v5412_v42  ;;  %v1269_v24 = vrot.slane %v1022_v30, 1  ;;  %v1270_v25 = vrot.slane %v1023_v43, 1 }
 0x287   : > { %v1272_v40 = vrot.slane %v1024_v52, 1  ;;  %v1274_v20 = vrot.slane %v1025_v47, 1  ;;  %v1582_v38 = vrot.slane %v1022_v30, 2  ;;  %v1583_v28 = vrot.slane %v1023_v43, 2 }
 0x288   : > { %5507 = vst [vmem:[%s8641_s10 + $0x10] sm:$0xff] %v5475_v6  ;;  %v1271_v56 = vsel %vm1142_vm0, %v1269_v24, %v1270_v25  ;;  %v1585_v45 = vrot.slane %v1024_v52, 2  ;;  %v1587_v3 = vrot.slane %v1025_v47, 2  ;;  %v1895_v41 = vrot.slane %v1022_v30, 3 }
 0x289   : > { %v1273_v54 = vsel %vm1142_vm0, %v1270_v25, %v1272_v40  ;;  %v1275_v14 = vsel %vm1142_vm0, %v1272_v40, %v1274_v20  ;;  %v1437_v31 = vmax.f32 %v1022_v30, %v1271_v56  ;;  %v1584_v5 = vsel %vm1455_vm1, %v1582_v38, %v1583_v28 }
 0x28a   : > { %5205 = vmatmul.f32.gmra.mxu3 %v5102_v63  ;;  %v1438_v15 = vmax.f32 %v1023_v43, %v1273_v54  ;;  %v1439_v61 = vmax.f32 %v1024_v52, %v1275_v14  ;;  %v1586_v42 = vsel %vm1455_vm1, %v1583_v28, %v1585_v45  ;;  %v1588_v58 = vsel %vm1455_vm1, %v1585_v45, %v1587_v3  ;;  %v4183_v14 = vpop.f32.mrf.mxu2 }
 0x28b   : > { %v1750_v6 = vmax.f32 %v1437_v31, %v1584_v5  ;;  %v1896_v59 = vrot.slane %v1023_v43, 3  ;;  %v1898_v24 = vrot.slane %v1024_v52, 3  ;;  %v1900_v29 = vrot.slane %v1025_v47, 3 }
 0x28c   : > { %v5726_v49 = vpop.eup %5725  ;;  %v1751_v16 = vmax.f32 %v1438_v15, %v1586_v42  ;;  %v1752_v25 = vmax.f32 %v1439_v61, %v1588_v58  ;;  %v2208_v37 = vrot.slane %v1022_v30, 4  ;;  %v2209_v40 = vrot.slane %v1023_v43, 4  ;;  %v10206_v15 = vld [vmem:[#allocation54_spill] sm:$0xff]  ;;  %v10207_v30 = vld [vmem:[#allocation37_spill] sm:$0xff] }
 0x28d   : > { %v5476_v20 = vmul.f32 %v5726_v49, %v8732_v8  ;;  %v1897_v63 = vsel %vm1768_vm2, %v1895_v41, %v1896_v59  ;;  %v1899_v38 = vsel %vm1768_vm2, %v1896_v59, %v1898_v24  ;;  %v1901_v28 = vsel %vm1768_vm2, %v1898_v24, %v1900_v29  ;;  %v10208_v8 = vld [vmem:[#allocation36_spill] sm:$0xff] }
 0x28e   : > { %v2063_v56 = vmax.f32 %v1750_v6, %v1897_v63  ;;  %v2064_v45 = vmax.f32 %v1751_v16, %v1899_v38  ;;  %v2065_v3 = vmax.f32 %v1752_v25, %v1901_v28  ;;  %v2210_v54 = vsel %vm2081_vm3, %v2208_v37, %v2209_v40  ;;  %v5161_v6 = vpop.f32.mrf.mxu3  ;;  %v8847_v63 = vld [vmem:[#allocation2 + $0x208] sm:$0xff] }
 0x28f   : > { %5508 = vst [vmem:[%s8641_s10 + $0x18] sm:$0xff] %v5476_v20  ;;  %v2211_v31 = vrot.slane %v1024_v52, 4  ;;  %v2213_v5 = vrot.slane %v1025_v47, 4  ;;  %v4329_v43 = vmax.f32 %v10207_v30, %v10206_v15  ;;  %v4330_v49 = vmax.f32 %v10208_v8, %v8410_v18  ;;  %v2716_v8 = vpop.f32.mrf.mxu1 }
 0x290   : > { %v8822_v41 = vmax.f32 %v2063_v56, %v2210_v54  ;;  %v4271_v59 = vadd.f32 %v4183_v14, %v8745_v55  ;;  %v2492_v29 = vrot.slane %v8221_v33, 4  ;;  %v9865_v16 = vrot.slane %v8223_v34, 4 }
 0x291   : > { %v2212_v37 = vsel %vm2081_vm3, %v2209_v40, %v2211_v31  ;;  %v2214_v61 = vsel %vm2081_vm3, %v2211_v31, %v2213_v5  ;;  %v8830_v52 = vmax.f32 %v4329_v43, %v8548_v22  ;;  %v8833_v47 = vmax.f32 %v4330_v49, %v8550_v27  ;;  %v5901_v40 = vld [vmem:[#allocation2 + $0x200] sm:$0xff]  ;;  %v2603_v43 = vpop.f32.mrf.mxu0 }
 0x292   : > { %v8835_v42 = vmax.f32 %v2064_v45, %v2212_v37  ;;  %v8837_v58 = vmax.f32 %v2065_v3, %v2214_v61  ;;  %v3019_v55 = vmax.f32 %v2959_v50, %v8822_v41  ;;  %v2494_v33 = vsel %vm2081_vm3, %v2492_v29, %v9865_v16 }
 0x293   : > { %2647 = vmatmul.f32.gmra.mxu0 %v2494_v33  ;;  %v584_v20 = vrot.slane %v5901_v40, 6  ;;  %v585_v38 = vrot.slane %v8847_v63, 6  ;;  %v10209_v50 = vmax.f32 %v8787_v48, %v10204_v13  ;;  %v10210_v56 = vmax.f32 %v8790_v17, %v10205_v4 }
 0x294   : > { %v3167_v3 = vrot.slane %v3019_v55, 1  ;;  %v3387_v54 = vrot.slane %v3019_v55, 2  ;;  %v3607_v14 = vrot.slane %v3019_v55, 3  ;;  %v3827_v31 = vrot.slane %v3019_v55, 4 }
 0x295   : > { %v3020_v28 = vmax.f32 %v10209_v50, %v8835_v42  ;;  %v8858_v45 = vmax.f32 %v10210_v56, %v8837_v58  ;;  %v586_v5 = vsel %vm533_vm4, %v584_v20, %v585_v38  ;;  %v5249_v30 = vadd.f32 %v5161_v6, %v4271_v59 }
 0x296   : > { %2760 = vmatmul.f32.gmra.mxu1 %v586_v5  ;;  %v2717_v22 = vadd.f32 %v2716_v8, %v2603_v43  ;;  %v10212_v8 = vrot.slane %v8223_v34, 4  ;;  %v4080_v34 = vrot.slane %v8717_v53, 2 }
 0x297   : > { %v3168_v49 = vrot.slane %v3020_v28, 1  ;;  %v3170_v29 = vrot.slane %v8858_v45, 1  ;;  %v3388_v48 = vrot.slane %v3020_v28, 2  ;;  %v3390_v37 = vrot.slane %v8858_v45, 2 }
 0x298   : > { %v3608_v61 = vrot.slane %v3020_v28, 3  ;;  %v3610_v17 = vrot.slane %v8858_v45, 3  ;;  %v3828_v33 = vrot.slane %v3020_v28, 4  ;;  %v3830_v40 = vrot.slane %v8858_v45, 4 }
 0x299   : > { %v3169_v63 = vsel %vm1142_vm0, %v3167_v3, %v3168_v49  ;;  %v3171_v20 = vsel %vm1142_vm0, %v3168_v49, %v3170_v29  ;;  %v3389_v59 = vsel %vm1455_vm1, %v3387_v54, %v3388_v48  ;;  %v3391_v6 = vsel %vm1455_vm1, %v3388_v48, %v3390_v37  ;;  %v4186_v49 = vpop.f32.mrf.mxu2 }
 0x29a   : > { %v3299_v50 = vmax.f32 %v3019_v55, %v3169_v63  ;;  %v3300_v56 = vmax.f32 %v3020_v28, %v3171_v20  ;;  %v3609_v25 = vsel %vm1768_vm2, %v3607_v14, %v3608_v61  ;;  %v3611_v5 = vsel %vm1768_vm2, %v3608_v61, %v3610_v17  ;;  %v5164_v61 = vpop.f32.mrf.mxu3 }
 0x29b   : > { %v3829_v24 = vsel %vm2081_vm3, %v3827_v31, %v3828_v33  ;;  %v3831_v16 = vsel %vm2081_vm3, %v3828_v33, %v3830_v40  ;;  %v8874_v18 = vadd.f32 %v8525_v0, %v5249_v30  ;;  %v4078_v3 = vrot.slane %v8568_v23, 2 }
 0x29c   : > { %v3519_v15 = vmax.f32 %v3299_v50, %v3389_v59  ;;  %v3520_v54 = vmax.f32 %v3300_v56, %v3391_v6  ;;  %v3301_v55 = vmax.f32 %v8858_v45, %v3170_v29  ;;  %v10211_v14 = vrot.slane %v8550_v27, 2  ;;  %v5903_v6 = vld [vmem:[#allocation2 + $0x210] sm:$0xff] }
 0x29d   : > { %v5317_v28 = vsub.f32 0.0, %v8874_v18  ;;  %v4331_v31 = vmax.f32 %v8297_v19, %v8419_v39  ;;  %v2495_v30 = vrot.slane %v10169_v26, 4  ;;  %v4272_v59 = vadd.f32 %v4186_v49, %v2717_v22 }
 0x29e   : > { %v4079_v48 = vsel %vm1455_vm1, %v10211_v14, %v4078_v3  ;;  %v3739_v33 = vmax.f32 %v3519_v15, %v3609_v25  ;;  %v3740_v63 = vmax.f32 %v3520_v54, %v3611_v5  ;;  %v3521_v20 = vmax.f32 %v3301_v55, %v3390_v37  ;;  %v2606_v25 = vpop.f32.mrf.mxu0  ;;  %v2719_v5 = vpop.f32.mrf.mxu1  ;;  %v8916_v14 = vld [vmem:[#allocation2 + $0x288] sm:$0xff] }
 0x29f   : > { %4233 = vmatmul.f32.gmra.mxu2 %v4079_v48  ;;  %v5353_v43 = vmul.f32 1.442695, %v5317_v28  ;;  %v4379_v45 = vmax.f32 %v4331_v31, %v8568_v23  ;;  %v2496_v29 = vsel %vm2081_vm3, %v10212_v8, %v2495_v30  ;;  %v587_v50 = vrot.slane %v5903_v6, 6  ;;  %v8912_v28 = vld [vmem:[#allocation2 + $0x280] sm:$0xff] }
 0x2a0   : > { %v8889_v56 = vmax.f32 %v3739_v33, %v3829_v24  ;;  %v8891_v19 = vmax.f32 %v3740_v63, %v3831_v16  ;;  %v3741_v26 = vmax.f32 %v3521_v20, %v3610_v17  ;;  %2650 = vmatmul.f32.gmra.mxu0 %v2496_v29  ;;  %v5250_v15 = vadd.f32 %v5164_v61, %v4272_v59 }
 0x2a1   : > { %5727 = vpow2.f32 %v5353_v43  ;;  %v4427_v22 = vmax.f32 %v4379_v45, %v8729_v7  ;;  %v588_v37 = vsel %vm533_vm4, %v585_v38, %v587_v50  ;;  %v10213_v3 = vmax.f32 %v8830_v52, %v8717_v53 }
 0x2a2   : > { %v10214_v16 = vmax.f32 %v8833_v47, %v8722_v62  ;;  %v8904_v49 = vmax.f32 %v3741_v26, %v3830_v40  ;;  %2763 = vmatmul.f32.gmra.mxu1 %v588_v37  ;;  %v8907_v54 = vadd.f32 %v8525_v0, %v5250_v15  ;;  %v9869_v38 = vrot.slane %v8722_v62, 2 }
 0x2a3   : > { %v4473_v24 = vmax.f32 %v10213_v3, %v8889_v56  ;;  %v8910_v55 = vadd.f32 %v2719_v5, %v2606_v25  ;;  %v738_v52 = vmax.f32 %v8751_v35, %v8912_v28  ;;  %v739_v47 = vmax.f32 %v8755_v9, %v8916_v14  ;;  %v8929_v3 = vld [vmem:[#allocation2 + $0x290] sm:$0xff] }
 0x2a4   : > { %v4474_v17 = vmax.f32 %v10214_v16, %v8891_v19  ;;  %v4475_v43 = vmax.f32 %v4427_v22, %v8904_v49  ;;  %v5318_v35 = vsub.f32 0.0, %v8907_v54  ;;  %v4082_v6 = vsel %vm1455_vm1, %v4080_v34, %v9869_v38 }
 0x2a5   : > { %v4589_v40 = vrot.slane %v4473_v24, 1  ;;  %v4733_v31 = vrot.slane %v4473_v24, 2  ;;  %v4877_v0 = vrot.slane %v4473_v24, 3  ;;  %v5021_v33 = vrot.slane %v4473_v24, 4 }
 0x2a6   : > { %v4590_v48 = vrot.slane %v4474_v17, 1  ;;  %v4734_v30 = vrot.slane %v4474_v17, 2  ;;  %v4878_v61 = vrot.slane %v4474_v17, 3  ;;  %v5022_v63 = vrot.slane %v4474_v17, 4 }
 0x2a7   : > { %v5728_v45 = vpop.eup %5727  ;;  %v4592_v26 = vrot.slane %v4475_v43, 1  ;;  %v4736_v15 = vrot.slane %v4475_v43, 2  ;;  %v4880_v25 = vrot.slane %v4475_v43, 3  ;;  %4236 = vmatmul.f32.gmra.mxu2 %v4082_v6  ;;  %v5024_v37 = vrot.slane %v4475_v43, 4 }
 0x2a8   : > { %v4591_v20 = vsel %vm1142_vm0, %v4589_v40, %v4590_v48  ;;  %v4735_v59 = vsel %vm1455_vm1, %v4733_v31, %v4734_v30  ;;  %v4879_v9 = vsel %vm1768_vm2, %v4877_v0, %v4878_v61  ;;  %v5023_v29 = vsel %vm2081_vm3, %v5021_v33, %v5022_v63 }
 0x2a9   : > { %v4671_v8 = vmax.f32 %v4473_v24, %v4591_v20  ;;  %v5413_v50 = vadd.f32 1.0, %v5728_v45  ;;  %v5355_v22 = vmul.f32 1.442695, %v5318_v35  ;;  %v740_v24 = vmax.f32 %v8759_v2, %v8929_v3  ;;  %v8937_v20 = vld [vmem:[#allocation2 + $0x298] sm:$0xf] }
 0x2aa   : > { %v4593_v16 = vsel %vm1142_vm0, %v4590_v48, %v4592_v26  ;;  %v4737_v40 = vsel %vm1455_vm1, %v4734_v30, %v4736_v15  ;;  %v4881_v34 = vsel %vm1768_vm2, %v4878_v61, %v4880_v25  ;;  %v5025_v33 = vsel %vm2081_vm3, %v5022_v63, %v5024_v37 }
 0x2ab   : > { %v4815_v5 = vmax.f32 %v4671_v8, %v4735_v59  ;;  %5729 = vrcp.f32 %v5413_v50  ;;  %v4672_v0 = vmax.f32 %v4474_v17, %v4593_v16  ;;  %v741_v59 = vmax.f32 %v8763_v46, %v8937_v20 }
 0x2ac   : > { %5731 = vpow2.f32 %v5355_v22  ;;  %v834_v43 = vmax.f32 %v738_v52, %v8602_v32  ;;  %v835_v2 = vmax.f32 %v739_v47, %v8607_v21  ;;  %v836_v48 = vmax.f32 %v740_v24, %v10200_v60  ;;  %v8952_v52 = vld [vmem:[#allocation2 + $0x2f8] sm:$0xf] }
 0x2ad   : > { %v4959_v31 = vmax.f32 %v4815_v5, %v4879_v9  ;;  %v4816_v30 = vmax.f32 %v4672_v0, %v4737_v40  ;;  %v2842_v61 = vmax.f32 %v8350_v11, %v10201_v44  ;;  %v2843_v17 = vmax.f32 %v10178_v1, %v8478_v12  ;;  %v10215_v47 = vld [vmem:[#allocation50_spill] sm:$0xff] }
 0x2ae   : > { %v837_v63 = vmax.f32 %v741_v59, %v10202_v51  ;;  %v930_v45 = vmax.f32 %v834_v43, %v8792_v10  ;;  %v931_v46 = vmax.f32 %v835_v2, %v8792_v10  ;;  %v932_v32 = vmax.f32 %v836_v48, %v8792_v10 }
 0x2af   : > { %v5103_v35 = vmax.f32 %v4959_v31, %v5023_v29  ;;  %v4960_v21 = vmax.f32 %v4816_v30, %v4881_v34  ;;  %v2844_v60 = vmax.f32 %v10179_v36, %v10192_v57  ;;  %v8957_v8 = vmax.f32 %v2842_v61, %v10215_v47  ;;  %v10216_v29 = vld [vmem:[#allocation51_spill] sm:$0xff] }
 0x2b0   : > { %v8960_v9 = vmax.f32 %v2843_v17, %v10204_v13  ;;  %v933_v6 = vmax.f32 %v837_v63, %v10216_v29  ;;  %v1026_v50 = vmax.f32 %v930_v45, %v8792_v10  ;;  %v1027_v26 = vmax.f32 %v931_v46, %v8792_v10 }
 0x2b1   : > { %5208 = vmatmul.f32.gmra.mxu3 %v5103_v35  ;;  %v5730_v51 = vpop.eup %5729  ;;  %v1028_v15 = vmax.f32 %v932_v32, %v8792_v10  ;;  %v5104_v37 = vmax.f32 %v4960_v21, %v5025_v33  ;;  %v8968_v22 = vmax.f32 %v2844_v60, %v10205_v4  ;;  %v2962_v24 = vmax.f32 %v8957_v8, %v8822_v41 }
 0x2b2   : > { %v5732_v25 = vpop.eup %5731  ;;  %v5477_v5 = vmul.f32 %v5730_v51, %v8874_v18  ;;  %v1029_v40 = vmax.f32 %v933_v6, %v8952_v52  ;;  %v1276_v34 = vrot.slane %v1026_v50, 1  ;;  %v1277_v31 = vrot.slane %v1027_v26, 1 }
 0x2b3   : > { %v5414_v16 = vadd.f32 1.0, %v5732_v25  ;;  %v1279_v0 = vrot.slane %v1028_v15, 1  ;;  %v1589_v59 = vrot.slane %v1026_v50, 2  ;;  %v1590_v43 = vrot.slane %v1027_v26, 2 }
 0x2b4   : > { %5509 = vst [vmem:[%s8641_s10 + $0x20] sm:$0xff] %v5477_v5  ;;  %v1592_v2 = vrot.slane %v1028_v15, 2  ;;  %v1278_v18 = vsel %vm1142_vm0, %v1276_v34, %v1277_v31  ;;  %v1281_v33 = vrot.slane %v1029_v40, 1  ;;  %v1594_v48 = vrot.slane %v1029_v40, 2 }
 0x2b5   : > { %5733 = vrcp.f32 %v5414_v16  ;;  %v1280_v35 = vsel %vm1142_vm0, %v1277_v31, %v1279_v0  ;;  %v1440_v30 = vmax.f32 %v1026_v50, %v1278_v18  ;;  %v1591_v61 = vsel %vm1455_vm1, %v1589_v59, %v1590_v43 }
 0x2b6   : > { %v1593_v17 = vsel %vm1455_vm1, %v1590_v43, %v1592_v2  ;;  %v1282_v63 = vsel %vm1142_vm0, %v1279_v0, %v1281_v33  ;;  %v1441_v45 = vmax.f32 %v1027_v26, %v1280_v35  ;;  %v1595_v46 = vsel %vm1455_vm1, %v1592_v2, %v1594_v48  ;;  %v4189_v48 = vpop.f32.mrf.mxu2 }
 0x2b7   : > { %v1902_v32 = vrot.slane %v1026_v50, 3  ;;  %v1442_v21 = vmax.f32 %v1028_v15, %v1282_v63  ;;  %v1753_v60 = vmax.f32 %v1440_v30, %v1591_v61  ;;  %v1903_v8 = vrot.slane %v1027_v26, 3 }
 0x2b8   : > { %v1905_v51 = vrot.slane %v1028_v15, 3  ;;  %v1754_v6 = vmax.f32 %v1441_v45, %v1593_v17  ;;  %v1907_v25 = vrot.slane %v1029_v40, 3  ;;  %v2215_v5 = vrot.slane %v1026_v50, 4 }
 0x2b9   : > { %5211 = vmatmul.f32.gmra.mxu3 %v5104_v37  ;;  %v2216_v16 = vrot.slane %v1027_v26, 4  ;;  %v1755_v34 = vmax.f32 %v1442_v21, %v1595_v46  ;;  %v1904_v31 = vsel %vm1768_vm2, %v1902_v32, %v1903_v8  ;;  %v2218_v0 = vrot.slane %v1028_v15, 4  ;;  %v10217_v46 = vld [vmem:[#allocation4_spill] sm:$0xff]  ;;  %v10218_v32 = vld [vmem:[#allocation54_spill] sm:$0xff] }
 0x2ba   : > { %v1906_v59 = vsel %vm1768_vm2, %v1903_v8, %v1905_v51  ;;  %v1908_v2 = vsel %vm1768_vm2, %v1905_v51, %v1907_v25  ;;  %v2066_v18 = vmax.f32 %v1753_v60, %v1904_v31  ;;  %v2220_v26 = vrot.slane %v1029_v40, 4  ;;  %v10219_v21 = vld [vmem:[#allocation46_spill] sm:$0xff]  ;;  %v5167_v31 = vpop.f32.mrf.mxu3 }
 0x2bb   : > { %v5734_v43 = vpop.eup %5733  ;;  %v2067_v37 = vmax.f32 %v1754_v6, %v1906_v59  ;;  %v2217_v33 = vsel %vm2081_vm3, %v2215_v5, %v2216_v16  ;;  %v2068_v30 = vmax.f32 %v1755_v34, %v1908_v2  ;;  %v2219_v50 = vsel %vm2081_vm3, %v2216_v16, %v2218_v0  ;;  %v10221_v16 = vld [vmem:[#allocation9_spill] sm:$0xff] }
 0x2bc   : > { %v5478_v35 = vmul.f32 %v5734_v43, %v8907_v54  ;;  %v8986_v61 = vmax.f32 %v2066_v18, %v2217_v33  ;;  %v2963_v15 = vmax.f32 %v8960_v9, %v8835_v42  ;;  %v2964_v63 = vmax.f32 %v8968_v22, %v8837_v58 }
 0x2bd   : > { %v8988_v17 = vmax.f32 %v2067_v37, %v2219_v50  ;;  %v2221_v45 = vsel %vm2081_vm3, %v2218_v0, %v2220_v26  ;;  %v4332_v54 = vmax.f32 %v10218_v32, %v10217_v46  ;;  %v4333_v60 = vmax.f32 %v10219_v21, %v8550_v27 }
 0x2be   : > { %5510 = vst [vmem:[%s8641_s10 + $0x28] sm:$0xff] %v5478_v35  ;;  %v4273_v40 = vadd.f32 %v4189_v48, %v8910_v55  ;;  %v9001_v8 = vmax.f32 %v2068_v30, %v2221_v45  ;;  %v3022_v51 = vmax.f32 %v2962_v24, %v8986_v61  ;;  %v2497_v6 = vrot.slane %v8350_v11, 4 }
 0x2bf   : > { %v3023_v9 = vmax.f32 %v2963_v15, %v8988_v17  ;;  %v4380_v22 = vmax.f32 %v4332_v54, %v8717_v53  ;;  %v9008_v25 = vmax.f32 %v4333_v60, %v8722_v62  ;;  %v2498_v5 = vrot.slane %v10178_v1, 4 }
 0x2c0   : > { %10220 = vst [vmem:[#allocation57_spill] sm:$0xff] %v9001_v8  ;;  %v589_v34 = vrot.slane %v10221_v16, 6  ;;  %v9013_v55 = vmax.f32 %v2964_v63, %v9001_v8  ;;  %v3172_v59 = vrot.slane %v3022_v51, 1  ;;  %v3392_v24 = vrot.slane %v3022_v51, 2 }
 0x2c1   : > { %v3173_v0 = vrot.slane %v3023_v9, 1  ;;  %v3393_v43 = vrot.slane %v3023_v9, 2  ;;  %v3612_v2 = vrot.slane %v3022_v51, 3  ;;  %v3613_v18 = vrot.slane %v3023_v9, 3 }
 0x2c2   : > { %v3832_v11 = vrot.slane %v3022_v51, 4  ;;  %v3175_v33 = vrot.slane %v9013_v55, 1  ;;  %v3395_v48 = vrot.slane %v9013_v55, 2  ;;  %v3615_v35 = vrot.slane %v9013_v55, 3 }
 0x2c3   : > { %v3174_v37 = vsel %vm1142_vm0, %v3172_v59, %v3173_v0  ;;  %v3394_v50 = vsel %vm1455_vm1, %v3392_v24, %v3393_v43  ;;  %v3614_v26 = vsel %vm1768_vm2, %v3612_v2, %v3613_v18  ;;  %v3833_v15 = vrot.slane %v3023_v9, 4 }
 0x2c4   : > { %v3302_v30 = vmax.f32 %v3022_v51, %v3174_v37  ;;  %v3176_v63 = vsel %vm1142_vm0, %v3173_v0, %v3175_v33  ;;  %v3396_v45 = vsel %vm1455_vm1, %v3393_v43, %v3395_v48  ;;  %v3616_v32 = vsel %vm1768_vm2, %v3613_v18, %v3615_v35  ;;  %v2609_v51 = vpop.f32.mrf.mxu0  ;;  %v2722_v37 = vpop.f32.mrf.mxu1  ;;  %v5908_v43 = vld [vmem:[#allocation2 + $0x228] sm:$0xff] }
 0x2c5   : > { %v3835_v54 = vrot.slane %v9013_v55, 4  ;;  %v3303_v21 = vmax.f32 %v3023_v9, %v3176_v63  ;;  %v3834_v16 = vsel %vm2081_vm3, %v3832_v11, %v3833_v15  ;;  %v4428_v59 = vmax.f32 %v4380_v22, %v8889_v56  ;;  %v4192_v22 = vpop.f32.mrf.mxu2 }
 0x2c6   : > { %v3522_v60 = vmax.f32 %v3302_v30, %v3394_v50  ;;  %v4429_v2 = vmax.f32 %v9008_v25, %v8891_v19  ;;  %v2499_v0 = vsel %vm2081_vm3, %v2497_v6, %v2498_v5  ;;  %v590_v18 = vrot.slane %v5908_v43, 6  ;;  %v9043_v6 = vld [vmem:[%s9681_s2] ss:$0 sm:$0xff] }
 0x2c7   : > { %v3836_v24 = vsel %vm2081_vm3, %v3833_v15, %v3835_v54  ;;  %v3523_v38 = vmax.f32 %v3303_v21, %v3396_v45  ;;  %2653 = vmatmul.f32.gmra.mxu0 %v2499_v0  ;;  %v5251_v30 = vadd.f32 %v5167_v31, %v4273_v40  ;;  %v4083_v11 = vrot.slane %v8729_v7, 2 }
 0x2c8   : > { %v3742_v9 = vmax.f32 %v3522_v60, %v3614_v26  ;;  %v591_v50 = vsel %vm533_vm4, %v589_v34, %v590_v18  ;;  %v2723_v63 = vadd.f32 %v2722_v37, %v2609_v51  ;;  %v3304_v15 = vmax.f32 %v9013_v55, %v3175_v33  ;;  %v5170_v55 = vpop.f32.mrf.mxu3  ;;  %v5910_v60 = vld [vmem:[#allocation2 + $0x230] sm:$0xff] }
 0x2c9   : > { %v4334_v25 = vmax.f32 %v8419_v39, %v8568_v23  ;;  %v3743_v27 = vmax.f32 %v3523_v38, %v3616_v32  ;;  %2766 = vmatmul.f32.gmra.mxu1 %v591_v50  ;;  %v9046_v40 = vadd.f32 %v9043_v6, %v5251_v30  ;;  %v10222_v34 = vrot.slane %v8722_v62, 2 }
 0x2ca   : > { %v9038_v8 = vmax.f32 %v3742_v9, %v3834_v16  ;;  %v3524_v33 = vmax.f32 %v3304_v15, %v3395_v48  ;;  %v4274_v38 = vadd.f32 %v4192_v22, %v2723_v63  ;;  %v2500_v26 = vrot.slane %v10179_v36, 4 }
 0x2cb   : > { %v4084_v31 = vsel %vm1455_vm1, %v10222_v34, %v4083_v11  ;;  %v4382_v39 = vmax.f32 %v4334_v25, %v8729_v7  ;;  %v9053_v45 = vmax.f32 %v3743_v27, %v3836_v24  ;;  %v5319_v21 = vsub.f32 0.0, %v9046_v40 }
 0x2cc   : > { %4239 = vmatmul.f32.gmra.mxu2 %v4084_v31  ;;  %v4476_v32 = vmax.f32 %v4428_v59, %v9038_v8  ;;  %v592_v16 = vrot.slane %v5910_v60, 6  ;;  %v3744_v51 = vmax.f32 %v3524_v33, %v3615_v35  ;;  %v2501_v48 = vsel %vm2081_vm3, %v2498_v5, %v2500_v26  ;;  %v2612_v15 = vpop.f32.mrf.mxu0  ;;  %v2725_v25 = vpop.f32.mrf.mxu1 }
 0x2cd   : > { %10223 = vst [vmem:[#allocation52_spill] sm:$0xff] %v9053_v45  ;;  %v4430_v37 = vmax.f32 %v4382_v39, %v8904_v49  ;;  %v5252_v0 = vadd.f32 %v5170_v55, %v4274_v38  ;;  %v4477_v43 = vmax.f32 %v4429_v2, %v9053_v45  ;;  %v5357_v30 = vmul.f32 1.442695, %v5319_v21 }
 0x2ce   : > { %v4594_v9 = vrot.slane %v4476_v32, 1  ;;  %v4738_v36 = vrot.slane %v4476_v32, 2  ;;  %v4882_v27 = vrot.slane %v4476_v32, 3  ;;  %v5026_v24 = vrot.slane %v4476_v32, 4 }
 0x2cf   : > { %v9062_v59 = vmax.f32 %v3744_v51, %v3835_v54  ;;  %v593_v11 = vsel %vm533_vm4, %v590_v18, %v592_v16  ;;  %v4595_v22 = vrot.slane %v4477_v43, 1  ;;  %v4739_v35 = vrot.slane %v4477_v43, 2  ;;  %2656 = vmatmul.f32.gmra.mxu0 %v2501_v48 }
 0x2d0   : > { %v4883_v50 = vrot.slane %v4477_v43, 3  ;;  %v5027_v63 = vrot.slane %v4477_v43, 4  ;;  %5735 = vpow2.f32 %v5357_v30  ;;  %v9067_v5 = vadd.f32 %v9043_v6, %v5252_v0 }
 0x2d1   : > { %10224 = vst [vmem:[#allocation58_spill] sm:$0xff] %v9062_v59  ;;  %v4478_v1 = vmax.f32 %v4430_v37, %v9062_v59  ;;  %v4085_v2 = vrot.slane %v8889_v56, 2  ;;  %v4596_v54 = vsel %vm1142_vm0, %v4594_v9, %v4595_v22  ;;  %v4740_v34 = vsel %vm1455_vm1, %v4738_v36, %v4739_v35  ;;  %2769 = vmatmul.f32.gmra.mxu1 %v593_v11  ;;  %v9085_v11 = vld [vmem:[#allocation2 + $0x2a0] sm:$0xff] }
 0x2d2   : > { %v4884_v18 = vsel %vm1768_vm2, %v4882_v27, %v4883_v50  ;;  %v5028_v31 = vsel %vm2081_vm3, %v5026_v24, %v5027_v63  ;;  %v4673_v55 = vmax.f32 %v4476_v32, %v4596_v54  ;;  %v5320_v21 = vsub.f32 0.0, %v9067_v5 }
 0x2d3   : > { %v4597_v33 = vrot.slane %v4478_v1, 1  ;;  %v4741_v39 = vrot.slane %v4478_v1, 2  ;;  %v4885_v38 = vrot.slane %v4478_v1, 3  ;;  %v5029_v26 = vrot.slane %v4478_v1, 4  ;;  %v9089_v1 = vld [vmem:[#allocation2 + $0x2a8] sm:$0xff] }
 0x2d4   : > { %v9873_v60 = vrot.slane %v8891_v19, 2  ;;  %v9076_v16 = vadd.f32 %v2725_v25, %v2612_v15  ;;  %v4817_v51 = vmax.f32 %v4673_v55, %v4740_v34  ;;  %v5359_v36 = vmul.f32 1.442695, %v5320_v21  ;;  %v9097_v15 = vld [vmem:[#allocation2 + $0x2b8] sm:$0xf] }
 0x2d5   : > { %v4598_v37 = vsel %vm1142_vm0, %v4595_v22, %v4597_v33  ;;  %v4742_v48 = vsel %vm1455_vm1, %v4739_v35, %v4741_v39  ;;  %v4886_v0 = vsel %vm1768_vm2, %v4883_v50, %v4885_v38  ;;  %v5030_v32 = vsel %vm2081_vm3, %v5027_v63, %v5029_v26  ;;  %v9093_v35 = vld [vmem:[#allocation2 + $0x2b0] sm:$0xff]  ;;  %v9107_v33 = vld [vmem:[#allocation2 + $0x318] sm:$0xf] }
 0x2d6   : > { %v4674_v9 = vmax.f32 %v4477_v43, %v4598_v37  ;;  %v4087_v27 = vsel %vm1455_vm1, %v4085_v2, %v9873_v60  ;;  %v5736_v24 = vpop.eup %5735  ;;  %v4961_v30 = vmax.f32 %v4817_v51, %v4884_v18  ;;  %v742_v22 = vmax.f32 %v8912_v28, %v9085_v11 }
 0x2d7   : > { %4242 = vmatmul.f32.gmra.mxu2 %v4087_v27  ;;  %v743_v43 = vmax.f32 %v8916_v14, %v9089_v1  ;;  %v744_v50 = vmax.f32 %v8929_v3, %v9093_v35  ;;  %v5415_v63 = vadd.f32 1.0, %v5736_v24  ;;  %5737 = vpow2.f32 %v5359_v36 }
 0x2d8   : > { %v4818_v2 = vmax.f32 %v4674_v9, %v4742_v48  ;;  %v745_v25 = vmax.f32 %v8937_v20, %v9097_v15  ;;  %v5105_v54 = vmax.f32 %v4961_v30, %v5028_v31  ;;  %v838_v28 = vmax.f32 %v742_v22, %v8792_v10 }
 0x2d9   : > { %v839_v34 = vmax.f32 %v743_v43, %v8792_v10  ;;  %v840_v14 = vmax.f32 %v744_v50, %v8792_v10  ;;  %5739 = vrcp.f32 %v5415_v63  ;;  %v2845_v3 = vmax.f32 %v10201_v44, %v10215_v47 }
 0x2da   : > { %v4962_v18 = vmax.f32 %v4818_v2, %v4886_v0  ;;  %v841_v55 = vmax.f32 %v745_v25, %v10216_v29  ;;  %5214 = vmatmul.f32.gmra.mxu3 %v5105_v54  ;;  %v934_v39 = vmax.f32 %v838_v28, %v8792_v10  ;;  %v2846_v38 = vmax.f32 %v8478_v12, %v10204_v13 }
 0x2db   : > { %v935_v20 = vmax.f32 %v839_v34, %v8792_v10  ;;  %v936_v31 = vmax.f32 %v840_v14, %v8792_v10  ;;  %v2847_v29 = vmax.f32 %v10192_v57, %v10205_v4  ;;  %v9118_v51 = vmax.f32 %v2845_v3, %v8822_v41 }
 0x2dc   : > { %v5106_v26 = vmax.f32 %v4962_v18, %v5030_v32  ;;  %v937_v21 = vmax.f32 %v841_v55, %v8952_v52  ;;  %v1030_v37 = vmax.f32 %v934_v39, %v8792_v10  ;;  %v9124_v9 = vmax.f32 %v2846_v38, %v8835_v42 }
 0x2dd   : > { %v1031_v48 = vmax.f32 %v935_v20, %v8792_v10  ;;  %v1032_v0 = vmax.f32 %v936_v31, %v8792_v10  ;;  %v5738_v36 = vpop.eup %5737  ;;  %v9128_v27 = vmax.f32 %v2847_v29, %v8837_v58  ;;  %v2965_v24 = vmax.f32 %v9118_v51, %v8986_v61 }
 0x2de   : > { %v1033_v32 = vmax.f32 %v937_v21, %v9107_v33  ;;  %v4335_v30 = vmax.f32 %v10217_v46, %v8717_v53  ;;  %v5416_v22 = vadd.f32 1.0, %v5738_v36  ;;  %v1283_v43 = vrot.slane %v1030_v37, 1 }
 0x2df   : > { %v1284_v50 = vrot.slane %v1031_v48, 1  ;;  %v1286_v10 = vrot.slane %v1032_v0, 1  ;;  %v5740_v63 = vpop.eup %5739  ;;  %v1596_v25 = vrot.slane %v1030_v37, 2  ;;  %v1597_v54 = vrot.slane %v1031_v48, 2 }
 0x2e0   : > { %v1288_v2 = vrot.slane %v1033_v32, 1  ;;  %v1599_v28 = vrot.slane %v1032_v0, 2  ;;  %v5479_v34 = vmul.f32 %v5740_v63, %v9046_v40  ;;  %5741 = vrcp.f32 %v5416_v22 }
 0x2e1   : > { %v1285_v14 = vsel %vm1142_vm0, %v1283_v43, %v1284_v50  ;;  %v1287_v18 = vsel %vm1142_vm0, %v1284_v50, %v1286_v10  ;;  %v1598_v39 = vsel %vm1455_vm1, %v1596_v25, %v1597_v54  ;;  %v1601_v38 = vrot.slane %v1033_v32, 2 }
 0x2e2   : > { %v1289_v55 = vsel %vm1142_vm0, %v1286_v10, %v1288_v2  ;;  %v1443_v46 = vmax.f32 %v1030_v37, %v1285_v14  ;;  %v1444_v3 = vmax.f32 %v1031_v48, %v1287_v18  ;;  %5511 = vst [vmem:[%s8641_s10 + $0x30] sm:$0xff] %v5479_v34  ;;  %5217 = vmatmul.f32.gmra.mxu3 %v5106_v26  ;;  %v1909_v21 = vrot.slane %v1030_v37, 3 }
 0x2e3   : > { %v1445_v20 = vmax.f32 %v1032_v0, %v1289_v55  ;;  %v1600_v31 = vsel %vm1455_vm1, %v1597_v54, %v1599_v28  ;;  %v1910_v51 = vrot.slane %v1031_v48, 3  ;;  %v1912_v36 = vrot.slane %v1032_v0, 3 }
 0x2e4   : > { %v1756_v29 = vmax.f32 %v1443_v46, %v1598_v39  ;;  %v1757_v40 = vmax.f32 %v1444_v3, %v1600_v31  ;;  %v1602_v22 = vsel %vm1455_vm1, %v1599_v28, %v1601_v38  ;;  %v1914_v43 = vrot.slane %v1033_v32, 3  ;;  %v4195_v46 = vpop.f32.mrf.mxu2  ;;  %v10225_v31 = vld [vmem:[#allocation57_spill] sm:$0xff] }
 0x2e5   : > { %v2222_v50 = vrot.slane %v1030_v37, 4  ;;  %v2223_v10 = vrot.slane %v1031_v48, 4  ;;  %v1758_v63 = vmax.f32 %v1445_v20, %v1602_v22  ;;  %v1911_v2 = vsel %vm1768_vm2, %v1909_v21, %v1910_v51 }
 0x2e6   : > { %v1913_v25 = vsel %vm1768_vm2, %v1910_v51, %v1912_v36  ;;  %v2225_v26 = vrot.slane %v1032_v0, 4  ;;  %v5742_v34 = vpop.eup %5741  ;;  %v1915_v54 = vsel %vm1768_vm2, %v1912_v36, %v1914_v43  ;;  %v2069_v14 = vmax.f32 %v1756_v29, %v1911_v2  ;;  %v10226_v29 = vld [vmem:[#allocation48_spill] sm:$0xff] }
 0x2e7   : > { %v2070_v18 = vmax.f32 %v1757_v40, %v1913_v25  ;;  %v2224_v55 = vsel %vm2081_vm3, %v2222_v50, %v2223_v10  ;;  %v5480_v28 = vmul.f32 %v5742_v34, %v9067_v5  ;;  %v2071_v3 = vmax.f32 %v1758_v63, %v1915_v54 }
 0x2e8   : > { %v2226_v37 = vsel %vm2081_vm3, %v2223_v10, %v2225_v26  ;;  %v2227_v48 = vrot.slane %v1033_v32, 4  ;;  %v9148_v39 = vmax.f32 %v2069_v14, %v2224_v55  ;;  %v2966_v0 = vmax.f32 %v9124_v9, %v8988_v17  ;;  %v5915_v10 = vld [vmem:[#allocation2 + $0x240] sm:$0xff] }
 0x2e9   : > { %v9150_v20 = vmax.f32 %v2070_v18, %v2226_v37  ;;  %v2967_v38 = vmax.f32 %v9128_v27, %v10225_v31  ;;  %5512 = vst [vmem:[%s8641_s10 + $0x38] sm:$0xff] %v5480_v28  ;;  %v4336_v5 = vmax.f32 %v10226_v29, %v8722_v62  ;;  %v9161_v40 = vmax.f32 %v4335_v30, %v8889_v56  ;;  %v5173_v27 = vpop.f32.mrf.mxu3 }
 0x2ea   : > { %v2228_v21 = vsel %vm2081_vm3, %v2225_v26, %v2227_v48  ;;  %v4275_v32 = vadd.f32 %v4195_v46, %v9076_v16  ;;  %v3025_v36 = vmax.f32 %v2965_v24, %v9148_v39  ;;  %v2502_v22 = vrot.slane %v10201_v44, 4 }
 0x2eb   : > { %v9164_v51 = vmax.f32 %v2071_v3, %v2228_v21  ;;  %v3026_v9 = vmax.f32 %v2966_v0, %v9150_v20  ;;  %v9170_v43 = vmax.f32 %v4336_v5, %v8891_v19  ;;  %v4431_v50 = vmax.f32 %v9161_v40, %v9038_v8  ;;  %v2615_v5 = vpop.f32.mrf.mxu0  ;;  %v2728_v40 = vpop.f32.mrf.mxu1 }
 0x2ec   : > { %v2503_v30 = vrot.slane %v8478_v12, 4  ;;  %v594_v63 = vrot.slane %v5915_v10, 6  ;;  %v3177_v2 = vrot.slane %v3025_v36, 1  ;;  %v3397_v25 = vrot.slane %v3025_v36, 2 }
 0x2ed   : > { %10227 = vst [vmem:[#allocation38_spill] sm:$0xff] %v9164_v51  ;;  %v9176_v16 = vmax.f32 %v2967_v38, %v9164_v51  ;;  %v3178_v24 = vrot.slane %v3026_v9, 1  ;;  %v3398_v26 = vrot.slane %v3026_v9, 2  ;;  %v3617_v34 = vrot.slane %v3025_v36, 3 }
 0x2ee   : > { %v3618_v44 = vrot.slane %v3026_v9, 3  ;;  %v3837_v54 = vrot.slane %v3025_v36, 4  ;;  %v3838_v48 = vrot.slane %v3026_v9, 4 }
 0x2ef   : > { %v3179_v14 = vsel %vm1142_vm0, %v3177_v2, %v3178_v24  ;;  %v3180_v18 = vrot.slane %v9176_v16, 1  ;;  %v3400_v55 = vrot.slane %v9176_v16, 2  ;;  %v3620_v46 = vrot.slane %v9176_v16, 3 }
 0x2f0   : > { %v3305_v28 = vmax.f32 %v3025_v36, %v3179_v14  ;;  %v3399_v3 = vsel %vm1455_vm1, %v3397_v25, %v3398_v26  ;;  %v3619_v37 = vsel %vm1768_vm2, %v3617_v34, %v3618_v44  ;;  %v3840_v29 = vrot.slane %v9176_v16, 4  ;;  %v4198_v14 = vpop.f32.mrf.mxu2 }
 0x2f1   : > { %v3181_v0 = vsel %vm1142_vm0, %v3178_v24, %v3180_v18  ;;  %v3401_v38 = vsel %vm1455_vm1, %v3398_v26, %v3400_v55  ;;  %v3621_v21 = vsel %vm1768_vm2, %v3618_v44, %v3620_v46  ;;  %v3839_v60 = vsel %vm2081_vm3, %v3837_v54, %v3838_v48  ;;  %v5916_v26 = vld [vmem:[#allocation2 + $0x248] sm:$0xff] }
 0x2f2   : > { %v3306_v10 = vmax.f32 %v3026_v9, %v3181_v0  ;;  %v3525_v2 = vmax.f32 %v3305_v28, %v3399_v3  ;;  %v4432_v36 = vmax.f32 %v9170_v43, %v9053_v45  ;;  %v3841_v25 = vsel %vm2081_vm3, %v3838_v48, %v3840_v29  ;;  %v5176_v48 = vpop.f32.mrf.mxu3 }
 0x2f3   : > { %v2504_v24 = vsel %vm2081_vm3, %v2502_v22, %v2503_v30  ;;  %v595_v34 = vrot.slane %v5916_v26, 6  ;;  %v5253_v44 = vadd.f32 %v5173_v27, %v4275_v32  ;;  %v4088_v9 = vrot.slane %v8904_v49, 2 }
 0x2f4   : > { %v3526_v62 = vmax.f32 %v3306_v10, %v3401_v38  ;;  %v3745_v51 = vmax.f32 %v3525_v2, %v3619_v37  ;;  %2659 = vmatmul.f32.gmra.mxu0 %v2504_v24  ;;  %v2729_v28 = vadd.f32 %v2728_v40, %v2615_v5  ;;  %v3307_v3 = vmax.f32 %v9176_v16, %v3180_v18 }
 0x2f5   : > { %v596_v54 = vsel %vm533_vm4, %v594_v63, %v595_v34  ;;  %v9198_v43 = vadd.f32 %v9043_v6, %v5253_v44  ;;  %v4337_v22 = vmax.f32 %v8568_v23, %v8729_v7  ;;  %v10228_v27 = vrot.slane %v8891_v19, 2 }
 0x2f6   : > { %v3746_v0 = vmax.f32 %v3526_v62, %v3621_v21  ;;  %v9203_v32 = vmax.f32 %v3745_v51, %v3839_v60  ;;  %2772 = vmatmul.f32.gmra.mxu1 %v596_v54  ;;  %v4276_v38 = vadd.f32 %v4198_v14, %v2729_v28  ;;  %v3527_v5 = vmax.f32 %v3307_v3, %v3400_v55  ;;  %v5917_v62 = vld [vmem:[#allocation2 + $0x250] sm:$0xff] }
 0x2f7   : > { %v4089_v37 = vsel %vm1455_vm1, %v10228_v27, %v4088_v9  ;;  %v5321_v63 = vsub.f32 0.0, %v9198_v43  ;;  %v4385_v40 = vmax.f32 %v4337_v22, %v8904_v49  ;;  %v2505_v16 = vrot.slane %v10192_v57, 4  ;;  %v2618_v22 = vpop.f32.mrf.mxu0 }
 0x2f8   : > { %4245 = vmatmul.f32.gmra.mxu2 %v4089_v37  ;;  %v9211_v18 = vmax.f32 %v3746_v0, %v3841_v25  ;;  %v4479_v23 = vmax.f32 %v4431_v50, %v9203_v32  ;;  %v597_v60 = vrot.slane %v5917_v62, 6  ;;  %v5254_v51 = vadd.f32 %v5176_v48, %v4276_v38  ;;  %v2731_v48 = vpop.f32.mrf.mxu1 }
 0x2f9   : > { %v5361_v21 = vmul.f32 1.442695, %v5321_v63  ;;  %v3747_v10 = vmax.f32 %v3527_v5, %v3620_v46  ;;  %v4433_v2 = vmax.f32 %v4385_v40, %v9062_v59  ;;  %v2506_v24 = vsel %vm2081_vm3, %v2503_v30, %v2505_v16 }
 0x2fa   : > { %10229 = vst [vmem:[#allocation39_spill] sm:$0xff] %v9211_v18  ;;  %v4480_v55 = vmax.f32 %v4432_v36, %v9211_v18  ;;  %v4599_v26 = vrot.slane %v4479_v23, 1  ;;  %v4743_v44 = vrot.slane %v4479_v23, 2  ;;  %v4887_v57 = vrot.slane %v4479_v23, 3 }
 0x2fb   : > { %v5031_v25 = vrot.slane %v4479_v23, 4  ;;  %5743 = vpow2.f32 %v5361_v21  ;;  %v9219_v14 = vmax.f32 %v3747_v10, %v3840_v29  ;;  %v598_v50 = vsel %vm533_vm4, %v595_v34, %v597_v60 }
 0x2fc   : > { %v4600_v9 = vrot.slane %v4480_v55, 1  ;;  %v4744_v28 = vrot.slane %v4480_v55, 2  ;;  %v4888_v46 = vrot.slane %v4480_v55, 3  ;;  %v5032_v54 = vrot.slane %v4480_v55, 4  ;;  %2662 = vmatmul.f32.gmra.mxu0 %v2506_v24 }
 0x2fd   : > { %v4481_v12 = vmax.f32 %v4433_v2, %v9219_v14  ;;  %v9224_v30 = vadd.f32 %v9043_v6, %v5254_v51  ;;  %v4090_v36 = vrot.slane %v9038_v8, 2  ;;  %v4091_v3 = vrot.slane %v9053_v45, 2 }
 0x2fe   : > { %v4601_v29 = vsel %vm1142_vm0, %v4599_v26, %v4600_v9  ;;  %v4745_v34 = vsel %vm1455_vm1, %v4743_v44, %v4744_v28  ;;  %v4889_v0 = vsel %vm1768_vm2, %v4887_v57, %v4888_v46  ;;  %v5033_v27 = vsel %vm2081_vm3, %v5031_v25, %v5032_v54  ;;  %2775 = vmatmul.f32.gmra.mxu1 %v598_v50  ;;  %v9242_v50 = vld [vmem:[#allocation2] sm:$0xff] }
 0x2ff   : > { %v4675_v37 = vmax.f32 %v4479_v23, %v4601_v29  ;;  %v4602_v38 = vrot.slane %v4481_v12, 1  ;;  %v4746_v63 = vrot.slane %v4481_v12, 2  ;;  %v4890_v5 = vrot.slane %v4481_v12, 3 }
 0x300   : > { %v5034_v40 = vrot.slane %v4481_v12, 4  ;;  %v5322_v16 = vsub.f32 0.0, %v9224_v30  ;;  %v4092_v62 = vsel %vm1455_vm1, %v4090_v36, %v4091_v3  ;;  %v9236_v60 = vadd.f32 %v2731_v48, %v2618_v22 }
 0x301   : > { %v5744_v51 = vpop.eup %5743  ;;  %v4819_v21 = vmax.f32 %v4675_v37, %v4745_v34  ;;  %v4603_v10 = vsel %vm1142_vm0, %v4600_v9, %v4602_v38  ;;  %v4747_v2 = vsel %vm1455_vm1, %v4744_v28, %v4746_v63  ;;  %v4891_v23 = vsel %vm1768_vm2, %v4888_v46, %v4890_v5  ;;  %4248 = vmatmul.f32.gmra.mxu2 %v4092_v62  ;;  %v9250_v46 = vld [vmem:[#allocation2 + $0x2d8] sm:$0xf] }
 0x302   : > { %v5417_v24 = vadd.f32 1.0, %v5744_v51  ;;  %v4676_v26 = vmax.f32 %v4480_v55, %v4603_v10  ;;  %v5035_v44 = vsel %vm2081_vm3, %v5032_v54, %v5034_v40  ;;  %v5363_v57 = vmul.f32 1.442695, %v5322_v16 }
 0x303   : > { %v4963_v25 = vmax.f32 %v4819_v21, %v4889_v0  ;;  %v746_v12 = vmax.f32 %v9085_v11, %v9242_v50  ;;  %v747_v36 = vmax.f32 %v9089_v1, %v9242_v50  ;;  %v748_v9 = vmax.f32 %v9093_v35, %v9242_v50  ;;  %v9262_v0 = vld [vmem:[#allocation2 + $0x338] sm:$0xf] }
 0x304   : > { %5745 = vrcp.f32 %v5417_v24  ;;  %v4820_v28 = vmax.f32 %v4676_v26, %v4747_v2  ;;  %v749_v55 = vmax.f32 %v9097_v15, %v9250_v46  ;;  %v2848_v54 = vmax.f32 %v10215_v47, %v8822_v41 }
 0x305   : > { %v5107_v22 = vmax.f32 %v4963_v25, %v5033_v27  ;;  %5747 = vpow2.f32 %v5363_v57  ;;  %v842_v11 = vmax.f32 %v746_v12, %v9242_v50  ;;  %v843_v48 = vmax.f32 %v747_v36, %v9242_v50 }
 0x306   : > { %v4964_v1 = vmax.f32 %v4820_v28, %v4891_v23  ;;  %v844_v29 = vmax.f32 %v748_v9, %v9242_v50  ;;  %v845_v35 = vmax.f32 %v749_v55, %v8952_v52  ;;  %v2849_v34 = vmax.f32 %v10204_v13, %v8835_v42 }
 0x307   : > { %5220 = vmatmul.f32.gmra.mxu3 %v5107_v22  ;;  %v938_v15 = vmax.f32 %v842_v11, %v9242_v50  ;;  %v939_v27 = vmax.f32 %v843_v48, %v9242_v50  ;;  %v2850_v37 = vmax.f32 %v10205_v4, %v8837_v58  ;;  %v9269_v38 = vmax.f32 %v2848_v54, %v8986_v61 }
 0x308   : > { %v5108_v63 = vmax.f32 %v4964_v1, %v5035_v44  ;;  %v940_v5 = vmax.f32 %v844_v29, %v9242_v50  ;;  %v941_v52 = vmax.f32 %v845_v35, %v9107_v33  ;;  %v9274_v40 = vmax.f32 %v2849_v34, %v8988_v17 }
 0x309   : > { %v1034_v16 = vmax.f32 %v938_v15, %v9242_v50  ;;  %v1035_v62 = vmax.f32 %v939_v27, %v9242_v50  ;;  %v9279_v51 = vmax.f32 %v2850_v37, %v10225_v31  ;;  %v2968_v21 = vmax.f32 %v9269_v38, %v9148_v39 }
 0x30a   : > { %v5746_v10 = vpop.eup %5745  ;;  %v1036_v2 = vmax.f32 %v940_v5, %v9242_v50  ;;  %v1037_v23 = vmax.f32 %v941_v52, %v9262_v0  ;;  %v2969_v24 = vmax.f32 %v9274_v40, %v9150_v20  ;;  %v4338_v26 = vmax.f32 %v8717_v53, %v8889_v56 }
 0x30b   : > { %v5748_v44 = vpop.eup %5747  ;;  %v5481_v57 = vmul.f32 %v5746_v10, %v9198_v43  ;;  %v1290_v25 = vrot.slane %v1034_v16, 1  ;;  %v1291_v12 = vrot.slane %v1035_v62, 1  ;;  %v1603_v36 = vrot.slane %v1034_v16, 2 }
 0x30c   : > { %v5418_v9 = vadd.f32 1.0, %v5748_v44  ;;  %v1293_v28 = vrot.slane %v1036_v2, 1  ;;  %v1295_v55 = vrot.slane %v1037_v23, 1  ;;  %v1604_v54 = vrot.slane %v1035_v62, 2 }
 0x30d   : > { %5513 = vst [vmem:[%s8641_s10 + $0x40] sm:$0xff] %v5481_v57  ;;  %v1292_v22 = vsel %vm1142_vm0, %v1290_v25, %v1291_v12  ;;  %v1606_v11 = vrot.slane %v1036_v2, 2  ;;  %v1608_v48 = vrot.slane %v1037_v23, 2  ;;  %v1916_v1 = vrot.slane %v1034_v16, 3 }
 0x30e   : > { %5749 = vrcp.f32 %v5418_v9  ;;  %v1294_v29 = vsel %vm1142_vm0, %v1291_v12, %v1293_v28  ;;  %v1296_v53 = vsel %vm1142_vm0, %v1293_v28, %v1295_v55  ;;  %v1446_v35 = vmax.f32 %v1034_v16, %v1292_v22  ;;  %v4201_v22 = vpop.f32.mrf.mxu2 }
 0x30f   : > { %5223 = vmatmul.f32.gmra.mxu3 %v5108_v63  ;;  %v1447_v43 = vmax.f32 %v1035_v62, %v1294_v29  ;;  %v1448_v34 = vmax.f32 %v1036_v2, %v1296_v53  ;;  %v1605_v15 = vsel %vm1455_vm1, %v1603_v36, %v1604_v54  ;;  %v1607_v27 = vsel %vm1455_vm1, %v1604_v54, %v1606_v11 }
 0x310   : > { %v1609_v37 = vsel %vm1455_vm1, %v1606_v11, %v1608_v48  ;;  %v1759_v38 = vmax.f32 %v1446_v35, %v1605_v15  ;;  %v1917_v5 = vrot.slane %v1035_v62, 3  ;;  %v1919_v52 = vrot.slane %v1036_v2, 3 }
 0x311   : > { %v1760_v40 = vmax.f32 %v1447_v43, %v1607_v27  ;;  %v1761_v10 = vmax.f32 %v1448_v34, %v1609_v37  ;;  %v1921_v44 = vrot.slane %v1037_v23, 3  ;;  %v2229_v57 = vrot.slane %v1034_v16, 4  ;;  %v10230_v16 = vld [vmem:[#allocation38_spill] sm:$0xff] }
 0x312   : > { %v1918_v25 = vsel %vm1768_vm2, %v1916_v1, %v1917_v5  ;;  %v1920_v12 = vsel %vm1768_vm2, %v1917_v5, %v1919_v52  ;;  %v2230_v63 = vrot.slane %v1035_v62, 4  ;;  %v2232_v9 = vrot.slane %v1036_v2, 4 }
 0x313   : > { %v1922_v28 = vsel %vm1768_vm2, %v1919_v52, %v1921_v44  ;;  %v2072_v36 = vmax.f32 %v1759_v38, %v1918_v25  ;;  %v2073_v55 = vmax.f32 %v1760_v40, %v1920_v12  ;;  %v2234_v54 = vrot.slane %v1037_v23, 4  ;;  %v10231_v23 = vld [vmem:[#allocation56_spill] sm:$0xff]  ;;  %v5179_v52 = vpop.f32.mrf.mxu3  ;;  %v5920_v44 = vld [vmem:[#allocation2 + $0x260] sm:$0xff] }
 0x314   : > { %v5750_v11 = vpop.eup %5749  ;;  %v2074_v48 = vmax.f32 %v1761_v10, %v1922_v28  ;;  %v2231_v29 = vsel %vm2081_vm3, %v2229_v57, %v2230_v63  ;;  %v2233_v53 = vsel %vm2081_vm3, %v2230_v63, %v2232_v9  ;;  %v2970_v1 = vmax.f32 %v9279_v51, %v10230_v16 }
 0x315   : > { %v5482_v35 = vmul.f32 %v5750_v11, %v9224_v30  ;;  %v2235_v62 = vsel %vm2081_vm3, %v2232_v9, %v2234_v54  ;;  %v9306_v2 = vmax.f32 %v2072_v36, %v2231_v29  ;;  %v9308_v43 = vmax.f32 %v2073_v55, %v2233_v53 }
 0x316   : > { %v9310_v34 = vmax.f32 %v2074_v48, %v2235_v62  ;;  %v4339_v15 = vmax.f32 %v10231_v23, %v8891_v19  ;;  %v9315_v27 = vmax.f32 %v4338_v26, %v9038_v8  ;;  %v4277_v37 = vadd.f32 %v4201_v22, %v9236_v60  ;;  %v2621_v62 = vpop.f32.mrf.mxu0  ;;  %v2734_v23 = vpop.f32.mrf.mxu1 }
 0x317   : > { %5514 = vst [vmem:[%s8641_s10 + $0x48] sm:$0xff] %v5482_v35  ;;  %v3028_v51 = vmax.f32 %v2968_v21, %v9306_v2  ;;  %v3029_v30 = vmax.f32 %v2969_v24, %v9308_v43  ;;  %v2507_v38 = vrot.slane %v10215_v47, 4  ;;  %v2508_v5 = vrot.slane %v10204_v13, 4 }
 0x318   : > { %v9324_v40 = vmax.f32 %v2970_v1, %v9310_v34  ;;  %v4387_v10 = vmax.f32 %v4339_v15, %v9053_v45  ;;  %v4434_v26 = vmax.f32 %v9315_v27, %v9203_v32  ;;  %v599_v60 = vrot.slane %v5920_v44, 6 }
 0x319   : > { %v3182_v57 = vrot.slane %v3028_v51, 1  ;;  %v3183_v25 = vrot.slane %v3029_v30, 1  ;;  %v3402_v21 = vrot.slane %v3028_v51, 2  ;;  %v3403_v12 = vrot.slane %v3029_v30, 2 }
 0x31a   : > { %v3185_v24 = vrot.slane %v9324_v40, 1  ;;  %v3405_v47 = vrot.slane %v9324_v40, 2  ;;  %v3622_v13 = vrot.slane %v3028_v51, 3  ;;  %v3623_v63 = vrot.slane %v3029_v30, 3 }
 0x31b   : > { %v3184_v9 = vsel %vm1142_vm0, %v3182_v57, %v3183_v25  ;;  %v3404_v28 = vsel %vm1455_vm1, %v3402_v21, %v3403_v12  ;;  %v3625_v36 = vrot.slane %v9324_v40, 3  ;;  %v3842_v55 = vrot.slane %v3028_v51, 4  ;;  %v5921_v57 = vld [vmem:[#allocation2 + $0x268] sm:$0xff] }
 0x31c   : > { %v3186_v54 = vsel %vm1142_vm0, %v3183_v25, %v3185_v24  ;;  %v3308_v22 = vmax.f32 %v3028_v51, %v3184_v9  ;;  %v3406_v11 = vsel %vm1455_vm1, %v3403_v12, %v3405_v47  ;;  %v3624_v48 = vsel %vm1768_vm2, %v3622_v13, %v3623_v63 }
 0x31d   : > { %v3309_v29 = vmax.f32 %v3029_v30, %v3186_v54  ;;  %v3626_v53 = vsel %vm1768_vm2, %v3623_v63, %v3625_v36  ;;  %v3843_v1 = vrot.slane %v3029_v30, 4  ;;  %v3845_v35 = vrot.slane %v9324_v40, 4  ;;  %v4204_v63 = vpop.f32.mrf.mxu2 }
 0x31e   : > { %v3528_v15 = vmax.f32 %v3308_v22, %v3404_v28  ;;  %v4435_v27 = vmax.f32 %v4387_v10, %v9211_v18  ;;  %v2509_v44 = vsel %vm2081_vm3, %v2507_v38, %v2508_v5  ;;  %v600_v25 = vrot.slane %v5921_v57, 6 }
 0x31f   : > { %v3529_v51 = vmax.f32 %v3309_v29, %v3406_v11  ;;  %v3844_v21 = vsel %vm2081_vm3, %v3842_v55, %v3843_v1  ;;  %v3846_v12 = vsel %vm2081_vm3, %v3843_v1, %v3845_v35  ;;  %2665 = vmatmul.f32.gmra.mxu0 %v2509_v44  ;;  %v5255_v13 = vadd.f32 %v5179_v52, %v4277_v37  ;;  %v5182_v11 = vpop.f32.mrf.mxu3 }
 0x320   : > { %v3748_v30 = vmax.f32 %v3528_v15, %v3624_v48  ;;  %v601_v9 = vsel %vm533_vm4, %v599_v60, %v600_v25  ;;  %v4093_v54 = vrot.slane %v9062_v59, 2  ;;  %v2735_v28 = vadd.f32 %v2734_v23, %v2621_v62  ;;  %v5922_v62 = vld [vmem:[#allocation2 + $0x270] sm:$0xff] }
 0x321   : > { %v3749_v22 = vmax.f32 %v3529_v51, %v3626_v53  ;;  %2778 = vmatmul.f32.gmra.mxu1 %v601_v9  ;;  %v9346_v38 = vadd.f32 %v9043_v6, %v5255_v13  ;;  %v3310_v10 = vmax.f32 %v9324_v40, %v3185_v24  ;;  %v4340_v55 = vmax.f32 %v8729_v7, %v8904_v49 }
 0x322   : > { %v9351_v29 = vmax.f32 %v3748_v30, %v3844_v21  ;;  %v4094_v37 = vsel %vm1455_vm1, %v4091_v3, %v4093_v54  ;;  %v4278_v52 = vadd.f32 %v4204_v63, %v2735_v28  ;;  %v2510_v60 = vrot.slane %v10205_v4, 4  ;;  %v2737_v54 = vpop.f32.mrf.mxu1 }
 0x323   : > { %v9357_v48 = vmax.f32 %v3749_v22, %v3846_v12  ;;  %v5323_v53 = vsub.f32 0.0, %v9346_v38  ;;  %4251 = vmatmul.f32.gmra.mxu2 %v4094_v37  ;;  %v3530_v1 = vmax.f32 %v3310_v10, %v3405_v47  ;;  %v4388_v40 = vmax.f32 %v4340_v55, %v9062_v59 }
 0x324   : > { %v4482_v7 = vmax.f32 %v4434_v26, %v9351_v29  ;;  %v2511_v24 = vsel %vm2081_vm3, %v2508_v5, %v2510_v60  ;;  %v602_v23 = vrot.slane %v5922_v62, 6  ;;  %v5256_v15 = vadd.f32 %v5182_v11, %v4278_v52  ;;  %v9381_v60 = vld [vmem:[#allocation2 + $0x2f8] sm:$0xf] }
 0x325   : > { %v4483_v3 = vmax.f32 %v4435_v27, %v9357_v48  ;;  %v5365_v44 = vmul.f32 1.442695, %v5323_v53  ;;  %v3750_v57 = vmax.f32 %v3530_v1, %v3625_v36  ;;  %v4436_v4 = vmax.f32 %v4388_v40, %v9219_v14  ;;  %v2624_v36 = vpop.f32.mrf.mxu0 }
 0x326   : > { %v4604_v51 = vrot.slane %v4482_v7, 1  ;;  %v4748_v21 = vrot.slane %v4482_v7, 2  ;;  %v4892_v12 = vrot.slane %v4482_v7, 3  ;;  %v5036_v13 = vrot.slane %v4482_v7, 4 }
 0x327   : > { %v4605_v47 = vrot.slane %v4483_v3, 1  ;;  %v4749_v63 = vrot.slane %v4483_v3, 2  ;;  %v4893_v30 = vrot.slane %v4483_v3, 3  ;;  %v5037_v9 = vrot.slane %v4483_v3, 4  ;;  %2668 = vmatmul.f32.gmra.mxu0 %v2511_v24 }
 0x328   : > { %5751 = vpow2.f32 %v5365_v44  ;;  %v9365_v5 = vmax.f32 %v3750_v57, %v3845_v35  ;;  %v603_v26 = vsel %vm533_vm4, %v600_v25, %v602_v23  ;;  %v9369_v27 = vadd.f32 %v9043_v6, %v5256_v15 }
 0x329   : > { %v4606_v28 = vsel %vm1142_vm0, %v4604_v51, %v4605_v47  ;;  %v4750_v22 = vsel %vm1455_vm1, %v4748_v21, %v4749_v63  ;;  %v4894_v10 = vsel %vm1768_vm2, %v4892_v12, %v4893_v30  ;;  %v5038_v55 = vsel %vm2081_vm3, %v5036_v13, %v5037_v9  ;;  %2781 = vmatmul.f32.gmra.mxu1 %v603_v26 }
 0x32a   : > { %v4677_v11 = vmax.f32 %v4482_v7, %v4606_v28  ;;  %v4484_v35 = vmax.f32 %v4436_v4, %v9365_v5  ;;  %v5324_v37 = vsub.f32 0.0, %v9369_v27  ;;  %v4095_v25 = vrot.slane %v9203_v32, 2 }
 0x32b   : > { %v4096_v6 = vrot.slane %v9211_v18, 2  ;;  %v9379_v52 = vadd.f32 %v2737_v54, %v2624_v36  ;;  %v753_v53 = vmax.f32 %v9250_v46, %v9381_v60  ;;  %v2851_v54 = vmax.f32 %v8822_v41, %v8986_v61 }
 0x32c   : > { %v4821_v1 = vmax.f32 %v4677_v11, %v4750_v22  ;;  %v4607_v40 = vrot.slane %v4484_v35, 1  ;;  %v4751_v24 = vrot.slane %v4484_v35, 2  ;;  %v4895_v62 = vrot.slane %v4484_v35, 3  ;;  %v9395_v22 = vld [vmem:[#allocation2 + $0x358] sm:$0xf] }
 0x32d   : > { %v5039_v7 = vrot.slane %v4484_v35, 4  ;;  %v5367_v23 = vmul.f32 1.442695, %v5324_v37  ;;  %v4097_v15 = vsel %vm1455_vm1, %v4095_v25, %v4096_v6  ;;  %v849_v36 = vmax.f32 %v753_v53, %v9107_v33 }
 0x32e   : > { %v5752_v44 = vpop.eup %5751  ;;  %v4965_v57 = vmax.f32 %v4821_v1, %v4894_v10  ;;  %v4608_v4 = vsel %vm1142_vm0, %v4605_v47, %v4607_v40  ;;  %v4752_v51 = vsel %vm1455_vm1, %v4749_v63, %v4751_v24  ;;  %v4896_v21 = vsel %vm1768_vm2, %v4893_v30, %v4895_v62  ;;  %4254 = vmatmul.f32.gmra.mxu2 %v4097_v15 }
 0x32f   : > { %v5419_v46 = vadd.f32 1.0, %v5752_v44  ;;  %v4678_v12 = vmax.f32 %v4483_v3, %v4608_v4  ;;  %v5040_v13 = vsel %vm2081_vm3, %v5037_v9, %v5039_v7  ;;  %5753 = vpow2.f32 %v5367_v23 }
 0x330   : > { %v5109_v26 = vmax.f32 %v4965_v57, %v5038_v55  ;;  %v2852_v47 = vmax.f32 %v8835_v42, %v8988_v17  ;;  %v2853_v63 = vmax.f32 %v8837_v58, %v10225_v31  ;;  %v945_v3 = vmax.f32 %v849_v36, %v9262_v0 }
 0x331   : > { %5755 = vrcp.f32 %v5419_v46  ;;  %v4822_v28 = vmax.f32 %v4678_v12, %v4752_v51  ;;  %v2911_v30 = vmax.f32 %v2851_v54, %v9148_v39  ;;  %v4341_v33 = vmax.f32 %v8889_v56, %v9038_v8 }
 0x332   : > { %5226 = vmatmul.f32.gmra.mxu3 %v5109_v26  ;;  %v2912_v10 = vmax.f32 %v2852_v47, %v9150_v20  ;;  %v9407_v55 = vmax.f32 %v2853_v63, %v10230_v16  ;;  %v4342_v11 = vmax.f32 %v8891_v19, %v9053_v45  ;;  %v1041_v35 = vmax.f32 %v945_v3, %v9395_v22  ;;  %v4207_v63 = vpop.f32.mrf.mxu2 }
 0x333   : > { %v4966_v9 = vmax.f32 %v4822_v28, %v4896_v21  ;;  %v9413_v37 = vrot.slane %v9242_v50, 1  ;;  %v9416_v25 = vrot.slane %v9242_v50, 2  ;;  %v9419_v53 = vrot.slane %v9242_v50, 3 }
 0x334   : > { %v9422_v40 = vrot.slane %v9242_v50, 4  ;;  %v2971_v24 = vmax.f32 %v2911_v30, %v9306_v2  ;;  %v2972_v19 = vmax.f32 %v2912_v10, %v9308_v43  ;;  %v1302_v7 = vrot.slane %v1041_v35, 1 }
 0x335   : > { %v5754_v56 = vpop.eup %5753  ;;  %v5110_v1 = vmax.f32 %v4966_v9, %v5040_v13  ;;  %v1449_v15 = vmax.f32 %v9242_v50, %v9413_v37  ;;  %v1615_v44 = vrot.slane %v1041_v35, 2  ;;  %v1928_v57 = vrot.slane %v1041_v35, 3  ;;  %v5185_v9 = vpop.f32.mrf.mxu3 }
 0x336   : > { %v5420_v62 = vadd.f32 1.0, %v5754_v56  ;;  %v1303_v51 = vsel %vm1142_vm0, %v9413_v37, %v1302_v7  ;;  %v2241_v26 = vrot.slane %v1041_v35, 4  ;;  %v9441_v36 = vmax.f32 %v4341_v33, %v9203_v32  ;;  %v2627_v35 = vpop.f32.mrf.mxu0  ;;  %v2740_v56 = vpop.f32.mrf.mxu1  ;;  %v5924_v7 = vld [vmem:[#allocation2 + $0x280] sm:$0xff] }
 0x337   : > { %v5756_v23 = vpop.eup %5755  ;;  %v1451_v21 = vmax.f32 %v9242_v50, %v1303_v51  ;;  %v1616_v46 = vsel %vm1455_vm1, %v9416_v25, %v1615_v44  ;;  %v1762_v12 = vmax.f32 %v1449_v15, %v9416_v25  ;;  %v1929_v13 = vsel %vm1768_vm2, %v9419_v53, %v1928_v57  ;;  %v9462_v44 = vld [vmem:[#allocation2 + $0x288] sm:$0xff] }
 0x338   : > { %v5483_v4 = vmul.f32 %v5756_v23, %v9346_v38  ;;  %5757 = vrcp.f32 %v5420_v62  ;;  %v2973_v38 = vmax.f32 %v9407_v55, %v9310_v34  ;;  %v9444_v54 = vmax.f32 %v4342_v11, %v9211_v18 }
 0x339   : > { %v1764_v28 = vmax.f32 %v1451_v21, %v1616_v46  ;;  %v2075_v47 = vmax.f32 %v1762_v12, %v9419_v53  ;;  %v2512_v3 = vrot.slane %v8822_v41, 4  ;;  %v9877_v30 = vrot.slane %v8835_v42, 4 }
 0x33a   : > { %5515 = vst [vmem:[%s8641_s10 + $0x50] sm:$0xff] %v5483_v4  ;;  %5229 = vmatmul.f32.gmra.mxu3 %v5110_v1  ;;  %v2242_v10 = vsel %vm2081_vm3, %v9422_v40, %v2241_v26  ;;  %v4279_v11 = vadd.f32 %v4207_v63, %v9379_v52  ;;  %v604_v23 = vrot.slane %v5924_v7, 6  ;;  %v605_v57 = vrot.slane %v9462_v44, 6  ;;  %v4210_v44 = vpop.f32.mrf.mxu2 }
 0x33b   : > { %v2077_v1 = vmax.f32 %v1764_v28, %v1929_v13  ;;  %v9457_v62 = vmax.f32 %v2075_v47, %v9422_v40  ;;  %v2514_v41 = vsel %vm2081_vm3, %v2512_v3, %v9877_v30  ;;  %v4098_v4 = vrot.slane %v9219_v14, 2  ;;  %v9475_v28 = vld [vmem:[%s9681_s2] ss:$0 sm:$0xff] }
 0x33c   : > { %2671 = vmatmul.f32.gmra.mxu0 %v2514_v41  ;;  %v5257_v52 = vadd.f32 %v5185_v9, %v4279_v11  ;;  %v2741_v51 = vadd.f32 %v2740_v56, %v2627_v35  ;;  %v606_v26 = vsel %vm533_vm4, %v604_v23, %v605_v57  ;;  %v4343_v63 = vmax.f32 %v8904_v49, %v9062_v59 }
 0x33d   : > { %v9467_v46 = vmax.f32 %v2077_v1, %v2242_v10  ;;  %v3031_v12 = vmax.f32 %v2971_v24, %v9457_v62  ;;  %v3032_v13 = vmax.f32 %v2972_v19, %v9457_v62  ;;  %2784 = vmatmul.f32.gmra.mxu1 %v606_v26 }
 0x33e   : > { %v5758_v15 = vpop.eup %5757  ;;  %v9478_v47 = vadd.f32 %v9475_v28, %v5257_v52  ;;  %v4280_v30 = vadd.f32 %v4210_v44, %v2741_v51 }
 0x33f   : > { %v5484_v21 = vmul.f32 %v5758_v15, %v9369_v27  ;;  %v4099_v27 = vsel %vm1455_vm1, %v4096_v6, %v4098_v4  ;;  %v3033_v24 = vmax.f32 %v2973_v38, %v9467_v46  ;;  %v3187_v19 = vrot.slane %v3031_v12, 1 }
 0x340   : > { %v3188_v3 = vrot.slane %v3032_v13, 1  ;;  %v3407_v9 = vrot.slane %v3031_v12, 2  ;;  %4257 = vmatmul.f32.gmra.mxu2 %v4099_v27  ;;  %v3408_v10 = vrot.slane %v3032_v13, 2  ;;  %v3627_v11 = vrot.slane %v3031_v12, 3 }
 0x341   : > { %5516 = vst [vmem:[%s8641_s10 + $0x58] sm:$0xff] %v5484_v21  ;;  %v3628_v35 = vrot.slane %v3032_v13, 3  ;;  %v3847_v56 = vrot.slane %v3031_v12, 4  ;;  %v3190_v41 = vrot.slane %v3033_v24, 1  ;;  %v3410_v7 = vrot.slane %v3033_v24, 2 }
 0x342   : > { %v3189_v1 = vsel %vm1142_vm0, %v3187_v19, %v3188_v3  ;;  %v3630_v6 = vrot.slane %v3033_v24, 3  ;;  %v3409_v49 = vsel %vm1455_vm1, %v3407_v9, %v3408_v10  ;;  %v3848_v38 = vrot.slane %v3032_v13, 4 }
 0x343   : > { %v3311_v23 = vmax.f32 %v3031_v12, %v3189_v1  ;;  %v3629_v15 = vsel %vm1768_vm2, %v3627_v11, %v3628_v35  ;;  %v3191_v52 = vsel %vm1142_vm0, %v3188_v3, %v3190_v41  ;;  %v3411_v4 = vsel %vm1455_vm1, %v3408_v10, %v3410_v7  ;;  %v5188_v12 = vpop.f32.mrf.mxu3 }
 0x344   : > { %v3631_v21 = vsel %vm1768_vm2, %v3628_v35, %v3630_v6  ;;  %v3850_v26 = vrot.slane %v3033_v24, 4  ;;  %v3312_v27 = vmax.f32 %v3032_v13, %v3191_v52  ;;  %v3849_v19 = vsel %vm2081_vm3, %v3847_v56, %v3848_v38 }
 0x345   : > { %v3531_v33 = vmax.f32 %v3311_v23, %v3409_v49  ;;  %v5325_v55 = vsub.f32 0.0, %v9478_v47  ;;  %v3313_v1 = vmax.f32 %v3033_v24, %v3190_v41  ;;  %v4391_v11 = vmax.f32 %v4343_v63, %v9219_v14  ;;  %v5927_v23 = vld [vmem:[#allocation2 + $0x290] sm:$0xff] }
 0x346   : > { %v3851_v9 = vsel %vm2081_vm3, %v3848_v38, %v3850_v26  ;;  %v3532_v59 = vmax.f32 %v3312_v27, %v3411_v4  ;;  %v2515_v10 = vrot.slane %v8837_v58, 4  ;;  %v607_v49 = vrot.slane %v5927_v23, 6 }
 0x347   : > { %v3751_v3 = vmax.f32 %v3531_v33, %v3629_v15  ;;  %v5369_v45 = vmul.f32 1.442695, %v5325_v55  ;;  %v3533_v35 = vmax.f32 %v3313_v1, %v3410_v7  ;;  %v4439_v13 = vmax.f32 %v4391_v11, %v9365_v5 }
 0x348   : > { %v5258_v56 = vadd.f32 %v5188_v12, %v4280_v30  ;;  %v3752_v52 = vmax.f32 %v3532_v59, %v3631_v21  ;;  %v10232_v24 = vrot.slane %v8835_v42, 4  ;;  %v608_v55 = vsel %vm533_vm4, %v605_v57, %v607_v49  ;;  %v5928_v57 = vld [vmem:[#allocation2 + $0x318] sm:$0xf] }
 0x349   : > { %v9499_v18 = vmax.f32 %v3751_v3, %v3849_v19  ;;  %5759 = vpow2.f32 %v5369_v45  ;;  %v3753_v51 = vmax.f32 %v3533_v35, %v3630_v6  ;;  %v4100_v33 = vrot.slane %v9351_v29, 2  ;;  %2787 = vmatmul.f32.gmra.mxu1 %v608_v55 }
 0x34a   : > { %v2516_v63 = vsel %vm2081_vm3, %v10232_v24, %v2515_v10  ;;  %v9506_v58 = vadd.f32 %v9475_v28, %v5258_v56  ;;  %v9509_v41 = vmax.f32 %v3752_v52, %v3851_v9  ;;  %v10233_v59 = vmax.f32 %v9441_v36, %v9351_v29 }
 0x34b   : > { %2674 = vmatmul.f32.gmra.mxu0 %v2516_v63  ;;  %v4101_v42 = vrot.slane %v9357_v48, 2  ;;  %v9516_v30 = vmax.f32 %v3753_v51, %v3850_v26  ;;  %v757_v6 = vmax.f32 %v9381_v60, %v5928_v57  ;;  %v10234_v15 = vmax.f32 %v9444_v54, %v9357_v48 }
 0x34c   : > { %v4485_v45 = vmax.f32 %v10233_v59, %v9499_v18  ;;  %v5326_v7 = vsub.f32 0.0, %v9506_v58  ;;  %v2854_v35 = vmax.f32 %v8986_v61, %v9148_v39  ;;  %v2630_v39 = vpop.f32.mrf.mxu0 }
 0x34d   : > { %v4486_v38 = vmax.f32 %v10234_v15, %v9509_v41  ;;  %v4487_v27 = vmax.f32 %v4439_v13, %v9516_v30  ;;  %v4102_v26 = vsel %vm1455_vm1, %v4100_v33, %v4101_v42  ;;  %v853_v57 = vmax.f32 %v757_v6, %v9262_v0 }
 0x34e   : > { %v4609_v44 = vrot.slane %v4485_v45, 1  ;;  %v4753_v4 = vrot.slane %v4485_v45, 2  ;;  %v4897_v21 = vrot.slane %v4485_v45, 3  ;;  %v5041_v36 = vrot.slane %v4485_v45, 4  ;;  %4260 = vmatmul.f32.gmra.mxu2 %v4102_v26 }
 0x34f   : > { %v5371_v19 = vmul.f32 1.442695, %v5326_v7  ;;  %v5760_v12 = vpop.eup %5759  ;;  %v4610_v9 = vrot.slane %v4486_v38, 1  ;;  %v4754_v1 = vrot.slane %v4486_v38, 2  ;;  %v4898_v60 = vrot.slane %v4486_v38, 3  ;;  %v2743_v7 = vpop.f32.mrf.mxu1 }
 0x350   : > { %v5042_v11 = vrot.slane %v4486_v38, 4  ;;  %v5421_v3 = vadd.f32 1.0, %v5760_v12  ;;  %v4612_v54 = vrot.slane %v4487_v27, 1  ;;  %v4756_v10 = vrot.slane %v4487_v27, 2 }
 0x351   : > { %v4611_v23 = vsel %vm1142_vm0, %v4609_v44, %v4610_v9  ;;  %v4755_v13 = vsel %vm1455_vm1, %v4753_v4, %v4754_v1  ;;  %v4899_v49 = vsel %vm1768_vm2, %v4897_v21, %v4898_v60  ;;  %v4900_v56 = vrot.slane %v4487_v27, 3  ;;  %v484_v21 = vld [vmem:[#allocation2 + $0x378] sm:$0xf] }
 0x352   : > { %v4679_v52 = vmax.f32 %v4485_v45, %v4611_v23  ;;  %5761 = vrcp.f32 %v5421_v3  ;;  %v4613_v24 = vsel %vm1142_vm0, %v4610_v9, %v4612_v54  ;;  %v4757_v63 = vsel %vm1455_vm1, %v4754_v1, %v4756_v10 }
 0x353   : > { %v5043_v51 = vsel %vm2081_vm3, %v5041_v36, %v5042_v11  ;;  %v4680_v55 = vmax.f32 %v4486_v38, %v4613_v24  ;;  %v5044_v33 = vrot.slane %v4487_v27, 4  ;;  %5763 = vpow2.f32 %v5371_v19 }
 0x354   : > { %v4823_v59 = vmax.f32 %v4679_v52, %v4755_v13  ;;  %v2855_v15 = vmax.f32 %v8988_v17, %v9150_v20  ;;  %v2856_v45 = vmax.f32 %v10225_v31, %v10230_v16  ;;  %v4901_v4 = vsel %vm1768_vm2, %v4898_v60, %v4900_v56 }
 0x355   : > { %v4824_v44 = vmax.f32 %v4680_v55, %v4757_v63  ;;  %v2914_v36 = vmax.f32 %v2854_v35, %v9306_v2  ;;  %v4344_v38 = vmax.f32 %v9038_v8, %v9203_v32  ;;  %v949_v19 = vmax.f32 %v853_v57, %v9395_v22 }
 0x356   : > { %v4967_v27 = vmax.f32 %v4823_v59, %v4899_v49  ;;  %v2915_v0 = vmax.f32 %v2855_v15, %v9308_v43  ;;  %v9548_v6 = vmax.f32 %v2856_v45, %v9310_v34  ;;  %v5045_v20 = vsel %vm2081_vm3, %v5042_v11, %v5044_v33 }
 0x357   : > { %v2744_v16 = vadd.f32 %v2743_v7, %v2630_v39  ;;  %v2974_v26 = vmax.f32 %v2914_v36, %v9457_v62  ;;  %v4968_v2 = vmax.f32 %v4824_v44, %v4901_v4  ;;  %v1045_v1 = vmax.f32 %v949_v19, %v484_v21  ;;  %v4213_v39 = vpop.f32.mrf.mxu2  ;;  %v2633_v44 = vpop.f32.mrf.mxu0 }
 0x358   : > { %v5762_v12 = vpop.eup %5761  ;;  %v5111_v9 = vmax.f32 %v4967_v27, %v5043_v51  ;;  %v2975_v8 = vmax.f32 %v2915_v0, %v9457_v62  ;;  %v2976_v43 = vmax.f32 %v9548_v6, %v9467_v46  ;;  %v9558_v60 = vmax.f32 %v4344_v38, %v9351_v29  ;;  %v2746_v4 = vpop.f32.mrf.mxu1  ;;  %v5929_v0 = vld [vmem:[#allocation2 + $0x2a0] sm:$0xff] }
 0x359   : > { %v5764_v32 = vpop.eup %5763  ;;  %v5485_v22 = vmul.f32 %v5762_v12, %v9478_v47  ;;  %v3034_v34 = vmax.f32 %v2974_v26, %v9457_v62  ;;  %v1309_v3 = vrot.slane %v1045_v1, 1  ;;  %v1622_v54 = vrot.slane %v1045_v1, 2 }
 0x35a   : > { %5232 = vmatmul.f32.gmra.mxu3 %v5111_v9  ;;  %v5422_v11 = vadd.f32 1.0, %v5764_v32  ;;  %v1935_v10 = vrot.slane %v1045_v1, 3  ;;  %v2248_v35 = vrot.slane %v1045_v1, 4  ;;  %v9562_v23 = vmax.f32 %v2975_v8, %v9457_v62 }
 0x35b   : > { %5517 = vst [vmem:[%s8641_s10 + $0x60] sm:$0xff] %v5485_v22  ;;  %v3192_v13 = vrot.slane %v3034_v34, 1  ;;  %v3412_v47 = vrot.slane %v3034_v34, 2  ;;  %v5112_v49 = vmax.f32 %v4968_v2, %v5045_v20  ;;  %v1310_v46 = vsel %vm1142_vm0, %v9413_v37, %v1309_v3  ;;  %v5930_v20 = vld [vmem:[#allocation2 + $0x2a8] sm:$0xff]  ;;  %v10237_v3 = vld [vmem:[#allocation58_spill] sm:$0xff] }
 0x35c   : > { %5765 = vrcp.f32 %v5422_v11  ;;  %v1623_v29 = vsel %vm1455_vm1, %v9416_v25, %v1622_v54  ;;  %v1454_v56 = vmax.f32 %v9242_v50, %v1310_v46  ;;  %v1936_v52 = vsel %vm1768_vm2, %v9419_v53, %v1935_v10  ;;  %v5191_v53 = vpop.f32.mrf.mxu3 }
 0x35d   : > { %v3193_v24 = vrot.slane %v9562_v23, 1  ;;  %v3413_v62 = vrot.slane %v9562_v23, 2  ;;  %v3632_v63 = vrot.slane %v3034_v34, 3  ;;  %v3633_v51 = vrot.slane %v9562_v23, 3 }
 0x35e   : > { %v3852_v55 = vrot.slane %v3034_v34, 4  ;;  %v3853_v33 = vrot.slane %v9562_v23, 4  ;;  %v1767_v59 = vmax.f32 %v1454_v56, %v1623_v29  ;;  %v2249_v37 = vsel %vm2081_vm3, %v9422_v40, %v2248_v35 }
 0x35f   : > { %v3194_v25 = vsel %vm1142_vm0, %v3192_v13, %v3193_v24  ;;  %v3414_v50 = vsel %vm1455_vm1, %v3412_v47, %v3413_v62  ;;  %v3634_v57 = vsel %vm1768_vm2, %v3632_v63, %v3633_v51  ;;  %v4440_v45 = vmax.f32 %v9558_v60, %v9499_v18  ;;  %v10236_v60 = vld [vmem:[#allocation52_spill] sm:$0xff] }
 0x360   : > { %v3314_v7 = vmax.f32 %v3034_v34, %v3194_v25  ;;  %v3854_v15 = vsel %vm2081_vm3, %v3852_v55, %v3853_v33  ;;  %v2080_v21 = vmax.f32 %v1767_v59, %v1936_v52  ;;  %v4281_v36 = vadd.f32 %v4213_v39, %v2744_v16  ;;  %v10235_v34 = vld [vmem:[#allocation39_spill] sm:$0xff]  ;;  %v5931_v52 = vld [vmem:[#allocation2 + $0x2b0] sm:$0xff]  ;;  %v2749_v39 = vpop.f32.mrf.mxu1 }
 0x361   : > { %v2517_v40 = vrot.slane %v8986_v61, 4  ;;  %v2518_v38 = vrot.slane %v8988_v17, 4  ;;  %v609_v6 = vrot.slane %v5929_v0, 6  ;;  %v610_v26 = vrot.slane %v5930_v20, 6 }
 0x362   : > { %v5766_v27 = vpop.eup %5765  ;;  %5235 = vmatmul.f32.gmra.mxu3 %v5112_v49  ;;  %v3534_v19 = vmax.f32 %v3314_v7, %v3414_v50  ;;  %v4103_v12 = vrot.slane %v9365_v5, 2  ;;  %v2393_v9 = vmax.f32 %v2080_v21, %v2249_v37  ;;  %v5259_v16 = vadd.f32 %v5191_v53, %v4281_v36  ;;  %v4216_v49 = vpop.f32.mrf.mxu2 }
 0x363   : > { %v5486_v18 = vmul.f32 %v5766_v27, %v9506_v58  ;;  %v2519_v2 = vsel %vm2081_vm3, %v2517_v40, %v2518_v38  ;;  %v611_v61 = vsel %vm533_vm4, %v609_v6, %v610_v26  ;;  %v2747_v8 = vadd.f32 %v2746_v4, %v2633_v44  ;;  %v2636_v50 = vpop.f32.mrf.mxu0 }
 0x364   : > { %v3754_v1 = vmax.f32 %v3534_v19, %v3634_v57  ;;  %2677 = vmatmul.f32.gmra.mxu0 %v2519_v2  ;;  %v4104_v17 = vsel %vm1455_vm1, %v4101_v42, %v4103_v12  ;;  %v3036_v32 = vmax.f32 %v2976_v43, %v2393_v9  ;;  %2790 = vmatmul.f32.gmra.mxu1 %v611_v61  ;;  %v2520_v10 = vrot.slane %v10225_v31, 4  ;;  %v5194_v43 = vpop.f32.mrf.mxu3 }
 0x365   : > { %5518 = vst [vmem:[%s8641_s10 + $0x68] sm:$0xff] %v5486_v18  ;;  %v9594_v22 = vadd.f32 %v9475_v28, %v5259_v16  ;;  %4263 = vmatmul.f32.gmra.mxu2 %v4104_v17  ;;  %v4345_v11 = vmax.f32 %v10236_v60, %v10235_v34  ;;  %v4346_v54 = vmax.f32 %v10237_v3, %v9219_v14  ;;  %v612_v63 = vrot.slane %v5931_v52, 6 }
 0x366   : > { %v3974_v58 = vmax.f32 %v3754_v1, %v3854_v15  ;;  %v3195_v35 = vrot.slane %v3036_v32, 1  ;;  %v3415_v13 = vrot.slane %v3036_v32, 2  ;;  %v3635_v42 = vrot.slane %v3036_v32, 3 }
 0x367   : > { %v3855_v47 = vrot.slane %v3036_v32, 4  ;;  %v5327_v29 = vsub.f32 0.0, %v9594_v22  ;;  %v4282_v56 = vadd.f32 %v4216_v49, %v2747_v8  ;;  %v4393_v25 = vmax.f32 %v4345_v11, %v9357_v48 }
 0x368   : > { %v9601_v46 = vmax.f32 %v4440_v45, %v3974_v58  ;;  %v3196_v55 = vsel %vm1142_vm0, %v3193_v24, %v3195_v35  ;;  %v3416_v59 = vsel %vm1455_vm1, %v3413_v62, %v3415_v13  ;;  %v3636_v14 = vsel %vm1768_vm2, %v3633_v51, %v3635_v42  ;;  %v2752_v18 = vpop.f32.mrf.mxu1 }
 0x369   : > { %v3856_v31 = vsel %vm2081_vm3, %v3853_v33, %v3855_v47  ;;  %v3315_v37 = vmax.f32 %v9562_v23, %v3196_v55  ;;  %v5373_v53 = vmul.f32 1.442695, %v5327_v29  ;;  %v3316_v7 = vmax.f32 %v3036_v32, %v3195_v35 }
 0x36a   : > { %v4394_v57 = vmax.f32 %v4346_v54, %v9365_v5  ;;  %v2521_v45 = vsel %vm2081_vm3, %v2518_v38, %v2520_v10  ;;  %v613_v24 = vsel %vm533_vm4, %v610_v26, %v612_v63  ;;  %v5260_v62 = vadd.f32 %v5194_v43, %v4282_v56  ;;  %v4219_v21 = vpop.f32.mrf.mxu2 }
 0x36b   : > { %v3535_v15 = vmax.f32 %v3315_v37, %v3416_v59  ;;  %5767 = vpow2.f32 %v5373_v53  ;;  %v3536_v51 = vmax.f32 %v3316_v7, %v3415_v13  ;;  %v2750_v33 = vadd.f32 %v2749_v39, %v2636_v50  ;;  %v2639_v12 = vpop.f32.mrf.mxu0 }
 0x36c   : > { %2680 = vmatmul.f32.gmra.mxu0 %v2521_v45  ;;  %2793 = vmatmul.f32.gmra.mxu1 %v613_v24  ;;  %v4441_v48 = vmax.f32 %v4393_v25, %v9509_v41  ;;  %v9615_v44 = vadd.f32 %v9475_v28, %v5260_v62  ;;  %v4442_v5 = vmax.f32 %v4394_v57, %v9516_v30  ;;  %v5197_v36 = vpop.f32.mrf.mxu3  ;;  %v4614_v19 = vrot.slane %v9601_v46, 1 }
 0x36d   : > { %v3755_v23 = vmax.f32 %v3535_v15, %v3636_v14  ;;  %v3756_v4 = vmax.f32 %v3536_v51, %v3635_v42  ;;  %v4283_v27 = vadd.f32 %v4219_v21, %v2750_v33  ;;  %v4758_v20 = vrot.slane %v9601_v46, 2 }
 0x36e   : > { %v5328_v38 = vsub.f32 0.0, %v9615_v44  ;;  %v4902_v41 = vrot.slane %v9601_v46, 3  ;;  %v5046_v26 = vrot.slane %v9601_v46, 4  ;;  %v2753_v1 = vadd.f32 %v2752_v18, %v2639_v12 }
 0x36f   : > { %v3975_v40 = vmax.f32 %v3755_v23, %v3856_v31  ;;  %v3976_v0 = vmax.f32 %v3756_v4, %v3855_v47  ;;  %v5261_v16 = vadd.f32 %v5197_v36, %v4283_v27 }
 0x370   : > { %v5375_v2 = vmul.f32 1.442695, %v5328_v38  ;;  %v2755_v37 = vpop.f32.mrf.mxu1 }
 0x371   : > { %v4489_v6 = vmax.f32 %v4441_v48, %v3975_v40  ;;  %v5768_v9 = vpop.eup %5767  ;;  %v4490_v30 = vmax.f32 %v4442_v5, %v3976_v0  ;;  %v5297_v55 = vadd.f32 %v9475_v28, %v5261_v16 }
 0x372   : > { %v5423_v58 = vadd.f32 1.0, %v5768_v9  ;;  %v4222_v49 = vpop.f32.mrf.mxu2 }
 0x373   : > { %v4615_v61 = vrot.slane %v4489_v6, 1  ;;  %v4759_v17 = vrot.slane %v4489_v6, 2  ;;  %v4903_v8 = vrot.slane %v4489_v6, 3  ;;  %v5047_v32 = vrot.slane %v4489_v6, 4 }
 0x374   : > { %v4617_v34 = vrot.slane %v4490_v30, 1  ;;  %v4761_v60 = vrot.slane %v4490_v30, 2  ;;  %v4905_v11 = vrot.slane %v4490_v30, 3  ;;  %5769 = vrcp.f32 %v5423_v58  ;;  %v5200_v43 = vpop.f32.mrf.mxu3 }
 0x375   : > { %v4616_v3 = vsel %vm1142_vm0, %v4614_v19, %v4615_v61  ;;  %v4760_v54 = vsel %vm1455_vm1, %v4758_v20, %v4759_v17  ;;  %v4904_v10 = vsel %vm1768_vm2, %v4902_v41, %v4903_v8  ;;  %v5048_v35 = vsel %vm2081_vm3, %v5046_v26, %v5047_v32 }
 0x376   : > { %v4681_v13 = vmax.f32 %v9601_v46, %v4616_v3  ;;  %v4618_v42 = vsel %vm1142_vm0, %v4615_v61, %v4617_v34  ;;  %v4762_v47 = vsel %vm1455_vm1, %v4759_v17, %v4761_v60  ;;  %v4906_v56 = vsel %vm1768_vm2, %v4903_v8, %v4905_v11  ;;  %v2642_v46 = vpop.f32.mrf.mxu0 }
 0x377   : > { %v4682_v29 = vmax.f32 %v4489_v6, %v4618_v42  ;;  %v5049_v52 = vrot.slane %v4490_v30, 4  ;;  %5771 = vpow2.f32 %v5375_v2  ;;  %v4284_v59 = vadd.f32 %v4222_v49, %v2753_v1 }
 0x378   : > { %v4825_v63 = vmax.f32 %v4681_v13, %v4760_v54  ;;  %v5329_v50 = vsub.f32 0.0, %v5297_v55  ;;  %v2756_v7 = vadd.f32 %v2755_v37, %v2642_v46  ;;  %v2758_v27 = vpop.f32.mrf.mxu1 }
 0x379   : > { %v4826_v14 = vmax.f32 %v4682_v29, %v4762_v47  ;;  %v5050_v31 = vsel %vm2081_vm3, %v5047_v32, %v5049_v52  ;;  %v5262_v39 = vadd.f32 %v5200_v43, %v4284_v59 }
 0x37a   : > { %v4969_v25 = vmax.f32 %v4825_v63, %v4904_v10  ;;  %v5770_v57 = vpop.eup %5769  ;;  %v5377_v45 = vmul.f32 1.442695, %v5329_v50  ;;  %v4225_v4 = vpop.f32.mrf.mxu2 }
 0x37b   : > { %v4970_v53 = vmax.f32 %v4826_v14, %v4906_v56  ;;  %v5298_v24 = vadd.f32 %v9475_v28, %v5262_v39  ;;  %v5487_v51 = vmul.f32 %v5770_v57, %v9594_v22  ;;  %v4285_v21 = vadd.f32 %v4225_v4, %v2756_v7 }
 0x37c   : > { %v5113_v15 = vmax.f32 %v4969_v25, %v5048_v35  ;;  %5773 = vpow2.f32 %v5377_v45  ;;  %v5203_v5 = vpop.f32.mrf.mxu3 }
 0x37d   : > { %v5772_v62 = vpop.eup %5771  ;;  %v5114_v33 = vmax.f32 %v4970_v53, %v5050_v31  ;;  %v5330_v48 = vsub.f32 0.0, %v5298_v24  ;;  %5519 = vst [vmem:[%s8641_s10 + $0x70] sm:$0xff] %v5487_v51  ;;  %v5263_v40 = vadd.f32 %v5203_v5, %v4285_v21 }
 0x37e   : > { %5238 = vmatmul.f32.gmra.mxu3 %v5113_v15  ;;  %v5424_v23 = vadd.f32 1.0, %v5772_v62  ;;  %v2645_v38 = vpop.f32.mrf.mxu0 }
 0x37f   : > { %v5379_v36 = vmul.f32 1.442695, %v5330_v48  ;;  %v5299_v19 = vadd.f32 %v9475_v28, %v5263_v40  ;;  %v2759_v0 = vadd.f32 %v2758_v27, %v2645_v38 }
 0x380   : > { %5775 = vrcp.f32 %v5424_v23  ;;  %v2761_v17 = vpop.f32.mrf.mxu1 }
 0x381   : > { %5777 = vpow2.f32 %v5379_v36  ;;  %v5331_v20 = vsub.f32 0.0, %v5299_v19 }
 0x382   : > { %v5774_v22 = vpop.eup %5773  ;;  %v4228_v26 = vpop.f32.mrf.mxu2 }
 0x383   : > { %v5425_v6 = vadd.f32 1.0, %v5774_v22  ;;  %v5381_v9 = vmul.f32 1.442695, %v5331_v20  ;;  %v4286_v30 = vadd.f32 %v4228_v26, %v2759_v0 }
 0x384   : > { %v5206_v12 = vpop.f32.mrf.mxu3 }
 0x385   : > { %5779 = vrcp.f32 %v5425_v6  ;;  %v5264_v1 = vadd.f32 %v5206_v12, %v4286_v30 }
 0x386   : > { %v5776_v41 = vpop.eup %5775  ;;  %5241 = vmatmul.f32.gmra.mxu3 %v5114_v33  ;;  %5781 = vpow2.f32 %v5381_v9  ;;  %v2648_v61 = vpop.f32.mrf.mxu0 }
 0x387   : > { %v5488_v18 = vmul.f32 %v5776_v41, %v9615_v44  ;;  %v5778_v2 = vpop.eup %5777  ;;  %v5300_v8 = vadd.f32 %v9475_v28, %v5264_v1  ;;  %v2762_v32 = vadd.f32 %v2761_v17, %v2648_v61 }
 0x388   : > { %v5426_v16 = vadd.f32 1.0, %v5778_v2  ;;  %v2764_v49 = vpop.f32.mrf.mxu1 }
 0x389   : > { %5520 = vst [vmem:[%s8641_s10 + $0x78] sm:$0xff] %v5488_v18  ;;  %v5332_v34 = vsub.f32 0.0, %v5300_v8 }
 0x38a   : > { %5783 = vrcp.f32 %v5426_v16  ;;  %v4231_v11 = vpop.f32.mrf.mxu2 }
 0x38b   : > { %v5780_v58 = vpop.eup %5779  ;;  %v5383_v54 = vmul.f32 1.442695, %v5332_v34  ;;  %v4287_v10 = vadd.f32 %v4231_v11, %v2762_v32 }
 0x38c   : > { %v5489_v60 = vmul.f32 %v5780_v58, %v5297_v55  ;;  %v5209_v44 = vpop.f32.mrf.mxu3  ;;  %v5782_v3 = vpop.eup %5781 }
 0x38d   : > { %v5427_v35 = vadd.f32 1.0, %v5782_v3  ;;  %5785 = vpow2.f32 %v5383_v54  ;;  %v5265_v42 = vadd.f32 %v5209_v44, %v4287_v10 }
 0x38e   : > { %5521 = vst [vmem:[%s8641_s10 + $0x80] sm:$0xff] %v5489_v60  ;;  %v2651_v47 = vpop.f32.mrf.mxu0 }
 0x38f   : > { %5787 = vrcp.f32 %v5427_v35  ;;  %v5301_v29 = vadd.f32 %v9475_v28, %v5265_v42  ;;  %v2765_v56 = vadd.f32 %v2764_v49, %v2651_v47 }
 0x390   : > { %v5784_v13 = vpop.eup %5783  ;;  %v2767_v53 = vpop.f32.mrf.mxu1 }
 0x391   : > { %v5490_v43 = vmul.f32 %v5784_v13, %v5298_v24  ;;  %v5333_v52 = vsub.f32 0.0, %v5301_v29 }
 0x392   : > { %v4234_v63 = vpop.f32.mrf.mxu2 }
 0x393   : > { %5522 = vst [vmem:[%s8641_s10 + $0x88] sm:$0xff] %v5490_v43  ;;  %v5786_v59 = vpop.eup %5785  ;;  %v5385_v14 = vmul.f32 1.442695, %v5333_v52  ;;  %v4288_v31 = vadd.f32 %v4234_v63, %v2765_v56 }
 0x394   : > { %v5212_v55 = vpop.f32.mrf.mxu3  ;;  %v5428_v37 = vadd.f32 1.0, %v5786_v59 }
 0x395   : > { %v5788_v46 = vpop.eup %5787  ;;  %5789 = vpow2.f32 %v5385_v14  ;;  %v5266_v50 = vadd.f32 %v5212_v55, %v4288_v31 }
 0x396   : > { %v5491_v25 = vmul.f32 %v5788_v46, %v5299_v19  ;;  %v2654_v39 = vpop.f32.mrf.mxu0  ;;  %5791 = vrcp.f32 %v5428_v37 }
 0x397   : > { %v5302_v7 = vadd.f32 %v9475_v28, %v5266_v50  ;;  %v2768_v57 = vadd.f32 %v2767_v53, %v2654_v39 }
 0x398   : > { %5523 = vst [vmem:[%s8641_s10 + $0x90] sm:$0xff] %v5491_v25  ;;  %v2770_v36 = vpop.f32.mrf.mxu1 }
 0x399   : > { %v5334_v15 = vsub.f32 0.0, %v5302_v7 }
 0x39a   : > { %v4237_v45 = vpop.f32.mrf.mxu2 }
 0x39b   : > { %v5790_v62 = vpop.eup %5789  ;;  %v5387_v51 = vmul.f32 1.442695, %v5334_v15  ;;  %v4289_v33 = vadd.f32 %v4237_v45, %v2768_v57 }
 0x39c   : > { %v5215_v24 = vpop.f32.mrf.mxu3  ;;  %v5792_v23 = vpop.eup %5791  ;;  %v5429_v48 = vadd.f32 1.0, %v5790_v62 }
 0x39d   : > { %v5492_v4 = vmul.f32 %v5792_v23, %v5300_v8  ;;  %5793 = vpow2.f32 %v5387_v51  ;;  %v5267_v5 = vadd.f32 %v5215_v24, %v4289_v33 }
 0x39e   : > { %v2657_v21 = vpop.f32.mrf.mxu0  ;;  %5795 = vrcp.f32 %v5429_v48 }
 0x39f   : > { %5524 = vst [vmem:[%s8641_s10 + $0x98] sm:$0xff] %v5492_v4  ;;  %v5303_v40 = vadd.f32 %v9475_v28, %v5267_v5  ;;  %v2771_v38 = vadd.f32 %v2770_v36, %v2657_v21 }
 0x3a0   : > { %v2773_v30 = vpop.f32.mrf.mxu1 }
 0x3a1   : > { %v5335_v27 = vsub.f32 0.0, %v5303_v40 }
 0x3a2   : > { %v4240_v19 = vpop.f32.mrf.mxu2 }
 0x3a3   : > { %v5794_v22 = vpop.eup %5793  ;;  %v5389_v6 = vmul.f32 1.442695, %v5335_v27  ;;  %v4290_v20 = vadd.f32 %v4240_v19, %v2771_v38 }
 0x3a4   : > { %v5218_v0 = vpop.f32.mrf.mxu3  ;;  %v5796_v41 = vpop.eup %5795  ;;  %v5430_v26 = vadd.f32 1.0, %v5794_v22 }
 0x3a5   : > { %v5493_v12 = vmul.f32 %v5796_v41, %v5301_v29  ;;  %5797 = vpow2.f32 %v5389_v6  ;;  %v5268_v18 = vadd.f32 %v5218_v0, %v4290_v20 }
 0x3a6   : > { %v2660_v9 = vpop.f32.mrf.mxu0  ;;  %5799 = vrcp.f32 %v5430_v26 }
 0x3a7   : > { %5525 = vst [vmem:[%s8641_s10 + $0xa0] sm:$0xff] %v5493_v12  ;;  %v5304_v2 = vadd.f32 %v9475_v28, %v5268_v18  ;;  %v2774_v16 = vadd.f32 %v2773_v30, %v2660_v9 }
 0x3a8   : > { %v2776_v54 = vpop.f32.mrf.mxu1 }
 0x3a9   : > { %v5336_v1 = vsub.f32 0.0, %v5304_v2 }
 0x3aa   : > { %v4243_v61 = vpop.f32.mrf.mxu2 }
 0x3ab   : > { %v5798_v8 = vpop.eup %5797  ;;  %v5391_v32 = vmul.f32 1.442695, %v5336_v1  ;;  %v4291_v58 = vadd.f32 %v4243_v61, %v2774_v16 }
 0x3ac   : > { %v5221_v17 = vpop.f32.mrf.mxu3  ;;  %v5800_v34 = vpop.eup %5799  ;;  %v5431_v60 = vadd.f32 1.0, %v5798_v8 }
 0x3ad   : > { %v5494_v11 = vmul.f32 %v5800_v34, %v5302_v7  ;;  %5801 = vpow2.f32 %v5391_v32  ;;  %v5269_v44 = vadd.f32 %v5221_v17, %v4291_v58 }
 0x3ae   : > { %v2663_v3 = vpop.f32.mrf.mxu0  ;;  %5803 = vrcp.f32 %v5431_v60 }
 0x3af   : > { %5526 = vst [vmem:[%s8641_s10 + $0xa8] sm:$0xff] %v5494_v11  ;;  %v5305_v10 = vadd.f32 %v9475_v28, %v5269_v44  ;;  %v2777_v35 = vadd.f32 %v2776_v54, %v2663_v3 }
 0x3b0   : > { %v2779_v14 = vpop.f32.mrf.mxu1 }
 0x3b1   : > { %v5337_v13 = vsub.f32 0.0, %v5305_v10 }
 0x3b2   : > { %v4246_v42 = vpop.f32.mrf.mxu2 }
 0x3b3   : > { %v5802_v49 = vpop.eup %5801  ;;  %v5393_v43 = vmul.f32 1.442695, %v5337_v13  ;;  %v4292_v29 = vadd.f32 %v4246_v42, %v2777_v35 }
 0x3b4   : > { %v5224_v47 = vpop.f32.mrf.mxu3  ;;  %v5804_v56 = vpop.eup %5803  ;;  %v5432_v52 = vadd.f32 1.0, %v5802_v49 }
 0x3b5   : > { %v5495_v63 = vmul.f32 %v5804_v56, %v5303_v40  ;;  %5805 = vpow2.f32 %v5393_v43  ;;  %v5270_v55 = vadd.f32 %v5224_v47, %v4292_v29 }
 0x3b6   : > { %v2666_v59 = vpop.f32.mrf.mxu0  ;;  %5807 = vrcp.f32 %v5432_v52 }
 0x3b7   : > { %5527 = vst [vmem:[%s8641_s10 + $0xb0] sm:$0xff] %v5495_v63  ;;  %v5306_v31 = vadd.f32 %v9475_v28, %v5270_v55  ;;  %v2780_v46 = vadd.f32 %v2779_v14, %v2666_v59 }
 0x3b8   : > { %v2782_v51 = vpop.f32.mrf.mxu1 }
 0x3b9   : > { %v5338_v37 = vsub.f32 0.0, %v5306_v31 }
 0x3ba   : > { %v4249_v25 = vpop.f32.mrf.mxu2 }
 0x3bb   : > { %v5806_v39 = vpop.eup %5805  ;;  %v5395_v53 = vmul.f32 1.442695, %v5338_v37  ;;  %v4293_v7 = vadd.f32 %v4249_v25, %v2780_v46 }
 0x3bc   : > { %v5227_v50 = vpop.f32.mrf.mxu3  ;;  %v5808_v57 = vpop.eup %5807  ;;  %v5433_v15 = vadd.f32 1.0, %v5806_v39 }
 0x3bd   : > { %v5496_v45 = vmul.f32 %v5808_v57, %v5304_v2  ;;  %5809 = vpow2.f32 %v5395_v53  ;;  %v5271_v24 = vadd.f32 %v5227_v50, %v4293_v7 }
 0x3be   : > { %v2669_v62 = vpop.f32.mrf.mxu0  ;;  %5811 = vrcp.f32 %v5433_v15 }
 0x3bf   : > { %5528 = vst [vmem:[%s8641_s10 + $0xb8] sm:$0xff] %v5496_v45  ;;  %v5307_v33 = vadd.f32 %v9475_v28, %v5271_v24  ;;  %v2783_v23 = vadd.f32 %v2782_v51, %v2669_v62 }
 0x3c0   : > { %v2785_v9 = vpop.f32.mrf.mxu1 }
 0x3c1   : > { %v5339_v48 = vsub.f32 0.0, %v5307_v33 }
 0x3c2   : > { %v4252_v4 = vpop.f32.mrf.mxu2 }
 0x3c3   : > { %v5810_v21 = vpop.eup %5809  ;;  %v5397_v36 = vmul.f32 1.442695, %v5339_v48  ;;  %v4294_v40 = vadd.f32 %v4252_v4, %v2783_v23 }
 0x3c4   : > { %v5230_v5 = vpop.f32.mrf.mxu3  ;;  %v5812_v38 = vpop.eup %5811  ;;  %v5434_v27 = vadd.f32 1.0, %v5810_v21 }
 0x3c5   : > { %v5497_v19 = vmul.f32 %v5812_v38, %v5305_v10  ;;  %5813 = vpow2.f32 %v5397_v36  ;;  %v5272_v0 = vadd.f32 %v5230_v5, %v4294_v40  ;;  %v5932_v40 = vld [vmem:[%s9681_s2] ss:$0 sm:$0xff] }
 0x3c6   : > { %5815 = vrcp.f32 %v5434_v27  ;;  %v2672_v18 = vpop.f32.mrf.mxu0 }
 0x3c7   : > { %5529 = vst [vmem:[%s8641_s10 + $0xc0] sm:$0xff] %v5497_v19  ;;  %v5308_v22 = vadd.f32 %v9475_v28, %v5272_v0  ;;  %v2786_v16 = vadd.f32 %v2785_v9, %v2672_v18 }
 0x3c8   : > { %v2788_v34 = vpop.f32.mrf.mxu1 }
 0x3c9   : > { %v5340_v6 = vsub.f32 0.0, %v5308_v22 }
 0x3ca   : > { %v4255_v2 = vpop.f32.mrf.mxu2 }
 0x3cb   : > { %v5814_v20 = vpop.eup %5813  ;;  %v5399_v41 = vmul.f32 1.442695, %v5340_v6  ;;  %v4295_v32 = vadd.f32 %v4255_v2, %v2786_v16 }
 0x3cc   : > { %v5816_v26 = vpop.eup %5815  ;;  %v5435_v12 = vadd.f32 1.0, %v5814_v20 }
 0x3cd   : > { %v5498_v30 = vmul.f32 %v5816_v26, %v5306_v31  ;;  %5817 = vpow2.f32 %v5399_v41 }
 0x3ce   : > { %5819 = vrcp.f32 %v5435_v12  ;;  %v2675_v58 = vpop.f32.mrf.mxu0 }
 0x3cf   : > { %5530 = vst [vmem:[%s8641_s10 + $0xc8] sm:$0xff] %v5498_v30  ;;  %v2789_v44 = vadd.f32 %v2788_v34, %v2675_v58 }
 0x3d2   : > { %v4258_v3 = vpop.f32.mrf.mxu2 }
 0x3d3   : > { %v5818_v1 = vpop.eup %5817  ;;  %v4296_v42 = vadd.f32 %v4258_v3, %v2789_v44 }
 0x3d4   : > { %v5820_v61 = vpop.eup %5819  ;;  %v5436_v17 = vadd.f32 1.0, %v5818_v1 }
 0x3d5   : > { %v5499_v8 = vmul.f32 %v5820_v61, %v5307_v33 }
 0x3d6   : > { %5821 = vrcp.f32 %v5436_v17 }
 0x3d7   : > { %5531 = vst [vmem:[%s8641_s10 + $0xd0] sm:$0xff] %v5499_v8 }
 0x3da   : > { %v4261_v50 = vpop.f32.mrf.mxu2 }
 0x3dc   : > { %v5822_v10 = vpop.eup %5821 }
 0x3dd   : > { %v5233_v60 = vpop.f32.mrf.mxu3  ;;  %v5500_v35 = vmul.f32 %v5822_v10, %v5308_v22 }
 0x3de   : > { %v5273_v11 = vadd.f32 %v5233_v60, %v4295_v32 }
 0x3df   : > { %5532 = vst [vmem:[%s8641_s10 + $0xd8] sm:$0xff] %v5500_v35 }
 0x3e0   : > { %v5309_v54 = vadd.f32 %v9475_v28, %v5273_v11 }
 0x3e1   : > { %v2678_v37 = vpop.f32.mrf.mxu0  ;;  %v2791_v25 = vpop.f32.mrf.mxu1 }
 0x3e2   : > { %v5341_v13 = vsub.f32 0.0, %v5309_v54  ;;  %v2792_v39 = vadd.f32 %v2791_v25, %v2678_v37 }
 0x3e4   : > { %v5401_v47 = vmul.f32 1.442695, %v5341_v13  ;;  %v4297_v57 = vadd.f32 %v4261_v50, %v2792_v39 }
 0x3e5   : > { %v5236_v49 = vpop.f32.mrf.mxu3 }
 0x3e6   : > { %5823 = vpow2.f32 %v5401_v47  ;;  %v5274_v43 = vadd.f32 %v5236_v49, %v4296_v42 }
 0x3e8   : > { %v5310_v29 = vadd.f32 %v9475_v28, %v5274_v43  ;;  %v4264_v33 = vpop.f32.mrf.mxu2 }
 0x3e9   : > { %v2681_v15 = vpop.f32.mrf.mxu0  ;;  %v2794_v45 = vpop.f32.mrf.mxu1 }
 0x3ea   : > { %v5342_v56 = vsub.f32 0.0, %v5310_v29  ;;  %v2795_v51 = vadd.f32 %v2794_v45, %v2681_v15 }
 0x3ec   : > { %v5824_v52 = vpop.eup %5823  ;;  %v5403_v63 = vmul.f32 1.442695, %v5342_v56  ;;  %v4298_v4 = vadd.f32 %v4264_v33, %v2795_v51 }
 0x3ed   : > { %v5437_v55 = vadd.f32 1.0, %v5824_v52 }
 0x3ee   : > { %5825 = vpow2.f32 %v5403_v63 }
 0x3ef   : > { %5827 = vrcp.f32 %v5437_v55 }
 0x3f4   : > { %v5826_v59 = vpop.eup %5825 }
 0x3f5   : > { %v5828_v14 = vpop.eup %5827  ;;  %v5438_v31 = vadd.f32 1.0, %v5826_v59 }
 0x3f6   : > { %v5501_v46 = vmul.f32 %v5828_v14, %v5309_v54 }
 0x3f7   : > { %5829 = vrcp.f32 %v5438_v31 }
 0x3f8   : > { %5533 = vst [vmem:[%s8641_s10 + $0xe0] sm:$0xff] %v5501_v46 }
 0x3fd   : > { %v5830_v53 = vpop.eup %5829 }
 0x3fe   : > { %v5502_v7 = vmul.f32 %v5830_v53, %v5310_v29 }
 0x400   : > { %5534 = vst [vmem:[%s8641_s10 + $0xe8] sm:$0xff] %v5502_v7 }
 0x401   : > { %v5239_v24 = vpop.f32.mrf.mxu3 }
 0x402   : > { %v5275_v62 = vadd.f32 %v5239_v24, %v4297_v57 }
 0x404   : > { %v5311_v23 = vadd.f32 %v9475_v28, %v5275_v62 }
 0x406   : > { %v5343_v48 = vsub.f32 0.0, %v5311_v23 }
 0x408   : > { %v5405_v5 = vmul.f32 1.442695, %v5343_v48 }
 0x409   : > { %v5242_v21 = vpop.f32.mrf.mxu3 }
 0x40a   : > { %5831 = vpow2.f32 %v5405_v5  ;;  %v5276_v36 = vadd.f32 %v5242_v21, %v4298_v4 }
 0x40c   : > { %v5312_v38 = vadd.f32 %v5932_v40, %v5276_v36 }
 0x40e   : > { %v5344_v27 = vsub.f32 0.0, %v5312_v38 }
 0x410   : > { %v5832_v19 = vpop.eup %5831  ;;  %v5407_v0 = vmul.f32 1.442695, %v5344_v27 }
 0x411   : > { %v5439_v22 = vadd.f32 1.0, %v5832_v19 }
 0x412   : > { %5833 = vpow2.f32 %v5407_v0 }
 0x413   : > { %5835 = vrcp.f32 %v5439_v22 }
 0x418   : > { %v5834_v28 = vpop.eup %5833 }
 0x419   : > { %v5836_v6 = vpop.eup %5835  ;;  %v5440_v20 = vadd.f32 1.0, %v5834_v28 }
 0x41a   : > { %v5503_v41 = vmul.f32 %v5836_v6, %v5311_v23 }
 0x41b   : > { %5837 = vrcp.f32 %v5440_v20 }
 0x41c   : > { %5535 = vst [vmem:[%s8641_s10 + $0xf0] sm:$0xff] %v5503_v41 }
 0x421   : > { %v5838_v26 = vpop.eup %5837 }
 0x422   : > { %v5504_v12 = vmul.f32 %v5838_v26, %v5312_v38 }
 0x424   : > { %5536 = vst [vmem:[%s8641_s10 + $0xf8] sm:$0xff] %v5504_v12 }
 0x425 PF: > { %s13_s14 = sadd.s32 1, %s5955_s14   ;;  %s10238_s12 = smov %s5951_s13 }
 0x426   : > { %p10_p5 = scmp.ge.s32.totalorder %s13_s14, 4   ;;  %s10239_s13 = smov %s10241_s15 }
 0x428   :  { %12 = sbr.rel (!%p10_p5) target bundleno = 2 (0x2), region = 66 }

</bundles_post_ra>
